<compile_context>
chip_gen: v7x
topology: tpu7x:2x2x1
jax: 0.10.0
libtpu: 0.0.40
codegen_flags: <defaults>
</compile_context>

<pallas_src>
import functools

import jax
import jax.numpy as jnp
from jax.experimental import pallas as pl
from jax.experimental.pallas import tpu as pltpu

_EPS = 1e-5


# ------------------------------ kernel helpers --------------------------------

def _conv3x3_gn_silu(x_bf, xpad_ref, mask_l, mask_r, w_ref, bias, gamma, beta,
                     *, H, W, pad):
    """3x3 'same' conv + GroupNorm(1 group) + SiLU for one VMEM-resident sample.

    x_bf     : (H*W, C) bf16 flattened NHWC sample
    xpad_ref : (H*W + 2*pad, C) bf16 VMEM scratch (zero-padded staging buffer)
    mask_l/r : (H*W, 1) bool column masks (col >= 1 / col <= W-2), hoisted
    w_ref    : (3, 3*C, Cout) bf16 conv weights, grouped by kernel row (oy)
    bias/gamma/beta : (1, Cout) f32
    returns (H*W, Cout) f32
    """
    HW, C = x_bf.shape
    Cout = w_ref.shape[-1]

    # Stage the sample into a zero-padded buffer: the oy = +/-1 shifts become
    # plain slices (no wrap handling, no row masks).
    zpad = jnp.zeros((pad, C), jnp.bfloat16)
    xpad_ref[pl.ds(0, pad), :] = zpad
    xpad_ref[pl.ds(pad + HW, pad), :] = zpad
    xpad_ref[pl.ds(pad, HW), :] = x_bf

    y = jnp.zeros((HW, Cout), jnp.float32)
    for g, oy in enumerate((-1, 0, 1)):
        taps = []
        for ox in (-1, 0, 1):
            t = xpad_ref[pl.ds(pad + oy * W + ox, HW), :]        # bf16 tap
            if ox == -1:
                t = jnp.where(mask_l, t, 0)
            elif ox == 1:
                t = jnp.where(mask_r, t, 0)
            taps.append(t)
        # 3-tap group: K = 3*C keeps the MXU fed while the peak live concat is
        # only 1/3 of a full 9-tap im2col slab.
        grp = jnp.concatenate(taps, axis=-1)                     # (HW, 3*C) bf16
        y = y + jnp.dot(grp, w_ref[g], preferred_element_type=jnp.float32)

    y = y + bias
    # GroupNorm(num_groups=1): single-pass statistics, f32 accumulation.
    mean = jnp.mean(y, keepdims=True)
    meansq = jnp.mean(y * y, keepdims=True)
    var = jnp.maximum(meansq - mean * mean, 0.0)
    y = (y - mean) * jax.lax.rsqrt(var + jnp.float32(_EPS)) * gamma + beta
    return y * jax.nn.sigmoid(y)       # SiLU (Dropout2d is identity: p=0 / eval)


def _resblock_kernel(*refs, H, W, pad, has_res):
    if has_res:
        (x_ref, emb_ref, w1_ref, w2_ref, prm_ref, wr_ref, o_ref,
         xpad1_ref, xpad2_ref) = refs
    else:
        (x_ref, emb_ref, w1_ref, w2_ref, prm_ref, o_ref,
         xpad1_ref, xpad2_ref) = refs
        wr_ref = None

    HW = H * W
    x_bf = x_ref[0]                                # (HW, Cin) bf16
    prm = prm_ref[...]                             # (8, Cout) f32 packed rows
    b1, g1, be1 = prm[0:1], prm[1:2], prm[2:3]
    b2, g2, be2 = prm[3:4], prm[4:5], prm[5:6]
    br = prm[6:7]

    # Column masks built once per sample and shared by both convs.
    idx = jax.lax.broadcasted_iota(jnp.int32, (HW, 1), 0)
    if (W & (W - 1)) == 0:                         # power-of-two width
        col = idx & (W - 1)
    else:
        col = idx - (idx // W) * W
    mask_l = col >= 1
    mask_r = col <= W - 2

    # block1 + precomputed time/phi encodings (broadcast over H, W)
    h = _conv3x3_gn_silu(x_bf, xpad1_ref, mask_l, mask_r, w1_ref, b1, g1, be1,
                         H=H, W=W, pad=pad)
    h = h + emb_ref[0]                             # (HW, Cout) + (1, Cout)
    h_bf = h.astype(jnp.bfloat16)                  # single cast before conv2 taps

    # block2 (h stays in VMEM)
    h2 = _conv3x3_gn_silu(h_bf, xpad2_ref, mask_l, mask_r, w2_ref, b2, g2, be2,
                          H=H, W=W, pad=pad)

    # residual: 1x1 conv when dim != dim_out, plain add otherwise (no wasted MXU)
    if has_res:
        res = jnp.dot(x_bf, wr_ref[...], preferred_element_type=jnp.float32) + br
    else:
        res = x_bf.astype(jnp.float32)
    o_ref[0] = (h2 + res).astype(o_ref.dtype)


# ---------------------------------- wrapper ------------------------------------

def _vmem_limit_bytes():
    # ~80% of the physical per-core VMEM (v5e/v6e: 128 MiB, v7x: 64 MiB); never
    # request full capacity so the compiler keeps double-buffering headroom.
    try:
        return int(0.8 * pltpu.get_tpu_info().vmem_capacity_bytes)
    except Exception:
        return 48 * 1024 * 1024


def resnet_block_gdiff2d(x, time_emb, phi_emb, params, *, channels_last=False,
                         out_dtype=jnp.bfloat16):
    """Forward pass of ResnetBlockGDiff2D (one fused pallas_call, grid over B).

    x is NCHW (PyTorch layout) by default; pass channels_last=True to feed and
    receive NHWC directly and skip the two full-array transposes when chaining.
    """
    if channels_last:
        B, H, W, Cin = x.shape
        x_nhwc = x
    else:
        B, Cin, H, W = x.shape
        x_nhwc = jnp.transpose(x, (0, 2, 3, 1))
    Cout = params["w1"].shape[-1]
    HW = H * W
    has_res = "wr" in params
    if not has_res:
        assert Cin == Cout, "identity residual requires dim == dim_out"

    # bf16 activations halve the dominant HBM DMA; GroupNorm re-standardizes so
    # the precision loss stays bounded.
    x_flat = x_nhwc.reshape(B, HW, Cin).astype(jnp.bfloat16)

    # time/phi MLPs (SiLU -> Linear) hoisted to one tiny batched XLA matmul each;
    # the kernel only receives the per-sample (1, Cout) bias row.
    emb = jnp.zeros((B, Cout), jnp.float32)
    if time_emb is not None and "wt" in params:
        a = time_emb.astype(jnp.float32)
        a = a * jax.nn.sigmoid(a)
        emb = emb + a @ params["wt"].astype(jnp.float32) + params["bt"].astype(jnp.float32)
    if phi_emb is not None and "wp" in params:
        a = phi_emb.astype(jnp.float32)
        a = a * jax.nn.sigmoid(a)
        emb = emb + a @ params["wp"].astype(jnp.float32) + params["bp"].astype(jnp.float32)
    emb = emb.reshape(B, 1, Cout)

    # conv weights grouped by kernel row: (3, 3*C, Cout), taps ordered ox=-1,0,1.
    w1 = params["w1"].reshape(3, 3 * Cin, Cout).astype(jnp.bfloat16)
    w2 = params["w2"].reshape(3, 3 * Cout, Cout).astype(jnp.bfloat16)

    # Pack all per-channel parameter rows into a single (8, Cout) VMEM tile.
    row = lambda v: v.reshape(-1).astype(jnp.float32)
    zero = jnp.zeros((Cout,), jnp.float32)
    br = row(params["br"]) if has_res else zero
    prm = jnp.stack([row(params["b1"]), row(params["g1"]), row(params["beta1"]),
                     row(params["b2"]), row(params["g2"]), row(params["beta2"]),
                     br, zero], axis=0)

    pad = W + 8                      # zero-pad rows around the staged sample

    const2 = lambda shp: pl.BlockSpec(shp, lambda b: (0, 0))
    const3 = lambda shp: pl.BlockSpec(shp, lambda b: (0, 0, 0))
    # TODO(synk): mark the constant operand specs pipeline_mode=pl.Buffered(1)
    # once single-buffered constant blocks are verified on the target jax build.
    in_specs = [
        pl.BlockSpec((1, HW, Cin), lambda b: (b, 0, 0)),        # x (bf16)
        pl.BlockSpec((1, 1, Cout), lambda b: (b, 0, 0)),        # emb bias row
        const3((3, 3 * Cin, Cout)),                             # w1 (bf16)
        const3((3, 3 * Cout, Cout)),                            # w2 (bf16)
        const2((8, Cout)),                                      # packed params
    ]
    args = [x_flat, emb, w1, w2, prm]
    if has_res:
        in_specs.append(const2((Cin, Cout)))                    # wr (bf16)
        args.append(params["wr"].astype(jnp.bfloat16))

    flops = B * (2 * 9 * HW * Cin * Cout + 2 * 9 * HW * Cout * Cout
                 + (2 * HW * Cin * Cout if has_res else 0))
    bytes_accessed = (B * HW * Cin * 2 + B * HW * Cout * 2
                      + (9 * Cin * Cout + 9 * Cout * Cout) * 2
                      + (Cin * Cout * 2 if has_res else 0)
                      + B * Cout * 4 + 8 * Cout * 4)
    cost = pl.CostEstimate(flops=flops, transcendentals=2 * B * HW * Cout,
                           bytes_accessed=bytes_accessed)

    out_flat = pl.pallas_call(
        functools.partial(_resblock_kernel, H=H, W=W, pad=pad, has_res=has_res),
        out_shape=jax.ShapeDtypeStruct((B, HW, Cout), out_dtype),
        grid=(B,),
        in_specs=in_specs,
        out_specs=pl.BlockSpec((1, HW, Cout), lambda b: (b, 0, 0)),
        scratch_shapes=[pltpu.VMEM((HW + 2 * pad, Cin), jnp.bfloat16),
                        pltpu.VMEM((HW + 2 * pad, Cout), jnp.bfloat16)],
        compiler_params=pltpu.CompilerParams(
            dimension_semantics=("parallel",),
            vmem_limit_bytes=_vmem_limit_bytes()),
        cost_estimate=cost,
    )(*args)

    out = out_flat.reshape(B, H, W, Cout)
    return out if channels_last else jnp.transpose(out, (0, 3, 1, 2))


# ----------------------------- pure-JAX reference -------------------------------

def _ref_forward(x_nchw, time_emb, phi_emb, p):
    x = jnp.transpose(x_nchw, (0, 2, 3, 1)).astype(jnp.float32)
    conv = lambda xh, w: jax.lax.conv_general_dilated(
        xh, w, (1, 1), "SAME", dimension_numbers=("NHWC", "HWIO", "NHWC"))

    def gn(y, g, b):
        m = jnp.mean(y, axis=(1, 2, 3), keepdims=True)
        v = jnp.mean(jnp.square(y - m), axis=(1, 2, 3), keepdims=True)
        return (y - m) * jax.lax.rsqrt(v + _EPS) * g + b

    silu = lambda z: z * jax.nn.sigmoid(z)
    h = silu(gn(conv(x, p["w1"]) + p["b1"], p["g1"], p["beta1"]))
    if time_emb is not None and "wt" in p:
        h = h + (silu(time_emb) @ p["wt"] + p["bt"])[:, None, None, :]
    if phi_emb is not None and "wp" in p:
        h = h + (silu(phi_emb) @ p["wp"] + p["bp"])[:, None, None, :]
    h2 = silu(gn(conv(h, p["w2"]) + p["b2"], p["g2"], p["beta2"]))
    res = (x @ p["wr"] + p["br"]) if "wr" in p else x
    return jnp.transpose(h2 + res, (0, 3, 1, 2))


# -------------------------------------- main ------------------------------------

if __name__ == "__main__":
    def make_params(key, dim, dim_out, tdim=None, pdim=None, res=True):
        ks = jax.random.split(key, 16)
        r = lambda k, shp, s=0.1: s * jax.random.normal(k, shp, jnp.float32)
        p = {
            "w1": r(ks[0], (3, 3, dim, dim_out)),
            "b1": r(ks[1], (dim_out,)),
            "g1": 1.0 + r(ks[2], (dim_out,)),
            "beta1": r(ks[3], (dim_out,)),
            "w2": r(ks[4], (3, 3, dim_out, dim_out)),
            "b2": r(ks[5], (dim_out,)),
            "g2": 1.0 + r(ks[6], (dim_out,)),
            "beta2": r(ks[7], (dim_out,)),
        }
        if tdim is not None:
            p["wt"] = r(ks[8], (tdim, dim_out))
            p["bt"] = r(ks[9], (dim_out,))
        if pdim is not None:
            p["wp"] = r(ks[10], (pdim, dim_out))
            p["bp"] = r(ks[11], (dim_out,))
        if res:
            p["wr"] = r(ks[12], (dim, dim_out))
            p["br"] = r(ks[13], (dim_out,))
        return p

    key = jax.random.PRNGKey(0)
    k1, k2, k3, k4, k5, k6, k7 = jax.random.split(key, 7)

    # Case 1: dim != dim_out (1x1 res conv), time + phi embeddings, 16x16.
    B, dim, dim_out, H, W, Tdim, Pdim = 2, 4, 8, 16, 16, 8, 8
    p1 = make_params(k1, dim, dim_out, Tdim, Pdim, res=True)
    x1 = jax.random.normal(k2, (B, dim, H, W), jnp.float32)        # NCHW
    t1 = jax.random.normal(k3, (B, Tdim), jnp.float32)
    f1 = jax.random.normal(k4, (B, Pdim), jnp.float32)
    out1 = jax.block_until_ready(resnet_block_gdiff2d(x1, t1, f1, p1))
    assert out1.shape == (B, dim_out, H, W), out1.shape
    err1 = float(jnp.max(jnp.abs(out1.astype(jnp.float32) - _ref_forward(x1, t1, f1, p1))))
    # bf16 MXU operands + bf16 output bound the abs error well below 5e-2 after
    # the GroupNorms re-standardize.
    assert err1 < 5e-2, f"case1 max abs error vs f32 reference: {err1}"

    # Case 2: dim == dim_out (identity residual path), time only, 8x8.
    B2, d2, H2, W2 = 2, 8, 8, 8
    p2 = make_params(k5, d2, d2, Tdim, None, res=False)
    x2 = jax.random.normal(k6, (B2, d2, H2, W2), jnp.float32)
    t2 = jax.random.normal(k7, (B2, Tdim), jnp.float32)
    out2 = jax.block_until_ready(resnet_block_gdiff2d(x2, t2, None, p2))
    assert out2.shape == (B2, d2, H2, W2), out2.shape
    err2 = float(jnp.max(jnp.abs(out2.astype(jnp.float32) - _ref_forward(x2, t2, None, p2))))
    assert err2 < 5e-2, f"case2 max abs error vs f32 reference: {err2}"

    print("KERNEL_OK")
</pallas_src>

<mosaic_0001>
module attributes {stable_mosaic.version = 11 : i64} {
  func.func @_resblock_kernel(%arg0: i32, %arg1: memref<1x256x4xbf16, #tpu.memory_space<vmem>>, %arg2: memref<1x1x8xf32, #tpu.memory_space<vmem>>, %arg3: memref<3x12x8xbf16, #tpu.memory_space<vmem>>, %arg4: memref<3x24x8xbf16, #tpu.memory_space<vmem>>, %arg5: memref<8x8xf32, #tpu.memory_space<vmem>>, %arg6: memref<4x8xbf16, #tpu.memory_space<vmem>>, %arg7: memref<1x256x8xbf16, #tpu.memory_space<vmem>>, %arg8: memref<304x4xbf16, #tpu.memory_space<vmem>>, %arg9: memref<304x8xbf16, #tpu.memory_space<vmem>>) attributes {dimension_semantics = [#tpu.dimension_semantics<parallel>], iteration_bounds = array<i64: 2>, scalar_prefetch = 0 : i64, scratch_operands = 2 : i64, tpu.core_type = #tpu.core_type<tc>, window_params = [{transform_indices = @transform_0, window_bounds = array<i64: 1, 256, 4>}, {transform_indices = @transform_1, window_bounds = array<i64: 1, 1, 8>}, {pipeline_mode = #tpu.pipeline_mode<synchronous>, transform_indices = @transform_2, window_bounds = array<i64: 3, 12, 8>}, {pipeline_mode = #tpu.pipeline_mode<synchronous>, transform_indices = @transform_3, window_bounds = array<i64: 3, 24, 8>}, {pipeline_mode = #tpu.pipeline_mode<synchronous>, transform_indices = @transform_4, window_bounds = array<i64: 8, 8>}, {pipeline_mode = #tpu.pipeline_mode<synchronous>, transform_indices = @transform_5, window_bounds = array<i64: 4, 8>}, {transform_indices = @transform_6, window_bounds = array<i64: 1, 256, 8>}]} {
    %c0 = arith.constant 0 : index
    %c0_0 = arith.constant 0 : index
    %c0_1 = arith.constant 0 : index
    %0 = vector.load %arg1[%c0, %c0_0, %c0_1] : memref<1x256x4xbf16, #tpu.memory_space<vmem>>, vector<1x256x4xbf16>
    %1 = vector.shape_cast %0 : vector<1x256x4xbf16> to vector<256x4xbf16>
    %c0_2 = arith.constant 0 : index
    %c0_3 = arith.constant 0 : index
    %2 = vector.load %arg5[%c0_2, %c0_3] : memref<8x8xf32, #tpu.memory_space<vmem>>, vector<8x8xf32>
    %3 = vector.extract_strided_slice %2 {offsets = [0, 0], sizes = [1, 8], strides = [1, 1]} : vector<8x8xf32> to vector<1x8xf32>
    %4 = vector.extract_strided_slice %2 {offsets = [1, 0], sizes = [1, 8], strides = [1, 1]} : vector<8x8xf32> to vector<1x8xf32>
    %5 = vector.extract_strided_slice %2 {offsets = [2, 0], sizes = [1, 8], strides = [1, 1]} : vector<8x8xf32> to vector<1x8xf32>
    %6 = vector.extract_strided_slice %2 {offsets = [3, 0], sizes = [1, 8], strides = [1, 1]} : vector<8x8xf32> to vector<1x8xf32>
    %7 = vector.extract_strided_slice %2 {offsets = [4, 0], sizes = [1, 8], strides = [1, 1]} : vector<8x8xf32> to vector<1x8xf32>
    %8 = vector.extract_strided_slice %2 {offsets = [5, 0], sizes = [1, 8], strides = [1, 1]} : vector<8x8xf32> to vector<1x8xf32>
    %9 = vector.extract_strided_slice %2 {offsets = [6, 0], sizes = [1, 8], strides = [1, 1]} : vector<8x8xf32> to vector<1x8xf32>
    %10 = tpu.iota {dimensions = array<i32: 0>} : vector<256x1xi32>
    %c15_i32 = arith.constant 15 : i32
    %11 = vector.broadcast %c15_i32 : i32 to vector<256x1xi32>
    %12 = arith.andi %10, %11 : vector<256x1xi32>
    %c1_i32 = arith.constant 1 : i32
    %13 = vector.broadcast %c1_i32 : i32 to vector<256x1xi32>
    %14 = arith.cmpi sge, %12, %13 : vector<256x1xi32>
    %c14_i32 = arith.constant 14 : i32
    %15 = vector.broadcast %c14_i32 : i32 to vector<256x1xi32>
    %16 = arith.cmpi sle, %12, %15 : vector<256x1xi32>
    %cst = arith.constant 0.000000e+00 : bf16
    %17 = vector.broadcast %cst : bf16 to vector<24x4xbf16>
    %c0_4 = arith.constant 0 : index
    %c0_5 = arith.constant 0 : index
    %18 = vector.load %arg8[%c0_4, %c0_5] : memref<304x4xbf16, #tpu.memory_space<vmem>>, vector<24x4xbf16>
    tpu.vector_store %arg8[%c0_4, %c0_5], %17 {strides = array<i32>} : memref<304x4xbf16, #tpu.memory_space<vmem>>, vector<24x4xbf16>,
    %c280 = arith.constant 280 : index
    %c0_6 = arith.constant 0 : index
    %19 = vector.load %arg8[%c280, %c0_6] : memref<304x4xbf16, #tpu.memory_space<vmem>>, vector<24x4xbf16>
    tpu.vector_store %arg8[%c280, %c0_6], %17 {strides = array<i32>} : memref<304x4xbf16, #tpu.memory_space<vmem>>, vector<24x4xbf16>,
    %c24 = arith.constant 24 : index
    %c0_7 = arith.constant 0 : index
    %20 = vector.load %arg8[%c24, %c0_7] : memref<304x4xbf16, #tpu.memory_space<vmem>>, vector<256x4xbf16>
    tpu.vector_store %arg8[%c24, %c0_7], %1 {strides = array<i32>} : memref<304x4xbf16, #tpu.memory_space<vmem>>, vector<256x4xbf16>,
    %cst_8 = arith.constant 0.000000e+00 : f32
    %21 = vector.broadcast %cst_8 : f32 to vector<256x8xf32>
    %c7 = arith.constant 7 : index
    %c0_9 = arith.constant 0 : index
    %22 = vector.load %arg8[%c7, %c0_9] : memref<304x4xbf16, #tpu.memory_space<vmem>>, vector<256x4xbf16>
    %c0_i32 = arith.constant 0 : i32
    %23 = arith.sitofp %c0_i32 : i32 to bf16
    %24 = vector.shape_cast %14 : vector<256x1xi1> to vector<256x1xi1>
    %25 = vector.broadcast %24 : vector<256x1xi1> to vector<256x4xi1>
    %26 = vector.broadcast %23 : bf16 to vector<256x4xbf16>
    %27 = arith.select %25, %22, %26 : vector<256x4xi1>, vector<256x4xbf16>
    %c8 = arith.constant 8 : index
    %c0_10 = arith.constant 0 : index
    %28 = vector.load %arg8[%c8, %c0_10] : memref<304x4xbf16, #tpu.memory_space<vmem>>, vector<256x4xbf16>
    %c9 = arith.constant 9 : index
    %c0_11 = arith.constant 0 : index
    %29 = vector.load %arg8[%c9, %c0_11] : memref<304x4xbf16, #tpu.memory_space<vmem>>, vector<256x4xbf16>
    %c0_i32_12 = arith.constant 0 : i32
    %30 = arith.sitofp %c0_i32_12 : i32 to bf16
    %31 = vector.shape_cast %16 : vector<256x1xi1> to vector<256x1xi1>
    %32 = vector.broadcast %31 : vector<256x1xi1> to vector<256x4xi1>
    %33 = vector.broadcast %30 : bf16 to vector<256x4xbf16>
    %34 = arith.select %32, %29, %33 : vector<256x4xi1>, vector<256x4xbf16>
    %35 = tpu.concatenate %27, %28, %34 in 1 : vector<256x4xbf16>, vector<256x4xbf16>, vector<256x4xbf16> -> vector<256x12xbf16>
    %c0_13 = arith.constant 0 : index
    %c0_14 = arith.constant 0 : index
    %c0_15 = arith.constant 0 : index
    %36 = vector.load %arg3[%c0_13, %c0_14, %c0_15] : memref<3x12x8xbf16, #tpu.memory_space<vmem>>, vector<1x12x8xbf16>
    %37 = vector.shape_cast %36 : vector<1x12x8xbf16> to vector<12x8xbf16>
    %cst_16 = arith.constant dense<0.000000e+00> : vector<256x8xf32>
    %38 = tpu.matmul %35, %37, %cst_16 {dimension_numbers = #tpu.dot_dimension_numbers<[1], [0], [0], [1], [0, 0, 1, 1], [], []>} : vector<256x12xbf16>, vector<12x8xbf16>, vector<256x8xf32> -> vector<256x8xf32>
    %39 = arith.addf %21, %38 : vector<256x8xf32>
    %c23 = arith.constant 23 : index
    %c0_17 = arith.constant 0 : index
    %40 = vector.load %arg8[%c23, %c0_17] : memref<304x4xbf16, #tpu.memory_space<vmem>>, vector<256x4xbf16>
    %c0_i32_18 = arith.constant 0 : i32
    %41 = arith.sitofp %c0_i32_18 : i32 to bf16
    %42 = vector.shape_cast %14 : vector<256x1xi1> to vector<256x1xi1>
    %43 = vector.broadcast %42 : vector<256x1xi1> to vector<256x4xi1>
    %44 = vector.broadcast %41 : bf16 to vector<256x4xbf16>
    %45 = arith.select %43, %40, %44 : vector<256x4xi1>, vector<256x4xbf16>
    %c24_19 = arith.constant 24 : index
    %c0_20 = arith.constant 0 : index
    %46 = vector.load %arg8[%c24_19, %c0_20] : memref<304x4xbf16, #tpu.memory_space<vmem>>, vector<256x4xbf16>
    %c25 = arith.constant 25 : index
    %c0_21 = arith.constant 0 : index
    %47 = vector.load %arg8[%c25, %c0_21] : memref<304x4xbf16, #tpu.memory_space<vmem>>, vector<256x4xbf16>
    %c0_i32_22 = arith.constant 0 : i32
    %48 = arith.sitofp %c0_i32_22 : i32 to bf16
    %49 = vector.shape_cast %16 : vector<256x1xi1> to vector<256x1xi1>
    %50 = vector.broadcast %49 : vector<256x1xi1> to vector<256x4xi1>
    %51 = vector.broadcast %48 : bf16 to vector<256x4xbf16>
    %52 = arith.select %50, %47, %51 : vector<256x4xi1>, vector<256x4xbf16>
    %53 = tpu.concatenate %45, %46, %52 in 1 : vector<256x4xbf16>, vector<256x4xbf16>, vector<256x4xbf16> -> vector<256x12xbf16>
    %c1 = arith.constant 1 : index
    %c0_23 = arith.constant 0 : index
    %c0_24 = arith.constant 0 : index
    %54 = vector.load %arg3[%c1, %c0_23, %c0_24] : memref<3x12x8xbf16, #tpu.memory_space<vmem>>, vector<1x12x8xbf16>
    %55 = vector.shape_cast %54 : vector<1x12x8xbf16> to vector<12x8xbf16>
    %cst_25 = arith.constant dense<0.000000e+00> : vector<256x8xf32>
    %56 = tpu.matmul %53, %55, %cst_25 {dimension_numbers = #tpu.dot_dimension_numbers<[1], [0], [0], [1], [0, 0, 1, 1], [], []>} : vector<256x12xbf16>, vector<12x8xbf16>, vector<256x8xf32> -> vector<256x8xf32>
    %57 = arith.addf %39, %56 : vector<256x8xf32>
    %c39 = arith.constant 39 : index
    %c0_26 = arith.constant 0 : index
    %58 = vector.load %arg8[%c39, %c0_26] : memref<304x4xbf16, #tpu.memory_space<vmem>>, vector<256x4xbf16>
    %c0_i32_27 = arith.constant 0 : i32
    %59 = arith.sitofp %c0_i32_27 : i32 to bf16
    %60 = vector.shape_cast %14 : vector<256x1xi1> to vector<256x1xi1>
    %61 = vector.broadcast %60 : vector<256x1xi1> to vector<256x4xi1>
    %62 = vector.broadcast %59 : bf16 to vector<256x4xbf16>
    %63 = arith.select %61, %58, %62 : vector<256x4xi1>, vector<256x4xbf16>
    %c40 = arith.constant 40 : index
    %c0_28 = arith.constant 0 : index
    %64 = vector.load %arg8[%c40, %c0_28] : memref<304x4xbf16, #tpu.memory_space<vmem>>, vector<256x4xbf16>
    %c41 = arith.constant 41 : index
    %c0_29 = arith.constant 0 : index
    %65 = vector.load %arg8[%c41, %c0_29] : memref<304x4xbf16, #tpu.memory_space<vmem>>, vector<256x4xbf16>
    %c0_i32_30 = arith.constant 0 : i32
    %66 = arith.sitofp %c0_i32_30 : i32 to bf16
    %67 = vector.shape_cast %16 : vector<256x1xi1> to vector<256x1xi1>
    %68 = vector.broadcast %67 : vector<256x1xi1> to vector<256x4xi1>
    %69 = vector.broadcast %66 : bf16 to vector<256x4xbf16>
    %70 = arith.select %68, %65, %69 : vector<256x4xi1>, vector<256x4xbf16>
    %71 = tpu.concatenate %63, %64, %70 in 1 : vector<256x4xbf16>, vector<256x4xbf16>, vector<256x4xbf16> -> vector<256x12xbf16>
    %c2 = arith.constant 2 : index
    %c0_31 = arith.constant 0 : index
    %c0_32 = arith.constant 0 : index
    %72 = vector.load %arg3[%c2, %c0_31, %c0_32] : memref<3x12x8xbf16, #tpu.memory_space<vmem>>, vector<1x12x8xbf16>
    %73 = vector.shape_cast %72 : vector<1x12x8xbf16> to vector<12x8xbf16>
    %cst_33 = arith.constant dense<0.000000e+00> : vector<256x8xf32>
    %74 = tpu.matmul %71, %73, %cst_33 {dimension_numbers = #tpu.dot_dimension_numbers<[1], [0], [0], [1], [0, 0, 1, 1], [], []>} : vector<256x12xbf16>, vector<12x8xbf16>, vector<256x8xf32> -> vector<256x8xf32>
    %75 = arith.addf %57, %74 : vector<256x8xf32>
    %76 = vector.broadcast %3 : vector<1x8xf32> to vector<256x8xf32>
    %77 = arith.addf %75, %76 : vector<256x8xf32>
    %78 = vector.shape_cast %77 : vector<256x8xf32> to vector<1x256x8xf32>
    %cst_34 = arith.constant dense<0.000000e+00> : vector<1xf32>
    %79 = vector.multi_reduction <add>, %78, %cst_34 [1, 2] : vector<1x256x8xf32> to vector<1xf32>
    %80 = vector.shape_cast %79 : vector<1xf32> to vector<1x1x1xf32>
    %81 = vector.extract %80[0, 0, 0] : f32 from vector<1x1x1xf32>
    %82 = vector.broadcast %81 : f32 to vector<1x1xf32>
    %cst_35 = arith.constant 2.048000e+03 : f32
    %83 = vector.broadcast %cst_35 : f32 to vector<1x1xf32>
    %84 = arith.divf %82, %83 : vector<1x1xf32>
    %85 = arith.mulf %77, %77 : vector<256x8xf32>
    %86 = vector.shape_cast %85 : vector<256x8xf32> to vector<1x256x8xf32>
    %cst_36 = arith.constant dense<0.000000e+00> : vector<1xf32>
    %87 = vector.multi_reduction <add>, %86, %cst_36 [1, 2] : vector<1x256x8xf32> to vector<1xf32>
    %88 = vector.shape_cast %87 : vector<1xf32> to vector<1x1x1xf32>
    %89 = vector.extract %88[0, 0, 0] : f32 from vector<1x1x1xf32>
    %90 = vector.broadcast %89 : f32 to vector<1x1xf32>
    %cst_37 = arith.constant 2.048000e+03 : f32
    %91 = vector.broadcast %cst_37 : f32 to vector<1x1xf32>
    %92 = arith.divf %90, %91 : vector<1x1xf32>
    %93 = arith.mulf %84, %84 : vector<1x1xf32>
    %94 = arith.subf %92, %93 : vector<1x1xf32>
    %cst_38 = arith.constant 0.000000e+00 : f32
    %95 = vector.broadcast %cst_38 : f32 to vector<1x1xf32>
    %96 = arith.maximumf %94, %95 : vector<1x1xf32>
    %97 = vector.broadcast %84 : vector<1x1xf32> to vector<256x8xf32>
    %98 = arith.subf %77, %97 : vector<256x8xf32>
    %cst_39 = arith.constant 9.99999974E-6 : f32
    %99 = vector.broadcast %cst_39 : f32 to vector<1x1xf32>
    %100 = arith.addf %96, %99 : vector<1x1xf32>
    %101 = math.rsqrt %100 : vector<1x1xf32>
    %102 = vector.broadcast %101 : vector<1x1xf32> to vector<256x8xf32>
    %103 = arith.mulf %98, %102 : vector<256x8xf32>
    %104 = vector.broadcast %4 : vector<1x8xf32> to vector<256x8xf32>
    %105 = arith.mulf %103, %104 : vector<256x8xf32>
    %106 = vector.broadcast %5 : vector<1x8xf32> to vector<256x8xf32>
    %107 = arith.addf %105, %106 : vector<256x8xf32>
    %108 = arith.negf %107 : vector<256x8xf32>
    %109 = math.exp %108 : vector<256x8xf32>
    %cst_40 = arith.constant 1.000000e+00 : f32
    %110 = vector.broadcast %cst_40 : f32 to vector<256x8xf32>
    %111 = arith.addf %110, %109 : vector<256x8xf32>
    %112 = arith.divf %110, %111 : vector<256x8xf32>
    %113 = arith.mulf %107, %112 : vector<256x8xf32>
    %c0_41 = arith.constant 0 : index
    %c0_42 = arith.constant 0 : index
    %c0_43 = arith.constant 0 : index
    %114 = vector.load %arg2[%c0_41, %c0_42, %c0_43] : memref<1x1x8xf32, #tpu.memory_space<vmem>>, vector<1x1x8xf32>
    %115 = vector.shape_cast %114 : vector<1x1x8xf32> to vector<1x8xf32>
    %116 = vector.broadcast %115 : vector<1x8xf32> to vector<256x8xf32>
    %117 = arith.addf %113, %116 : vector<256x8xf32>
    %118 = arith.truncf %117 : vector<256x8xf32> to vector<256x8xbf16>
    %cst_44 = arith.constant 0.000000e+00 : bf16
    %119 = vector.broadcast %cst_44 : bf16 to vector<24x8xbf16>
    %c0_45 = arith.constant 0 : index
    %c0_46 = arith.constant 0 : index
    %120 = vector.load %arg9[%c0_45, %c0_46] : memref<304x8xbf16, #tpu.memory_space<vmem>>, vector<24x8xbf16>
    tpu.vector_store %arg9[%c0_45, %c0_46], %119 {strides = array<i32>} : memref<304x8xbf16, #tpu.memory_space<vmem>>, vector<24x8xbf16>,
    %c280_47 = arith.constant 280 : index
    %c0_48 = arith.constant 0 : index
    %121 = vector.load %arg9[%c280_47, %c0_48] : memref<304x8xbf16, #tpu.memory_space<vmem>>, vector<24x8xbf16>
    tpu.vector_store %arg9[%c280_47, %c0_48], %119 {strides = array<i32>} : memref<304x8xbf16, #tpu.memory_space<vmem>>, vector<24x8xbf16>,
    %c24_49 = arith.constant 24 : index
    %c0_50 = arith.constant 0 : index
    %122 = vector.load %arg9[%c24_49, %c0_50] : memref<304x8xbf16, #tpu.memory_space<vmem>>, vector<256x8xbf16>
    tpu.vector_store %arg9[%c24_49, %c0_50], %118 {strides = array<i32>} : memref<304x8xbf16, #tpu.memory_space<vmem>>, vector<256x8xbf16>,
    %cst_51 = arith.constant 0.000000e+00 : f32
    %123 = vector.broadcast %cst_51 : f32 to vector<256x8xf32>
    %c7_52 = arith.constant 7 : index
    %c0_53 = arith.constant 0 : index
    %124 = vector.load %arg9[%c7_52, %c0_53] : memref<304x8xbf16, #tpu.memory_space<vmem>>, vector<256x8xbf16>
    %c0_i32_54 = arith.constant 0 : i32
    %125 = arith.sitofp %c0_i32_54 : i32 to bf16
    %126 = vector.shape_cast %14 : vector<256x1xi1> to vector<256x1xi1>
    %127 = vector.broadcast %126 : vector<256x1xi1> to vector<256x8xi1>
    %128 = vector.broadcast %125 : bf16 to vector<256x8xbf16>
    %129 = arith.select %127, %124, %128 : vector<256x8xi1>, vector<256x8xbf16>
    %c8_55 = arith.constant 8 : index
    %c0_56 = arith.constant 0 : index
    %130 = vector.load %arg9[%c8_55, %c0_56] : memref<304x8xbf16, #tpu.memory_space<vmem>>, vector<256x8xbf16>
    %c9_57 = arith.constant 9 : index
    %c0_58 = arith.constant 0 : index
    %131 = vector.load %arg9[%c9_57, %c0_58] : memref<304x8xbf16, #tpu.memory_space<vmem>>, vector<256x8xbf16>
    %c0_i32_59 = arith.constant 0 : i32
    %132 = arith.sitofp %c0_i32_59 : i32 to bf16
    %133 = vector.shape_cast %16 : vector<256x1xi1> to vector<256x1xi1>
    %134 = vector.broadcast %133 : vector<256x1xi1> to vector<256x8xi1>
    %135 = vector.broadcast %132 : bf16 to vector<256x8xbf16>
    %136 = arith.select %134, %131, %135 : vector<256x8xi1>, vector<256x8xbf16>
    %137 = tpu.concatenate %129, %130, %136 in 1 : vector<256x8xbf16>, vector<256x8xbf16>, vector<256x8xbf16> -> vector<256x24xbf16>
    %c0_60 = arith.constant 0 : index
    %c0_61 = arith.constant 0 : index
    %c0_62 = arith.constant 0 : index
    %138 = vector.load %arg4[%c0_60, %c0_61, %c0_62] : memref<3x24x8xbf16, #tpu.memory_space<vmem>>, vector<1x24x8xbf16>
    %139 = vector.shape_cast %138 : vector<1x24x8xbf16> to vector<24x8xbf16>
    %cst_63 = arith.constant dense<0.000000e+00> : vector<256x8xf32>
    %140 = tpu.matmul %137, %139, %cst_63 {dimension_numbers = #tpu.dot_dimension_numbers<[1], [0], [0], [1], [0, 0, 1, 1], [], []>} : vector<256x24xbf16>, vector<24x8xbf16>, vector<256x8xf32> -> vector<256x8xf32>
    %141 = arith.addf %123, %140 : vector<256x8xf32>
    %c23_64 = arith.constant 23 : index
    %c0_65 = arith.constant 0 : index
    %142 = vector.load %arg9[%c23_64, %c0_65] : memref<304x8xbf16, #tpu.memory_space<vmem>>, vector<256x8xbf16>
    %c0_i32_66 = arith.constant 0 : i32
    %143 = arith.sitofp %c0_i32_66 : i32 to bf16
    %144 = vector.shape_cast %14 : vector<256x1xi1> to vector<256x1xi1>
    %145 = vector.broadcast %144 : vector<256x1xi1> to vector<256x8xi1>
    %146 = vector.broadcast %143 : bf16 to vector<256x8xbf16>
    %147 = arith.select %145, %142, %146 : vector<256x8xi1>, vector<256x8xbf16>
    %c24_67 = arith.constant 24 : index
    %c0_68 = arith.constant 0 : index
    %148 = vector.load %arg9[%c24_67, %c0_68] : memref<304x8xbf16, #tpu.memory_space<vmem>>, vector<256x8xbf16>
    %c25_69 = arith.constant 25 : index
    %c0_70 = arith.constant 0 : index
    %149 = vector.load %arg9[%c25_69, %c0_70] : memref<304x8xbf16, #tpu.memory_space<vmem>>, vector<256x8xbf16>
    %c0_i32_71 = arith.constant 0 : i32
    %150 = arith.sitofp %c0_i32_71 : i32 to bf16
    %151 = vector.shape_cast %16 : vector<256x1xi1> to vector<256x1xi1>
    %152 = vector.broadcast %151 : vector<256x1xi1> to vector<256x8xi1>
    %153 = vector.broadcast %150 : bf16 to vector<256x8xbf16>
    %154 = arith.select %152, %149, %153 : vector<256x8xi1>, vector<256x8xbf16>
    %155 = tpu.concatenate %147, %148, %154 in 1 : vector<256x8xbf16>, vector<256x8xbf16>, vector<256x8xbf16> -> vector<256x24xbf16>
    %c1_72 = arith.constant 1 : index
    %c0_73 = arith.constant 0 : index
    %c0_74 = arith.constant 0 : index
    %156 = vector.load %arg4[%c1_72, %c0_73, %c0_74] : memref<3x24x8xbf16, #tpu.memory_space<vmem>>, vector<1x24x8xbf16>
    %157 = vector.shape_cast %156 : vector<1x24x8xbf16> to vector<24x8xbf16>
    %cst_75 = arith.constant dense<0.000000e+00> : vector<256x8xf32>
    %158 = tpu.matmul %155, %157, %cst_75 {dimension_numbers = #tpu.dot_dimension_numbers<[1], [0], [0], [1], [0, 0, 1, 1], [], []>} : vector<256x24xbf16>, vector<24x8xbf16>, vector<256x8xf32> -> vector<256x8xf32>
    %159 = arith.addf %141, %158 : vector<256x8xf32>
    %c39_76 = arith.constant 39 : index
    %c0_77 = arith.constant 0 : index
    %160 = vector.load %arg9[%c39_76, %c0_77] : memref<304x8xbf16, #tpu.memory_space<vmem>>, vector<256x8xbf16>
    %c0_i32_78 = arith.constant 0 : i32
    %161 = arith.sitofp %c0_i32_78 : i32 to bf16
    %162 = vector.shape_cast %14 : vector<256x1xi1> to vector<256x1xi1>
    %163 = vector.broadcast %162 : vector<256x1xi1> to vector<256x8xi1>
    %164 = vector.broadcast %161 : bf16 to vector<256x8xbf16>
    %165 = arith.select %163, %160, %164 : vector<256x8xi1>, vector<256x8xbf16>
    %c40_79 = arith.constant 40 : index
    %c0_80 = arith.constant 0 : index
    %166 = vector.load %arg9[%c40_79, %c0_80] : memref<304x8xbf16, #tpu.memory_space<vmem>>, vector<256x8xbf16>
    %c41_81 = arith.constant 41 : index
    %c0_82 = arith.constant 0 : index
    %167 = vector.load %arg9[%c41_81, %c0_82] : memref<304x8xbf16, #tpu.memory_space<vmem>>, vector<256x8xbf16>
    %c0_i32_83 = arith.constant 0 : i32
    %168 = arith.sitofp %c0_i32_83 : i32 to bf16
    %169 = vector.shape_cast %16 : vector<256x1xi1> to vector<256x1xi1>
    %170 = vector.broadcast %169 : vector<256x1xi1> to vector<256x8xi1>
    %171 = vector.broadcast %168 : bf16 to vector<256x8xbf16>
    %172 = arith.select %170, %167, %171 : vector<256x8xi1>, vector<256x8xbf16>
    %173 = tpu.concatenate %165, %166, %172 in 1 : vector<256x8xbf16>, vector<256x8xbf16>, vector<256x8xbf16> -> vector<256x24xbf16>
    %c2_84 = arith.constant 2 : index
    %c0_85 = arith.constant 0 : index
    %c0_86 = arith.constant 0 : index
    %174 = vector.load %arg4[%c2_84, %c0_85, %c0_86] : memref<3x24x8xbf16, #tpu.memory_space<vmem>>, vector<1x24x8xbf16>
    %175 = vector.shape_cast %174 : vector<1x24x8xbf16> to vector<24x8xbf16>
    %cst_87 = arith.constant dense<0.000000e+00> : vector<256x8xf32>
    %176 = tpu.matmul %173, %175, %cst_87 {dimension_numbers = #tpu.dot_dimension_numbers<[1], [0], [0], [1], [0, 0, 1, 1], [], []>} : vector<256x24xbf16>, vector<24x8xbf16>, vector<256x8xf32> -> vector<256x8xf32>
    %177 = arith.addf %159, %176 : vector<256x8xf32>
    %178 = vector.broadcast %6 : vector<1x8xf32> to vector<256x8xf32>
    %179 = arith.addf %177, %178 : vector<256x8xf32>
    %180 = vector.shape_cast %179 : vector<256x8xf32> to vector<1x256x8xf32>
    %cst_88 = arith.constant dense<0.000000e+00> : vector<1xf32>
    %181 = vector.multi_reduction <add>, %180, %cst_88 [1, 2] : vector<1x256x8xf32> to vector<1xf32>
    %182 = vector.shape_cast %181 : vector<1xf32> to vector<1x1x1xf32>
    %183 = vector.extract %182[0, 0, 0] : f32 from vector<1x1x1xf32>
    %184 = vector.broadcast %183 : f32 to vector<1x1xf32>
    %cst_89 = arith.constant 2.048000e+03 : f32
    %185 = vector.broadcast %cst_89 : f32 to vector<1x1xf32>
    %186 = arith.divf %184, %185 : vector<1x1xf32>
    %187 = arith.mulf %179, %179 : vector<256x8xf32>
    %188 = vector.shape_cast %187 : vector<256x8xf32> to vector<1x256x8xf32>
    %cst_90 = arith.constant dense<0.000000e+00> : vector<1xf32>
    %189 = vector.multi_reduction <add>, %188, %cst_90 [1, 2] : vector<1x256x8xf32> to vector<1xf32>
    %190 = vector.shape_cast %189 : vector<1xf32> to vector<1x1x1xf32>
    %191 = vector.extract %190[0, 0, 0] : f32 from vector<1x1x1xf32>
    %192 = vector.broadcast %191 : f32 to vector<1x1xf32>
    %cst_91 = arith.constant 2.048000e+03 : f32
    %193 = vector.broadcast %cst_91 : f32 to vector<1x1xf32>
    %194 = arith.divf %192, %193 : vector<1x1xf32>
    %195 = arith.mulf %186, %186 : vector<1x1xf32>
    %196 = arith.subf %194, %195 : vector<1x1xf32>
    %cst_92 = arith.constant 0.000000e+00 : f32
    %197 = vector.broadcast %cst_92 : f32 to vector<1x1xf32>
    %198 = arith.maximumf %196, %197 : vector<1x1xf32>
    %199 = vector.broadcast %186 : vector<1x1xf32> to vector<256x8xf32>
    %200 = arith.subf %179, %199 : vector<256x8xf32>
    %cst_93 = arith.constant 9.99999974E-6 : f32
    %201 = vector.broadcast %cst_93 : f32 to vector<1x1xf32>
    %202 = arith.addf %198, %201 : vector<1x1xf32>
    %203 = math.rsqrt %202 : vector<1x1xf32>
    %204 = vector.broadcast %203 : vector<1x1xf32> to vector<256x8xf32>
    %205 = arith.mulf %200, %204 : vector<256x8xf32>
    %206 = vector.broadcast %7 : vector<1x8xf32> to vector<256x8xf32>
    %207 = arith.mulf %205, %206 : vector<256x8xf32>
    %208 = vector.broadcast %8 : vector<1x8xf32> to vector<256x8xf32>
    %209 = arith.addf %207, %208 : vector<256x8xf32>
    %210 = arith.negf %209 : vector<256x8xf32>
    %211 = math.exp %210 : vector<256x8xf32>
    %cst_94 = arith.constant 1.000000e+00 : f32
    %212 = vector.broadcast %cst_94 : f32 to vector<256x8xf32>
    %213 = arith.addf %212, %211 : vector<256x8xf32>
    %214 = arith.divf %212, %213 : vector<256x8xf32>
    %215 = arith.mulf %209, %214 : vector<256x8xf32>
    %c0_95 = arith.constant 0 : index
    %c0_96 = arith.constant 0 : index
    %216 = vector.load %arg6[%c0_95, %c0_96] : memref<4x8xbf16, #tpu.memory_space<vmem>>, vector<4x8xbf16>
    %cst_97 = arith.constant dense<0.000000e+00> : vector<256x8xf32>
    %217 = tpu.matmul %1, %216, %cst_97 {dimension_numbers = #tpu.dot_dimension_numbers<[1], [0], [0], [1], [0, 0, 1, 1], [], []>} : vector<256x4xbf16>, vector<4x8xbf16>, vector<256x8xf32> -> vector<256x8xf32>
    %218 = vector.broadcast %9 : vector<1x8xf32> to vector<256x8xf32>
    %219 = arith.addf %217, %218 : vector<256x8xf32>
    %220 = arith.addf %215, %219 : vector<256x8xf32>
    %221 = arith.truncf %220 : vector<256x8xf32> to vector<256x8xbf16>
    %c0_98 = arith.constant 0 : index
    %c0_99 = arith.constant 0 : index
    %c0_100 = arith.constant 0 : index
    %222 = vector.load %arg7[%c0_98, %c0_99, %c0_100] : memref<1x256x8xbf16, #tpu.memory_space<vmem>>, vector<1x256x8xbf16>
    %223 = vector.shape_cast %222 : vector<1x256x8xbf16> to vector<256x8xbf16>
    %224 = vector.shape_cast %221 : vector<256x8xbf16> to vector<1x256x8xbf16>
    tpu.vector_store %arg7[%c0_98, %c0_99, %c0_100], %224 {strides = array<i32>} : memref<1x256x8xbf16, #tpu.memory_space<vmem>>, vector<1x256x8xbf16>,
    return
  }
  func.func @transform_0(%arg0: i32) -> (i32, i32, i32) {
    %c0_i32 = arith.constant 0 : i32
    %c0_i32_0 = arith.constant 0 : i32
    %c0_i32_1 = arith.constant 0 : i32
    return %arg0, %c0_i32, %c0_i32_0 : i32, i32, i32
  }
  func.func @transform_1(%arg0: i32) -> (i32, i32, i32) {
    %c0_i32 = arith.constant 0 : i32
    %c0_i32_0 = arith.constant 0 : i32
    %c0_i32_1 = arith.constant 0 : i32
    return %arg0, %c0_i32, %c0_i32_0 : i32, i32, i32
  }
  func.func @transform_2(%arg0: i32) -> (i32, i32, i32) {
    %c0_i32 = arith.constant 0 : i32
    %c0_i32_0 = arith.constant 0 : i32
    %c0_i32_1 = arith.constant 0 : i32
    %c0_i32_2 = arith.constant 0 : i32
    return %c0_i32, %c0_i32_0, %c0_i32_1 : i32, i32, i32
  }
  func.func @transform_3(%arg0: i32) -> (i32, i32, i32) {
    %c0_i32 = arith.constant 0 : i32
    %c0_i32_0 = arith.constant 0 : i32
    %c0_i32_1 = arith.constant 0 : i32
    %c0_i32_2 = arith.constant 0 : i32
    return %c0_i32, %c0_i32_0, %c0_i32_1 : i32, i32, i32
  }
  func.func @transform_4(%arg0: i32) -> (i32, i32) {
    %c0_i32 = arith.constant 0 : i32
    %c0_i32_0 = arith.constant 0 : i32
    %c0_i32_1 = arith.constant 0 : i32
    return %c0_i32, %c0_i32_0 : i32, i32
  }
  func.func @transform_5(%arg0: i32) -> (i32, i32) {
    %c0_i32 = arith.constant 0 : i32
    %c0_i32_0 = arith.constant 0 : i32
    %c0_i32_1 = arith.constant 0 : i32
    return %c0_i32, %c0_i32_0 : i32, i32
  }
  func.func @transform_6(%arg0: i32) -> (i32, i32, i32) {
    %c0_i32 = arith.constant 0 : i32
    %c0_i32_0 = arith.constant 0 : i32
    %c0_i32_1 = arith.constant 0 : i32
    return %arg0, %c0_i32, %c0_i32_0 : i32, i32, i32
  }
}

</mosaic_0001>

<bundles_post_ra>
// kernel: tpu_custom_call.1
= control target key start
LH: loop header
LB: loop body
LE: loop exit
PB: predicated region body
PF: predicated region fallthrough
CT: control target
= control target key end

     0   :  { %s8526_s21 = smov 0   ;;  %s12859_s0 = inlined_call_operand.vmem [shape: bf16[2,256,4], index: 0, kind: input, shape index: {}]   ;;  %s12860_s1 = inlined_call_operand.vmem [shape: f32[2,1,8], index: 1, kind: input, shape index: {}]   ;;  %s12861_s2 = inlined_call_operand.vmem [shape: bf16[3,12,8], index: 2, kind: input, shape index: {}]   ;;  %s12862_s3 = inlined_call_operand.vmem [shape: bf16[3,24,8], index: 3, kind: input, shape index: {}]   ;;  %s12863_s4 = inlined_call_operand.vmem [shape: f32[8,8], index: 4, kind: input, shape index: {}]   ;;  %s12864_s5 = inlined_call_operand.vmem [shape: bf16[4,8], index: 5, kind: input, shape index: {}]   ;;  %s12865_s6 = inlined_call_operand.vmem [shape: bf16[2,256,8], index: 6, kind: output, shape index: {}]  }
   0x1 LB: > { %s7256_s22 = sadd.s32 4294967295, %s8484_s21   ;;  %p7260_p0 = scmp.ge.s32.totalorder %s8484_s21, 1  ;;  %s8484_s21 = sphi %s8526_s21, %s16_s21  }
   0x2   : > { %p220_p1 = scmp.lt.s32.totalorder %s8484_s21, 3 }
   0x4   : > { %p221_p2 = pnand %p7260_p0, %p220_p1 }
   0x6   : > { %224 = sbr.rel (%p221_p2) target bundleno = 1769 (0x6e9), region = 44 }
   0xd   : > { %p253_p3 = scmp.lt.s32.totalorder %s7256_s22, 1  ;;  %v302_v0 = vlaneseq  ;;  %vm12872_vm0 = vcmask 31744   ;;  %vm435_vm1 = vcmask 31748   ;;  %v12875_v2 = vmov 0   ;;  %s8488_s27 = smov 4  }
   0xe   : > { %432 = vst.msk [vmem:[#allocation2] sm:$0xff] %vm12872_vm0, %v12875_v2  ;;  %437 = vst.msk [vmem:[#allocation2 + $0x90] sm:$0xff] %vm12872_vm0, %v12875_v2  ;;  %vm12866_vm2 = vcmask 27648   ;;  %vm8487_vm3 = vmmov 1   ;;  %vm12894_vm7 = vsmask.f32 7424 }
   0xf   : > { %s13518_s22 = smov (!%p253_p3, %s7256_s22), 1  ;;  %v8536_v1 = vshrl.u32 %v302_v0, 7  ;;  %436 = vst.msk [vmem:[#allocation2 + $0x88] sm:$0xf0] %vm435_vm1, %v12875_v2  ;;  %vm8558_vm4 = vmpackc.low %vm8487_vm3, %vm8487_vm3  ;;  %s8489_s28 = smov 8  }
  0x10   : > { %434 = vst.msk [vmem:[#allocation2 + $0x8] sm:$0xf] %vm12866_vm2, %v12875_v2  ;;  %s7560_s23 = sshll.u32 %s13518_s22, 7  ;;  %v8599_v44 = vsel %vm8558_vm4, 65537, %v12875_v2  ;;  %s260_s17 = scalar_lea.vmem %s12860_s1, %s13518_s22 }
  0x11   : > { %13016 = vst [vmem:[#allocation4_spill] sm:$0xff] %v8536_v1  ;;  %v304_v3 = vadd.s32 8, %v8536_v1  ;;  %v306_v4 = vadd.s32 24, %v8536_v1  ;;  %v308_v5 = vadd.s32 40, %v8536_v1  ;;  %v310_v6 = vadd.s32 56, %v8536_v1  ;;  %s8556_s26 = scalar_lea.vmem %s12859_s0, %s7560_s23  ;;  %s8490_s18 = smov 16  }
  0x12   : > { %v312_v8 = vadd.s32 72, %v8536_v1  ;;  %v314_v9 = vadd.s32 88, %v8536_v1  ;;  %v8565_v10 = vadd.s32 104, %v8536_v1  ;;  %v8568_v11 = vadd.s32 120, %v8536_v1  ;;  %v272_v12 = vld [vmem:[%s8556_s26 + $0xc] sm:$0xf] }
  0x13   : > { %v273_v13 = vld [vmem:[%s8556_s26 + $0x10] sm:$0xf]  ;;  %v274_v14 = vld [vmem:[%s8556_s26 + $0x14] sm:$0xf]  ;;  %v275_v15 = vld [vmem:[%s8556_s26 + $0x18] sm:$0xf] }
  0x14   : > { %v7267_v16 = vcombine.low %v272_v12, %v273_v13  ;;  %v270_v17 = vld [vmem:[%s8556_s26 + $0x4] sm:$0xf]  ;;  %v271_v18 = vld [vmem:[%s8556_s26 + $0x8] sm:$0xf]  ;;  %v7268_v19 = vcombine.low %v274_v14, %v275_v15  ;;  %v276_v21 = vld [vmem:[%s8556_s26 + $0x1c] sm:$0xf] }
  0x15   : > { %v7266_v20 = vcombine.low %v270_v17, %v271_v18  ;;  %v277_v22 = vld [vmem:[%s8556_s26 + $0x20] sm:$0xf]  ;;  %v278_v23 = vld [vmem:[%s8556_s26 + $0x24] sm:$0xf]  ;;  %v279_v24 = vld [vmem:[%s8556_s26 + $0x28] sm:$0xf] }
  0x16   : > { %538 = vst.msk [vmem:[#allocation2 + $0x18] sm:$0xff] %vm12872_vm0, %v7267_v16  ;;  %v7269_v25 = vcombine.low %v276_v21, %v277_v22  ;;  %v269_v26 = vld [vmem:[%s8556_s26] sm:$0xf]  ;;  %v280_v27 = vld [vmem:[%s8556_s26 + $0x2c] sm:$0xf]  ;;  %539 = vst.msk [vmem:[#allocation2 + $0x20] sm:$0xff] %vm12872_vm0, %v7268_v19  ;;  %v7270_v28 = vcombine.low %v278_v23, %v279_v24 }
  0x17   : > { %537 = vst.msk [vmem:[#allocation2 + $0x10] sm:$0xff] %vm12872_vm0, %v7266_v20  ;;  %v7265_v29 = vcombine.low %v269_v26, %v269_v26  ;;  %v281_v30 = vld [vmem:[%s8556_s26 + $0x30] sm:$0xf]  ;;  %v282_v31 = vld [vmem:[%s8556_s26 + $0x34] sm:$0xf]  ;;  %v336_v35 = vand.u32 15, %v304_v3 }
  0x18   : > { %v283_v32 = vld [vmem:[%s8556_s26 + $0x38] sm:$0xf]  ;;  %540 = vst.msk [vmem:[#allocation2 + $0x28] sm:$0xff] %vm12872_vm0, %v7269_v25  ;;  %v7271_v33 = vcombine.low %v280_v27, %v281_v30  ;;  %v338_v36 = vand.u32 15, %v306_v4  ;;  %v284_v37 = vld [vmem:[%s8556_s26 + $0x3c] sm:$0xf] }
  0x19   : > { %v7272_v34 = vcombine.low %v282_v31, %v283_v32  ;;  %v285_v38 = vld [vmem:[%s8556_s26 + $0x40] sm:$0xf]  ;;  %541 = vst.msk [vmem:[#allocation2 + $0x30] sm:$0xff] %vm12872_vm0, %v7270_v28  ;;  %v340_v39 = vand.u32 15, %v308_v5  ;;  %v342_v40 = vand.u32 15, %v310_v6  ;;  %v344_v41 = vand.u32 15, %v312_v8 }
  0x1a   : > { %536 = vst.msk [vmem:[#allocation2 + $0x8] sm:$0xf0] %vm435_vm1, %v7265_v29  ;;  %v346_v42 = vand.u32 15, %v314_v9  ;;  %v286_v43 = vld [vmem:[%s8556_s26 + $0x44] sm:$0xf]  ;;  %vm400_vm5 = vcmp.le.s32.totalorder %v336_v35, 14  ;;  %v7273_v52 = vcombine.low %v284_v37, %v285_v38 }
  0x1b   : > { %542 = vst.msk [vmem:[#allocation2 + $0x38] sm:$0xff] %vm12872_vm0, %v7271_v33  ;;  %543 = vst.msk [vmem:[#allocation2 + $0x40] sm:$0xff] %vm12872_vm0, %v7272_v34  ;;  %vm402_vm6 = vcmp.le.s32.totalorder %v338_v36, 14  ;;  %v348_v45 = vand.u32 15, %v8565_v10  ;;  %v287_v46 = vld [vmem:[%s8556_s26 + $0x48] sm:$0xf] }
  0x1c   : > { %vm991_vm8 = vmpackc.low %vm400_vm5, %vm400_vm5  ;;  %vm8603_vm9 = vcmp.le.s32.totalorder %v340_v39, 14  ;;  %v350_v48 = vand.u32 15, %v8568_v11  ;;  %vm8609_vm11 = vcmp.le.s32.totalorder %v342_v40, 14  ;;  %vm8613_vm12 = vcmp.le.s32.totalorder %v344_v41, 14  ;;  %544 = vst.msk [vmem:[#allocation2 + $0x48] sm:$0xff] %vm12872_vm0, %v7273_v52 }
  0x1d   : > { %vm993_vm10 = vmpackc.low %vm402_vm6, %vm402_vm6  ;;  %v1023_v49 = vsel %vm991_vm8, 65537, %v12875_v2  ;;  %v8617_v53 = vld [vmem:[#allocation2 + $0x18] sm:$0xff]  ;;  %vm8626_vm14 = vcmp.le.s32.totalorder %v346_v42, 14  ;;  %v7274_v57 = vcombine.low %v286_v43, %v287_v46  ;;  %v8630_v58 = vld [vmem:[#allocation2 + $0x20] sm:$0xff]  ;;  %vm8640_vm15 = vcmp.le.s32.totalorder %v348_v45, 14 }
  0x1e   : > { %v1025_v54 = vsel %vm993_vm10, 65537, %v12875_v2  ;;  %v8621_v55 = vcombine.low %v8599_v44, %v1023_v49  ;;  %vm995_vm13 = vmpackc.low %vm8603_vm9, %vm8603_vm9  ;;  %v1305_v59 = vshll.u32 %v8617_v53, 16  ;;  %v1309_v60 = vshrl.u32 %v8617_v53, 16  ;;  %v8634_v61 = vld [vmem:[#allocation2 + $0x10] sm:$0xff] }
  0x1f   : > { %v8637_v62 = vcombine.low %v8599_v44, %v1025_v54  ;;  %v1027_v63 = vsel %vm995_vm13, 65537, %v12875_v2  ;;  %v1313_v3 = vshll.u32 %v8630_v58, 16  ;;  %v1297_v4 = vshll.u32 %v8634_v61, 16  ;;  %v8648_v6 = vld [vmem:[#allocation2 + $0x28] sm:$0xff]  ;;  %545 = vst.msk [vmem:[#allocation2 + $0x50] sm:$0xff] %vm12872_vm0, %v7274_v57  ;;  %vm997_vm4 = vmpackc.low %vm8609_vm11, %vm8609_vm11 }
  0x20   : > { %v1301_v5 = vshrl.u32 %v8634_v61, 16  ;;  %v1317_v7 = vshrl.u32 %v8630_v58, 16  ;;  %v8652_v8 = vrot.slane %v1305_v59, 1  ;;  %v8654_v9 = vld [vmem:[#allocation2 + $0x30] sm:$0xff]  ;;  %v1321_v10 = vshll.u32 %v8648_v6, 16  ;;  %vm999_vm5 = vmpackc.low %vm8613_vm12, %vm8613_vm12 }
  0x21   : > { %v1325_v11 = vshrl.u32 %v8648_v6, 16  ;;  %v8658_v12 = vld [vmem:[#allocation2 + $0x8] sm:$0xf0]  ;;  %v7300_v13 = vcombine.low %v8599_v44, %v1027_v63  ;;  %v1315_v14 = vrot.slane %v1313_v3, 1  ;;  %v8661_v15 = vrot.slane %v1297_v4, 1  ;;  %vm1001_vm8 = vmpackc.low %vm8626_vm14, %vm8626_vm14 }
  0x22   : > { %v1329_v16 = vshll.u32 %v8654_v9, 16  ;;  %v1663_v17 = vshrl.u32 %v8658_v12, 16  ;;  %v8665_v18 = vld [vmem:[#allocation2 + $0x38] sm:$0xff]  ;;  %v8667_v19 = vld [vmem:[#allocation2 + $0x40] sm:$0xff]  ;;  %v1311_v20 = vor.u32 %v1309_v60, %v8652_v8  ;;  %v1323_v21 = vrot.slane %v1321_v10, 1  ;;  %vm1003_vm9 = vmpackc.low %vm8640_vm15, %vm8640_vm15 }
  0x23   : > { %v1665_v22 = vshll.u32 %v8658_v12, 16  ;;  %v1337_v23 = vshll.u32 %v8665_v18, 16  ;;  %v1303_v24 = vor.u32 %v1301_v5, %v8661_v15  ;;  %v1341_v26 = vshrl.u32 %v8665_v18, 16 }
  0x24   : > { %v1331_v25 = vrot.slane %v1329_v16, 1  ;;  %v1345_v27 = vshll.u32 %v8667_v19, 16  ;;  %vm1102_vm1 = vsmask.f32 4352  ;;  %v8676_v28 = vsel %vm12894_vm7, %v1311_v20, %v1315_v14 }
  0x25   : > { %v8678_v29 = vor.u32 %v1325_v11, %v1323_v21  ;;  %v1667_v30 = vrot.slane %v1665_v22, 1  ;;  %v8680_v31 = vrot.slane %v1337_v23, 1  ;;  %vm8682_vm3 = vcmp.le.s32.totalorder %v350_v48, 14  ;;  %1422 = vrot.lane.b32.xlu1 %v8676_v28, %s8488_s27 }
  0x26   : > { %v1308_v33 = vsel %vm12894_vm7, %v1303_v24, %v8652_v8  ;;  %v8690_v34 = vrot.slane %v1345_v27, 1  ;;  %v1319_v35 = vor.u32 %v1317_v7, %v1315_v14  ;;  %v1333_v36 = vshrl.u32 %v8654_v9, 16  ;;  %vm1005_vm12 = vmpackc.low %vm8682_vm3, %vm8682_vm3 }
  0x27   : > { %1420 = vrot.lane.b32.xlu0 %v1308_v33, %s8488_s27  ;;  %v1332_v37 = vsel %vm12894_vm7, %v8678_v29, %v1331_v25  ;;  %v1668_v38 = vor.u32 %v1667_v30, %v1663_v17  ;;  %v1343_v39 = vor.u32 %v1341_v26, %v8680_v31  ;;  %v1104_v40 = vshrl.u32 %v8621_v55, 16 }
  0x28   : > { %v8702_v41 = vsel %vm12894_vm7, %v1319_v35, %v1323_v21  ;;  %v1335_v42 = vor.u32 %v1333_v36, %v1331_v25  ;;  %v1107_v43 = vshll.u32 %v8621_v55, 16  ;;  %v1112_v45 = vshrl.u32 %v8637_v62, 16 }
  0x29   : > { %v1669_v46 = vsel %vm12894_vm7, %v1668_v38, %v8661_v15  ;;  %v8713_v47 = vsel %vm12894_vm7, %v1343_v39, %v8690_v34  ;;  %v1106_v48 = vrot.slane %v1104_v40, 3  ;;  %v1115_v49 = vshll.u32 %v8637_v62, 16  ;;  %1426 = vrot.lane.b32.xlu1 %v1332_v37, %s8488_s27 }
  0x2a   : > { %vm12943_vm6 = vcmask 1046528   ;;  %v1340_v52 = vsel %vm12894_vm7, %v1335_v42, %v8680_v31  ;;  %v1109_v54 = vrot.slane %v1107_v43, 4  ;;  %v1114_v55 = vrot.slane %v1112_v45, 3 }
  0x2b   : > { %v1121_v57 = vshrl.u32 %v7300_v13, 16  ;;  %1686 = vrot.lane.b32.xlu0 %v1669_v46, %s8488_s27  ;;  %v1117_v59 = vrot.slane %v1115_v49, 4  ;;  %v1124_v60 = vshll.u32 %v7300_v13, 16  ;;  %v1029_v62 = vsel %vm997_vm4, 65537, %v12875_v2 }
  0x2c   : > { %v1031_v63 = vsel %vm999_vm5, 65537, %v12875_v2  ;;  %v8738_v0 = vor.u32 %v1109_v54, %v1106_v48  ;;  %v7301_v4 = vcombine.low %v8599_v44, %v1029_v62  ;;  %v1033_v50 = vsel %vm1001_vm8, 65537, %v12875_v2  ;;  %v8793_v54 = vld [vmem:[#allocation2 + $0x48] sm:$0xff] }
  0x2d   : > { %v1123_v3 = vrot.slane %v1121_v57, 3  ;;  %v7302_v5 = vcombine.low %v8599_v44, %v1031_v63  ;;  %v1118_v7 = vor.u32 %v1117_v59, %v1114_v55  ;;  %v1126_v10 = vrot.slane %v1124_v60, 4  ;;  %1430 = vrot.lane.b32.xlu1 %v8713_v47, %s8488_s27 }
  0x2e   : > { %13031 = vst [vmem:[#allocation5_spill] sm:$0xff] %v8738_v0  ;;  %v1035_v51 = vsel %vm1003_vm9, 65537, %v12875_v2  ;;  %vm12891_vm10 = vcmp.ne.s16.totalorder %v8738_v0, 0  ;;  %v1130_v11 = vshrl.u32 %v7301_v4, 16  ;;  %v1133_v13 = vshll.u32 %v7301_v4, 16 }
  0x2f   : > { %v1139_v14 = vshrl.u32 %v7302_v5, 16  ;;  %1424 = vrot.lane.b32.xlu0 %v8702_v41, %s8488_s27  ;;  %v8756_v16 = vsel %vm1102_vm1, %v8738_v0, %v1118_v7  ;;  %v1645_v56 = vsel %vm12891_vm10, %v8658_v12, 0  ;;  %v1127_v17 = vor.u32 %v1126_v10, %v1123_v3 }
  0x30   : > { %13032 = vst [vmem:[#allocation6_spill] sm:$0xff] %v8756_v16  ;;  %v1142_v20 = vshll.u32 %v7302_v5, 16  ;;  %vm12890_vm11 = vcmp.ne.s16.totalorder %v8756_v16, 0  ;;  %v1711_v21 = vrot.slane %v1645_v56, 1  ;;  %v1132_v22 = vrot.slane %v1130_v11, 3 }
  0x31   : > { %v1135_v23 = vrot.slane %v1133_v13, 4  ;;  %v1646_v24 = vsel %vm12890_vm11, %v8634_v61, 0  ;;  %v8769_v25 = vsel %vm1102_vm1, %v1118_v7, %v1127_v17  ;;  %v1141_v26 = vrot.slane %v1139_v14, 3  ;;  %v8805_v14 = vld [vmem:[#allocation2 + $0x50] sm:$0xff] }
  0x32   : > { %13033 = vst [vmem:[#allocation7_spill] sm:$0xff] %v8769_v25  ;;  %v1144_v12 = vrot.slane %v1142_v20, 4  ;;  %v1712_v27 = vrot.slane %v1646_v24, 1  ;;  %vm12889_vm13 = vcmp.ne.s16.totalorder %v8769_v25, 0  ;;  %v7303_v33 = vcombine.low %v8599_v44, %v1033_v50 }
  0x33   : > { %v1136_v30 = vor.u32 %v1135_v23, %v1132_v22  ;;  %1428 = vrot.lane.b32.xlu0 %v1340_v52, %s8488_s27  ;;  %v1647_v32 = vsel %vm12889_vm13, %v8617_v53, 0  ;;  %v7304_v36 = vcombine.low %v8599_v44, %v1035_v51  ;;  %v1037_v37 = vsel %vm1005_vm12, 65537, %v12875_v2 }
  0x34   : > { %v1145_v35 = vor.u32 %v1144_v12, %v1141_v26  ;;  %v1713_v38 = vsel %vm12943_vm6, %v1711_v21, %v1712_v27  ;;  %v1714_v39 = vrot.slane %v1647_v32, 1  ;;  %v1148_v42 = vshrl.u32 %v7303_v33, 16 }
  0x35   : > { %v8781_v40 = vsel %vm1102_vm1, %v1127_v17, %v1136_v30  ;;  %1744 = vrot.lane.b32.xlu1 %v1713_v38, %s8489_s28  ;;  %v1151_v45 = vshll.u32 %v7303_v33, 16  ;;  %v1157_v46 = vshrl.u32 %v7304_v36, 16  ;;  %v1160_v63 = vshll.u32 %v7304_v36, 16 }
  0x36   : > { %13034 = vst [vmem:[#allocation8_spill] sm:$0xff] %v8781_v40  ;;  %vm12888_vm14 = vcmp.ne.s16.totalorder %v8781_v40, 0  ;;  %v8786_v43 = vsel %vm1102_vm1, %v1136_v30, %v1145_v35  ;;  %v1715_v48 = vsel %vm12943_vm6, %v1712_v27, %v1714_v39  ;;  %v1150_v52 = vrot.slane %v1148_v42, 3 }
  0x37   : > { %13035 = vst [vmem:[#allocation9_spill] sm:$0xff] %v8786_v43  ;;  %v1648_v49 = vsel %vm12888_vm14, %v8630_v58, 0  ;;  %vm12887_vm15 = vcmp.ne.s16.totalorder %v8786_v43, 0  ;;  %1746 = vrot.lane.b32.xlu0 %v1715_v48, %s8489_s28  ;;  %v1153_v59 = vrot.slane %v1151_v45, 4  ;;  %v1159_v62 = vrot.slane %v1157_v46, 3 }
  0x38   : > { %v1716_v55 = vrot.slane %v1648_v49, 1  ;;  %v1649_v57 = vsel %vm12887_vm15, %v8648_v6, 0  ;;  %v7305_v3 = vcombine.low %v8599_v44, %v1037_v37  ;;  %v1353_v7 = vshll.u32 %v8793_v54, 16  ;;  %v554_v37 = vld [vmem:[#allocation2 + $0x8] sm:$0xff]  ;;  %v924_v48 = vld [vmem:[#allocation2] sm:$0xf0] }
  0x39   : > { %v1718_v60 = vrot.slane %v1649_v57, 1  ;;  %v1154_v5 = vor.u32 %v1153_v59, %v1150_v52  ;;  %v320_v10 = vadd.s32 136, %v8536_v1  ;;  %v1162_v51 = vrot.slane %v1160_v63, 4 }
  0x3a   : > { %v1717_v4 = vsel %vm12943_vm6, %v1714_v39, %v1716_v55  ;;  %v1166_v11 = vshrl.u32 %v7305_v3, 16  ;;  %v1169_v13 = vshll.u32 %v7305_v3, 16  ;;  %v1349_v17 = vshrl.u32 %v8667_v19, 16 }
  0x3b   : > { %1748 = vrot.lane.b32.xlu1 %v1717_v4, %s8489_s28  ;;  %v1719_v50 = vsel %vm12943_vm6, %v1716_v55, %v1718_v60  ;;  %v8809_v56 = vsel %vm1102_vm1, %v1145_v35, %v1154_v5  ;;  %v1163_v20 = vor.u32 %v1162_v51, %v1159_v62  ;;  %v1355_v24 = vrot.slane %v1353_v7, 1 }
  0x3c   : > { %1750 = vrot.lane.b32.xlu0 %v1719_v50, %s8489_s28  ;;  %13036 = vst [vmem:[#allocation10_spill] sm:$0xff] %v8809_v56  ;;  %vm12886_vm3 = vcmp.ne.s16.totalorder %v8809_v56, 0  ;;  %v1168_v21 = vrot.slane %v1166_v11, 3  ;;  %v1171_v22 = vrot.slane %v1169_v13, 4  ;;  %v1357_v26 = vshrl.u32 %v8793_v54, 16 }
  0x3d   : > { %v1650_v23 = vsel %vm12886_vm3, %v8654_v9, 0  ;;  %v1361_v12 = vshll.u32 %v8805_v14, 16  ;;  %v8819_v30 = vsel %vm1102_vm1, %v1154_v5, %v1163_v20  ;;  %v352_v32 = vand.u32 15, %v320_v10  ;;  %v300_v56 = vld [vmem:[%s8556_s26 + $0x7c] sm:$0xf] }
  0x3e   : > { %v1720_v27 = vrot.slane %v1650_v23, 1  ;;  %13037 = vst [vmem:[#allocation11_spill] sm:$0xff] %v8819_v30  ;;  %v1172_v33 = vor.u32 %v1171_v22, %v1168_v21  ;;  %vm12870_vm4 = vcmp.ne.s16.totalorder %v8819_v30, 0  ;;  %v1351_v35 = vor.u32 %v1349_v17, %v8690_v34 }
  0x3f   : > { %v322_v36 = vadd.s32 152, %v8536_v1  ;;  %v1651_v39 = vsel %vm12870_vm4, %v8665_v18, 0  ;;  %vm416_vm5 = vcmp.le.s32.totalorder %v352_v32, 14  ;;  %v1359_v46 = vor.u32 %v1357_v26, %v1355_v24 }
  0x40   : > { %v1721_v38 = vsel %vm12943_vm6, %v1718_v60, %v1720_v27  ;;  %v8829_v42 = vsel %vm1102_vm1, %v1163_v20, %v1172_v33  ;;  %v1722_v45 = vrot.slane %v1651_v39, 1  ;;  %vm1007_vm9 = vmpackc.low %vm416_vm5, %vm416_vm5  ;;  %v8836_v52 = vrot.slane %v1361_v12, 1 }
  0x41   : > { %13038 = vst [vmem:[#allocation12_spill] sm:$0xff] %v8829_v42  ;;  %1752 = vrot.lane.b32.xlu1 %v1721_v38, %s8489_s28  ;;  %vm12868_vm8 = vcmp.ne.s16.totalorder %v8829_v42, 0  ;;  %v354_v34 = vand.u32 15, %v322_v36  ;;  %v1039_v55 = vsel %vm1007_vm9, 65537, %v12875_v2  ;;  %v1289_v57 = vshll.u32 %v554_v37, 16 }
  0x42   : > { %v1652_v49 = vsel %vm12868_vm8, %v8667_v19, 0  ;;  %v1723_v59 = vsel %vm12943_vm6, %v1720_v27, %v1722_v45  ;;  %v7306_v62 = vcombine.low %v8599_v44, %v1039_v55  ;;  %v8843_v63 = vsel %vm12894_vm7, %v1351_v35, %v1355_v24  ;;  %v288_v55 = vld [vmem:[%s8556_s26 + $0x4c] sm:$0xf] }
  0x43   : > { %v1724_v60 = vrot.slane %v1652_v49, 1  ;;  %vm418_vm12 = vcmp.le.s32.totalorder %v354_v34, 14  ;;  %1754 = vrot.lane.b32.xlu0 %v1723_v59, %s8489_s28  ;;  %13039 = vst [vmem:[#allocation13_spill] sm:$0xff] %v8843_v63  ;;  %v1284_v3 = vshll.u32 %v924_v48, 16  ;;  %v8850_v50 = vsel %vm12894_vm7, %v1359_v46, %v8836_v52 }
  0x44   : > { %vm1009_vm5 = vmpackc.low %vm418_vm12, %vm418_vm12  ;;  %v1175_v5 = vshrl.u32 %v7306_v62, 16  ;;  %v1178_v7 = vshll.u32 %v7306_v62, 16  ;;  %13040 = vst [vmem:[#allocation14_spill] sm:$0xff] %v8850_v50  ;;  %v1291_v11 = vrot.slane %v1289_v57, 1  ;;  %v1293_v13 = vshrl.u32 %v554_v37, 16 }
  0x45   : > { %v1725_v4 = vsel %vm12943_vm6, %v1722_v45, %v1724_v60  ;;  %v1041_v10 = vsel %vm1009_vm5, 65537, %v12875_v2  ;;  %v1282_v21 = vshrl.u32 %v924_v48, 16  ;;  %v1264_v22 = vsel %vm12890_vm11, %v554_v37, 0 }
  0x46   : > { %1756 = vrot.lane.b32.xlu1 %v1725_v4, %s8489_s28  ;;  %v7307_v51 = vcombine.low %v8599_v44, %v1041_v10  ;;  %v1177_v17 = vrot.slane %v1175_v5, 3  ;;  %v1180_v20 = vrot.slane %v1178_v7, 4  ;;  %v1286_v26 = vrot.slane %v1284_v3, 1  ;;  %v289_v3 = vld [vmem:[%s8556_s26 + $0x50] sm:$0xf] }
  0x47   : > { %1432 = vrot.lane.b32.xlu0 %v8843_v63, %s8488_s27  ;;  %v1265_v12 = vsel %vm12889_vm13, %v8634_v61, 0  ;;  %v1263_v32 = vsel %vm12891_vm10, %v924_v48, 0  ;;  %v1266_v37 = vsel %vm12888_vm14, %v8617_v53, 0  ;;  %v1267_v38 = vsel %vm12887_vm15, %v8630_v58, 0  ;;  %v290_v7 = vld [vmem:[%s8556_s26 + $0x54] sm:$0xf] }
  0x48   : > { %v1184_v23 = vshrl.u32 %v7307_v51, 16  ;;  %v1187_v24 = vshll.u32 %v7307_v51, 16  ;;  %v1181_v27 = vor.u32 %v1180_v20, %v1177_v17  ;;  %v1295_v39 = vor.u32 %v1293_v13, %v1291_v11  ;;  %v291_v10 = vld [vmem:[%s8556_s26 + $0x58] sm:$0xf]  ;;  %v292_v20 = vld [vmem:[%s8556_s26 + $0x5c] sm:$0xf] }
  0x49   : > { %v1469_v45 = vrot.slane %v1264_v22, 1  ;;  %v1471_v46 = vrot.slane %v1265_v12, 1  ;;  %v1287_v48 = vor.u32 %v1286_v26, %v1282_v21  ;;  %v1268_v49 = vsel %vm12886_vm3, %v8648_v6, 0  ;;  %v294_v26 = vld [vmem:[%s8556_s26 + $0x64] sm:$0xf] }
  0x4a   : > { %1434 = vrot.lane.b32.xlu1 %v8850_v50, %s8488_s27  ;;  %v1186_v35 = vrot.slane %v1184_v23, 3  ;;  %v1189_v36 = vrot.slane %v1187_v24, 4  ;;  %v8871_v61 = vsel %vm1102_vm1, %v1172_v33, %v1181_v27  ;;  %v1468_v57 = vrot.slane %v1263_v32, 1  ;;  %v293_v24 = vld [vmem:[%s8556_s26 + $0x60] sm:$0xf] }
  0x4b   : > { %13041 = vst [vmem:[#allocation15_spill] sm:$0xff] %v8871_v61  ;;  %vm12867_vm9 = vcmp.ne.s16.totalorder %v8871_v61, 0  ;;  %v1473_v59 = vrot.slane %v1266_v37, 1  ;;  %v1475_v62 = vrot.slane %v1267_v38, 1  ;;  %v1300_v51 = vsel %vm12894_vm7, %v1295_v39, %v8661_v15  ;;  %v295_v32 = vld [vmem:[%s8556_s26 + $0x68] sm:$0xf] }
  0x4c   : > { %v8874_v34 = vor.u32 %v1189_v36, %v1186_v35  ;;  %v1653_v33 = vsel %vm12867_vm9, %v8793_v54, 0  ;;  %v8896_v13 = vsel %vm12870_vm4, %v8654_v9, 0  ;;  %v1477_v17 = vrot.slane %v1268_v49, 1  ;;  %v296_v35 = vld [vmem:[%s8556_s26 + $0x6c] sm:$0xf] }
  0x4d   : > { %v1726_v4 = vrot.slane %v1653_v33, 1  ;;  %v8906_v23 = vsel %vm12943_vm6, %v1469_v45, %v1471_v46  ;;  %v7275_v15 = vcombine.low %v288_v55, %v289_v3  ;;  %v1292_v12 = vsel %vm12894_vm7, %v1287_v48, %v1291_v11  ;;  %v297_v11 = vld [vmem:[%s8556_s26 + $0x70] sm:$0xf]  ;;  %v298_v55 = vld [vmem:[%s8556_s26 + $0x74] sm:$0xf] }
  0x4e   : > { %v8886_v5 = vsel %vm1102_vm1, %v1181_v27, %v8874_v34  ;;  %v8915_v27 = vsel %vm12943_vm6, %v1473_v59, %v1475_v62  ;;  %v8920_v36 = vsel %vm12943_vm6, %v1471_v46, %v1473_v59  ;;  %v1479_v37 = vrot.slane %v8896_v13, 1  ;;  %v299_v13 = vld [vmem:[%s8556_s26 + $0x78] sm:$0xf] }
  0x4f   : > { %13042 = vst [vmem:[#allocation16_spill] sm:$0xff] %v8886_v5  ;;  %vm12869_vm12 = vcmp.ne.s16.totalorder %v8886_v5, 0  ;;  %v1727_v21 = vsel %vm12943_vm6, %v1724_v60, %v1726_v4  ;;  %v1470_v60 = vsel %vm12943_vm6, %v1468_v57, %v1469_v45  ;;  %546 = vst.msk [vmem:[#allocation2 + $0x58] sm:$0xff] %vm12872_vm0, %v7275_v15  ;;  %v324_v38 = vadd.s32 168, %v8536_v1 }
  0x50   : > { %v8903_v22 = vsel %vm12869_vm12, %v8805_v14, 0  ;;  %1758 = vrot.lane.b32.xlu0 %v1727_v21, %s8489_s28  ;;  %v326_v39 = vadd.s32 184, %v8536_v1  ;;  %v8931_v48 = vsel %vm12943_vm6, %v1475_v62, %v1477_v17  ;;  %v7276_v49 = vcombine.low %v290_v7, %v291_v10 }
  0x51   : > { %13043 = vst [vmem:[#allocation17_spill] sm:$0xff] %v8903_v22  ;;  %v12871_v9 = vrot.slane %v8903_v22, 1  ;;  %v7277_v46 = vcombine.low %v292_v20, %v293_v24  ;;  %v1270_v33 = vsel %vm12868_vm8, %v8665_v18, 0  ;;  %v356_v57 = vand.u32 15, %v324_v38 }
  0x52   : > { %v358_v59 = vand.u32 15, %v326_v39  ;;  %v328_v3 = vadd.s32 200, %v8536_v1  ;;  %v1271_v62 = vsel %vm12867_vm9, %v8667_v19, 0  ;;  %547 = vst.msk [vmem:[#allocation2 + $0x60] sm:$0xff] %vm12872_vm0, %v7276_v49  ;;  %v7278_v7 = vcombine.low %v294_v26, %v295_v32 }
  0x53   : > { %v1729_v45 = vsel %vm12943_vm6, %v1726_v4, %v12871_v9  ;;  %548 = vst.msk [vmem:[#allocation2 + $0x68] sm:$0xff] %vm12872_vm0, %v7277_v46  ;;  %v330_v4 = vadd.s32 216, %v8536_v1  ;;  %v7279_v10 = vcombine.low %v296_v35, %v297_v11  ;;  %vm8947_vm5 = vcmp.le.s32.totalorder %v356_v57, 14 }
  0x54   : > { %1760 = vrot.lane.b32.xlu1 %v1729_v45, %s8489_s28  ;;  %1416 = vrot.lane.b32.xlu0 %v1292_v12, %s8488_s27  ;;  %vm8951_vm2 = vcmp.le.s32.totalorder %v358_v59, 14  ;;  %v360_v15 = vand.u32 15, %v328_v3  ;;  %v332_v24 = vadd.s32 232, %v8536_v1  ;;  %v8957_v12 = vsel %vm12943_vm6, %v1477_v17, %v1479_v37  ;;  %vm1011_vm9 = vmpackc.low %vm8947_vm5, %vm8947_vm5  ;;  %549 = vst.msk [vmem:[#allocation2 + $0x70] sm:$0xff] %vm12872_vm0, %v7278_v7 }
  0x55   : > { %v8962_v38 = vsel %vm12869_vm12, %v8793_v54, 0  ;;  %v362_v26 = vand.u32 15, %v330_v4  ;;  %550 = vst.msk [vmem:[#allocation2 + $0x78] sm:$0xff] %vm12872_vm0, %v7279_v10  ;;  %v7280_v32 = vcombine.low %v298_v55, %v299_v13  ;;  %v1481_v35 = vrot.slane %v1270_v33, 1  ;;  %vm1013_vm8 = vmpackc.low %vm8951_vm2, %vm8951_vm2 }
  0x56   : > { %v1483_v17 = vrot.slane %v1271_v62, 1  ;;  %v1043_v39 = vsel %vm1011_vm9, 65537, %v12875_v2  ;;  %vm424_vm12 = vcmp.le.s32.totalorder %v360_v15, 14  ;;  %v1365_v11 = vshrl.u32 %v8805_v14, 16 }
  0x57   : > { %v1045_v45 = vsel %vm1013_vm8, 65537, %v12875_v2  ;;  %v7308_v49 = vcombine.low %v8599_v44, %v1043_v39  ;;  %vm426_vm5 = vcmp.le.s32.totalorder %v362_v26, 14  ;;  %vm1015_vm4 = vmpackc.low %vm424_vm12, %vm424_vm12  ;;  %551 = vst.msk [vmem:[#allocation2 + $0x80] sm:$0xff] %vm12872_vm0, %v7280_v32  ;;  %v1485_v46 = vrot.slane %v8962_v38, 1 }
  0x58   : > { %1418 = vrot.lane.b32.xlu1 %v1300_v51, %s8488_s27  ;;  %1501 = vrot.lane.b32.xlu0 %v1470_v60, %s8489_s28  ;;  %v8979_v51 = vld [vmem:[#allocation2 + $0x58] sm:$0xff]  ;;  %v7309_v55 = vcombine.low %v8599_v44, %v1045_v45  ;;  %vm1017_vm2 = vmpackc.low %vm426_vm5, %vm426_vm5  ;;  %v1047_v33 = vsel %vm1015_vm4, 65537, %v12875_v2  ;;  %v364_v60 = vand.u32 15, %v332_v24  ;;  %v1482_v62 = vsel %vm12943_vm6, %v1479_v37, %v1481_v35 }
  0x59   : > { %v1193_v57 = vshrl.u32 %v7308_v49, 16  ;;  %v1196_v59 = vshll.u32 %v7308_v49, 16  ;;  %v1049_v3 = vsel %vm1017_vm2, 65537, %v12875_v2  ;;  %v7310_v13 = vcombine.low %v8599_v44, %v1047_v33  ;;  %v8994_v26 = vld [vmem:[#allocation2 + $0x60] sm:$0xff] }
  0x5a   : > { %v1202_v4 = vshrl.u32 %v7309_v55, 16  ;;  %v1205_v7 = vshll.u32 %v7309_v55, 16  ;;  %v7311_v10 = vcombine.low %v8599_v44, %v1049_v3  ;;  %v1484_v20 = vsel %vm12943_vm6, %v1481_v35, %v1483_v17  ;;  %v9000_v49 = vld [vmem:[#allocation2 + $0x68] sm:$0xff] }
  0x5b   : > { %v1369_v21 = vshll.u32 %v8979_v51, 16  ;;  %v1195_v15 = vrot.slane %v1193_v57, 3  ;;  %v1198_v24 = vrot.slane %v1196_v59, 4  ;;  %v1367_v32 = vor.u32 %v1365_v11, %v8836_v52 }
  0x5c   : > { %1503 = vrot.lane.b32.xlu1 %v8906_v23, %s8489_s28  ;;  %1505 = vrot.lane.b32.xlu0 %v8920_v36, %s8489_s28  ;;  %v1486_v23 = vsel %vm12943_vm6, %v1483_v17, %v1485_v46  ;;  %v1204_v37 = vrot.slane %v1202_v4, 3  ;;  %v1207_v39 = vrot.slane %v1205_v7, 4  ;;  %v1211_v36 = vshrl.u32 %v7310_v13, 16  ;;  %v9022_v7 = vld [vmem:[#allocation2 + $0x10] sm:$0xf0] }
  0x5d   : > { %v1199_v45 = vor.u32 %v1198_v24, %v1195_v15  ;;  %v334_v35 = vadd.s32 248, %v8536_v1  ;;  %vm9003_vm4 = vcmp.le.s32.totalorder %v364_v60, 14  ;;  %v1377_v11 = vshll.u32 %v8994_v26, 16 }
  0x5e   : > { %v1208_v52 = vor.u32 %v1207_v39, %v1204_v37  ;;  %v1214_v33 = vshll.u32 %v7310_v13, 16  ;;  %v1220_v17 = vshrl.u32 %v7311_v10, 16  ;;  %v1371_v57 = vrot.slane %v1369_v21, 1  ;;  %v9031_v39 = vld [vmem:[#allocation2 + $0x70] sm:$0xff]  ;;  %vm1019_vm12 = vmpackc.low %vm9003_vm4, %vm9003_vm4 }
  0x5f   : > { %v9014_v59 = vsel %vm1102_vm1, %v8874_v34, %v1199_v45  ;;  %v1373_v60 = vshrl.u32 %v8979_v51, 16  ;;  %v1213_v3 = vrot.slane %v1211_v36, 3  ;;  %v1223_v21 = vshll.u32 %v7311_v10, 16 }
  0x60   : > { %1507 = vrot.lane.b32.xlu1 %v8915_v27, %s8489_s28  ;;  %1509 = vrot.lane.b32.xlu0 %v8931_v48, %s8489_s28  ;;  %13050 = vst [vmem:[#allocation18_spill] sm:$0xff] %v9014_v59  ;;  %v9018_v4 = vsel %vm1102_vm1, %v1199_v45, %v1208_v52  ;;  %vm12905_vm8 = vcmp.ne.s16.totalorder %v9014_v59, 0  ;;  %v1385_v27 = vshll.u32 %v9000_v49, 16  ;;  %v1216_v13 = vrot.slane %v1214_v33, 4 }
  0x61   : > { %13051 = vst [vmem:[#allocation19_spill] sm:$0xff] %v9018_v4  ;;  %vm12873_vm9 = vcmp.ne.s16.totalorder %v9018_v4, 0  ;;  %v1273_v34 = vsel %vm12905_vm8, %v8805_v14, 0  ;;  %v1222_v48 = vrot.slane %v1220_v17, 3  ;;  %v1379_v15 = vrot.slane %v1377_v11, 1 }
  0x62   : > { %v1381_v24 = vshrl.u32 %v8994_v26, 16  ;;  %v1217_v37 = vor.u32 %v1216_v13, %v1213_v3  ;;  %v366_v45 = vand.u32 15, %v334_v35  ;;  %v1274_v36 = vsel %vm12873_vm9, %v8979_v51, 0  ;;  %v9049_v13 = vld [vmem:[#allocation2 + $0x78] sm:$0xff] }
  0x63   : > { %v1225_v33 = vrot.slane %v1223_v21, 4  ;;  %v2615_v10 = vshll.u32 %v9022_v7, 16  ;;  %v1487_v11 = vrot.slane %v1273_v34, 1  ;;  %v1375_v9 = vor.u32 %v1373_v60, %v1371_v57 }
  0x64   : > { %1511 = vrot.lane.b32.xlu1 %v8957_v12, %s8489_s28  ;;  %1513 = vrot.lane.b32.xlu0 %v1482_v62, %s8489_s28  ;;  %v9040_v12 = vsel %vm12894_vm7, %v1367_v32, %v1371_v57  ;;  %v9043_v3 = vsel %vm1102_vm1, %v1208_v52, %v1217_v37  ;;  %v1387_v62 = vrot.slane %v1385_v27, 1  ;;  %v1393_v21 = vshll.u32 %v9031_v39, 16 }
  0x65   : > { %13052 = vst [vmem:[#allocation20_spill] sm:$0xff] %v9040_v12  ;;  %13053 = vst [vmem:[#allocation21_spill] sm:$0xff] %v9043_v3  ;;  %v1226_v35 = vor.u32 %v1225_v33, %v1222_v48  ;;  %vm12908_vm5 = vcmp.ne.s16.totalorder %v9043_v3, 0  ;;  %v1489_v32 = vrot.slane %v1274_v36, 1  ;;  %v1383_v34 = vor.u32 %v1381_v24, %v1379_v15  ;;  %v9068_v48 = vld [vmem:[#allocation2 + $0x80] sm:$0xf] }
  0x66   : > { %v1389_v57 = vshrl.u32 %v9000_v49, 16  ;;  %vm430_vm2 = vcmp.le.s32.totalorder %v366_v45, 14  ;;  %v1275_v60 = vsel %vm12908_vm5, %v8994_v26, 0  ;;  %v1397_v27 = vshrl.u32 %v9031_v39, 16 }
  0x67   : > { %v9056_v52 = vsel %vm1102_vm1, %v1217_v37, %v1226_v35  ;;  %vm1021_vm0 = vmpackc.low %vm430_vm2, %vm430_vm2  ;;  %v1401_v24 = vshll.u32 %v9049_v13, 16  ;;  %v1395_v55 = vrot.slane %v1393_v21, 1  ;;  %v1490_v38 = vsel %vm12943_vm6, %v1487_v11, %v1489_v32 }
  0x68   : > { %1515 = vrot.lane.b32.xlu1 %v1484_v20, %s8489_s28  ;;  %1517 = vrot.lane.b32.xlu0 %v1486_v23, %s8489_s28  ;;  %13054 = vst [vmem:[#allocation22_spill] sm:$0xff] %v9056_v52  ;;  %v1051_v20 = vsel %vm1019_vm12, 65537, %v12875_v2  ;;  %v1488_v23 = vsel %vm12943_vm6, %v1485_v46, %v1487_v11  ;;  %vm12942_vm9 = vcmp.ne.s16.totalorder %v9056_v52, 0  ;;  %v1053_v37 = vsel %vm1021_vm0, 65537, %v12875_v2 }
  0x69   : > { %v9079_v45 = vsel %vm12942_vm9, %v9000_v49, 0  ;;  %v7312_v36 = vcombine.low %v8599_v44, %v1051_v20  ;;  %v7313_v33 = vcombine.low %v8599_v44, %v1053_v37  ;;  %v1491_v46 = vrot.slane %v1275_v60, 1 }
  0x6a   : > { %v1391_v17 = vor.u32 %v1389_v57, %v1387_v62  ;;  %v1409_v50 = vshll.u32 %v9068_v48, 16  ;;  %v9089_v21 = vsel %vm12894_vm7, %v1383_v34, %v1387_v62  ;;  %v9092_v20 = vsel %vm12894_vm7, %v1375_v9, %v1379_v15 }
  0x6b   : > { %v1229_v2 = vshrl.u32 %v7312_v36, 16  ;;  %v1232_v52 = vshll.u32 %v7312_v36, 16  ;;  %v1238_v63 = vshrl.u32 %v7313_v33, 16  ;;  %v1241_v3 = vshll.u32 %v7313_v33, 16 }
  0x6c   : > { %1436 = vrot.lane.b32.xlu1 %v9040_v12, %s8488_s27  ;;  %1519 = vrot.lane.b32.xlu0 %v1488_v23, %s8489_s28  ;;  %v1493_v37 = vrot.slane %v9079_v45, 1  ;;  %v1403_v12 = vrot.slane %v1401_v24, 1  ;;  %v1492_v23 = vsel %vm12943_vm6, %v1489_v32, %v1491_v46  ;;  %v1399_v36 = vor.u32 %v1397_v27, %v1395_v55 }
  0x6d   : > { %v1231_v11 = vrot.slane %v1229_v2, 3  ;;  %v1234_v60 = vrot.slane %v1232_v52, 4  ;;  %v1240_v57 = vrot.slane %v1238_v63, 3  ;;  %v1243_v22 = vrot.slane %v1241_v3, 4  ;;  %v2563_v3 = vld [vmem:[#allocation2 + $0x30] sm:$0xff] }
  0x6e   : > { %v9098_v33 = vsel %vm12894_vm7, %v1391_v17, %v1395_v55  ;;  %v1411_v62 = vrot.slane %v1409_v50, 1  ;;  %v1413_v2 = vshrl.u32 %v9068_v48, 16  ;;  %v1405_v63 = vshrl.u32 %v9049_v13, 16  ;;  %v925_v52 = vld [vmem:[#allocation2 + $0x80] sm:$0x1f] }
  0x6f   : > { %v1235_v9 = vor.u32 %v1234_v60, %v1231_v11  ;;  %v9102_v15 = vor.u32 %v1243_v22, %v1240_v57  ;;  %v1494_v34 = vsel %vm12943_vm6, %v1491_v46, %v1493_v37  ;;  %v2617_v32 = vrot.slane %v2615_v10, 1 }
  0x70   : > { %1521 = vrot.lane.b32.xlu1 %v1490_v38, %s8489_s28  ;;  %1438 = vrot.lane.b32.xlu0 %v9092_v20, %s8488_s27  ;;  %v2595_v17 = vsel %vm12891_vm10, %v9022_v7, 0  ;;  %v2596_v50 = vsel %vm12890_vm11, %v8617_v53, 0  ;;  %v2597_v10 = vsel %vm12889_vm13, %v8630_v58, 0  ;;  %v9131_v53 = vsel %vm12888_vm14, %v8648_v6, 0 }
  0x71   : > { %13055 = vst [vmem:[#allocation23_spill] sm:$0xff] %v9102_v15  ;;  %v9114_v22 = vsel %vm1102_vm1, %v1226_v35, %v1235_v9  ;;  %v9118_v27 = vsel %vm1102_vm1, %v1235_v9, %v9102_v15  ;;  %vm12893_vm0 = vcmp.ne.s16.totalorder %v9102_v15, 0  ;;  %v2644_v35 = vshll.u32 %v2563_v3, 16 }
  0x72   : > { %13056 = vst [vmem:[#allocation24_spill] sm:$0xff] %v9114_v22  ;;  %13057 = vst [vmem:[#allocation25_spill] sm:$0xff] %v9118_v27  ;;  %vm12921_vm4 = vcmp.ne.s16.totalorder %v9114_v22, 0  ;;  %vm12895_vm12 = vcmp.ne.s16.totalorder %v9118_v27, 0  ;;  %v9140_v24 = vor.u32 %v1405_v63, %v1403_v12  ;;  %v9144_v45 = vsel %vm12893_vm0, %v925_v52, 0 }
  0x73   : > { %v1277_v48 = vsel %vm12921_vm4, %v9031_v39, 0  ;;  %v1278_v58 = vsel %vm12895_vm12, %v9049_v13, 0  ;;  %v13058_v6 = vshrl.u32 %v9022_v7, 16  ;;  %v2798_v46 = vrot.slane %v2595_v17, 1 }
  0x74   : > { %1440 = vrot.lane.b32.xlu1 %v9089_v21, %s8488_s27  ;;  %1523 = vrot.lane.b32.xlu0 %v1492_v23, %s8489_s28  ;;  %v1495_v55 = vrot.slane %v1277_v48, 1  ;;  %v2799_v11 = vrot.slane %v2596_v50, 1  ;;  %v2801_v60 = vrot.slane %v2597_v10, 1  ;;  %v12892_v57 = vrot.slane %v9131_v53, 1 }
  0x75   : > { %v2618_v38 = vor.u32 %v2617_v32, %v13058_v6  ;;  %v1497_v23 = vrot.slane %v1278_v58, 1  ;;  %v1499_v9 = vrot.slane %v9144_v45, 1  ;;  %v9151_v63 = vrot.slane %v2644_v35, 1 }
  0x76   : > { %v2648_v40 = vshrl.u32 %v2563_v3, 16  ;;  %v9154_v52 = vsel %vm12894_vm7, %v1399_v36, %v1403_v12  ;;  %v1415_v7 = vor.u32 %v1413_v2, %v1411_v62  ;;  %v1412_v32 = vsel %vm12894_vm7, %v9140_v24, %v1411_v62 }
  0x77   : > { %v1496_v17 = vsel %vm12943_vm6, %v1493_v37, %v1495_v55  ;;  %v9166_v50 = vsel %vm12943_vm6, %v2798_v46, %v2799_v11  ;;  %v305_v10 = vadd.s32 16, %v8536_v1  ;;  %v9172_v12 = vsel %vm12943_vm6, %v2801_v60, %v12892_v57 }
  0x78   : > { %1525 = vrot.lane.b32.xlu1 %v1494_v34, %s8489_s28  ;;  %1442 = vrot.lane.b32.xlu0 %v9098_v33, %s8488_s27  ;;  %v9163_v34 = vsel %vm12894_vm7, %v2618_v38, %v8652_v8  ;;  %v9175_v36 = vsel %vm12943_vm6, %v2799_v11, %v2801_v60  ;;  %v9179_v37 = vsel %vm12887_vm15, %v2563_v3, 0  ;;  %v9184_v8 = vsel %vm12886_vm3, %v8665_v18, 0 }
  0x79   : > { %v1498_v62 = vsel %vm12943_vm6, %v1495_v55, %v1497_v23  ;;  %v1500_v2 = vsel %vm12943_vm6, %v1497_v23, %v1499_v9  ;;  %v2650_v35 = vor.u32 %v2648_v40, %v9151_v63  ;;  %v307_v48 = vadd.s32 32, %v8536_v1 }
  0x7a   : > { %v309_v3 = vadd.s32 48, %v8536_v1  ;;  %v337_v58 = vand.u32 15, %v305_v10  ;;  %v335_v18 = vand.u32 15, %v8536_v1  ;;  %v2807_v38 = vrot.slane %v9184_v8, 1  ;;  %v8405_v8 = vld [vmem:[#allocation2 + $0x18] sm:$0xff] }
  0x7b   : > { %v339_v55 = vand.u32 15, %v307_v48  ;;  %vm13059_vm2 = vcmp.ne.s16.totalorder %v8819_v30, 0  ;;  %v311_v11 = vadd.s32 64, %v8536_v1  ;;  %vm13060_vm15 = vcmp.ne.s16.totalorder %v8829_v42, 0  ;;  %v8410_v42 = vld [vmem:[#allocation2 + $0x38] sm:$0xff] }
  0x7c   : > { %1444 = vrot.lane.b32.xlu1 %v9154_v52, %s8488_s27  ;;  %1527 = vrot.lane.b32.xlu0 %v1496_v17, %s8489_s28  ;;  %v9202_v46 = vsel %vm13059_vm2, %v8667_v19, 0  ;;  %v341_v40 = vand.u32 15, %v309_v3  ;;  %vm369_vm3 = vcmp.ge.s32.totalorder %v337_v58, 1  ;;  %v9209_v60 = vsel %vm13060_vm15, %v8793_v54, 0 }
  0x7d   : > { %vm371_vm14 = vcmp.ge.s32.totalorder %v339_v55, 1  ;;  %vm636_vm13 = vmpackc.low %vm369_vm3, %vm369_vm3  ;;  %vm9211_vm11 = vcmp.ge.s32.totalorder %v335_v18, 1  ;;  %v313_v19 = vadd.s32 80, %v8536_v1  ;;  %v9219_v17 = vsel %vm12894_vm7, %v2650_v35, %v8680_v31 }
  0x7e   : > { %vm373_vm2 = vcmp.ge.s32.totalorder %v341_v40, 1  ;;  %vm638_vm10 = vmpackc.low %vm371_vm14, %vm371_vm14  ;;  %v13063_v10 = vmov 0   ;;  %v343_v54 = vand.u32 15, %v311_v11  ;;  %vm1586_vm0 = vcmask 64512  }
  0x7f   : > { %vm640_vm15 = vmpackc.low %vm373_vm2, %vm373_vm2  ;;  %v670_v48 = vsel %vm638_vm10, 65537, %v13063_v10  ;;  %v345_v58 = vand.u32 15, %v313_v19  ;;  %vm746_vm2 = vsmask.f32 3328  ;;  %3974 = vst.msk [vmem:[#allocation3] sm:$0xff] %vm1586_vm0, %v13063_v10 }
  0x80   : > { %1529 = vrot.lane.b32.xlu1 %v1498_v62, %s8489_s28  ;;  %1446 = vrot.lane.b32.xlu0 %v1412_v32, %s8488_s27  ;;  %v668_v62 = vsel %vm636_vm13, 65537, %v13063_v10  ;;  %v672_v55 = vsel %vm640_vm15, 65537, %v13063_v10  ;;  %v7284_v32 = vcombine.low %v670_v48, %v8599_v44  ;;  %vm634_vm3 = vmpackc.low %vm9211_vm11, %vm9211_vm11  ;;  %vm9230_vm14 = vcmp.ge.s32.totalorder %v343_v54, 1  ;;  %3979 = vst.msk [vmem:[#allocation3 + $0x90] sm:$0xff] %vm1586_vm0, %v13063_v10 }
  0x81   : > { %v7283_v3 = vcombine.low %v668_v62, %v8599_v44  ;;  %v7285_v35 = vcombine.low %v672_v55, %v8599_v44  ;;  %v666_v19 = vsel %vm634_vm3, 65537, %v13063_v10  ;;  %vm9239_vm10 = vcmp.ge.s32.totalorder %v345_v58, 1  ;;  %vm642_vm11 = vmpackc.low %vm9230_vm14, %vm9230_vm14 }
  0x82   : > { %v765_v62 = vshrl.u32 %v7284_v32, 16  ;;  %v768_v48 = vshll.u32 %v7284_v32, 16  ;;  %v7282_v23 = vcombine.low %v666_v19, %v8599_v44  ;;  %vm644_vm13 = vmpackc.low %vm9239_vm10, %vm9239_vm10  ;;  %v2811_v58 = vrot.slane %v9209_v60, 1 }
  0x83   : > { %v756_v40 = vshrl.u32 %v7283_v3, 16  ;;  %v759_v11 = vshll.u32 %v7283_v3, 16  ;;  %v774_v55 = vshrl.u32 %v7285_v35, 16  ;;  %v777_v3 = vshll.u32 %v7285_v35, 16 }
  0x84   : > { %1448 = vrot.lane.b32.xlu1 %v1415_v7, %s8488_s27  ;;  %1531 = vrot.lane.b32.xlu0 %v1500_v2, %s8489_s28  ;;  %v767_v2 = vrot.slane %v765_v62, 4  ;;  %v770_v32 = vrot.slane %v768_v48, 5  ;;  %v748_v57 = vshrl.u32 %v7282_v23, 16  ;;  %v751_v19 = vshll.u32 %v7282_v23, 16 }
  0x85   : > { %v758_v7 = vrot.slane %v756_v40, 4  ;;  %v761_v54 = vrot.slane %v759_v11, 5  ;;  %v776_v31 = vrot.slane %v774_v55, 4  ;;  %v779_v6 = vrot.slane %v777_v3, 5 }
  0x86   : > { %v674_v40 = vsel %vm642_vm11, 65537, %v13063_v10  ;;  %v750_v18 = vrot.slane %v748_v57, 4  ;;  %v753_v35 = vrot.slane %v751_v19, 5  ;;  %v676_v11 = vsel %vm644_vm13, 65537, %v13063_v10 }
  0x87   : > { %v762_v62 = vor.u32 %v761_v54, %v758_v7  ;;  %v7286_v48 = vcombine.low %v674_v40, %v8599_v44  ;;  %vm13068_vm15 = vcmp.ne.s16.totalorder %v8871_v61, 0  ;;  %vm13069_vm3 = vcmp.ne.s16.totalorder %v8886_v5, 0 }
  0x88   : > { %1533 = vrot.lane.b32.xlu1 %v1499_v9, %s8489_s28  ;;  %2747 = vrot.lane.b32.xlu0 %v9163_v34, %s8488_s27  ;;  %v2603_v45 = vsel %vm13068_vm15, %v8805_v14, 0  ;;  %v9264_v9 = vsel %vm13069_vm3, %v8979_v51, 0  ;;  %v771_v60 = vor.u32 %v770_v32, %v767_v2  ;;  %v780_v23 = vor.u32 %v779_v6, %v776_v31 }
  0x89   : > { %v9266_v34 = vor.u32 %v753_v35, %v750_v18  ;;  %v7287_v57 = vcombine.low %v676_v11, %v8599_v44  ;;  %v783_v7 = vshrl.u32 %v7286_v48, 16  ;;  %v786_v54 = vshll.u32 %v7286_v48, 16 }
  0x8a   : > { %v315_v55 = vadd.s32 96, %v8536_v1  ;;  %v317_v14 = vadd.s32 112, %v8536_v1  ;;  %v2647_v6 = vsel %vm12894_vm7, %v8678_v29, %v9151_v63  ;;  %v13071_v3 = vrot.slane %v9179_v37, 1 }
  0x8b   : > { %13070 = vst [vmem:[#allocation26_spill] sm:$0xff] %v9266_v34  ;;  %v13073_v32 = vrot.slane %v9131_v53, 1  ;;  %v13074_v31 = vrot.slane %v9202_v46, 1  ;;  %v785_v40 = vrot.slane %v783_v7, 4  ;;  %v788_v29 = vrot.slane %v786_v54, 5 }
  0x8c   : > { %2749 = vrot.lane.b32.xlu1 %v8676_v28, %s8488_s27  ;;  %2751 = vrot.lane.b32.xlu0 %v8702_v41, %s8488_s27  ;;  %v9283_v2 = vsel %vm12943_vm6, %v13071_v3, %v2807_v38  ;;  %v13072_v28 = vmov %v13071_v3  ;;  %v2813_v63 = vrot.slane %v2603_v45, 1  ;;  %v9296_v18 = vsel %vm746_vm2, %v762_v62, %v771_v60 }
  0x8d   : > { %v2806_v19 = vsel %vm12943_vm6, %v13073_v32, %v13072_v28  ;;  %v9293_v41 = vsel %vm12943_vm6, %v13074_v31, %v2811_v58  ;;  %13075 = vst [vmem:[#allocation27_spill] sm:$0xff] %v9296_v18  ;;  %v792_v35 = vshrl.u32 %v7287_v57, 16  ;;  %v795_v11 = vshll.u32 %v7287_v57, 16 }
  0x8e   : > { %v12896_v48 = vrot.slane %v9264_v9, 1  ;;  %v9302_v53 = vsel %vm746_vm2, %v771_v60, %v780_v23  ;;  %v9306_v37 = vsel %vm746_vm2, %v9266_v34, %v762_v62  ;;  %v347_v7 = vand.u32 15, %v315_v55  ;;  %v8135_v55 = vld [vmem:[%s12861_s2 + $0x8] sm:$0x3f]  }
  0x8f   : > { %13076 = vst [vmem:[#allocation28_spill] sm:$0xff] %v9302_v53  ;;  %13077 = vst [vmem:[#allocation29_spill] sm:$0xff] %v9306_v37  ;;  %v349_v54 = vand.u32 15, %v317_v14  ;;  %v13078_v45 = vmov %v13074_v31  ;;  %v794_v3 = vrot.slane %v792_v35, 4  ;;  %v797_v60 = vrot.slane %v795_v11, 5 }
  0x90   : > { %2831 = vrot.lane.b32.xlu1 %v9166_v50, %s8489_s28  ;;  %2833 = vrot.lane.b32.xlu0 %v9175_v36, %s8489_s28  ;;  %v9315_v57 = vsel %vm12943_vm6, %v2807_v38, %v13078_v45  ;;  %v789_v50 = vor.u32 %v788_v29, %v785_v40  ;;  %vm12920_vm14 = vcmp.ne.s16.totalorder %v9296_v18, 0  ;;  %v9319_v62 = vsel %vm12943_vm6, %v2811_v58, %v2813_v63  ;;  %v1623_v58 = vld [vmem:[#allocation2 + $0x8] sm:$0xf8]  ;;  %v553_v18 = vld [vmem:[#allocation2] sm:$0xf8] }
  0x91   : > { %vm379_vm10 = vcmp.ge.s32.totalorder %v347_v7, 1  ;;  %vm9321_vm11 = vcmp.ge.s32.totalorder %v349_v54, 1  ;;  %vm12918_vm13 = vcmp.ne.s16.totalorder %v9302_v53, 0  ;;  %vm891_vm15 = vcmp.ne.s16.totalorder %v9306_v37, 0 }
  0x92   : > { %v9330_v36 = vsel %vm12943_vm6, %v2813_v63, %v12896_v48  ;;  %vm646_vm3 = vmpackc.low %vm379_vm10, %vm379_vm10  ;;  %v9336_v38 = vsel %vm12920_vm14, %v8405_v8, 0  ;;  %v798_v46 = vor.u32 %v797_v60, %v794_v3  ;;  %vm12945_vm7 = vcmp.ne.s16.totalorder %v9266_v34, 0 }
  0x93   : > { %vm648_vm12 = vmpackc.low %vm9321_vm11, %vm9321_vm11  ;;  %v678_v14 = vsel %vm646_vm3, 65537, %v13063_v10  ;;  %v9353_v32 = vsel %vm746_vm2, %v780_v23, %v789_v50  ;;  %v910_v29 = vsel %vm12918_vm13, %v8405_v8, 0  ;;  %v9367_v35 = vsel %vm12905_vm8, %v8979_v51, 0 }
  0x94   : > { %2835 = vrot.lane.b32.xlu1 %v9172_v12, %s8489_s28  ;;  %2753 = vrot.lane.b32.xlu0 %v2647_v6, %s8488_s27  ;;  %v8406_v12 = vld [vmem:[#allocation2 + $0x10] sm:$0xff]  ;;  %13081 = vst [vmem:[#allocation30_spill] sm:$0xff] %v9353_v32  ;;  %v680_v31 = vsel %vm648_vm12, 65537, %v13063_v10  ;;  %v7288_v40 = vcombine.low %v678_v14, %v8599_v44  ;;  %v9371_v23 = vsel %vm12945_vm7, %v1623_v58, 0  ;;  %v9376_v54 = vsel %vm12905_vm8, %v8994_v26, 0 }
  0x95   : > { %v9350_v28 = vsel %vm12920_vm14, %v8406_v12, 0  ;;  %v9361_v63 = vsel %vm891_vm15, %v8406_v12, 0  ;;  %v7289_v6 = vcombine.low %v680_v31, %v8599_v44  ;;  %v9381_v3 = vsel %vm746_vm2, %v789_v50, %v798_v46  ;;  %v8407_v12 = vld [vmem:[#allocation2 + $0x20] sm:$0xff] }
  0x96   : > { %v801_v11 = vshrl.u32 %v7288_v40, 16  ;;  %v804_v7 = vshll.u32 %v7288_v40, 16  ;;  %13082 = vst [vmem:[#allocation31_spill] sm:$0xff] %v9381_v3  ;;  %vm12906_vm12 = vcmp.ne.s16.totalorder %v9353_v32, 0  ;;  %v1730_v50 = vrot.slane %v9367_v35, 1 }
  0x97   : > { %v1423_v45 = vpop.permute.xlu1 %1422  ;;  %v810_v51 = vshrl.u32 %v7289_v6, 16  ;;  %v813_v60 = vshll.u32 %v7289_v6, 16  ;;  %v2817_v6 = vrot.slane %v9376_v54, 1  ;;  %vm13083_vm10 = vcmp.ne.s16.totalorder %v9018_v4, 0  ;;  %v9405_v35 = vld [vmem:[%s12861_s2] sm:$0x3f]  }
  0x98   : > { %2755 = vrot.lane.b32.xlu1 %v9219_v17, %s8488_s27  ;;  %2837 = vrot.lane.b32.xlu0 %v2806_v19, %s8489_s28  ;;  %v803_v58 = vrot.slane %v801_v11, 4  ;;  %v806_v14 = vrot.slane %v804_v7, 5  ;;  %v9390_v17 = vsel %vm12918_vm13, %v8407_v12, 0  ;;  %v9397_v48 = vsel %vm13083_vm10, %v9000_v49, 0  ;;  %v8408_v19 = vld [vmem:[#allocation2 + $0x28] sm:$0xff] }
  0x99   : > { %v1421_v8 = vpop.permute.xlu0 %1420  ;;  %v812_v31 = vrot.slane %v810_v51, 4  ;;  %v815_v40 = vrot.slane %v813_v60, 5  ;;  %vm12907_vm11 = vcmp.ne.s16.totalorder %v9381_v3, 0  ;;  %v1630_v11 = vsel %vm12906_vm12, %v8408_v19, 0 }
  0x9a   : > { %v807_v7 = vor.u32 %v806_v14, %v803_v58  ;;  %vm2042_vm3 = vcmask 1045504   ;;  %v911_v60 = vsel %vm12906_vm12, %v8407_v12, 0  ;;  %v1656_v59 = vsel %vm13083_vm10, %v8994_v26, 0 }
  0x9b   : > { %v1427_v54 = vpop.permute.xlu1 %1426  ;;  %v9409_v51 = vor.u32 %v815_v40, %v812_v31  ;;  %8090 = vmatprep.subr.msk.bf16.mxu0 %vm2042_vm3, %v8135_v55  ;;  %v2044_v58 = vsel %vm2042_vm3, %v8135_v55, 0  ;;  %v13085_v31 = vld [vmem:[#allocation17_spill] sm:$0xff]  ;;  %v2819_v12 = vrot.slane %v9397_v48, 1  ;;  %v9432_v4 = vsel %vm12908_vm5, %v9000_v49, 0  ;;  %8091 = vmatprep.subr.msk.bf16.mxu1 %vm2042_vm3, %v8135_v55 }
  0x9c   : > { %2839 = vrot.lane.b32.xlu1 %v9283_v2, %s8489_s28  ;;  %2757 = vrot.lane.b32.xlu0 %v8713_v47, %s8488_s27  ;;  %v9421_v2 = vsel %vm746_vm2, %v798_v46, %v807_v7  ;;  %v13086_v40 = vrot.slane %v13085_v31, 1  ;;  %v912_v61 = vsel %vm12907_vm11, %v8408_v19, 0  ;;  %v8409_v46 = vld [vmem:[#allocation2 + $0x30] sm:$0xff]  ;;  %vm13090_vm10 = vcmask 31744  }
  0x9d   : > { %v1687_v14 = vpop.permute.xlu0 %1686  ;;  %13084 = vst [vmem:[#allocation32_spill] sm:$0xff] %v9421_v2  ;;  %v9438_v47 = vsel %vm746_vm2, %v807_v7, %v9409_v51  ;;  %v9442_v31 = vsel %vm12907_vm11, %v8409_v46, 0  ;;  %7717 = vmatpush3.bf16.msra.mxu0 %v2044_v58  ;;  %v9451_v49 = vsel %vm13090_vm10, %v910_v29, %v1423_v45  ;;  %vm12919_vm8 = vcmp.ne.s16.totalorder %v9421_v2, 0  ;;  %7961 = vmatpush3.bf16.msra.mxu1 %v2044_v58  ;;  %vm13092_vm11 = vmmov %vm13090_vm10 }
  0x9e   : > { %v9426_v5 = vsel %vm12943_vm6, %v13086_v40, %v1730_v50  ;;  %13088 = vst [vmem:[#allocation17_spill] sm:$0xff] %v9438_v47  ;;  %v13089_v40 = vrot.slane %v9264_v9, 1  ;;  %vm897_vm12 = vcmp.ne.s16.totalorder %v9438_v47, 0  ;;  %v1732_v19 = vrot.slane %v1656_v59, 1  ;;  %8092 = vmatprep.subr.msk.bf16.mxu0 %vm2042_vm3, %v9405_v35  ;;  %v13091_v9 = vld [vmem:[#allocation13_spill] sm:$0xff] }
  0x9f   : > { %v9461_v7 = vsel %vm13092_vm11, %v9336_v38, %v1423_v45  ;;  %v9467_v55 = vsel %vm12908_vm5, %v9031_v39, 0  ;;  %v319_v59 = vadd.s32 128, %v8536_v1  ;;  %v9474_v58 = vsel %vm13090_vm10, %v9350_v28, %v1421_v8  ;;  %vm13093_vm11 = vmmov %vm13090_vm10  ;;  %v1431_v45 = vpop.permute.xlu1 %1430 }
  0xa0   : > { %v9447_v48 = vsel %vm12943_vm6, %v13089_v40, %v2817_v6  ;;  %2759 = vrot.lane.b32.xlu1 %v13091_v9, %s8488_s27  ;;  %2841 = vrot.lane.b32.xlu0 %v9315_v57, %s8489_s28  ;;  %v1782_v38 = vsel %vm13093_vm11, %v9361_v63, %v1421_v8  ;;  %v9479_v9 = vsel %vm12943_vm6, %v2817_v6, %v2819_v12  ;;  %v321_v29 = vadd.s32 144, %v8536_v1  ;;  %vm13094_vm5 = vmmov %vm13090_vm10 }
  0xa1   : > { %v1425_v40 = vpop.permute.xlu0 %1424  ;;  %v9483_v26 = vsel %vm13094_vm5, %v912_v61, %v1427_v54  ;;  %v914_v57 = vsel %vm897_vm12, %v8410_v42, 0  ;;  %v1632_v28 = vsel %vm12919_vm8, %v8410_v42, 0  ;;  %v351_v30 = vand.u32 15, %v319_v59  ;;  %vm13095_vm10 = vmmov %vm13094_vm5 }
  0xa2   : > { %v9491_v63 = vsel %vm13095_vm10, %v1630_v11, %v1427_v54  ;;  %v9494_v8 = vsel %vm12943_vm6, %v1730_v50, %v1732_v19  ;;  %v12922_v6 = vrot.slane %v9467_v55, 1  ;;  %v353_v43 = vand.u32 15, %v321_v29  ;;  %v13097_v50 = vld [vmem:[#allocation14_spill] sm:$0xff]  ;;  %vm13098_vm10 = vmmov %vm13094_vm5 }
  0xa3   : > { %v1780_v61 = vsel %vm13094_vm5, %v9371_v23, %v1687_v14  ;;  %v9503_v42 = vsel %vm12919_vm8, %v8409_v46, 0  ;;  %v13096_v59 = vrot.slane %v9432_v4, 1  ;;  %vm383_vm11 = vcmp.ge.s32.totalorder %v351_v30, 1  ;;  %vm13099_vm13 = vmmov %vm13094_vm5  ;;  %v9526_v29 = vld [vmem:[#allocation2 + $0x40] sm:$0xff] }
  0xa4   : > { %2843 = vrot.lane.b32.xlu1 %v9293_v41, %s8489_s28  ;;  %2761 = vrot.lane.b32.xlu0 %v13097_v50, %s8488_s27  ;;  %v9513_v54 = vsel %vm13098_vm10, %v914_v57, %v1431_v45  ;;  %v9516_v41 = vsel %vm13099_vm13, %v1632_v28, %v1431_v45  ;;  %vm650_vm5 = vmpackc.low %vm383_vm11, %vm383_vm11  ;;  %vm385_vm8 = vcmp.ge.s32.totalorder %v353_v43, 1  ;;  %v7281_v14 = vcombine.low %v300_v56, %v300_v56  ;;  %v13104_v28 = vld [vmem:[#allocation20_spill] sm:$0xff] }
  0xa5   : > { %v9508_v11 = vsel %vm12943_vm6, %v1732_v19, %v13096_v59  ;;  %v9518_v23 = vpop.permute.xlu0 %1428  ;;  %vm13100_vm14 = vmmov %vm13098_vm10  ;;  %v682_v19 = vsel %vm650_vm5, 65537, %v13063_v10  ;;  %v9531_v45 = vsel %vm897_vm12, %v9526_v29, 0  ;;  %vm1993_vm11 = vcmask 97280  }
  0xa6   : > { %v9521_v46 = vsel %vm13100_vm14, %v911_v60, %v1425_v40  ;;  %vm13101_vm4 = vmmov %vm13098_vm10  ;;  %v9536_v43 = vsel %vm12943_vm6, %v2819_v12, %v12922_v6  ;;  %v7290_v56 = vcombine.low %v682_v19, %v8599_v44  ;;  %v9553_v12 = vsel %vm12942_vm9, %v9031_v39, 0 }
  0xa7   : > { %v1786_v30 = vsel %vm13101_vm4, %v9390_v17, %v1425_v40  ;;  %vm652_vm13 = vmpackc.low %vm385_vm8, %vm385_vm8  ;;  %v1745_v57 = vpop.permute.xlu1 %1744  ;;  %v9543_v40 = vsel %vm12942_vm9, %v9049_v13, 0  ;;  %vm13103_vm4 = vcmask 27648   ;;  %v9557_v19 = vsel %vm2042_vm3, %v9405_v35, 0 }
  0xa8   : > { %v684_v17 = vsel %vm652_vm13, 65537, %v13063_v10  ;;  %552 = vst.msk [vmem:[#allocation2 + $0x88] sm:$0xf] %vm13103_vm4, %v7281_v14  ;;  %2763 = vrot.lane.b32.xlu1 %v13104_v28, %s8488_s27  ;;  %v1817_v59 = vsel %vm1586_vm0, %v1780_v61, %v1745_v57  ;;  %2845 = vrot.lane.b32.xlu0 %v9319_v62, %s8489_s28  ;;  %v819_v28 = vshrl.u32 %v7290_v56, 16  ;;  %v822_v16 = vshll.u32 %v7290_v56, 16  ;;  %vm13105_vm8 = vmmov %vm13098_vm10 }
  0xa9   : > { %v7291_v50 = vcombine.low %v684_v17, %v8599_v44  ;;  %v1853_v14 = vshrl.u32 %v1817_v59, 16  ;;  %v1856_v6 = vshll.u32 %v1817_v59, 16  ;;  %v1747_v25 = vpop.permute.xlu0 %1746  ;;  %vm13106_vm14 = vmmov %vm13105_vm8  ;;  %vm13112_vm13 = vcmp.ne.s16.totalorder %v9114_v22, 0 }
  0xaa   : > { %v1819_v61 = vsel %vm1586_vm0, %v1782_v38, %v1747_v25  ;;  %v821_v62 = vrot.slane %v819_v28, 4  ;;  %v824_v3 = vrot.slane %v822_v16, 5  ;;  %vm13113_vm4 = vcmp.ne.s16.totalorder %v9118_v27, 0 }
  0xab   : > { %v828_v57 = vshrl.u32 %v7291_v50, 16  ;;  %v831_v17 = vshll.u32 %v7291_v50, 16  ;;  %v1855_v39 = vrot.slane %v1853_v14, 3  ;;  %v1858_v0 = vrot.slane %v1856_v6, 4  ;;  %v1624_v14 = vld [vmem:[#allocation2 + $0x80] sm:$0xff] }
  0xac   : > { %v1860_v47 = vshrl.u32 %v1819_v61, 16  ;;  %v1863_v2 = vshll.u32 %v1819_v61, 16  ;;  %2847 = vrot.lane.b32.xlu1 %v9330_v36, %s8489_s28  ;;  %2765 = vrot.lane.b32.xlu0 %v9092_v20, %s8488_s27  ;;  %v825_v53 = vor.u32 %v824_v3, %v821_v62  ;;  %v1790_v62 = vsel %vm13106_vm14, %v9442_v31, %v9518_v23  ;;  %vm13115_vm14 = vmmov %vm13113_vm4 }
  0xad   : > { %v1749_v35 = vpop.permute.xlu1 %1748  ;;  %v830_v59 = vrot.slane %v828_v57, 4  ;;  %v833_v32 = vrot.slane %v831_v17, 5  ;;  %v1859_v6 = vor.u32 %v1858_v0, %v1855_v39  ;;  %v1671_v0 = vshll.u32 %v1624_v14, 16  ;;  %v8412_v39 = vld [vmem:[#allocation2 + $0x8] sm:$0xff] }
  0xae   : > { %v1862_v25 = vrot.slane %v1860_v47, 3  ;;  %v1865_v38 = vrot.slane %v1863_v2, 4  ;;  %v1821_v56 = vsel %vm1586_vm0, %v9461_v7, %v1749_v35  ;;  %v1751_v50 = vpop.permute.xlu0 %1750  ;;  %v1736_v47 = vrot.slane %v9553_v12, 1 }
  0xaf   : > { %v1868_v61 = vshrl.u32 %v1821_v56, 16  ;;  %v1871_v60 = vshll.u32 %v1821_v56, 16  ;;  %v1823_v36 = vsel %vm1586_vm0, %v1786_v30, %v1751_v50  ;;  %v9570_v17 = vor.u32 %v833_v32, %v830_v59 }
  0xb0   : > { %v1876_v28 = vshrl.u32 %v1823_v36, 16  ;;  %v1879_v16 = vshll.u32 %v1823_v36, 16  ;;  %v1866_v57 = vor.u32 %v1865_v38, %v1862_v25  ;;  %1762 = vrot.lane.b32.xlu1 %v9426_v5, %s8489_s28  ;;  %2767 = vrot.lane.b32.xlu0 %v9089_v21, %s8488_s27  ;;  %v9580_v32 = vsel %vm891_vm15, %v8412_v39, 0 }
  0xb1   : > { %v1870_v20 = vrot.slane %v1868_v61, 3  ;;  %v1873_v2 = vrot.slane %v1871_v60, 4  ;;  %v9585_v5 = vsel %vm13105_vm8, %v9503_v42, %v9518_v23  ;;  %v9590_v21 = vsel %vm12945_vm7, %v553_v18, 0  ;;  %v9606_v18 = vld [vmem:[%s12861_s2 + $0x10] sm:$0x3f]   ;;  %vm13114_vm8 = vmmov %vm13112_vm13 }
  0xb2   : > { %v1878_v7 = vrot.slane %v1876_v28, 3  ;;  %v1881_v30 = vrot.slane %v1879_v16, 4  ;;  %v1867_v3 = vsel %vm1102_vm1, %v1859_v6, %v1866_v57  ;;  %v2728_v35 = vshrl.u32 %v1624_v14, 16  ;;  %v9620_v6 = vld [vmem:[#allocation2 + $0x88] sm:$0xff] }
  0xb3   : > { %v1874_v60 = vor.u32 %v1873_v2, %v1870_v20  ;;  %7718 = vmatprep.mubr.msk.bf16.mxu0 %vm1993_vm11, %v1867_v3  ;;  %v1753_v25 = vpop.permute.xlu1 %1752  ;;  %v9597_v38 = vsel %vm746_vm2, %v9409_v51, %v825_v53  ;;  %v9601_v42 = vsel %vm746_vm2, %v825_v53, %v9570_v17  ;;  %v13109_v51 = vrot.slane %v9543_v40, 1 }
  0xb4   : > { %v1882_v59 = vor.u32 %v1881_v30, %v1878_v7  ;;  %13107 = vst [vmem:[#allocation13_spill] sm:$0xff] %v9597_v38  ;;  %13108 = vst [vmem:[#allocation14_spill] sm:$0xff] %v9601_v42  ;;  %2849 = vrot.lane.b32.xlu1 %v9447_v48, %s8489_s28  ;;  %v1825_v31 = vsel %vm1586_vm0, %v9491_v63, %v1753_v25  ;;  %v13110_v56 = vrot.slane %v9467_v55, 1  ;;  %v1673_v50 = vrot.slane %v1671_v0, 1 }
  0xb5   : > { %v1875_v23 = vsel %vm1102_vm1, %v1866_v57, %v1874_v60  ;;  %1764 = vrot.lane.b32.xlu0 %v9494_v8, %s8489_s28  ;;  %v1884_v61 = vshrl.u32 %v1825_v31, 16  ;;  %v1887_v48 = vshll.u32 %v1825_v31, 16  ;;  %v13111_v36 = vrot.slane %v9432_v4, 1  ;;  %v1755_v28 = vpop.permute.xlu0 %1754  ;;  %v9640_v57 = vld [vmem:[#allocation2 + $0x88] sm:$0xf] }
  0xb6   : > { %v9618_v53 = vsel %vm12943_vm6, %v13110_v56, %v13109_v51  ;;  %7719 = vmatmul.mubr.msk.bf16.vlgmr.msra.gmra.mrb[0].mxu0 %vm1993_vm11, %v1875_v23  ;;  %v1883_v63 = vsel %vm1102_vm1, %v1874_v60, %v1882_v59  ;;  %vm898_vm10 = vcmp.ne.s16.totalorder %v9597_v38, 0  ;;  %vm899_vm5 = vcmp.ne.s16.totalorder %v9601_v42, 0 }
  0xb7   : > { %v9631_v55 = vsel %vm12943_vm6, %v13111_v36, %v1736_v47  ;;  %7722 = vmatprep.mubr.msk.bf16.mxu0 %vm1993_vm11, %v1883_v63  ;;  %7751 = vmatpush3.bf16.msra.mxu0 %v9557_v19  ;;  %v2730_v8 = vor.u32 %v2728_v35, %v1673_v50  ;;  %v1659_v16 = vsel %vm13112_vm13, %v9049_v13, 0  ;;  %v1886_v4 = vrot.slane %v1884_v61, 3 }
  0xb8   : > { %v1889_v20 = vrot.slane %v1887_v48, 4  ;;  %v1827_v2 = vsel %vm1586_vm0, %v1790_v62, %v1755_v28  ;;  %v2732_v0 = vshll.u32 %v9620_v6, 16  ;;  %8093 = vmatprep.subr.msk.bf16.mxu0 %vm2042_vm3, %v9606_v18  ;;  %2851 = vrot.lane.b32.xlu1 %v9479_v9, %s8489_s28  ;;  %v1757_v30 = vpop.permute.xlu1 %1756  ;;  %v9650_v13 = vsel %vm13113_vm4, %v1624_v14, 0 }
  0xb9   : > { %v1892_v19 = vshrl.u32 %v1827_v2, 16  ;;  %v1895_v7 = vshll.u32 %v1827_v2, 16  ;;  %v2609_v3 = vsel %vm13114_vm8, %v1624_v14, 0  ;;  %2769 = vrot.lane.b32.xlu0 %v9098_v33, %s8488_s27  ;;  %v1829_v60 = vsel %vm1586_vm0, %v9516_v41, %v1757_v30  ;;  %v2575_v33 = vld [vmem:[#allocation2 + $0x90] sm:$0xf] }
  0xba   : > { %v1890_v39 = vor.u32 %v1889_v20, %v1886_v4  ;;  %v1738_v35 = vrot.slane %v1659_v16, 1  ;;  %v1679_v9 = vshll.u32 %v9640_v57, 16  ;;  %v1900_v31 = vshrl.u32 %v1829_v60, 16  ;;  %v9675_v16 = vpop.permute.xlu0 %1432  ;;  %v9677_v4 = vld [vmem:[#allocation2 + $0x48] sm:$0xff] }
  0xbb   : > { %v1894_v62 = vrot.slane %v1892_v19, 3  ;;  %v1897_v25 = vrot.slane %v1895_v7, 4  ;;  %v1903_v23 = vshll.u32 %v1829_v60, 16  ;;  %v2734_v51 = vrot.slane %v2732_v0, 1  ;;  %v1644_v7 = vld [vmem:[#allocation2 + $0x88] sm:$0x1f] }
  0xbc   : > { %v1740_v56 = vrot.slane %v9650_v13, 1  ;;  %v2825_v61 = vrot.slane %v2609_v3, 1  ;;  %v9663_v14 = vsel %vm13115_vm14, %v9620_v6, 0  ;;  %1766 = vrot.lane.b32.xlu1 %v9508_v11, %s8489_s28  ;;  %v1902_v48 = vrot.slane %v1900_v31, 3  ;;  %v9710_v60 = vpop.permute.xlu1 %1434 }
  0xbd   : > { %v1898_v41 = vor.u32 %v1897_v25, %v1894_v62  ;;  %v1905_v63 = vrot.slane %v1903_v23, 4  ;;  %v1891_v36 = vsel %vm1102_vm1, %v1882_v59, %v1890_v39  ;;  %2771 = vrot.lane.b32.xlu0 %v9154_v52, %s8488_s27  ;;  %v9673_v28 = vsel %vm898_vm10, %v9526_v29, 0 }
  0xbe   : > { %v1634_v11 = vsel %vm898_vm10, %v9677_v4, 0  ;;  %7723 = vmatmul.mubr.msk.bf16.gmra.mrb[4].mxu0 %vm1993_vm11, %v1891_v36  ;;  %vm13116_vm13 = vsmask.f32 7424  ;;  %v1681_v20 = vrot.slane %v1679_v9, 1  ;;  %v9688_v52 = vsel %vm899_vm5, %v9677_v4, 0 }
  0xbf   : > { %v1674_v59 = vsel %vm13116_vm13, %v9140_v24, %v1673_v50  ;;  %v1899_v2 = vsel %vm1102_vm1, %v1890_v39, %v1898_v41  ;;  %v2736_v0 = vshrl.u32 %v9620_v6, 16  ;;  %v2740_v19 = vshll.u32 %v2575_v33, 16  ;;  %vm13117_vm4 = vmmov %vm13116_vm13 }
  0xc0   : > { %7726 = vmatprep.mubr.msk.bf16.mxu0 %vm1993_vm11, %v1899_v2  ;;  %v9694_v30 = vsel %vm13117_vm4, %v2730_v8, %v2734_v51  ;;  %v1739_v24 = vsel %vm12943_vm6, %v1736_v47, %v1738_v35  ;;  %v9702_v50 = vsel %vm12943_vm6, %v1738_v35, %v1740_v56  ;;  %v2827_v3 = vrot.slane %v9663_v14, 1  ;;  %2853 = vrot.lane.b32.xlu1 %v9536_v43, %s8489_s28  ;;  %vm13120_vm14 = vmmov %vm13117_vm4 }
  0xc1   : > { %v1906_v39 = vor.u32 %v1905_v63, %v1902_v48  ;;  %vm13118_vm8 = vcmask 31744   ;;  %v13119_v12 = vrot.slane %v9543_v40, 1  ;;  %v1683_v35 = vshrl.u32 %v9640_v57, 16  ;;  %1768 = vrot.lane.b32.xlu0 %v9631_v55, %s8489_s28  ;;  %v2594_v48 = vld [vmem:[#allocation2 + $0x90] sm:$0x1f] }
  0xc2   : > { %v1794_v6 = vsel %vm13118_vm8, %v9531_v45, %v9675_v16  ;;  %v9721_v9 = vsel %vm13120_vm14, %v2730_v8, %v1681_v20  ;;  %vm13121_vm13 = vcmp.ne.s16.totalorder %v9102_v15, 0  ;;  %v323_v45 = vadd.s32 160, %v8536_v1  ;;  %vm13122_vm4 = vmmov %vm13118_vm8  ;;  %v1759_v23 = vpop.permute.xlu0 %1758 }
  0xc3   : > { %v9715_v47 = vsel %vm12943_vm6, %v13119_v12, %v2825_v61  ;;  %v9725_v43 = vsel %vm13121_vm13, %v1644_v7, 0  ;;  %v325_v62 = vadd.s32 176, %v8536_v1  ;;  %v1796_v40 = vsel %vm13122_vm4, %v1634_v11, %v9710_v60 }
  0xc4   : > { %v2738_v25 = vor.u32 %v2736_v0, %v2734_v51  ;;  %v2742_v31 = vrot.slane %v2740_v19, 1  ;;  %v2744_v57 = vshrl.u32 %v2575_v33, 16  ;;  %v9734_v55 = vsel %vm12943_vm6, %v2825_v61, %v2827_v3  ;;  %2855 = vrot.lane.b32.xlu1 %v9618_v53, %s8489_s28 }
  0xc5   : > { %v355_v8 = vand.u32 15, %v323_v45  ;;  %v327_v63 = vadd.s32 192, %v8536_v1  ;;  %v357_v36 = vand.u32 15, %v325_v62  ;;  %v1831_v2 = vsel %vm1586_vm0, %v1794_v6, %v1759_v23  ;;  %2773 = vrot.lane.b32.xlu0 %v1674_v59, %s8488_s27 }
  0xc6   : > { %v1907_v51 = vsel %vm1102_vm1, %v1898_v41, %v1906_v39  ;;  %v9741_v11 = vor.u32 %v1683_v35, %v1681_v20  ;;  %v1742_v33 = vrot.slane %v9725_v43, 1  ;;  %v1908_v0 = vshrl.u32 %v1831_v2, 16  ;;  %v1761_v7 = vpop.permute.xlu1 %1760  ;;  %v1417_v62 = vpop.permute.xlu0 %1416 }
  0xc7   : > { %v1911_v19 = vshll.u32 %v1831_v2, 16  ;;  %7727 = vmatmul.mubr.msk.bf16.gmra.mrb[8].mxu0 %vm1993_vm11, %v1907_v51  ;;  %vm387_vm8 = vcmp.ge.s32.totalorder %v355_v8, 1  ;;  %v359_v61 = vand.u32 15, %v327_v63  ;;  %v9747_v12 = vsel %vm13120_vm14, %v2738_v25, %v2742_v31 }
  0xc8   : > { %v9749_v53 = vor.u32 %v2744_v57, %v2742_v31  ;;  %vm654_vm13 = vmpackc.low %vm387_vm8, %vm387_vm8  ;;  %vm13123_vm4 = vcmp.ne.s16.totalorder %v9102_v15, 0  ;;  %vm9755_vm9 = vcmp.ge.s32.totalorder %v357_v36, 1  ;;  %v1910_v6 = vrot.slane %v1908_v0, 3  ;;  %1688 = vrot.lane.b32.xlu1 %v1674_v59, %s8488_s27 }
  0xc9   : > { %v9753_v41 = vsel %vm13123_vm4, %v2594_v48, 0  ;;  %v1913_v35 = vrot.slane %v1911_v19, 4  ;;  %v1833_v45 = vsel %vm1586_vm0, %v1796_v40, %v1761_v7  ;;  %v686_v23 = vsel %vm654_vm13, 65537, %v13063_v10  ;;  %vm656_vm14 = vmpackc.low %vm9755_vm9, %vm9755_vm9  ;;  %1770 = vrot.lane.b32.xlu0 %v1739_v24, %s8489_s28 }
  0xca   : > { %v1916_v25 = vshrl.u32 %v1833_v45, 16  ;;  %v1919_v31 = vshll.u32 %v1833_v45, 16  ;;  %v9770_v57 = vsel %vm12943_vm6, %v1740_v56, %v1742_v33  ;;  %v7292_v40 = vcombine.low %v686_v23, %v8599_v44  ;;  %v1419_v13 = vpop.permute.xlu1 %1418  ;;  %v1502_v19 = vpop.permute.xlu0 %1501 }
  0xcb   : > { %v1914_v8 = vor.u32 %v1913_v35, %v1910_v6  ;;  %vm9774_vm8 = vcmp.ge.s32.totalorder %v359_v61, 1  ;;  %v688_v63 = vsel %vm656_vm14, 65537, %v13063_v10  ;;  %v9780_v59 = vadd.s32 208, %v8536_v1 }
  0xcc   : > { %v1918_v36 = vrot.slane %v1916_v25, 3  ;;  %v1921_v2 = vrot.slane %v1919_v31, 4  ;;  %v837_v51 = vshrl.u32 %v7292_v40, 16  ;;  %v840_v56 = vshll.u32 %v7292_v40, 16  ;;  %vm658_vm13 = vmpackc.low %vm9774_vm8, %vm9774_vm8  ;;  %2775 = vrot.lane.b32.xlu1 %v9694_v30, %s8488_s27 }
  0xcd   : > { %vm13128_vm9 = vcmask 31744   ;;  %v1915_v24 = vsel %vm1102_vm1, %v1906_v39, %v1914_v8  ;;  %v2829_v61 = vrot.slane %v9753_v41, 1  ;;  %v7293_v7 = vcombine.low %v688_v63, %v8599_v44  ;;  %2857 = vrot.lane.b32.xlu0 %v9715_v47, %s8489_s28 }
  0xce   : > { %v1537_v0 = vsel %vm13128_vm9, %v9590_v21, %v1417_v62  ;;  %v9790_v20 = vor.u32 %v1921_v2, %v1918_v36  ;;  %vm13129_vm4 = vmmov %vm13128_vm9  ;;  %7730 = vmatprep.mubr.msk.bf16.mxu0 %vm1993_vm11, %v1915_v24  ;;  %v9799_v39 = vadd.s32 224, %v8536_v1  ;;  %v9805_v62 = vsel %vm2042_vm3, %v9606_v18, 0  ;;  %v1504_v23 = vpop.permute.xlu1 %1503  ;;  %v1506_v36 = vpop.permute.xlu0 %1505 }
  0xcf   : > { %v1540_v6 = vsel %vm13129_vm4, %v9580_v32, %v1419_v13  ;;  %v1588_v21 = vsel %vm1586_vm0, %v1537_v0, %v1502_v19  ;;  %v361_v32 = vand.u32 15, %v9780_v59  ;;  %v839_v25 = vrot.slane %v837_v51, 4  ;;  %vm13130_vm3 = vmmov %vm13129_vm4 }
  0xd0   : > { %v2207_v35 = vshrl.u32 %v1588_v21, 16  ;;  %v2210_v45 = vshll.u32 %v1588_v21, 16  ;;  %v1923_v30 = vsel %vm1102_vm1, %v1914_v8, %v9790_v20  ;;  %v842_v31 = vrot.slane %v840_v56, 5  ;;  %1772 = vrot.lane.b32.xlu1 %v9702_v50, %s8489_s28  ;;  %vm13136_vm4 = vmmov %vm13130_vm3 }
  0xd1   : > { %v690_v40 = vsel %vm658_vm13, 65537, %v13063_v10  ;;  %v1590_v47 = vsel %vm1586_vm0, %v1540_v6, %v1504_v23  ;;  %7731 = vmatmul.mubr.msk.bf16.gmra.mrb[12].mxu0 %vm1993_vm11, %v1923_v30  ;;  %v846_v2 = vshrl.u32 %v7293_v7, 16  ;;  %v1592_v8 = vsel %vm1586_vm0, %v9474_v58, %v1506_v36  ;;  %2859 = vrot.lane.b32.xlu0 %v9734_v55, %s8489_s28 }
  0xd2   : > { %v2209_v63 = vrot.slane %v2207_v35, 3  ;;  %v2212_v18 = vrot.slane %v2210_v45, 4  ;;  %v2214_v13 = vshrl.u32 %v1590_v47, 16  ;;  %v2217_v0 = vshll.u32 %v1590_v47, 16  ;;  %v1508_v45 = vpop.permute.xlu1 %1507  ;;  %v1510_v30 = vpop.permute.xlu0 %1509 }
  0xd3   : > { %v363_v48 = vand.u32 15, %v9799_v39  ;;  %v2222_v51 = vshrl.u32 %v1592_v8, 16  ;;  %v2225_v56 = vshll.u32 %v1592_v8, 16  ;;  %v9826_v19 = vcombine.low %v690_v40, %v8599_v44 }
  0xd4   : > { %v849_v24 = vshll.u32 %v7293_v7, 16  ;;  %v2216_v6 = vrot.slane %v2214_v13, 3  ;;  %v2219_v21 = vrot.slane %v2217_v0, 4  ;;  %v2213_v35 = vor.u32 %v2212_v18, %v2209_v63  ;;  %1690 = vrot.lane.b32.xlu1 %v9721_v9, %s8488_s27 }
  0xd5   : > { %v9828_v23 = vor.u32 %v842_v31, %v839_v25  ;;  %v1594_v58 = vsel %vm1586_vm0, %v9451_v49, %v1508_v45  ;;  %v2224_v50 = vrot.slane %v2222_v51, 3  ;;  %v2227_v39 = vrot.slane %v2225_v56, 4  ;;  %2777 = vrot.lane.b32.xlu0 %v9747_v12, %s8488_s27 }
  0xd6   : > { %v848_v47 = vrot.slane %v846_v2, 4  ;;  %v2220_v36 = vor.u32 %v2219_v21, %v2216_v6  ;;  %v2230_v8 = vshrl.u32 %v1594_v58, 16  ;;  %v2233_v55 = vshll.u32 %v1594_v58, 16  ;;  %v1512_v13 = vpop.permute.xlu1 %1511 }
  0xd7   : > { %v1596_v7 = vsel %vm1586_vm0, %v9521_v46, %v1510_v30  ;;  %v2228_v40 = vor.u32 %v2227_v39, %v2224_v50  ;;  %v851_v49 = vrot.slane %v849_v24, 5  ;;  %v855_v0 = vshrl.u32 %v9826_v19, 16  ;;  %v1514_v46 = vpop.permute.xlu0 %1513 }
  0xd8   : > { %v2238_v63 = vshrl.u32 %v1596_v7, 16  ;;  %v2241_v25 = vshll.u32 %v1596_v7, 16  ;;  %v2232_v31 = vrot.slane %v2230_v8, 3  ;;  %v2235_v18 = vrot.slane %v2233_v55, 4  ;;  %1692 = vrot.lane.b32.xlu1 %v9741_v11, %s8488_s27  ;;  %v9893_v7 = vld [vmem:[#allocation2 + $0x50] sm:$0xff] }
  0xd9   : > { %v2221_v2 = vsel %vm1102_vm1, %v2213_v35, %v2220_v36  ;;  %v1598_v9 = vsel %vm1586_vm0, %v9483_v26, %v1512_v13  ;;  %v2229_v6 = vsel %vm1102_vm1, %v2220_v36, %v2228_v40  ;;  %v1600_v35 = vsel %vm1586_vm0, %v9585_v5, %v1514_v46  ;;  %1774 = vrot.lane.b32.xlu0 %v9770_v57, %s8489_s28 }
  0xda   : > { %v2240_v51 = vrot.slane %v2238_v63, 3  ;;  %v2243_v56 = vrot.slane %v2241_v25, 4  ;;  %7752 = vmatprep.mubr.msk.bf16.mxu0 %vm1993_vm11, %v2221_v2  ;;  %v2236_v21 = vor.u32 %v2235_v18, %v2232_v31  ;;  %v2246_v12 = vshrl.u32 %v1598_v9, 16  ;;  %v1516_v57 = vpop.permute.xlu1 %1515 }
  0xdb   : > { %v2249_v24 = vshll.u32 %v1598_v9, 16  ;;  %7753 = vmatmul.mubr.msk.bf16.vlgmr.msra.gmra.mrb[0].mxu0 %vm1993_vm11, %v2229_v6  ;;  %v1561_v26 = vsel %vm13130_vm3, %v9673_v28, %v9675_v16  ;;  %v9857_v45 = vsel %vm746_vm2, %v9570_v17, %v9828_v23  ;;  %v2830_v5 = vsel %vm12943_vm6, %v2827_v3, %v2829_v61  ;;  %v1518_v3 = vpop.permute.xlu0 %1517 }
  0xdc   : > { %13131 = vst [vmem:[#allocation20_spill] sm:$0xff] %v9857_v45  ;;  %7785 = vmatpush3.bf16.msra.mxu0 %v9805_v62  ;;  %vm9867_vm14 = vcmp.ge.s32.totalorder %v361_v32, 1  ;;  %v2248_v16 = vrot.slane %v2246_v12, 3  ;;  %v2237_v17 = vsel %vm1102_vm1, %v2228_v40, %v2236_v21  ;;  %v858_v58 = vshll.u32 %v9826_v19, 16  ;;  %2779 = vrot.lane.b32.xlu1 %v9749_v53, %s8488_s27 }
  0xdd   : > { %v2251_v11 = vrot.slane %v2249_v24, 4  ;;  %v1602_v14 = vsel %vm1586_vm0, %v9513_v54, %v1516_v57  ;;  %v2254_v50 = vshrl.u32 %v1600_v35, 16  ;;  %7756 = vmatprep.mubr.msk.bf16.mxu0 %vm1993_vm11, %v2237_v17  ;;  %v852_v62 = vor.u32 %v851_v49, %v848_v47  ;;  %2861 = vrot.lane.b32.xlu0 %v2830_v5, %s8489_s28  ;;  %vm660_vm13 = vmpackc.low %vm9867_vm14, %vm9867_vm14 }
  0xde   : > { %vm9876_vm8 = vcmp.ge.s32.totalorder %v363_v48, 1  ;;  %v2244_v32 = vor.u32 %v2243_v56, %v2240_v51  ;;  %v2257_v39 = vshll.u32 %v1600_v35, 16  ;;  %vm900_vm9 = vcmp.ne.s16.totalorder %v9857_v45, 0  ;;  %v9885_v48 = vpop.permute.xlu1 %1436 }
  0xdf   : > { %v857_v19 = vrot.slane %v855_v0, 4  ;;  %v2262_v30 = vshrl.u32 %v1602_v14, 16  ;;  %v2265_v36 = vshll.u32 %v1602_v14, 16  ;;  %v1604_v54 = vsel %vm1586_vm0, %v1561_v26, %v1518_v3  ;;  %v1520_v63 = vpop.permute.xlu0 %1519  ;;  %vm662_vm3 = vmpackc.low %vm9876_vm8, %vm9876_vm8 }
  0xe0   : > { %v860_v8 = vrot.slane %v858_v58, 5  ;;  %v2252_v47 = vor.u32 %v2251_v11, %v2248_v16  ;;  %v1564_v53 = vsel %vm13136_vm4, %v9688_v52, %v9710_v60  ;;  %v2256_v55 = vrot.slane %v2254_v50, 3  ;;  %1776 = vrot.lane.b32.xlu1 %v1742_v33, %s8489_s28  ;;  %v9942_v16 = vld [vmem:[#allocation2 + $0x58] sm:$0xff] }
  0xe1   : > { %v917_v40 = vsel %vm900_vm9, %v9893_v7, 0  ;;  %v9900_v25 = vsel %vm746_vm2, %v9828_v23, %v852_v62  ;;  %v2259_v49 = vrot.slane %v2257_v39, 4  ;;  %v2270_v31 = vshrl.u32 %v1604_v54, 16  ;;  %2863 = vrot.lane.b32.xlu0 %v2829_v61, %s8489_s28 }
  0xe2   : > { %13137 = vst [vmem:[#allocation33_spill] sm:$0xff] %v9900_v25  ;;  %v1606_v52 = vsel %vm1586_vm0, %v1564_v53, %v1520_v63  ;;  %v861_v60 = vor.u32 %v860_v8, %v857_v19  ;;  %v2264_v18 = vrot.slane %v2262_v30, 3  ;;  %v2267_v13 = vrot.slane %v2265_v36, 4  ;;  %v1522_v0 = vpop.permute.xlu1 %1521 }
  0xe3   : > { %v2273_v2 = vshll.u32 %v1604_v54, 16  ;;  %v2245_v23 = vsel %vm1102_vm1, %v2236_v21, %v2244_v32  ;;  %v2253_v43 = vsel %vm1102_vm1, %v2244_v32, %v2252_v47  ;;  %v692_v33 = vsel %vm660_vm13, 65537, %v13063_v10  ;;  %v9931_v51 = vpop.permute.xlu0 %1438 }
  0xe4   : > { %v9914_v9 = vsel %vm746_vm2, %v852_v62, %v861_v60  ;;  %7757 = vmatmul.mubr.msk.bf16.gmra.mrb[4].mxu0 %vm1993_vm11, %v2245_v23  ;;  %v694_v41 = vsel %vm662_vm3, 65537, %v13063_v10  ;;  %v2278_v61 = vshrl.u32 %v1606_v52, 16  ;;  %vm901_vm4 = vcmp.ne.s16.totalorder %v9900_v25, 0  ;;  %v9948_v62 = vld [vmem:[#allocation2 + $0x60] sm:$0xff] }
  0xe5   : > { %13138 = vst [vmem:[#allocation34_spill] sm:$0xff] %v9914_v9  ;;  %7760 = vmatprep.mubr.msk.bf16.mxu0 %vm1993_vm11, %v2253_v43  ;;  %vm13139_vm6 = vcmask 31744   ;;  %v2281_v46 = vshll.u32 %v1606_v52, 16  ;;  %v333_v6 = vadd.s32 240, %v8536_v1  ;;  %v2260_v21 = vor.u32 %v2259_v49, %v2256_v55 }
  0xe6   : > { %v1567_v56 = vsel %vm13139_vm6, %v917_v40, %v9885_v48  ;;  %vm902_vm14 = vcmp.ne.s16.totalorder %v9914_v9, 0  ;;  %v7295_v12 = vcombine.low %v692_v33, %v8599_v44  ;;  %v7296_v24 = vcombine.low %v694_v41, %v8599_v44  ;;  %v9940_v28 = vpop.permute.xlu1 %1440  ;;  %vm13140_vm8 = vmmov %vm13139_vm6 }
  0xe7   : > { %v2268_v35 = vor.u32 %v2267_v13, %v2264_v18  ;;  %v2272_v26 = vrot.slane %v2270_v31, 3  ;;  %v2275_v5 = vrot.slane %v2273_v2, 4  ;;  %v918_v11 = vsel %vm901_vm4, %v9942_v16, 0  ;;  %v1524_v58 = vpop.permute.xlu0 %1523 }
  0xe8   : > { %v1608_v57 = vsel %vm1586_vm0, %v1567_v56, %v1522_v0  ;;  %v2280_v17 = vrot.slane %v2278_v61, 3  ;;  %v864_v14 = vshrl.u32 %v7295_v12, 16  ;;  %v867_v50 = vshll.u32 %v7295_v12, 16 }
  0xe9   : > { %v2283_v3 = vrot.slane %v2281_v46, 4  ;;  %v919_v59 = vsel %vm902_vm14, %v9948_v62, 0  ;;  %v873_v32 = vshrl.u32 %v7296_v24, 16  ;;  %v876_v39 = vshll.u32 %v7296_v24, 16  ;;  %v9973_v46 = vld [vmem:[#allocation2 + $0x68] sm:$0xff] }
  0xea   : > { %v1570_v19 = vsel %vm13139_vm6, %v918_v11, %v9931_v51  ;;  %v866_v30 = vrot.slane %v864_v14, 4  ;;  %v869_v36 = vrot.slane %v867_v50, 5  ;;  %v2261_v54 = vsel %vm1102_vm1, %v2252_v47, %v2260_v21  ;;  %v1526_v8 = vpop.permute.xlu1 %1525 }
  0xeb   : > { %v875_v53 = vrot.slane %v873_v32, 4  ;;  %v878_v55 = vrot.slane %v876_v39, 5  ;;  %v2269_v40 = vsel %vm1102_vm1, %v2260_v21, %v2268_v35  ;;  %v365_v63 = vand.u32 15, %v333_v6  ;;  %v9959_v52 = vpop.permute.xlu0 %1442 }
  0xec   : > { %7761 = vmatmul.mubr.msk.bf16.gmra.mrb[8].mxu0 %vm1993_vm11, %v2261_v54  ;;  %v1610_v49 = vsel %vm1586_vm0, %v1570_v19, %v1524_v58  ;;  %v870_v31 = vor.u32 %v869_v36, %v866_v30  ;;  %v2276_v18 = vor.u32 %v2275_v5, %v2272_v26  ;;  %v2286_v13 = vshrl.u32 %v1608_v57, 16 }
  0xed   : > { %7764 = vmatprep.mubr.msk.bf16.mxu0 %vm1993_vm11, %v2269_v40  ;;  %v2289_v2 = vshll.u32 %v1608_v57, 16  ;;  %v879_v23 = vor.u32 %v878_v55, %v875_v53  ;;  %v2284_v47 = vor.u32 %v2283_v3, %v2280_v17  ;;  %v1573_v0 = vsel %vm13140_vm8, %v919_v59, %v9940_v28  ;;  %v9987_v3 = vld [vmem:[#allocation2 + $0x70] sm:$0xff] }
  0xee   : > { %v9965_v43 = vsel %vm746_vm2, %v861_v60, %v870_v31  ;;  %vm397_vm13 = vcmp.ge.s32.totalorder %v365_v63, 1  ;;  %v2294_v33 = vshrl.u32 %v1610_v49, 16  ;;  %v2297_v41 = vshll.u32 %v1610_v49, 16  ;;  %v9971_v56 = vpop.permute.xlu1 %1444 }
  0xef   : > { %13141 = vst [vmem:[#allocation35_spill] sm:$0xff] %v9965_v43  ;;  %v9968_v61 = vsel %vm746_vm2, %v870_v31, %v879_v23  ;;  %vm12997_vm3 = vcmp.ne.s16.totalorder %v9965_v43, 0  ;;  %vm664_vm6 = vmpackc.low %vm397_vm13, %vm397_vm13  ;;  %v1528_v21 = vpop.permute.xlu0 %1527  ;;  %v2288_v12 = vrot.slane %v2286_v13, 3  ;;  %v2291_v24 = vrot.slane %v2289_v2, 4 }
  0xf0   : > { %13142 = vst [vmem:[#allocation36_spill] sm:$0xff] %v9968_v61  ;;  %v920_v6 = vsel %vm12997_vm3, %v9973_v46, 0  ;;  %v696_v60 = vsel %vm664_vm6, 65537, %v13063_v10  ;;  %vm12987_vm8 = vcmp.ne.s16.totalorder %v9968_v61, 0  ;;  %v1612_v26 = vsel %vm1586_vm0, %v1573_v0, %v1526_v8 }
  0xf1   : > { %v7297_v5 = vcombine.low %v696_v60, %v8599_v44  ;;  %v2277_v11 = vsel %vm1102_vm1, %v2268_v35, %v2276_v18  ;;  %v2296_v57 = vrot.slane %v2294_v33, 3  ;;  %v2299_v17 = vrot.slane %v2297_v41, 4 }
  0xf2   : > { %vm13143_vm13 = vcmask 31744   ;;  %v1530_v14 = vpop.permute.xlu1 %1529  ;;  %v2285_v50 = vsel %vm1102_vm1, %v2276_v18, %v2284_v47  ;;  %v921_v59 = vsel %vm12987_vm8, %v9987_v3, 0  ;;  %v2302_v19 = vshrl.u32 %v1612_v26, 16 }
  0xf3   : > { %v1576_v58 = vsel %vm13143_vm13, %v920_v6, %v9959_v52  ;;  %v882_v32 = vshrl.u32 %v7297_v5, 16  ;;  %v885_v35 = vshll.u32 %v7297_v5, 16  ;;  %v1447_v39 = vpop.permute.xlu0 %1446  ;;  %v2305_v30 = vshll.u32 %v1612_v26, 16  ;;  %vm13144_vm6 = vmmov %vm13143_vm13 }
  0xf4   : > { %7765 = vmatmul.mubr.msk.bf16.gmra.mrb[12].mxu0 %vm1993_vm11, %v2277_v11  ;;  %v1614_v44 = vsel %vm1586_vm0, %v1576_v58, %v1528_v21  ;;  %v2292_v36 = vor.u32 %v2291_v24, %v2288_v12  ;;  %v2300_v53 = vor.u32 %v2299_v17, %v2296_v57  ;;  %v1579_v55 = vsel %vm13144_vm6, %v921_v59, %v9971_v56  ;;  %v10008_v24 = vld [vmem:[#allocation2 + $0x78] sm:$0xff] }
  0xf5   : > { %7768 = vmatprep.mubr.msk.bf16.mxu0 %vm1993_vm11, %v2285_v50  ;;  %v884_v54 = vrot.slane %v882_v32, 4  ;;  %v887_v8 = vrot.slane %v885_v35, 5  ;;  %v2310_v40 = vshrl.u32 %v1614_v44, 16  ;;  %v2313_v63 = vshll.u32 %v1614_v44, 16  ;;  %v2559_v35 = vld [vmem:[#allocation2 + $0x10] sm:$0xf8] }
  0xf6   : > { %v1449_v49 = vpop.permute.xlu1 %1448  ;;  %v2304_v13 = vrot.slane %v2302_v19, 3  ;;  %v2307_v2 = vrot.slane %v2305_v30, 4  ;;  %v1616_v0 = vsel %vm1586_vm0, %v1579_v55, %v1530_v14  ;;  %v2293_v41 = vsel %vm1102_vm1, %v2284_v47, %v2292_v36 }
  0xf7   : > { %v9996_v31 = vor.u32 %v887_v8, %v884_v54  ;;  %v1532_v18 = vpop.permute.xlu0 %1531  ;;  %v2312_v6 = vrot.slane %v2310_v40, 3  ;;  %v2315_v21 = vrot.slane %v2313_v63, 4  ;;  %v2301_v12 = vsel %vm1102_vm1, %v2292_v36, %v2300_v53  ;;  %v8421_v36 = vld [vmem:[#allocation2 + $0x18] sm:$0xff] }
  0xf8   : > { %v2308_v57 = vor.u32 %v2307_v2, %v2304_v13  ;;  %v2318_v17 = vshrl.u32 %v1616_v0, 16  ;;  %v2321_v58 = vshll.u32 %v1616_v0, 16  ;;  %v2577_v54 = vsel %vm891_vm15, %v8421_v36, 0 }
  0xf9   : > { %13145 = vst [vmem:[#allocation37_spill] sm:$0xff] %v9996_v31  ;;  %vm12979_vm13 = vcmp.ne.s16.totalorder %v9996_v31, 0  ;;  %v10002_v33 = vsel %vm746_vm2, %v879_v23, %v9996_v31  ;;  %v8420_v23 = vld [vmem:[#allocation2 + $0x80] sm:$0xf]  ;;  %vm13147_vm2 = vcmask 31744   ;;  %v2316_v50 = vor.u32 %v2315_v21, %v2312_v6 }
  0xfa   : > { %13146 = vst [vmem:[#allocation38_spill] sm:$0xff] %v10002_v33  ;;  %vm12944_vm6 = vcmp.ne.s16.totalorder %v10002_v33, 0  ;;  %v1534_v60 = vpop.permute.xlu1 %1533  ;;  %v923_v47 = vsel %vm12979_vm13, %v8420_v23, 0  ;;  %v2320_v8 = vrot.slane %v2318_v17, 3  ;;  %v2323_v55 = vrot.slane %v2321_v58, 4 }
  0xfb   : > { %v922_v26 = vsel %vm12944_vm6, %v10008_v24, 0  ;;  %v2748_v5 = vpop.permute.xlu0 %2747  ;;  %vm13148_vm6 = vmmov %vm13147_vm2  ;;  %v2309_v40 = vsel %vm1102_vm1, %v2300_v53, %v2308_v57 }
  0xfc   : > { %7769 = vmatmul.mubr.msk.bf16.gmra.mrb[16].mxu0 %vm1993_vm11, %v2293_v41  ;;  %v1582_v11 = vsel %vm13147_vm2, %v922_v26, %v1447_v39  ;;  %v1585_v19 = vsel %vm13148_vm6, %v923_v47, %v1449_v49  ;;  %v2576_v39 = vsel %vm12945_vm7, %v2559_v35, 0  ;;  %v2317_v49 = vsel %vm1102_vm1, %v2308_v57, %v2316_v50  ;;  %vm13149_vm6 = vmmov %vm13147_vm2  ;;  %v8422_v47 = vld [vmem:[#allocation2 + $0x20] sm:$0xff]  ;;  %v8423_v35 = vld [vmem:[#allocation2 + $0x28] sm:$0xff] }
  0xfd   : > { %7772 = vmatprep.mubr.msk.bf16.mxu0 %vm1993_vm11, %v2301_v12  ;;  %v1618_v14 = vsel %vm1586_vm0, %v1582_v11, %v1532_v18  ;;  %v1620_v63 = vsel %vm1586_vm0, %v1585_v19, %v1534_v60  ;;  %v2867_v6 = vsel %vm13147_vm2, %v2576_v39, %v2748_v5  ;;  %v2324_v12 = vor.u32 %v2323_v55, %v2320_v8  ;;  %v13150_v11 = vld [vmem:[#allocation27_spill] sm:$0xff]  ;;  %v13152_v5 = vld [vmem:[#allocation28_spill] sm:$0xff] }
  0xfe   : > { %v2326_v59 = vshrl.u32 %v1618_v14, 16  ;;  %v2329_v44 = vshll.u32 %v1618_v14, 16  ;;  %v2750_v32 = vpop.permute.xlu1 %2749  ;;  %v2334_v53 = vshrl.u32 %v1620_v63, 16  ;;  %v2337_v26 = vshll.u32 %v1620_v63, 16 }
  0xff   : > { %v2752_v30 = vpop.permute.xlu0 %2751  ;;  %v2870_v0 = vsel %vm13149_vm6, %v2577_v54, %v2750_v32  ;;  %vm13151_vm7 = vcmp.ne.s16.totalorder %v13150_v11, 0  ;;  %vm13153_vm6 = vcmp.ne.s16.totalorder %v13152_v5, 0  ;;  %v2325_v55 = vsel %vm1102_vm1, %v2316_v50, %v2324_v12  ;;  %v13180_v5 = vld [vmem:[#allocation6_spill] sm:$0xff] }
 0x100   : > { %v2328_v18 = vrot.slane %v2326_v59, 3  ;;  %v2331_v13 = vrot.slane %v2329_v44, 4  ;;  %v2578_v17 = vsel %vm13151_vm7, %v8422_v47, 0  ;;  %v2579_v19 = vsel %vm13153_vm6, %v8423_v35, 0  ;;  %vm13154_vm7 = vmmov %vm13147_vm2  ;;  %v8425_v35 = vld [vmem:[#allocation2 + $0x38] sm:$0xff] }
 0x101   : > { %v2336_v36 = vrot.slane %v2334_v53, 3  ;;  %v2339_v54 = vrot.slane %v2337_v26, 4  ;;  %v2873_v8 = vsel %vm13147_vm2, %v2578_v17, %v2752_v30  ;;  %v13155_v30 = vld [vmem:[#allocation30_spill] sm:$0xff] }
 0x102   : > { %v2832_v2 = vpop.permute.xlu1 %2831  ;;  %v2332_v23 = vor.u32 %v2331_v13, %v2328_v18  ;;  %vm13156_vm6 = vcmp.ne.s16.totalorder %v13155_v30, 0 }
 0x103   : > { %v2834_v41 = vpop.permute.xlu0 %2833  ;;  %v2917_v60 = vsel %vm1586_vm0, %v2867_v6, %v2832_v2  ;;  %v8424_v6 = vld [vmem:[#allocation2 + $0x30] sm:$0xff]  ;;  %v2340_v53 = vor.u32 %v2339_v54, %v2336_v36 }
 0x104   : > { %7773 = vmatmul.mubr.msk.bf16.gmra.mrb[20].mxu0 %vm1993_vm11, %v2309_v40  ;;  %v2919_v21 = vsel %vm1586_vm0, %v2870_v0, %v2834_v41  ;;  %v2953_v44 = vshrl.u32 %v2917_v60, 16  ;;  %v2956_v32 = vshll.u32 %v2917_v60, 16  ;;  %v2333_v13 = vsel %vm1102_vm1, %v2324_v12, %v2332_v23 }
 0x105   : > { %7776 = vmatprep.mubr.msk.bf16.mxu0 %vm1993_vm11, %v2317_v49  ;;  %v2960_v58 = vshrl.u32 %v2919_v21, 16  ;;  %v2963_v14 = vshll.u32 %v2919_v21, 16  ;;  %v2580_v50 = vsel %vm13156_vm6, %v8424_v6, 0  ;;  %v2341_v54 = vsel %vm1102_vm1, %v2332_v23, %v2340_v53 }
 0x106   : > { %v2836_v57 = vpop.permute.xlu1 %2835  ;;  %v2955_v0 = vrot.slane %v2953_v44, 3  ;;  %v2958_v41 = vrot.slane %v2956_v32, 4  ;;  %v13157_v44 = vld [vmem:[#allocation31_spill] sm:$0xff] }
 0x107   : > { %v2754_v59 = vpop.permute.xlu0 %2753  ;;  %v2921_v39 = vsel %vm1586_vm0, %v2873_v8, %v2836_v57  ;;  %v2962_v40 = vrot.slane %v2960_v58, 3  ;;  %v2965_v63 = vrot.slane %v2963_v14, 4 }
 0x108   : > { %v2876_v2 = vsel %vm13154_vm7, %v2579_v19, %v2754_v59  ;;  %v2968_v26 = vshrl.u32 %v2921_v39, 16  ;;  %v2971_v60 = vshll.u32 %v2921_v39, 16  ;;  %v2959_v59 = vor.u32 %v2958_v41, %v2955_v0 }
 0x109   : > { %v2966_v47 = vor.u32 %v2965_v63, %v2962_v40  ;;  %vm13158_vm7 = vcmp.ne.s16.totalorder %v13157_v44, 0 }
 0x10a   : > { %v2756_v18 = vpop.permute.xlu1 %2755  ;;  %v2581_v32 = vsel %vm13158_vm7, %v8425_v35, 0  ;;  %v2970_v19 = vrot.slane %v2968_v26, 3  ;;  %v2973_v8 = vrot.slane %v2971_v60, 4  ;;  %vm13161_vm7 = vmmov %vm13147_vm2 }
 0x10b   : > { %v2838_v49 = vpop.permute.xlu0 %2837  ;;  %v2879_v58 = vsel %vm13147_vm2, %v2580_v50, %v2756_v18  ;;  %v2967_v18 = vsel %vm1102_vm1, %v2959_v59, %v2966_v47 }
 0x10c   : > { %7777 = vmatmul.mubr.msk.bf16.gmra.mrb[24].mxu0 %vm1993_vm11, %v2325_v55  ;;  %v2923_v21 = vsel %vm1586_vm0, %v2876_v2, %v2838_v49  ;;  %v13159_v55 = vld [vmem:[#allocation32_spill] sm:$0xff]  ;;  %v2974_v41 = vor.u32 %v2973_v8, %v2970_v19  ;;  %v2584_v19 = vsel %vm898_vm10, %v9893_v7, 0 }
 0x10d   : > { %7780 = vmatprep.mubr.msk.bf16.mxu0 %vm1993_vm11, %v2333_v13  ;;  %v2976_v57 = vshrl.u32 %v2923_v21, 16  ;;  %v2979_v12 = vshll.u32 %v2923_v21, 16  ;;  %vm13160_vm6 = vcmp.ne.s16.totalorder %v13159_v55, 0 }
 0x10e   : > { %v2840_v17 = vpop.permute.xlu1 %2839  ;;  %v2582_v36 = vsel %vm13160_vm6, %v9526_v29, 0  ;;  %v2975_v59 = vsel %vm1102_vm1, %v2966_v47, %v2974_v41  ;;  %vm13163_vm6 = vmmov %vm13147_vm2 }
 0x10f   : > { %v2758_v14 = vpop.permute.xlu0 %2757  ;;  %v2925_v39 = vsel %vm1586_vm0, %v2879_v58, %v2840_v17  ;;  %v2978_v40 = vrot.slane %v2976_v57, 3  ;;  %v2981_v63 = vrot.slane %v2979_v12, 4  ;;  %v2583_v12 = vsel %vm897_vm12, %v9677_v4, 0 }
 0x110   : > { %v2882_v2 = vsel %vm13147_vm2, %v2581_v32, %v2758_v14  ;;  %v2984_v29 = vshrl.u32 %v2925_v39, 16  ;;  %v2987_v6 = vshll.u32 %v2925_v39, 16 }
 0x111   : > { %v2982_v50 = vor.u32 %v2981_v63, %v2978_v40 }
 0x112   : > { %v2760_v13 = vpop.permute.xlu1 %2759  ;;  %v2986_v58 = vrot.slane %v2984_v29, 3  ;;  %v2989_v14 = vrot.slane %v2987_v6, 4 }
 0x113   : > { %v2842_v49 = vpop.permute.xlu0 %2841  ;;  %v2885_v23 = vsel %vm13161_vm7, %v2582_v36, %v2760_v13  ;;  %v2983_v36 = vsel %vm1102_vm1, %v2974_v41, %v2982_v50  ;;  %v1635_v41 = vsel %vm899_vm5, %v9893_v7, 0  ;;  %vm13164_vm7 = vmmov %vm13147_vm2 }
 0x114   : > { %7781 = vmatmul.mubr.msk.bf16.gmra.mrb[28].mxu0 %vm1993_vm11, %v2341_v54  ;;  %v2927_v0 = vsel %vm1586_vm0, %v2882_v2, %v2842_v49  ;;  %v2990_v63 = vor.u32 %v2989_v14, %v2986_v58 }
 0x115   : > { %7786 = vmatprep.mubr.msk.bf16.mxu0 %vm1993_vm11, %v2967_v18  ;;  %v2992_v53 = vshrl.u32 %v2927_v0, 16  ;;  %v2995_v26 = vshll.u32 %v2927_v0, 16 }
 0x116   : > { %v2844_v21 = vpop.permute.xlu1 %2843 }
 0x117   : > { %v2762_v60 = vpop.permute.xlu0 %2761  ;;  %v2929_v17 = vsel %vm1586_vm0, %v2885_v23, %v2844_v21  ;;  %v2994_v35 = vrot.slane %v2992_v53, 3  ;;  %v2997_v32 = vrot.slane %v2995_v26, 4 }
 0x118   : > { %v3000_v54 = vshrl.u32 %v2929_v17, 16  ;;  %v3003_v39 = vshll.u32 %v2929_v17, 16  ;;  %v2888_v40 = vsel %vm13163_vm6, %v2583_v12, %v2762_v60  ;;  %v2991_v60 = vsel %vm1102_vm1, %v2982_v50, %v2990_v63  ;;  %vm13165_vm6 = vmmov %vm13147_vm2 }
 0x119   : > { %v2998_v49 = vor.u32 %v2997_v32, %v2994_v35  ;;  %v1798_v17 = vsel %vm13164_vm7, %v1635_v41, %v9885_v48  ;;  %v1636_v12 = vsel %vm900_vm9, %v9942_v16, 0  ;;  %v2585_v50 = vsel %vm899_vm5, %v9942_v16, 0  ;;  %vm13166_vm7 = vmmov %vm13147_vm2 }
 0x11a   : > { %v2764_v8 = vpop.permute.xlu1 %2763  ;;  %v3002_v29 = vrot.slane %v3000_v54, 3  ;;  %v3005_v6 = vrot.slane %v3003_v39, 4  ;;  %v1800_v54 = vsel %vm13165_vm6, %v1636_v12, %v9931_v51  ;;  %v2586_v16 = vsel %vm900_vm9, %v9948_v62, 0  ;;  %vm13167_vm6 = vmmov %vm13147_vm2 }
 0x11b   : > { %v2846_v4 = vpop.permute.xlu0 %2845  ;;  %v2891_v13 = vsel %vm13147_vm2, %v2584_v19, %v2764_v8  ;;  %v2999_v7 = vsel %vm1102_vm1, %v2990_v63, %v2998_v49 }
 0x11c   : > { %7787 = vmatmul.mubr.msk.bf16.vlgmr.msra.gmra.mrb[0].mxu0 %vm1993_vm11, %v2975_v59  ;;  %v2931_v47 = vsel %vm1586_vm0, %v2888_v40, %v2846_v4  ;;  %v3006_v14 = vor.u32 %v3005_v6, %v3002_v29 }
 0x11d   : > { %7790 = vmatprep.mubr.msk.bf16.mxu0 %vm1993_vm11, %v2983_v36  ;;  %v3008_v18 = vshrl.u32 %v2931_v47, 16  ;;  %v3011_v2 = vshll.u32 %v2931_v47, 16 }
 0x11e   : > { %v2848_v0 = vpop.permute.xlu1 %2847 }
 0x11f   : > { %v2766_v23 = vpop.permute.xlu0 %2765  ;;  %v2933_v21 = vsel %vm1586_vm0, %v2891_v13, %v2848_v0  ;;  %v3010_v53 = vrot.slane %v3008_v18, 3  ;;  %v3013_v26 = vrot.slane %v3011_v2, 4  ;;  %v3007_v2 = vsel %vm1102_vm1, %v2998_v49, %v3006_v14 }
 0x120   : > { %v3016_v59 = vshrl.u32 %v2933_v21, 16  ;;  %v3019_v8 = vshll.u32 %v2933_v21, 16  ;;  %v2894_v4 = vsel %vm13147_vm2, %v2585_v50, %v2766_v23  ;;  %v1637_v49 = vsel %vm901_vm4, %v9948_v62, 0 }
 0x121   : > { %v3014_v36 = vor.u32 %v3013_v26, %v3010_v53 }
 0x122   : > { %v1763_v58 = vpop.permute.xlu1 %1762  ;;  %v3018_v63 = vrot.slane %v3016_v59, 3  ;;  %v3021_v6 = vrot.slane %v3019_v8, 4 }
 0x123   : > { %v1835_v35 = vsel %vm1586_vm0, %v1798_v17, %v1763_v58  ;;  %v2768_v32 = vpop.permute.xlu0 %2767  ;;  %v3015_v23 = vsel %vm1102_vm1, %v3006_v14, %v3014_v36 }
 0x124   : > { %7791 = vmatmul.mubr.msk.bf16.gmra.mrb[4].mxu0 %vm1993_vm11, %v2991_v60  ;;  %v1924_v48 = vshrl.u32 %v1835_v35, 16  ;;  %v1927_v19 = vshll.u32 %v1835_v35, 16  ;;  %v2897_v17 = vsel %vm13166_vm7, %v2586_v16, %v2768_v32  ;;  %v3022_v50 = vor.u32 %v3021_v6, %v3018_v63  ;;  %vm13168_vm7 = vmmov %vm13147_vm2 }
 0x125   : > { %7794 = vmatprep.mubr.msk.bf16.mxu0 %vm1993_vm11, %v2999_v7 }
 0x126   : > { %v1926_v39 = vrot.slane %v1924_v48, 3  ;;  %v1929_v40 = vrot.slane %v1927_v19, 4  ;;  %v2850_v47 = vpop.permute.xlu1 %2849 }
 0x127   : > { %v2935_v13 = vsel %vm1586_vm0, %v2894_v4, %v2850_v47  ;;  %v1765_v18 = vpop.permute.xlu0 %1764  ;;  %v1638_v47 = vsel %vm902_vm14, %v9973_v46, 0 }
 0x128   : > { %v3024_v0 = vshrl.u32 %v2935_v13, 16  ;;  %v3027_v41 = vshll.u32 %v2935_v13, 16  ;;  %v1837_v29 = vsel %vm1586_vm0, %v1800_v54, %v1765_v18  ;;  %v1930_v51 = vor.u32 %v1929_v40, %v1926_v39 }
 0x129   : > { %v1932_v21 = vshrl.u32 %v1837_v29, 16  ;;  %v1935_v53 = vshll.u32 %v1837_v29, 16  ;;  %v2587_v39 = vsel %vm901_vm4, %v9973_v46, 0  ;;  %v3023_v18 = vsel %vm1102_vm1, %v3014_v36, %v3022_v50 }
 0x12a   : > { %v3026_v26 = vrot.slane %v3024_v0, 3  ;;  %v3029_v60 = vrot.slane %v3027_v41, 4  ;;  %v2852_v12 = vpop.permute.xlu1 %2851  ;;  %v1931_v58 = vsel %vm1102_vm1, %v9790_v20, %v1930_v51  ;;  %v1802_v20 = vsel %vm13167_vm6, %v1637_v49, %v9940_v28  ;;  %vm13169_vm6 = vmmov %vm13147_vm2 }
 0x12b   : > { %v2937_v7 = vsel %vm1586_vm0, %v2897_v17, %v2852_v12  ;;  %v1934_v59 = vrot.slane %v1932_v21, 3  ;;  %v1937_v35 = vrot.slane %v1935_v53, 4  ;;  %7734 = vmatprep.mubr.msk.bf16.mxu1 %vm1993_vm11, %v1931_v58  ;;  %v2770_v14 = vpop.permute.xlu0 %2769  ;;  %v1804_v46 = vsel %vm13168_vm7, %v1638_v47, %v9959_v52  ;;  %vm13170_vm7 = vmmov %vm13147_vm2 }
 0x12c   : > { %7795 = vmatmul.mubr.msk.bf16.gmra.mrb[8].mxu0 %vm1993_vm11, %v3007_v2  ;;  %v3032_v32 = vshrl.u32 %v2937_v7, 16  ;;  %v3035_v48 = vshll.u32 %v2937_v7, 16  ;;  %v3030_v8 = vor.u32 %v3029_v60, %v3026_v26  ;;  %v2900_v41 = vsel %vm13147_vm2, %v2587_v39, %v2770_v14 }
 0x12d   : > { %7798 = vmatprep.mubr.msk.bf16.mxu0 %vm1993_vm11, %v3015_v23  ;;  %v1938_v19 = vor.u32 %v1937_v35, %v1934_v59  ;;  %v2588_v21 = vsel %vm902_vm14, %v9987_v3, 0 }
 0x12e   : > { %v1767_v54 = vpop.permute.xlu1 %1766  ;;  %v3034_v28 = vrot.slane %v3032_v32, 3  ;;  %v3037_v16 = vrot.slane %v3035_v48, 4 }
 0x12f   : > { %v1839_v62 = vsel %vm1586_vm0, %v1802_v20, %v1767_v54  ;;  %v2772_v40 = vpop.permute.xlu0 %2771  ;;  %v1939_v4 = vsel %vm1102_vm1, %v1930_v51, %v1938_v19  ;;  %v3031_v51 = vsel %vm1102_vm1, %v3022_v50, %v3030_v8  ;;  %v1639_v20 = vsel %vm12997_vm3, %v9987_v3, 0 }
 0x130   : > { %v1940_v63 = vshrl.u32 %v1839_v62, 16  ;;  %v1943_v13 = vshll.u32 %v1839_v62, 16  ;;  %7735 = vmatmul.mubr.msk.bf16.vlgmr.msra.gmra.mrb[0].mxu1 %vm1993_vm11, %v1939_v4  ;;  %v3038_v17 = vor.u32 %v3037_v16, %v3034_v28  ;;  %v2903_v52 = vsel %vm13169_vm6, %v2588_v21, %v2772_v40  ;;  %vm13171_vm6 = vmmov %vm13147_vm2 }
 0x131   : > { %v1806_v28 = vsel %vm13147_vm2, %v1639_v20, %v9971_v56  ;;  %v2589_v3 = vsel %vm12997_vm3, %v10008_v24, 0  ;;  %v1640_v56 = vsel %vm12987_vm8, %v10008_v24, 0 }
 0x132   : > { %v1942_v2 = vrot.slane %v1940_v63, 3  ;;  %v1945_v0 = vrot.slane %v1943_v13, 4  ;;  %v2854_v29 = vpop.permute.xlu1 %2853  ;;  %v3039_v40 = vsel %vm1102_vm1, %v3030_v8, %v3038_v17 }
 0x133   : > { %v2939_v6 = vsel %vm1586_vm0, %v2900_v41, %v2854_v29  ;;  %v1769_v53 = vpop.permute.xlu0 %1768 }
 0x134   : > { %7799 = vmatmul.mubr.msk.bf16.gmra.mrb[12].mxu0 %vm1993_vm11, %v3023_v18  ;;  %v1946_v36 = vor.u32 %v1945_v0, %v1942_v2  ;;  %v3040_v23 = vshrl.u32 %v2939_v6, 16  ;;  %v3043_v26 = vshll.u32 %v2939_v6, 16  ;;  %v1841_v60 = vsel %vm1586_vm0, %v1804_v46, %v1769_v53  ;;  %v8426_v46 = vld [vmem:[#allocation2 + $0x80] sm:$0xff] }
 0x135   : > { %7802 = vmatprep.mubr.msk.bf16.mxu0 %vm1993_vm11, %v3031_v51  ;;  %v1948_v12 = vshrl.u32 %v1841_v60, 16  ;;  %v1951_v58 = vshll.u32 %v1841_v60, 16  ;;  %v2590_v6 = vsel %vm12987_vm8, %v8426_v46, 0  ;;  %vm13258_vm8 = vsmask.f32 7424 }
 0x136   : > { %v3042_v49 = vrot.slane %v3040_v23, 3  ;;  %v3045_v7 = vrot.slane %v3043_v26, 4  ;;  %v2856_v59 = vpop.permute.xlu1 %2855  ;;  %v1947_v35 = vsel %vm1102_vm1, %v1938_v19, %v1946_v36 }
 0x137   : > { %v2941_v14 = vsel %vm1586_vm0, %v2903_v52, %v2856_v59  ;;  %v1950_v50 = vrot.slane %v1948_v12, 3  ;;  %v1953_v32 = vrot.slane %v1951_v58, 4  ;;  %7738 = vmatprep.mubr.msk.bf16.mxu1 %vm1993_vm11, %v1947_v35  ;;  %v2774_v48 = vpop.permute.xlu0 %2773 }
 0x138   : > { %v3046_v54 = vor.u32 %v3045_v7, %v3042_v49  ;;  %v3048_v62 = vshrl.u32 %v2941_v14, 16  ;;  %v3051_v39 = vshll.u32 %v2941_v14, 16  ;;  %v2906_v51 = vsel %vm13170_vm7, %v2589_v3, %v2774_v48 }
 0x139   : > { %v1954_v4 = vor.u32 %v1953_v32, %v1950_v50  ;;  %vm13172_vm7 = vcmp.ne.s16.totalorder %v10002_v33, 0 }
 0x13a   : > { %v3050_v47 = vrot.slane %v3048_v62, 3  ;;  %v3053_v63 = vrot.slane %v3051_v39, 4  ;;  %v1689_v19 = vpop.permute.xlu1 %1688  ;;  %v3047_v13 = vsel %vm1102_vm1, %v3038_v17, %v3046_v54 }
 0x13b   : > { %v1771_v16 = vpop.permute.xlu0 %1770  ;;  %v1955_v18 = vsel %vm1102_vm1, %v1946_v36, %v1954_v4  ;;  %v1809_v58 = vsel %vm13171_vm6, %v1640_v56, %v1689_v19  ;;  %vm13173_vm6 = vmmov %vm13147_vm2 }
 0x13c   : > { %7803 = vmatmul.mubr.msk.bf16.gmra.mrb[16].mxu0 %vm1993_vm11, %v3039_v40  ;;  %v1843_v8 = vsel %vm1586_vm0, %v1806_v28, %v1771_v16  ;;  %7739 = vmatmul.mubr.msk.bf16.gmra.mrb[4].mxu1 %vm1993_vm11, %v1955_v18  ;;  %v3054_v2 = vor.u32 %v3053_v63, %v3050_v47 }
 0x13d   : > { %7806 = vmatprep.mubr.msk.bf16.mxu0 %vm1993_vm11, %v3047_v13  ;;  %v1956_v0 = vshrl.u32 %v1843_v8, 16  ;;  %v1959_v41 = vshll.u32 %v1843_v8, 16 }
 0x13e   : > { %v2776_v29 = vpop.permute.xlu1 %2775  ;;  %v3055_v12 = vsel %vm1102_vm1, %v3046_v54, %v3054_v2 }
 0x13f   : > { %v1958_v21 = vrot.slane %v1956_v0, 3  ;;  %v1961_v53 = vrot.slane %v1959_v41, 4  ;;  %v2858_v36 = vpop.permute.xlu0 %2857  ;;  %v2909_v24 = vsel %vm13147_vm2, %v2590_v6, %v2776_v29  ;;  %v8427_v29 = vld [vmem:[#allocation2 + $0x88] sm:$0xff]  ;;  %vm13174_vm2 = vmmov %vm13172_vm7 }
 0x140   : > { %v2943_v23 = vsel %vm1586_vm0, %v2906_v51, %v2858_v36 }
 0x141   : > { %v1962_v26 = vor.u32 %v1961_v53, %v1958_v21  ;;  %v3056_v60 = vshrl.u32 %v2943_v23, 16  ;;  %v3059_v17 = vshll.u32 %v2943_v23, 16  ;;  %v8428_v21 = vld [vmem:[#allocation2 + $0x88] sm:$0xf] }
 0x142   : > { %v1773_v49 = vpop.permute.xlu1 %1772  ;;  %v1642_v53 = vsel %vm12979_vm13, %v8428_v21, 0 }
 0x143   : > { %v1845_v7 = vsel %vm1586_vm0, %v1809_v58, %v1773_v49  ;;  %v3058_v52 = vrot.slane %v3056_v60, 3  ;;  %v3061_v59 = vrot.slane %v3059_v17, 4  ;;  %v2860_v35 = vpop.permute.xlu0 %2859  ;;  %v1963_v14 = vsel %vm1102_vm1, %v1954_v4, %v1962_v26 }
 0x144   : > { %7807 = vmatmul.mubr.msk.bf16.gmra.mrb[20].mxu0 %vm1993_vm11, %v3055_v12  ;;  %v1964_v50 = vshrl.u32 %v1845_v7, 16  ;;  %v1967_v32 = vshll.u32 %v1845_v7, 16  ;;  %v2945_v48 = vsel %vm1586_vm0, %v2909_v24, %v2860_v35  ;;  %7742 = vmatprep.mubr.msk.bf16.mxu1 %vm1993_vm11, %v1963_v14  ;;  %v1641_v4 = vsel %vm13172_vm7, %v8426_v46, 0  ;;  %vm13175_vm7 = vmmov %vm13173_vm6 }
 0x145   : > { %v3062_v20 = vor.u32 %v3061_v59, %v3058_v52  ;;  %v3064_v54 = vshrl.u32 %v2945_v48, 16  ;;  %v3067_v62 = vshll.u32 %v2945_v48, 16 }
 0x146   : > { %v1966_v39 = vrot.slane %v1964_v50, 3  ;;  %v1969_v40 = vrot.slane %v1967_v32, 4  ;;  %v1691_v47 = vpop.permute.xlu1 %1690 }
 0x147   : > { %v3066_v63 = vrot.slane %v3064_v54, 3  ;;  %v3069_v19 = vrot.slane %v3067_v62, 4  ;;  %v2778_v13 = vpop.permute.xlu0 %2777  ;;  %v3063_v28 = vsel %vm1102_vm1, %v3054_v2, %v3062_v20  ;;  %v1812_v0 = vsel %vm13173_vm6, %v1641_v4, %v1691_v47 }
 0x148   : > { %v1970_v16 = vor.u32 %v1969_v40, %v1966_v39  ;;  %7810 = vmatprep.mubr.msk.bf16.mxu0 %vm1993_vm11, %v3063_v28  ;;  %v2591_v2 = vsel %vm13174_vm2, %v8427_v29, 0  ;;  %vm13176_vm2 = vmmov %vm13173_vm6  ;;  %v10206_v29 = vld [vmem:[%s12863_s4] sm:$0xff] }
 0x149   : > { %v3070_v18 = vor.u32 %v3069_v19, %v3066_v63  ;;  %v2912_v23 = vsel %vm13175_vm7, %v2591_v2, %v2778_v13  ;;  %vm3977_vm7 = vcmask 64516  }
 0x14a   : > { %v1693_v3 = vpop.permute.xlu1 %1692  ;;  %v1971_v8 = vsel %vm1102_vm1, %v1962_v26, %v1970_v16  ;;  %v8429_v26 = vld [vmem:[#allocation2 + $0x90] sm:$0xf]  ;;  %3978 = vst.msk [vmem:[#allocation3 + $0x88] sm:$0xf0] %vm3977_vm7, %v13063_v10 }
 0x14b   : > { %7743 = vmatmul.mubr.msk.bf16.gmra.mrb[8].mxu1 %vm1993_vm11, %v1971_v8  ;;  %v1775_v41 = vpop.permute.xlu0 %1774  ;;  %v3071_v56 = vsel %vm1102_vm1, %v3062_v20, %v3070_v18  ;;  %v2592_v60 = vsel %vm12979_vm13, %v8429_v26, 0  ;;  %v1815_v59 = vsel %vm13173_vm6, %v1642_v53, %v1693_v3  ;;  %vm12978_vm6 = vcmask 60416  }
 0x14c   : > { %v1847_v51 = vsel %vm1586_vm0, %v1812_v0, %v1775_v41  ;;  %7811 = vmatmul.mubr.msk.bf16.gmra.mrb[24].mxu0 %vm1993_vm11, %v3071_v56  ;;  %3976 = vst.msk [vmem:[#allocation3 + $0x8] sm:$0xf] %vm12978_vm6, %v13063_v10 }
 0x14d   : > { %v1972_v46 = vshrl.u32 %v1847_v51, 16  ;;  %v1975_v6 = vshll.u32 %v1847_v51, 16 }
 0x14e   : > { %v2780_v36 = vpop.permute.xlu1 %2779 }
 0x14f   : > { %v1974_v17 = vrot.slane %v1972_v46, 3  ;;  %v1977_v12 = vrot.slane %v1975_v6, 4  ;;  %v2862_v58 = vpop.permute.xlu0 %2861  ;;  %v2915_v35 = vsel %vm13176_vm2, %v2592_v60, %v2780_v36 }
 0x150   : > { %v2947_v24 = vsel %vm1586_vm0, %v2912_v23, %v2862_v58 }
 0x151   : > { %v1978_v49 = vor.u32 %v1977_v12, %v1974_v17  ;;  %v3072_v7 = vshrl.u32 %v2947_v24, 16  ;;  %v3075_v52 = vshll.u32 %v2947_v24, 16 }
 0x152   : > { %v1777_v14 = vpop.permute.xlu1 %1776 }
 0x153   : > { %v1849_v50 = vsel %vm1586_vm0, %v1815_v59, %v1777_v14  ;;  %v3074_v32 = vrot.slane %v3072_v7, 3  ;;  %v3077_v48 = vrot.slane %v3075_v52, 4  ;;  %v2864_v20 = vpop.permute.xlu0 %2863  ;;  %v1979_v54 = vsel %vm1102_vm1, %v1970_v16, %v1978_v49 }
 0x154   : > { %v1980_v62 = vshrl.u32 %v1849_v50, 16  ;;  %v1983_v39 = vshll.u32 %v1849_v50, 16  ;;  %v2949_v40 = vsel %vm1586_vm0, %v2915_v35, %v2864_v20  ;;  %7746 = vmatprep.mubr.msk.bf16.mxu1 %vm1993_vm11, %v1979_v54 }
 0x155   : > { %v3078_v47 = vor.u32 %v3077_v48, %v3074_v32  ;;  %v3080_v63 = vshrl.u32 %v2949_v40, 16  ;;  %v3083_v19 = vshll.u32 %v2949_v40, 16 }
 0x156   : > { %v1982_v13 = vrot.slane %v1980_v62, 3  ;;  %v1985_v28 = vrot.slane %v1983_v39, 4 }
 0x157   : > { %v3082_v4 = vrot.slane %v3080_v63, 3  ;;  %v3085_v3 = vrot.slane %v3083_v19, 4  ;;  %v3079_v8 = vsel %vm1102_vm1, %v3070_v18, %v3078_v47  ;;  %v3339_v18 = vsub.s32 0, %v8536_v1 }
 0x158   : > { %v1986_v0 = vor.u32 %v1985_v28, %v1982_v13  ;;  %7814 = vmatprep.mubr.msk.bf16.mxu0 %vm1993_vm11, %v3079_v8 }
 0x159   : > { %v3086_v41 = vor.u32 %v3085_v3, %v3082_v4  ;;  %v10209_v2 = vrot.slane %v10206_v29, %v3339_v18 }
 0x15a   : > { %v1987_v16 = vsel %vm1102_vm1, %v1978_v49, %v1986_v0 }
 0x15b   : > { %7747 = vmatmul.mubr.msk.bf16.gmra.mrb[12].mxu1 %vm1993_vm11, %v1987_v16  ;;  %v3087_v56 = vsel %vm1102_vm1, %v3078_v47, %v3086_v41 }
 0x15c   : > { %7815 = vmatmul.mubr.msk.bf16.gmra.mrb[28].mxu0 %vm1993_vm11, %v3087_v56  ;;  %vm3996_vm11 = vcmask 1043456  }
 0x1ef   : > { %v7788_v51 = vpop.f32.mrb[0].mxu0 }
 0x1f0   : > { %v3178_v46 = vpop.f32.mrb[1].mxu0  ;;  %v10212_v6 = vadd.f32 %v7788_v51, %v10209_v2 }
 0x1f1   : > { %v10215_v21 = vadd.f32 %v10209_v2, %v3178_v46  ;;  %v7789_v53 = vpop.f32.mrb[2].mxu0 }
 0x1f2   : > { %v3181_v10 = vpop.f32.mrb[3].mxu0  ;;  %v10220_v23 = vadd.f32 %v7789_v53, %v10209_v2  ;;  %v3450_v60 = vmul.f32 %v10212_v6, %v10212_v6  ;;  %v3376_v49 = vsel %vm1586_vm0, %v10212_v6, 0.0 }
 0x1f3   : > { %v3448_v36 = vmul.f32 %v10215_v21, %v10215_v21  ;;  %v10223_v26 = vadd.f32 %v10209_v2, %v3181_v10  ;;  %v3373_v17 = vsel %vm1586_vm0, %v10215_v21, 0.0 }
 0x1f4   : > { %v3451_v52 = vmul.f32 %v10220_v23, %v10220_v23  ;;  %v3483_v48 = vsel %vm1586_vm0, %v3450_v60, 0.0  ;;  %v3378_v20 = vsel %vm1586_vm0, %v10220_v23, 0.0 }
 0x1f5   : > { %v3374_v12 = vsel %vm1586_vm0, %v10223_v26, 0.0  ;;  %v3449_v58 = vmul.f32 %v10223_v26, %v10223_v26  ;;  %v3480_v7 = vsel %vm1586_vm0, %v3448_v36, 0.0 }
 0x1f6   : > { %v3375_v24 = vadd.f32 %v3374_v12, %v3373_v17  ;;  %v3485_v19 = vsel %vm1586_vm0, %v3451_v52, 0.0 }
 0x1f7   : > { %v3481_v59 = vsel %vm1586_vm0, %v3449_v58, 0.0  ;;  %v7792_v35 = vpop.f32.mrb[4].mxu0 }
 0x1f8   : > { %v3377_v14 = vadd.f32 %v3376_v49, %v3375_v24  ;;  %v3482_v50 = vadd.f32 %v3481_v59, %v3480_v7  ;;  %v3194_v32 = vpop.f32.mrb[5].mxu0  ;;  %v10246_v40 = vadd.f32 %v7792_v35, %v10209_v2 }
 0x1f9   : > { %v10243_v54 = vadd.f32 %v10209_v2, %v3194_v32  ;;  %v7793_v62 = vpop.f32.mrb[6].mxu0 }
 0x1fa   : > { %v3484_v39 = vadd.f32 %v3483_v48, %v3482_v50  ;;  %v3379_v47 = vadd.f32 %v3378_v20, %v3377_v14  ;;  %v3197_v63 = vpop.f32.mrb[7].mxu0  ;;  %v10257_v0 = vadd.f32 %v7793_v62, %v10209_v2  ;;  %v3454_v56 = vmul.f32 %v10246_v40, %v10246_v40 }
 0x1fb   : > { %v3380_v13 = vsel %vm1586_vm0, %v10243_v54, 0.0  ;;  %v3452_v28 = vmul.f32 %v10243_v54, %v10243_v54  ;;  %v10254_v4 = vadd.f32 %v10209_v2, %v3197_v63  ;;  %v3384_v53 = vsel %vm1586_vm0, %v10246_v40, 0.0 }
 0x1fc   : > { %v3381_v3 = vadd.f32 %v3380_v13, %v3379_v47  ;;  %v3486_v8 = vadd.f32 %v3485_v19, %v3484_v39  ;;  %v3455_v36 = vmul.f32 %v10257_v0, %v10257_v0  ;;  %v3386_v58 = vsel %vm1586_vm0, %v10257_v0, 0.0 }
 0x1fd   : > { %v3487_v41 = vsel %vm1586_vm0, %v3452_v28, 0.0  ;;  %v3382_v16 = vsel %vm1586_vm0, %v10254_v4, 0.0  ;;  %v3453_v46 = vmul.f32 %v10254_v4, %v10254_v4  ;;  %v3491_v52 = vsel %vm1586_vm0, %v3454_v56, 0.0 }
 0x1fe   : > { %v3488_v18 = vadd.f32 %v3487_v41, %v3486_v8  ;;  %v3383_v51 = vadd.f32 %v3382_v16, %v3381_v3  ;;  %v3493_v62 = vsel %vm1586_vm0, %v3455_v36, 0.0 }
 0x1ff   : > { %v7796_v10 = vpop.f32.mrb[8].mxu0  ;;  %v3489_v17 = vsel %vm1586_vm0, %v3453_v46, 0.0 }
 0x200   : > { %v3385_v60 = vadd.f32 %v3384_v53, %v3383_v51  ;;  %v3210_v12 = vpop.f32.mrb[9].mxu0  ;;  %v3490_v24 = vadd.f32 %v3489_v17, %v3488_v18  ;;  %v10278_v59 = vadd.f32 %v7796_v10, %v10209_v2 }
 0x201   : > { %v10274_v49 = vadd.f32 %v10209_v2, %v3210_v12  ;;  %v7797_v7 = vpop.f32.mrb[10].mxu0 }
 0x202   : > { %v3387_v35 = vadd.f32 %v3386_v58, %v3385_v60  ;;  %v3213_v14 = vpop.f32.mrb[11].mxu0  ;;  %v3492_v50 = vadd.f32 %v3491_v52, %v3490_v24  ;;  %v10289_v47 = vadd.f32 %v7797_v7, %v10209_v2  ;;  %v3458_v8 = vmul.f32 %v10278_v59, %v10278_v59 }
 0x203   : > { %v3388_v32 = vsel %vm1586_vm0, %v10274_v49, 0.0  ;;  %v3456_v48 = vmul.f32 %v10274_v49, %v10274_v49  ;;  %v10285_v20 = vadd.f32 %v10209_v2, %v3213_v14  ;;  %v7736_v13 = vpop.f32.mrb[0].mxu1  ;;  %v3392_v56 = vsel %vm1586_vm0, %v10278_v59, 0.0 }
 0x204   : > { %v3389_v39 = vadd.f32 %v3388_v32, %v3387_v35  ;;  %v3494_v63 = vadd.f32 %v3493_v62, %v3492_v50  ;;  %v2144_v16 = vpop.f32.mrb[1].mxu1  ;;  %v3459_v10 = vmul.f32 %v10289_v47, %v10289_v47  ;;  %v3394_v12 = vsel %vm1586_vm0, %v10289_v47, 0.0 }
 0x205   : > { %v3495_v19 = vsel %vm1586_vm0, %v3456_v48, 0.0  ;;  %v3390_v28 = vsel %vm1586_vm0, %v10285_v20, 0.0  ;;  %v3457_v3 = vmul.f32 %v10285_v20, %v10285_v20  ;;  %v7737_v46 = vpop.f32.mrb[2].mxu1  ;;  %v3499_v52 = vsel %vm1586_vm0, %v3458_v8, 0.0 }
 0x206   : > { %v3391_v41 = vadd.f32 %v3390_v28, %v3389_v39  ;;  %v3496_v18 = vadd.f32 %v3495_v19, %v3494_v63  ;;  %v2147_v60 = vpop.f32.mrb[3].mxu1  ;;  %v3501_v63 = vsel %vm1586_vm0, %v3459_v10, 0.0 }
 0x207   : > { %v3497_v51 = vsel %vm1586_vm0, %v3457_v3, 0.0  ;;  %v7800_v53 = vpop.f32.mrb[12].mxu0 }
 0x208   : > { %v3393_v36 = vadd.f32 %v3392_v56, %v3391_v41  ;;  %v3226_v17 = vpop.f32.mrb[13].mxu0  ;;  %v3498_v58 = vadd.f32 %v3497_v51, %v3496_v18  ;;  %v10310_v35 = vadd.f32 %v7800_v53, %v10209_v2 }
 0x209   : > { %v10306_v24 = vadd.f32 %v10209_v2, %v3226_v17  ;;  %v7801_v7 = vpop.f32.mrb[14].mxu0 }
 0x20a   : > { %v3395_v14 = vadd.f32 %v3394_v12, %v3393_v36  ;;  %v3229_v50 = vpop.f32.mrb[15].mxu0  ;;  %v3500_v32 = vadd.f32 %v3499_v52, %v3498_v58  ;;  %v10321_v28 = vadd.f32 %v7801_v7, %v10209_v2  ;;  %v3462_v18 = vmul.f32 %v10310_v35, %v10310_v35 }
 0x20b   : > { %v3396_v48 = vsel %vm1586_vm0, %v10306_v24, 0.0  ;;  %v3460_v62 = vmul.f32 %v10306_v24, %v10306_v24  ;;  %v10317_v39 = vadd.f32 %v10209_v2, %v3229_v50  ;;  %v3400_v53 = vsel %vm1586_vm0, %v10310_v35, 0.0 }
 0x20c   : > { %v3397_v19 = vadd.f32 %v3396_v48, %v3395_v14  ;;  %v3502_v3 = vadd.f32 %v3501_v63, %v3500_v32  ;;  %v3463_v12 = vmul.f32 %v10321_v28, %v10321_v28  ;;  %v3402_v63 = vsel %vm1586_vm0, %v10321_v28, 0.0 }
 0x20d   : > { %v3503_v8 = vsel %vm1586_vm0, %v3460_v62, 0.0  ;;  %v3398_v41 = vsel %vm1586_vm0, %v10317_v39, 0.0  ;;  %v3461_v56 = vmul.f32 %v10317_v39, %v10317_v39  ;;  %v3507_v62 = vsel %vm1586_vm0, %v3462_v18, 0.0 }
 0x20e   : > { %v3399_v51 = vadd.f32 %v3398_v41, %v3397_v19  ;;  %v3504_v10 = vadd.f32 %v3503_v8, %v3502_v3 }
 0x20f   : > { %v3505_v36 = vsel %vm1586_vm0, %v3461_v56, 0.0  ;;  %v7804_v17 = vpop.f32.mrb[16].mxu0  ;;  %v7740_v50 = vpop.f32.mrb[4].mxu1 }
 0x210   : > { %v3401_v58 = vadd.f32 %v3400_v53, %v3399_v51  ;;  %v7962_v7 = vadd.f32 %v7804_v17, %v7736_v13  ;;  %v3242_v52 = vpop.f32.mrb[17].mxu0  ;;  %v3506_v14 = vadd.f32 %v3505_v36, %v3504_v10  ;;  %v2160_v19 = vpop.f32.mrb[5].mxu1 }
 0x211   : > { %v7963_v32 = vadd.f32 %v3242_v52, %v2144_v16  ;;  %v7805_v48 = vpop.f32.mrb[18].mxu0  ;;  %v7741_v33 = vpop.f32.mrb[6].mxu1  ;;  %v3509_v16 = vsel %vm1586_vm0, %v3463_v12, 0.0 }
 0x212   : > { %v7964_v3 = vadd.f32 %v7805_v48, %v7737_v46  ;;  %v3245_v8 = vpop.f32.mrb[19].mxu0  ;;  %v3508_v41 = vadd.f32 %v3507_v62, %v3506_v14  ;;  %v10339_v56 = vadd.f32 %v7962_v7, %v10209_v2  ;;  %v3403_v53 = vadd.f32 %v3402_v63, %v3401_v58  ;;  %v2163_v10 = vpop.f32.mrb[7].mxu1 }
 0x213   : > { %v10342_v13 = vadd.f32 %v7963_v32, %v10209_v2  ;;  %v7965_v51 = vadd.f32 %v3245_v8, %v2147_v60 }
 0x214   : > { %v10350_v36 = vadd.f32 %v7964_v3, %v10209_v2  ;;  %v3510_v52 = vadd.f32 %v3509_v16, %v3508_v41  ;;  %v3466_v60 = vmul.f32 %v10339_v56, %v10339_v56  ;;  %v3408_v8 = vsel %vm1586_vm0, %v10339_v56, 0.0 }
 0x215   : > { %v3404_v18 = vsel %vm1586_vm0, %v10342_v13, 0.0  ;;  %v3464_v46 = vmul.f32 %v10342_v13, %v10342_v13  ;;  %v10353_v17 = vadd.f32 %v7965_v51, %v10209_v2 }
 0x216   : > { %v3405_v7 = vadd.f32 %v3404_v18, %v3403_v53  ;;  %v3467_v41 = vmul.f32 %v10350_v36, %v10350_v36  ;;  %v3515_v43 = vsel %vm1586_vm0, %v3466_v60, 0.0 }
 0x217   : > { %v3511_v12 = vsel %vm1586_vm0, %v3464_v46, 0.0  ;;  %v3406_v58 = vsel %vm1586_vm0, %v10353_v17, 0.0  ;;  %v3465_v14 = vmul.f32 %v10353_v17, %v10353_v17  ;;  %v7808_v32 = vpop.f32.mrb[20].mxu0 }
 0x218   : > { %v3512_v48 = vadd.f32 %v3511_v12, %v3510_v52  ;;  %v3407_v62 = vadd.f32 %v3406_v58, %v3405_v7  ;;  %v7966_v63 = vadd.f32 %v7808_v32, %v7740_v50  ;;  %v3258_v3 = vpop.f32.mrb[21].mxu0  ;;  %v3410_v50 = vsel %vm1586_vm0, %v10350_v36, 0.0 }
 0x219   : > { %v3513_v51 = vsel %vm1586_vm0, %v3465_v14, 0.0  ;;  %v7967_v16 = vadd.f32 %v3258_v3, %v2160_v19  ;;  %v7809_v53 = vpop.f32.mrb[22].mxu0  ;;  %v3517_v19 = vsel %vm1586_vm0, %v3467_v41, 0.0 }
 0x21a   : > { %v3409_v18 = vadd.f32 %v3408_v8, %v3407_v62  ;;  %v3514_v46 = vadd.f32 %v3513_v51, %v3512_v48  ;;  %v7968_v31 = vadd.f32 %v7809_v53, %v7741_v33  ;;  %v3261_v61 = vpop.f32.mrb[23].mxu0  ;;  %v10374_v58 = vadd.f32 %v7966_v63, %v10209_v2 }
 0x21b   : > { %v10371_v7 = vadd.f32 %v7967_v16, %v10209_v2  ;;  %v7969_v52 = vadd.f32 %v3261_v61, %v2163_v10 }
 0x21c   : > { %v3516_v12 = vadd.f32 %v3515_v43, %v3514_v46  ;;  %v3411_v14 = vadd.f32 %v3410_v50, %v3409_v18  ;;  %v10386_v43 = vadd.f32 %v7968_v31, %v10209_v2  ;;  %v3470_v63 = vmul.f32 %v10374_v58, %v10374_v58 }
 0x21d   : > { %v3412_v33 = vsel %vm1586_vm0, %v10371_v7, 0.0  ;;  %v3468_v60 = vmul.f32 %v10371_v7, %v10371_v7  ;;  %v10382_v32 = vadd.f32 %v7969_v52, %v10209_v2  ;;  %v3416_v16 = vsel %vm1586_vm0, %v10374_v58, 0.0 }
 0x21e   : > { %v3413_v48 = vadd.f32 %v3412_v33, %v3411_v14  ;;  %v3518_v62 = vadd.f32 %v3517_v19, %v3516_v12  ;;  %v7744_v8 = vpop.f32.mrb[8].mxu1  ;;  %v3471_v14 = vmul.f32 %v10386_v43, %v10386_v43  ;;  %v3418_v9 = vsel %vm1586_vm0, %v10386_v43, 0.0 }
 0x21f   : > { %v3519_v61 = vsel %vm1586_vm0, %v3468_v60, 0.0  ;;  %v3414_v10 = vsel %vm1586_vm0, %v10382_v32, 0.0  ;;  %v3469_v51 = vmul.f32 %v10382_v32, %v10382_v32  ;;  %v2176_v53 = vpop.f32.mrb[9].mxu1  ;;  %v7812_v18 = vpop.f32.mrb[24].mxu0 }
 0x220   : > { %v3520_v3 = vadd.f32 %v3519_v61, %v3518_v62  ;;  %v3415_v41 = vadd.f32 %v3414_v10, %v3413_v48  ;;  %v7745_v50 = vpop.f32.mrb[10].mxu1  ;;  %v7970_v52 = vadd.f32 %v7812_v18, %v7744_v8  ;;  %v3274_v12 = vpop.f32.mrb[25].mxu0  ;;  %v3523_v62 = vsel %vm1586_vm0, %v3470_v63, 0.0 }
 0x221   : > { %v3521_v31 = vsel %vm1586_vm0, %v3469_v51, 0.0  ;;  %v2179_v33 = vpop.f32.mrb[11].mxu1  ;;  %v7971_v60 = vadd.f32 %v3274_v12, %v2176_v53  ;;  %v7813_v48 = vpop.f32.mrb[26].mxu0  ;;  %v3525_v18 = vsel %vm1586_vm0, %v3471_v14, 0.0 }
 0x222   : > { %v3417_v46 = vadd.f32 %v3416_v16, %v3415_v41  ;;  %v3522_v19 = vadd.f32 %v3521_v31, %v3520_v3  ;;  %v7972_v61 = vadd.f32 %v7813_v48, %v7745_v50  ;;  %v3277_v10 = vpop.f32.mrb[27].mxu0 }
 0x223   : > { %v10403_v51 = vadd.f32 %v7971_v60, %v10209_v2  ;;  %v7973_v8 = vadd.f32 %v3277_v10, %v2179_v33 }
 0x224   : > { %v3524_v41 = vadd.f32 %v3523_v62, %v3522_v19  ;;  %v3419_v16 = vadd.f32 %v3418_v9, %v3417_v46  ;;  %v10417_v9 = vadd.f32 %v7970_v52, %v10209_v2  ;;  %v10423_v60 = vadd.f32 %v7972_v61, %v10209_v2 }
 0x225   : > { %v3420_v3 = vsel %vm1586_vm0, %v10403_v51, 0.0  ;;  %v3472_v53 = vmul.f32 %v10403_v51, %v10403_v51  ;;  %v10411_v63 = vadd.f32 %v7973_v8, %v10209_v2 }
 0x226   : > { %v3526_v31 = vadd.f32 %v3525_v18, %v3524_v41  ;;  %v3421_v19 = vadd.f32 %v3420_v3, %v3419_v16  ;;  %v3474_v62 = vmul.f32 %v10417_v9, %v10417_v9  ;;  %v3424_v8 = vsel %vm1586_vm0, %v10417_v9, 0.0 }
 0x227   : > { %v3527_v50 = vsel %vm1586_vm0, %v3472_v53, 0.0  ;;  %v3473_v12 = vmul.f32 %v10411_v63, %v10411_v63  ;;  %v3422_v46 = vsel %vm1586_vm0, %v10411_v63, 0.0  ;;  %v3475_v18 = vmul.f32 %v10423_v60, %v10423_v60 }
 0x228   : > { %v3528_v14 = vadd.f32 %v3527_v50, %v3526_v31  ;;  %v3423_v48 = vadd.f32 %v3422_v46, %v3421_v19  ;;  %v3531_v61 = vsel %vm1586_vm0, %v3474_v62, 0.0  ;;  %v3426_v45 = vsel %vm1586_vm0, %v10423_v60, 0.0 }
 0x229   : > { %v3529_v33 = vsel %vm1586_vm0, %v3473_v12, 0.0 }
 0x22a   : > { %v3530_v10 = vadd.f32 %v3529_v33, %v3528_v14  ;;  %v3425_v3 = vadd.f32 %v3424_v8, %v3423_v48 }
 0x22c   : > { %v3532_v33 = vadd.f32 %v3531_v61, %v3530_v10  ;;  %v3427_v8 = vadd.f32 %v3426_v45, %v3425_v3 }
 0x22e   : > { %v7748_v41 = vpop.f32.mrb[12].mxu1 }
 0x22f   : > { %v2192_v52 = vpop.f32.mrb[13].mxu1  ;;  %v7816_v16 = vpop.f32.mrb[28].mxu0 }
 0x230   : > { %v7749_v53 = vpop.f32.mrb[14].mxu1  ;;  %v7974_v31 = vadd.f32 %v7816_v16, %v7748_v41  ;;  %v3290_v50 = vpop.f32.mrb[29].mxu0  ;;  %v3533_v41 = vsel %vm1586_vm0, %v3475_v18, 0.0 }
 0x231   : > { %v2195_v12 = vpop.f32.mrb[15].mxu1  ;;  %v7975_v19 = vadd.f32 %v3290_v50, %v2192_v52  ;;  %v7817_v46 = vpop.f32.mrb[30].mxu0 }
 0x232   : > { %v7976_v25 = vadd.f32 %v7817_v46, %v7749_v53  ;;  %v3293_v14 = vpop.f32.mrb[31].mxu0  ;;  %v10435_v42 = vadd.f32 %v7974_v31, %v10209_v2  ;;  %v3534_v31 = vadd.f32 %v3533_v41, %v3532_v33 }
 0x233   : > { %v10438_v38 = vadd.f32 %v7975_v19, %v10209_v2  ;;  %v7977_v48 = vadd.f32 %v3293_v14, %v2195_v12 }
 0x234   : > { %v10446_v10 = vadd.f32 %v7976_v25, %v10209_v2  ;;  %v3478_v18 = vmul.f32 %v10435_v42, %v10435_v42  ;;  %v3432_v25 = vsel %vm1586_vm0, %v10435_v42, 0.0 }
 0x235   : > { %v3428_v62 = vsel %vm1586_vm0, %v10438_v38, 0.0  ;;  %v3476_v52 = vmul.f32 %v10438_v38, %v10438_v38  ;;  %v10449_v16 = vadd.f32 %v7977_v48, %v10209_v2 }
 0x236   : > { %v3429_v53 = vadd.f32 %v3428_v62, %v3427_v8  ;;  %v3479_v2 = vmul.f32 %v10446_v10, %v10446_v10  ;;  %v3434_v33 = vsel %vm1586_vm0, %v10446_v10, 0.0  ;;  %v3539_v48 = vsel %vm1586_vm0, %v3478_v18, 0.0 }
 0x237   : > { %v3477_v50 = vmul.f32 %v10449_v16, %v10449_v16  ;;  %v3430_v45 = vsel %vm1586_vm0, %v10449_v16, 0.0  ;;  %v3535_v3 = vsel %vm1586_vm0, %v3476_v52, 0.0 }
 0x238   : > { %v3431_v61 = vadd.f32 %v3430_v45, %v3429_v53  ;;  %v3536_v12 = vadd.f32 %v3535_v3, %v3534_v31  ;;  %v3541_v62 = vsel %vm1586_vm0, %v3479_v2, 0.0 }
 0x239   : > { %v3537_v19 = vsel %vm1586_vm0, %v3477_v50, 0.0 }
 0x23a   : > { %v3433_v46 = vadd.f32 %v3432_v25, %v3431_v61  ;;  %v3538_v14 = vadd.f32 %v3537_v19, %v3536_v12 }
 0x23c   : > { %v3435_v41 = vadd.f32 %v3434_v33, %v3433_v46  ;;  %v3540_v8 = vadd.f32 %v3539_v48, %v3538_v14 }
 0x23e   : > { %3436 = vadd.xlane.f32.xlu1 %v3435_v41  ;;  %v3542_v52 = vadd.f32 %v3541_v62, %v3540_v8 }
 0x240   : > { %3543 = vadd.xlane.f32.xlu0 %v3542_v52  ;;  %v3625_v52 = vsub.s32 1, %v8536_v1 }
 0x2cb   : > { %v3437_v53 = vpop.xlane.xlu1 %3436 }
 0x2cc   : > { %v3438_v31 = vrot.slane %v3437_v53, 4 }
 0x2cd   : > { %v3544_v45 = vpop.xlane.xlu0 %3543 }
 0x2ce   : > { %v3439_v3 = vadd.f32 %v3438_v31, %v3437_v53  ;;  %v3545_v55 = vrot.slane %v3544_v45, 4 }
 0x2d0   : > { %v3440_v50 = vrot.slane %v3439_v3, 2  ;;  %v3546_v61 = vadd.f32 %v3545_v55, %v3544_v45 }
 0x2d2   : > { %v3547_v12 = vrot.slane %v3546_v61, 2  ;;  %v3441_v25 = vadd.f32 %v3440_v50, %v3439_v3 }
 0x2d4   : > { %v3442_v19 = vrot.slane %v3441_v25, 1  ;;  %v3548_v57 = vadd.f32 %v3547_v12, %v3546_v61 }
 0x2d6   : > { %v3443_v44 = vadd.f32 %v3442_v19, %v3441_v25  ;;  %v3549_v18 = vrot.slane %v3548_v57, 1 }
 0x2d8   : > { %8098 = vpush %v3443_v44  ;;  %v3550_v46 = vadd.f32 %v3549_v18, %v3548_v57  ;;  %v3661_v44 = vsub.s32 2, %v8536_v1  ;;  %v10474_v57 = vrot.slane %v10206_v29, %v3625_v52 }
 0x2da   : > { %8100 = vpush %v3550_v46  ;;  %v10477_v53 = vrot.slane %v10206_v29, %v3661_v44 }
 0x309   : > { %s8099_s13 = spop %8098 }
 0x30a   : > { %v3445_v2 = vstv %s8099_s13 }
 0x30b   : > { %s8101_s14 = spop %8100  ;;  %v10467_v14 = vmul.f32 0.00048828125, %v3445_v2 }
 0x30c   : > { %v3552_v33 = vstv %s8101_s14 }
 0x30d   : > { %v3553_v48 = vmul.f32 0.00048828125, %v3552_v33  ;;  %v3554_v41 = vmul.f32 %v10467_v14, %v10467_v14  ;;  %v3557_v31 = vsub.f32 %v10215_v21, %v10467_v14  ;;  %v3558_v45 = vsub.f32 %v10223_v26, %v10467_v14 }
 0x30e   : > { %v3559_v3 = vsub.f32 %v10212_v6, %v10467_v14  ;;  %v3560_v50 = vsub.f32 %v10220_v23, %v10467_v14  ;;  %v3561_v61 = vsub.f32 %v10243_v54, %v10467_v14  ;;  %v3562_v12 = vsub.f32 %v10254_v4, %v10467_v14 }
 0x30f   : > { %v3555_v55 = vsub.f32 %v3553_v48, %v3554_v41  ;;  %v3569_v29 = vsub.f32 %v10306_v24, %v10467_v14  ;;  %v3570_v21 = vsub.f32 %v10317_v39, %v10467_v14  ;;  %v3571_v26 = vsub.f32 %v10310_v35, %v10467_v14 }
 0x310   : > { %v3572_v6 = vsub.f32 %v10321_v28, %v10467_v14  ;;  %v3573_v23 = vsub.f32 %v10342_v13, %v10467_v14  ;;  %v3574_v54 = vsub.f32 %v10353_v17, %v10467_v14  ;;  %v3575_v4 = vsub.f32 %v10339_v56, %v10467_v14 }
 0x311   : > { %v3556_v8 = vmax.f32 %v3555_v55, 0.0  ;;  %v3576_v24 = vsub.f32 %v10350_v36, %v10467_v14  ;;  %v3577_v39 = vsub.f32 %v10371_v7, %v10467_v14  ;;  %v3578_v35 = vsub.f32 %v10382_v32, %v10467_v14 }
 0x312   : > { %v3579_v28 = vsub.f32 %v10374_v58, %v10467_v14  ;;  %v3580_v13 = vsub.f32 %v10386_v43, %v10467_v14  ;;  %v3581_v56 = vsub.f32 %v10403_v51, %v10467_v14  ;;  %v3582_v36 = vsub.f32 %v10411_v63, %v10467_v14 }
 0x313   : > { %v3589_v62 = vadd.f32 1e-05, %v3556_v8  ;;  %v3583_v17 = vsub.f32 %v10417_v9, %v10467_v14  ;;  %v3584_v7 = vsub.f32 %v10423_v60, %v10467_v14  ;;  %v3585_v32 = vsub.f32 %v10438_v38, %v10467_v14 }
 0x314   : > { %v3586_v58 = vsub.f32 %v10449_v16, %v10467_v14  ;;  %v3587_v43 = vsub.f32 %v10435_v42, %v10467_v14  ;;  %v3588_v51 = vsub.f32 %v10446_v10, %v10467_v14 }
 0x315   : > { %8145 = vrsqrt.f32 %v3589_v62 }
 0x31f   : > { %v10511_v25 = vpop.eup %8145 }
 0x320   : > { %v3591_v63 = vmul.f32 %v10511_v25, %v3557_v31  ;;  %v3592_v19 = vmul.f32 %v10511_v25, %v3558_v45  ;;  %v3593_v9 = vmul.f32 %v10511_v25, %v3559_v3  ;;  %v3594_v60 = vmul.f32 %v10511_v25, %v3560_v50 }
 0x321   : > { %v3595_v18 = vmul.f32 %v10511_v25, %v3561_v61  ;;  %v3596_v38 = vmul.f32 %v10511_v25, %v3562_v12  ;;  %v3603_v16 = vmul.f32 %v10511_v25, %v3569_v29  ;;  %v10541_v46 = vmul.f32 %v10511_v25, %v3570_v21 }
 0x322   : > { %v10544_v42 = vmul.f32 %v10511_v25, %v3571_v26  ;;  %v10547_v10 = vmul.f32 %v10511_v25, %v3572_v6  ;;  %v10550_v2 = vmul.f32 %v10511_v25, %v3573_v23  ;;  %v10553_v33 = vmul.f32 %v10511_v25, %v3574_v54 }
 0x323   : > { %v10556_v48 = vmul.f32 %v10511_v25, %v3575_v4  ;;  %v10559_v41 = vmul.f32 %v10511_v25, %v3576_v24  ;;  %v10562_v55 = vmul.f32 %v10511_v25, %v3577_v39  ;;  %v10565_v8 = vmul.f32 %v10511_v25, %v3578_v35 }
 0x324   : > { %v10568_v62 = vmul.f32 %v10511_v25, %v3579_v28  ;;  %v10571_v52 = vmul.f32 %v10511_v25, %v3580_v13  ;;  %v10574_v44 = vmul.f32 %v10511_v25, %v3581_v56  ;;  %v10577_v31 = vmul.f32 %v10511_v25, %v3582_v36 }
 0x325   : > { %v10580_v45 = vmul.f32 %v10511_v25, %v3583_v17  ;;  %v10583_v3 = vmul.f32 %v10511_v25, %v3584_v7  ;;  %v10586_v50 = vmul.f32 %v10511_v25, %v3585_v32  ;;  %v10589_v61 = vmul.f32 %v10511_v25, %v3586_v58 }
 0x326   : > { %v10592_v12 = vmul.f32 %v10511_v25, %v3587_v43  ;;  %v10595_v29 = vmul.f32 %v10511_v25, %v3588_v51  ;;  %v3627_v21 = vmul.f32 %v10474_v57, %v3591_v63  ;;  %v3628_v26 = vmul.f32 %v10474_v57, %v3592_v19 }
 0x327   : > { %v3629_v6 = vmul.f32 %v10474_v57, %v3593_v9  ;;  %v3630_v23 = vmul.f32 %v10474_v57, %v3594_v60  ;;  %v3631_v54 = vmul.f32 %v10474_v57, %v3595_v18  ;;  %v3632_v4 = vmul.f32 %v10474_v57, %v3596_v38 }
 0x328   : > { %v10604_v24 = vadd.f32 %v10477_v53, %v3627_v21  ;;  %v10607_v39 = vadd.f32 %v10477_v53, %v3628_v26  ;;  %v3563_v51 = vsub.f32 %v10246_v40, %v10467_v14  ;;  %v3564_v63 = vsub.f32 %v10257_v0, %v10467_v14 }
 0x329   : > { %v10610_v35 = vadd.f32 %v10477_v53, %v3629_v6  ;;  %v10613_v28 = vadd.f32 %v10477_v53, %v3630_v23  ;;  %v10616_v13 = vadd.f32 %v10477_v53, %v3631_v54  ;;  %v10619_v56 = vadd.f32 %v10477_v53, %v3632_v4 }
 0x32a   : > { %v7369_v36 = vmul.f32 -1.442695, %v10604_v24  ;;  %v7370_v17 = vmul.f32 -1.442695, %v10607_v39  ;;  %v3565_v19 = vsub.f32 %v10274_v49, %v10467_v14  ;;  %v3566_v9 = vsub.f32 %v10285_v20, %v10467_v14 }
 0x32b   : > { %v7371_v7 = vmul.f32 -1.442695, %v10610_v35  ;;  %v7372_v32 = vmul.f32 -1.442695, %v10613_v28  ;;  %v7373_v58 = vmul.f32 -1.442695, %v10616_v13  ;;  %v3567_v60 = vsub.f32 %v10278_v59, %v10467_v14 }
 0x32c   : > { %8147 = vpow2.f32 %v7369_v36  ;;  %v7374_v43 = vmul.f32 -1.442695, %v10619_v56  ;;  %v3568_v18 = vsub.f32 %v10289_v47, %v10467_v14  ;;  %v3597_v38 = vmul.f32 %v10511_v25, %v3563_v51 }
 0x32d   : > { %8149 = vpow2.f32 %v7370_v17  ;;  %v3598_v40 = vmul.f32 %v10511_v25, %v3564_v63  ;;  %v3599_v0 = vmul.f32 %v10511_v25, %v3565_v19  ;;  %v3600_v49 = vmul.f32 %v10511_v25, %v3566_v9 }
 0x32e   : > { %8151 = vpow2.f32 %v7371_v7  ;;  %v3601_v21 = vmul.f32 %v10511_v25, %v3567_v60  ;;  %v3602_v20 = vmul.f32 %v10511_v25, %v3568_v18  ;;  %v3633_v59 = vmul.f32 %v10474_v57, %v3597_v38 }
 0x32f   : > { %8153 = vpow2.f32 %v7372_v32  ;;  %v3634_v26 = vmul.f32 %v10474_v57, %v3598_v40  ;;  %v3635_v47 = vmul.f32 %v10474_v57, %v3599_v0  ;;  %v3636_v14 = vmul.f32 %v10474_v57, %v3600_v49 }
 0x330   : > { %8155 = vpow2.f32 %v7373_v58  ;;  %v3637_v6 = vmul.f32 %v10474_v57, %v3601_v21  ;;  %v3638_v23 = vmul.f32 %v10474_v57, %v3602_v20  ;;  %v3639_v54 = vmul.f32 %v10474_v57, %v3603_v16 }
 0x331   : > { %8157 = vpow2.f32 %v7374_v43  ;;  %v3640_v36 = vmul.f32 %v10474_v57, %v10541_v46  ;;  %v3641_v25 = vmul.f32 %v10474_v57, %v10544_v42  ;;  %v3642_v17 = vmul.f32 %v10474_v57, %v10547_v10 }
 0x332   : > { %v3643_v7 = vmul.f32 %v10474_v57, %v10550_v2  ;;  %v3644_v43 = vmul.f32 %v10474_v57, %v10553_v33  ;;  %v3645_v16 = vmul.f32 %v10474_v57, %v10556_v48  ;;  %v3646_v46 = vmul.f32 %v10474_v57, %v10559_v41 }
 0x333   : > { %v3647_v42 = vmul.f32 %v10474_v57, %v10562_v55  ;;  %v3648_v10 = vmul.f32 %v10474_v57, %v10565_v8  ;;  %v3649_v2 = vmul.f32 %v10474_v57, %v10568_v62  ;;  %v3650_v33 = vmul.f32 %v10474_v57, %v10571_v52 }
 0x334   : > { %v10676_v48 = vmul.f32 %v10474_v57, %v10574_v44  ;;  %v10680_v55 = vmul.f32 %v10474_v57, %v10577_v31  ;;  %v10683_v8 = vadd.f32 %v10477_v53, %v3633_v59  ;;  %v10687_v52 = vmul.f32 %v10474_v57, %v10580_v45 }
 0x335   : > { %v10690_v44 = vadd.f32 %v10477_v53, %v3634_v26  ;;  %v10694_v31 = vmul.f32 %v10474_v57, %v10583_v3  ;;  %v10697_v40 = vadd.f32 %v10477_v53, %v3635_v47  ;;  %v10701_v0 = vmul.f32 %v10474_v57, %v10586_v50 }
 0x336   : > { %v8148_v4 = vpop.eup %8147  ;;  %v10705_v45 = vmul.f32 %v10474_v57, %v10589_v61  ;;  %v10708_v49 = vadd.f32 %v10477_v53, %v3636_v14  ;;  %v10712_v3 = vmul.f32 %v10474_v57, %v10592_v12  ;;  %v10715_v21 = vadd.f32 %v10477_v53, %v3637_v6 }
 0x337   : > { %v8150_v32 = vpop.eup %8149  ;;  %v3791_v58 = vadd.f32 1.0, %v8148_v4  ;;  %v7375_v20 = vmul.f32 -1.442695, %v10683_v8  ;;  %v10720_v50 = vmul.f32 %v10474_v57, %v10595_v29  ;;  %v10723_v61 = vadd.f32 %v10477_v53, %v3638_v23 }
 0x338   : > { %v8152_v51 = vpop.eup %8151  ;;  %v3792_v63 = vadd.f32 1.0, %v8150_v32  ;;  %v10726_v59 = vadd.f32 %v10477_v53, %v3639_v54  ;;  %v7376_v26 = vmul.f32 -1.442695, %v10690_v44  ;;  %v10734_v12 = vadd.f32 %v10477_v53, %v3640_v36 }
 0x339   : > { %v8154_v19 = vpop.eup %8153  ;;  %v3793_v9 = vadd.f32 1.0, %v8152_v51  ;;  %8159 = vrcp.f32 %v3791_v58  ;;  %v10737_v47 = vadd.f32 %v10477_v53, %v3641_v25  ;;  %v10740_v57 = vadd.f32 %v10477_v53, %v3642_v17 }
 0x33a   : > { %v8156_v41 = vpop.eup %8155  ;;  %v3794_v60 = vadd.f32 1.0, %v8154_v19  ;;  %8161 = vrcp.f32 %v3792_v63  ;;  %v7377_v29 = vmul.f32 -1.442695, %v10697_v40  ;;  %v10744_v14 = vadd.f32 %v10477_v53, %v3643_v7  ;;  %v10760_v7 = vld [vmem:[%s260_s17] ss:$0 sm:$0xff] }
 0x33b   : > { %v8158_v62 = vpop.eup %8157  ;;  %v3795_v18 = vadd.f32 1.0, %v8156_v41  ;;  %8163 = vrcp.f32 %v3793_v9  ;;  %v10747_v6 = vadd.f32 %v10477_v53, %v3644_v43  ;;  %v10750_v23 = vadd.f32 %v10477_v53, %v3645_v16 }
 0x33c   : > { %v3796_v38 = vadd.f32 1.0, %v8158_v62  ;;  %8165 = vrcp.f32 %v3794_v60  ;;  %v7378_v54 = vmul.f32 -1.442695, %v10708_v49  ;;  %v10754_v4 = vadd.f32 %v10477_v53, %v3646_v46 }
 0x33d   : > { %8167 = vrcp.f32 %v3795_v18  ;;  %v10757_v36 = vadd.f32 %v10477_v53, %v3647_v42  ;;  %v7379_v25 = vmul.f32 -1.442695, %v10715_v21  ;;  %v10763_v32 = vadd.f32 %v10477_v53, %v3648_v10 }
 0x33e   : > { %8169 = vrcp.f32 %v3796_v38  ;;  %v10766_v58 = vadd.f32 %v10477_v53, %v3649_v2  ;;  %v7380_v43 = vmul.f32 -1.442695, %v10723_v61  ;;  %v10771_v51 = vadd.f32 %v10477_v53, %v3650_v33 }
 0x33f   : > { %8171 = vpow2.f32 %v7375_v20  ;;  %v7381_v63 = vmul.f32 -1.442695, %v10726_v59  ;;  %v7382_v19 = vmul.f32 -1.442695, %v10734_v12  ;;  %v7383_v2 = vmul.f32 -1.442695, %v10737_v47 }
 0x340   : > { %8173 = vpow2.f32 %v7376_v26 }
 0x341   : > { %8175 = vpow2.f32 %v7377_v29 }
 0x342   : > { %8177 = vpow2.f32 %v7378_v54 }
 0x343   : > { %v8160_v17 = vpop.eup %8159  ;;  %8179 = vpow2.f32 %v7379_v25 }
 0x344   : > { %v8162_v16 = vpop.eup %8161  ;;  %v3887_v46 = vmul.f32 %v8160_v17, %v10604_v24  ;;  %v7384_v24 = vmul.f32 -1.442695, %v10740_v57  ;;  %8181 = vpow2.f32 %v7380_v43  ;;  %v7387_v17 = vmul.f32 -1.442695, %v10750_v23 }
 0x345   : > { %v8164_v42 = vpop.eup %8163  ;;  %v3888_v10 = vmul.f32 %v8162_v16, %v10607_v39  ;;  %v7385_v39 = vmul.f32 -1.442695, %v10744_v14  ;;  %8183 = vpow2.f32 %v7381_v63  ;;  %v7388_v43 = vmul.f32 -1.442695, %v10754_v4 }
 0x346   : > { %v8166_v9 = vpop.eup %8165  ;;  %v3889_v41 = vmul.f32 %v8164_v42, %v10610_v35  ;;  %v3926_v60 = vadd.f32 %v10760_v7, %v3887_v46  ;;  %v7386_v35 = vmul.f32 -1.442695, %v10747_v6  ;;  %8185 = vpow2.f32 %v7382_v19 }
 0x347   : > { %v8168_v33 = vpop.eup %8167  ;;  %v3890_v62 = vmul.f32 %v8166_v9, %v10613_v28  ;;  %v3927_v18 = vadd.f32 %v10760_v7, %v3888_v10  ;;  %8187 = vpow2.f32 %v7383_v2  ;;  %v10798_v63 = vadd.f32 %v10477_v53, %v10680_v55 }
 0x348   : > { %v8170_v38 = vpop.eup %8169  ;;  %v3891_v20 = vmul.f32 %v8168_v33, %v10616_v13  ;;  %v3928_v26 = vadd.f32 %v10760_v7, %v3889_v41  ;;  %8189 = vpow2.f32 %v7384_v24  ;;  %v7389_v10 = vmul.f32 -1.442695, %v10757_v36 }
 0x349   : > { %v3892_v29 = vmul.f32 %v8170_v38, %v10619_v56  ;;  %v3929_v54 = vadd.f32 %v10760_v7, %v3890_v62  ;;  %v3958_v25 = vpack.c.bf16 %v3927_v18, %v3926_v60  ;;  %v8172_v42 = vpop.eup %8171  ;;  %v10794_v56 = vadd.f32 %v10477_v53, %v10676_v48 }
 0x34a   : > { %v3930_v28 = vadd.f32 %v10760_v7, %v3891_v20  ;;  %8191 = vpow2.f32 %v7385_v39  ;;  %v8174_v19 = vpop.eup %8173  ;;  %v7390_v41 = vmul.f32 -1.442695, %v10763_v32  ;;  %v10805_v48 = vadd.f32 %v10477_v53, %v10687_v52 }
 0x34b   : > { %v3931_v13 = vadd.f32 %v10760_v7, %v3892_v29  ;;  %v3959_v16 = vpack.c.bf16 %v3929_v54, %v3928_v26  ;;  %v3997_v46 = vrot.slane %v3958_v25, 4  ;;  %8193 = vpow2.f32 %v7386_v35  ;;  %v8176_v60 = vpop.eup %8175 }
 0x34c   : > { %v10809_v55 = vadd.f32 %v10477_v53, %v10694_v31  ;;  %v7391_v24 = vmul.f32 -1.442695, %v10766_v58  ;;  %8195 = vpow2.f32 %v7387_v17  ;;  %v8178_v33 = vpop.eup %8177  ;;  %v7392_v39 = vmul.f32 -1.442695, %v10771_v51 }
 0x34d   : > { %v3960_v9 = vpack.c.bf16 %v3931_v13, %v3930_v28  ;;  %v3998_v2 = vrot.slane %v3959_v16, 4  ;;  %4045 = vst.msk [vmem:[#allocation3 + $0x8] sm:$0xf0] %vm3977_vm7, %v3997_v46  ;;  %8197 = vpow2.f32 %v7388_v43  ;;  %v10816_v38 = vpop.eup %8179  ;;  %v10821_v52 = vadd.f32 %v10477_v53, %v10701_v0 }
 0x34e   : > { %v7393_v31 = vmul.f32 -1.442695, %v10794_v56  ;;  %8199 = vpow2.f32 %v7389_v10  ;;  %v10824_v20 = vpop.eup %8181  ;;  %v7394_v35 = vmul.f32 -1.442695, %v10798_v63  ;;  %v10834_v54 = vadd.f32 %v10477_v53, %v10705_v45 }
 0x34f   : > { %v3999_v62 = vsel %vm3996_vm11, %v3997_v46, %v3998_v2  ;;  %v10813_v18 = vrot.slane %v3960_v9, 4  ;;  %8201 = vpow2.f32 %v7390_v41  ;;  %v10829_v29 = vpop.eup %8183  ;;  %v10838_v0 = vadd.f32 %v10477_v53, %v10712_v3  ;;  %v13177_v3 = vld [vmem:[#allocation5_spill] sm:$0xff] }
 0x350   : > { %4046 = vst.msk [vmem:[#allocation3 + $0x10] sm:$0xff] %vm1586_vm0, %v3999_v62  ;;  %v7395_v25 = vmul.f32 -1.442695, %v10805_v48  ;;  %8203 = vpow2.f32 %v7391_v24  ;;  %v8186_v28 = vpop.eup %8185  ;;  %v10843_v17 = vadd.f32 %v10477_v53, %v10720_v50  ;;  %v7396_v43 = vmul.f32 -1.442695, %v10809_v55 }
 0x351   : > { %v4001_v26 = vsel %vm3996_vm11, %v3998_v2, %v10813_v18  ;;  %8205 = vpow2.f32 %v7392_v39  ;;  %v8188_v13 = vpop.eup %8187  ;;  %v7397_v45 = vmul.f32 -1.442695, %v10821_v52  ;;  %vm13178_vm2 = vcmp.ne.s16.totalorder %v13177_v3, 0 }
 0x352   : > { %4047 = vst.msk [vmem:[#allocation3 + $0x18] sm:$0xff] %vm1586_vm0, %v4001_v26  ;;  %8207 = vpow2.f32 %v7393_v31  ;;  %v10847_v46 = vpop.eup %8189  ;;  %v3797_v2 = vadd.f32 1.0, %v8172_v42  ;;  %v7398_v53 = vmul.f32 -1.442695, %v10834_v54  ;;  %v7399_v50 = vmul.f32 -1.442695, %v10838_v0 }
 0x353   : > { %8209 = vpow2.f32 %v7394_v35  ;;  %v3798_v24 = vadd.f32 1.0, %v8174_v19  ;;  %v7400_v31 = vmul.f32 -1.442695, %v10843_v17  ;;  %v3799_v1 = vadd.f32 1.0, %v8176_v60  ;;  %v13182_v60 = vld [vmem:[#allocation7_spill] sm:$0xff] }
 0x354   : > { %v4477_v16 = vld [vmem:[#allocation3 + $0x8] sm:$0xf0]  ;;  %v8192_v41 = vpop.eup %8191  ;;  %8211 = vpow2.f32 %v7395_v25  ;;  %vm13181_vm7 = vcmp.ne.s16.totalorder %v13180_v5, 0  ;;  %v3800_v34 = vadd.f32 1.0, %v8178_v33 }
 0x355   : > { %v4479_v10 = vsel %vm13178_vm2, %v4477_v16, 0  ;;  %v4499_v9 = vshll.u32 %v4477_v16, 16  ;;  %v8194_v62 = vpop.eup %8193  ;;  %8213 = vpow2.f32 %v7396_v43  ;;  %vm13183_vm2 = vcmp.ne.s16.totalorder %v13182_v60, 0 }
 0x356   : > { %v4545_v26 = vrot.slane %v4479_v10, 1  ;;  %v8196_v30 = vpop.eup %8195  ;;  %8215 = vpow2.f32 %v7397_v45 }
 0x357   : > { %v10853_v39 = vld [vmem:[#allocation3 + $0x10] sm:$0xff]  ;;  %v8198_v11 = vpop.eup %8197  ;;  %v4501_v37 = vrot.slane %v4499_v9, 1  ;;  %8217 = vrcp.f32 %v3797_v2  ;;  %v4497_v9 = vshrl.u32 %v4477_v16, 16  ;;  %v3802_v16 = vadd.f32 1.0, %v10824_v20 }
 0x358   : > { %13179 = vst [vmem:[#allocation39_spill] sm:$0xff] %v10853_v39  ;;  %v4480_v42 = vsel %vm13181_vm7, %v10853_v39, 0  ;;  %v4131_v35 = vshll.u32 %v10853_v39, 16  ;;  %v4135_v10 = vshrl.u32 %v10853_v39, 16  ;;  %v8200_v3 = vpop.eup %8199  ;;  %8219 = vrcp.f32 %v3798_v24 }
 0x359   : > { %v10860_v25 = vld [vmem:[#allocation3 + $0x18] sm:$0xff]  ;;  %v4546_v19 = vrot.slane %v4480_v42, 1  ;;  %v8202_v33 = vpop.eup %8201  ;;  %vm13184_vm7 = vcmask 1046528   ;;  %8221 = vpow2.f32 %v7398_v53  ;;  %v4502_v22 = vor.u32 %v4501_v37, %v4497_v9 }
 0x35a   : > { %v10866_v43 = vsel %vm13183_vm2, %v10860_v25, 0  ;;  %v10868_v5 = vrot.slane %v4131_v35, 1  ;;  %v4139_v15 = vshll.u32 %v10860_v25, 16  ;;  %v8204_v39 = vpop.eup %8203  ;;  %8223 = vpow2.f32 %v7399_v50  ;;  %vm13185_vm2 = vmmov %vm13184_vm7 }
 0x35b   : > { %v4548_v45 = vrot.slane %v10866_v43, 1  ;;  %v4547_v42 = vsel %vm13184_vm7, %v4545_v26, %v4546_v19  ;;  %v3801_v35 = vadd.f32 1.0, %v10816_v38  ;;  %v8206_v27 = vpop.eup %8205  ;;  %8225 = vpow2.f32 %v7400_v31 }
 0x35c   : > { %4578 = vrot.lane.b32.xlu0 %v4547_v42, %s8490_s18  ;;  %v4137_v2 = vor.u32 %v4135_v10, %v10868_v5  ;;  %v4141_v60 = vrot.slane %v4139_v15, 1  ;;  %v8208_v53 = vpop.eup %8207  ;;  %vm13186_vm7 = vsmask.f32 7424  ;;  %v3803_v10 = vadd.f32 1.0, %v10829_v29 }
 0x35d   : > { %v4549_v24 = vsel %vm13185_vm2, %v4546_v19, %v4548_v45  ;;  %8227 = vrcp.f32 %v3799_v1  ;;  %v8210_v15 = vpop.eup %8209  ;;  %v3804_v50 = vadd.f32 1.0, %v8186_v28  ;;  %v3805_v42 = vadd.f32 1.0, %v8188_v13  ;;  %vm13187_vm2 = vmmov %vm13186_vm7 }
 0x35e   : > { %4580 = vrot.lane.b32.xlu1 %v4549_v24, %s8490_s18  ;;  %v4142_v26 = vsel %vm13186_vm7, %v4137_v2, %v4141_v60  ;;  %8229 = vrcp.f32 %v3800_v34  ;;  %v8212_v38 = vpop.eup %8211  ;;  %v4503_v20 = vsel %vm13187_vm2, %v4502_v22, %v10868_v5  ;;  %v3806_v31 = vadd.f32 1.0, %v10847_v46  ;;  %v8139_v34 = vld [vmem:[%s12862_s3 + $0xc] sm:$0xff]  }
 0x35f   : > { %8231 = vrcp.f32 %v3801_v35  ;;  %v8214_v37 = vpop.eup %8213  ;;  %v3807_v29 = vadd.f32 1.0, %v8192_v41  ;;  %v3808_v28 = vadd.f32 1.0, %v8194_v62  ;;  %v3809_v2 = vadd.f32 1.0, %v8196_v30  ;;  %7818 = vmatprep.subr.bf16.mxu1 %v8139_v34 }
 0x360   : > { %4254 = vrot.lane.b32.xlu0 %v4142_v26, %s8489_s28  ;;  %8233 = vrcp.f32 %v3802_v16  ;;  %v8216_v19 = vpop.eup %8215  ;;  %v3810_v22 = vadd.f32 1.0, %v8198_v11  ;;  %v4143_v24 = vshrl.u32 %v10860_v25, 16  ;;  %v3811_v41 = vadd.f32 1.0, %v8200_v3  ;;  %7819 = vmatpush3.bf16.msra.mxu1 %v8139_v34 }
 0x361   : > { %8235 = vrcp.f32 %v3803_v10  ;;  %v8218_v1 = vpop.eup %8217  ;;  %v3812_v26 = vadd.f32 1.0, %v8202_v33  ;;  %v3813_v10 = vadd.f32 1.0, %v8204_v39  ;;  %v3814_v11 = vadd.f32 1.0, %v8206_v27 }
 0x362   : > { %4520 = vrot.lane.b32.xlu1 %v4503_v20, %s8489_s28  ;;  %8237 = vrcp.f32 %v3804_v50  ;;  %v8220_v13 = vpop.eup %8219  ;;  %v3893_v9 = vmul.f32 %v8218_v1, %v10683_v8  ;;  %v3815_v8 = vadd.f32 1.0, %v8208_v53  ;;  %v3816_v20 = vadd.f32 1.0, %v8210_v15 }
 0x363   : > { %8239 = vrcp.f32 %v3805_v42  ;;  %v8222_v46 = vpop.eup %8221  ;;  %v3894_v35 = vmul.f32 %v8220_v13, %v10690_v44  ;;  %v10896_v44 = vor.u32 %v4143_v24, %v4141_v60  ;;  %v3817_v3 = vadd.f32 1.0, %v8212_v38 }
 0x364   : > { %8241 = vrcp.f32 %v3806_v31  ;;  %v8224_v62 = vpop.eup %8223  ;;  %v3932_v16 = vadd.f32 %v10760_v7, %v3893_v9  ;;  %v3818_v13 = vadd.f32 1.0, %v8214_v37  ;;  %v3820_v34 = vadd.f32 1.0, %v8222_v46 }
 0x365   : > { %8243 = vrcp.f32 %v3807_v29  ;;  %v8226_v50 = vpop.eup %8225  ;;  %v3933_v30 = vadd.f32 %v10760_v7, %v3894_v35  ;;  %v3819_v29 = vadd.f32 1.0, %v8216_v19  ;;  %v3821_v9 = vadd.f32 1.0, %v8224_v62 }
 0x366   : > { %8245 = vrcp.f32 %v3808_v28  ;;  %vm13190_vm2 = vcmask 1046528  }
 0x367   : > { %v8228_v42 = vpop.eup %8227  ;;  %8247 = vrcp.f32 %v3809_v2  ;;  %v3961_v1 = vpack.c.bf16 %v3933_v30, %v3932_v16 }
 0x368   : > { %v8230_v31 = vpop.eup %8229  ;;  %8249 = vrcp.f32 %v3810_v22  ;;  %v3895_v39 = vmul.f32 %v8228_v42, %v10697_v40 }
 0x369   : > { %v8232_v33 = vpop.eup %8231  ;;  %8251 = vrcp.f32 %v3811_v41  ;;  %v3896_v27 = vmul.f32 %v8230_v31, %v10708_v49  ;;  %v4002_v28 = vrot.slane %v3961_v1, 4  ;;  %v10938_v1 = vld [vmem:[%s12862_s3 + $0x14] ss:$0 sps:$4 sm:$0xff]  }
 0x36a   : > { %v8234_v53 = vpop.eup %8233  ;;  %8253 = vrcp.f32 %v3812_v26  ;;  %v3934_v60 = vadd.f32 %v10760_v7, %v3895_v39  ;;  %v3897_v15 = vmul.f32 %v8232_v33, %v10715_v21  ;;  %8094 = vmatprep.subr.msk.bf16.mxu1 %vm3996_vm11, %v10938_v1 }
 0x36b   : > { %v8236_v38 = vpop.eup %8235  ;;  %8255 = vrcp.f32 %v3813_v10  ;;  %v3935_v37 = vadd.f32 %v10760_v7, %v3896_v27  ;;  %v3898_v40 = vmul.f32 %v8234_v53, %v10723_v61  ;;  %v4003_v19 = vsel %vm3996_vm11, %v10813_v18, %v4002_v28 }
 0x36c   : > { %v8238_v2 = vpop.eup %8237  ;;  %8257 = vrcp.f32 %v3814_v11  ;;  %v3899_v49 = vmul.f32 %v8236_v38, %v10726_v59  ;;  %v3936_v22 = vadd.f32 %v10760_v7, %v3897_v15  ;;  %4048 = vst.msk [vmem:[#allocation3 + $0x20] sm:$0xff] %vm1586_vm0, %v4003_v19  ;;  %v3822_v61 = vadd.f32 1.0, %v8226_v50 }
 0x36d   : > { %v8240_v46 = vpop.eup %8239  ;;  %8259 = vrcp.f32 %v3815_v8  ;;  %v3962_v21 = vpack.c.bf16 %v3935_v37, %v3934_v60  ;;  %v3900_v35 = vmul.f32 %v8238_v2, %v10734_v12  ;;  %v3937_v24 = vadd.f32 %v10760_v7, %v3898_v40  ;;  %v13188_v60 = vld [vmem:[#allocation8_spill] sm:$0xff] }
 0x36e   : > { %v8242_v41 = vpop.eup %8241  ;;  %8261 = vrcp.f32 %v3816_v20  ;;  %v3901_v62 = vmul.f32 %v8240_v46, %v10737_v47  ;;  %v10913_v18 = vadd.f32 %v10760_v7, %v3899_v49  ;;  %vm13189_vm7 = vcmp.ne.s16.totalorder %v13188_v60, 0 }
 0x36f   : > { %v8244_v59 = vpop.eup %8243  ;;  %8263 = vrcp.f32 %v3817_v3  ;;  %v4004_v16 = vrot.slane %v3962_v21, 4  ;;  %v3902_v26 = vmul.f32 %v8242_v41, %v10740_v57  ;;  %v3963_v10 = vpack.c.bf16 %v3937_v24, %v3936_v22 }
 0x370   : > { %v8246_v30 = vpop.eup %8245  ;;  %8265 = vrcp.f32 %v3818_v13  ;;  %v3903_v12 = vmul.f32 %v8244_v59, %v10744_v14  ;;  %v10918_v11 = vadd.f32 %v10760_v7, %v3900_v35  ;;  %v10921_v50 = vadd.f32 %v10760_v7, %v3901_v62 }
 0x371   : > { %v8248_v47 = vpop.eup %8247  ;;  %8267 = vrcp.f32 %v3819_v29  ;;  %v4005_v8 = vsel %vm3996_vm11, %v4002_v28, %v4004_v16  ;;  %v3904_v42 = vmul.f32 %v8246_v30, %v10747_v6  ;;  %v10925_v20 = vrot.slane %v3963_v10, 4 }
 0x372   : > { %v8250_v57 = vpop.eup %8249  ;;  %8269 = vrcp.f32 %v3820_v34  ;;  %4049 = vst.msk [vmem:[#allocation3 + $0x28] sm:$0xff] %vm1586_vm0, %v4005_v8  ;;  %v3905_v14 = vmul.f32 %v8248_v47, %v10750_v23  ;;  %v10930_v3 = vadd.f32 %v10760_v7, %v3902_v26  ;;  %v10933_v31 = vadd.f32 %v10760_v7, %v3903_v12  ;;  %v13192_v26 = vld [vmem:[#allocation9_spill] sm:$0xff] }
 0x373   : > { %v8252_v6 = vpop.eup %8251  ;;  %8271 = vrcp.f32 %v3821_v9  ;;  %v3906_v13 = vmul.f32 %v8250_v57, %v10754_v4  ;;  %v4007_v39 = vsel %vm3996_vm11, %v4004_v16, %v10925_v20  ;;  %v10944_v23 = vadd.f32 %v10760_v7, %v3904_v42  ;;  %v10946_v29 = vld [vmem:[#allocation3 + $0x20] sm:$0xff] }
 0x374   : > { %v8254_v33 = vpop.eup %8253  ;;  %8273 = vrcp.f32 %v3822_v61  ;;  %v3907_v34 = vmul.f32 %v8252_v6, %v10757_v36  ;;  %4050 = vst.msk [vmem:[#allocation3 + $0x30] sm:$0xff] %vm1586_vm0, %v4007_v39  ;;  %v10951_v27 = vadd.f32 %v10760_v7, %v3905_v14  ;;  %v3964_v4 = vpack.c.bf16 %v10918_v11, %v10913_v18 }
 0x375   : > { %v8256_v53 = vpop.eup %8255  ;;  %v4147_v28 = vshll.u32 %v10946_v29, 16  ;;  %v4482_v15 = vsel %vm13189_vm7, %v10946_v29, 0  ;;  %v3908_v36 = vmul.f32 %v8254_v33, %v10763_v32  ;;  %v10963_v38 = vadd.f32 %v10760_v7, %v3906_v13 }
 0x376   : > { %v8258_v9 = vpop.eup %8257  ;;  %v4550_v37 = vrot.slane %v4482_v15, 1  ;;  %v3909_v40 = vmul.f32 %v8256_v53, %v10766_v58  ;;  %v10967_v2 = vadd.f32 %v10760_v7, %v3907_v34  ;;  %v4151_v19 = vshrl.u32 %v10946_v29, 16 }
 0x377   : > { %v8260_v49 = vpop.eup %8259  ;;  %v10970_v22 = vrot.slane %v4147_v28, 1  ;;  %v3910_v46 = vmul.f32 %v8258_v9, %v10771_v51  ;;  %v3947_v21 = vadd.f32 %v10760_v7, %v3908_v36  ;;  %v3965_v32 = vpack.c.bf16 %v10930_v3, %v10921_v50 }
 0x378   : > { %v8262_v35 = vpop.eup %8261  ;;  %v4551_v58 = vsel %vm13190_vm2, %v4548_v45, %v4550_v37  ;;  %v3911_v24 = vmul.f32 %v8260_v49, %v10794_v56  ;;  %v3948_v41 = vadd.f32 %v10760_v7, %v3909_v40  ;;  %v3966_v61 = vpack.c.bf16 %v10944_v23, %v10933_v31 }
 0x379   : > { %v8264_v62 = vpop.eup %8263  ;;  %vm13191_vm7 = vsmask.f32 7424  ;;  %4582 = vrot.lane.b32.xlu0 %v4551_v58, %s8490_s18  ;;  %v10987_v59 = vld [vmem:[#allocation3 + $0x28] sm:$0xff]  ;;  %v3912_v43 = vmul.f32 %v8262_v35, %v10798_v63  ;;  %v3949_v45 = vadd.f32 %v10760_v7, %v3910_v46  ;;  %v4153_v56 = vor.u32 %v4151_v19, %v10970_v22 }
 0x37a   : > { %v4150_v51 = vsel %vm13191_vm7, %v10896_v44, %v10970_v22  ;;  %v8266_v16 = vpop.eup %8265  ;;  %vm13193_vm2 = vcmp.ne.s16.totalorder %v13192_v26, 0  ;;  %v3913_v30 = vmul.f32 %v8264_v62, %v10805_v48  ;;  %v3950_v44 = vadd.f32 %v10760_v7, %v3911_v24  ;;  %v13194_v48 = vld [vmem:[#allocation10_spill] sm:$0xff] }
 0x37b   : > { %4256 = vrot.lane.b32.xlu1 %v4150_v51, %s8489_s28  ;;  %v4483_v10 = vsel %vm13193_vm2, %v10987_v59, 0  ;;  %v4155_v12 = vshll.u32 %v10987_v59, 16  ;;  %v8268_v50 = vpop.eup %8267  ;;  %v3914_v63 = vmul.f32 %v8266_v16, %v10809_v55  ;;  %v11000_v8 = vld [vmem:[#allocation3 + $0x30] sm:$0xff]  ;;  %v3951_v42 = vadd.f32 %v10760_v7, %v3912_v43 }
 0x37c   : > { %v4552_v47 = vrot.slane %v4483_v10, 1  ;;  %v3967_v57 = vpack.c.bf16 %v10963_v38, %v10951_v27  ;;  %v8270_v14 = vpop.eup %8269  ;;  %v3915_v3 = vmul.f32 %v8268_v50, %v10821_v52  ;;  %vm13195_vm7 = vcmp.ne.s16.totalorder %v13194_v48, 0 }
 0x37d   : > { %v11009_v31 = vsel %vm13195_vm7, %v11000_v8, 0  ;;  %v3952_v6 = vadd.f32 %v10760_v7, %v3913_v30  ;;  %v4157_v13 = vrot.slane %v4155_v12, 1  ;;  %v8272_v39 = vpop.eup %8271  ;;  %vm13196_vm2 = vcmask 1046528  }
 0x37e   : > { %v4553_v55 = vsel %vm13196_vm2, %v4550_v37, %v4552_v47  ;;  %v3916_v23 = vmul.f32 %v8270_v14, %v10834_v54  ;;  %v4554_v33 = vrot.slane %v11009_v31, 1  ;;  %v3953_v34 = vadd.f32 %v10760_v7, %v3914_v63  ;;  %v8274_v27 = vpop.eup %8273 }
 0x37f   : > { %4584 = vrot.lane.b32.xlu1 %v4553_v55, %s8490_s18  ;;  %v3917_v52 = vmul.f32 %v8272_v39, %v10838_v0  ;;  %v3954_v53 = vadd.f32 %v10760_v7, %v3915_v3  ;;  %vm13197_vm7 = vsmask.f32 7424  ;;  %v3968_v15 = vpack.c.bf16 %v3947_v21, %v10967_v2  ;;  %v13202_v39 = vld [vmem:[#allocation12_spill] sm:$0xff] }
 0x380   : > { %v11020_v28 = vsel %vm13197_vm7, %v4153_v56, %v4157_v13  ;;  %v3918_v36 = vmul.f32 %v8274_v27, %v10843_v17  ;;  %v4555_v54 = vsel %vm13196_vm2, %v4552_v47, %v4554_v33  ;;  %v3955_v38 = vadd.f32 %v10760_v7, %v3916_v23  ;;  %v11068_v47 = vld [vmem:[%s12862_s3] sm:$0xff]  }
 0x381   : > { %v3969_v9 = vpack.c.bf16 %v3949_v45, %v3948_v41  ;;  %4586 = vrot.lane.b32.xlu0 %v4555_v54, %s8490_s18  ;;  %v3956_v0 = vadd.f32 %v10760_v7, %v3917_v52  ;;  %v3970_v37 = vpack.c.bf16 %v3951_v42, %v3950_v44  ;;  %v3971_v40 = vpack.c.bf16 %v3953_v34, %v3952_v6 }
 0x382   : > { %v4159_v19 = vshrl.u32 %v10987_v59, 16  ;;  %v3957_v49 = vadd.f32 %v10760_v7, %v3918_v36  ;;  %v3972_v2 = vpack.c.bf16 %v3955_v38, %v3954_v53  ;;  %v4163_v17 = vshll.u32 %v11000_v8, 16 }
 0x383   : > { %v4008_v46 = vrot.slane %v3964_v4, 4  ;;  %4258 = vrot.lane.b32.xlu1 %v11020_v28, %s8489_s28  ;;  %v4010_v35 = vrot.slane %v3965_v32, 4  ;;  %v4012_v58 = vrot.slane %v3966_v61, 4  ;;  %v4014_v24 = vrot.slane %v3967_v57, 4  ;;  %v13199_v57 = vld [vmem:[#allocation11_spill] sm:$0xff] }
 0x384   : > { %v4161_v21 = vor.u32 %v4159_v19, %v4157_v13  ;;  %v3973_v41 = vpack.c.bf16 %v3957_v49, %v3956_v0  ;;  %v4165_v62 = vrot.slane %v4163_v17, 1  ;;  %v4016_v51 = vrot.slane %v3968_v15, 4  ;;  %v13206_v0 = vld [vmem:[#allocation15_spill] sm:$0xff] }
 0x385   : > { %v4018_v43 = vrot.slane %v3969_v9, 4  ;;  %v4020_v45 = vrot.slane %v3970_v37, 4  ;;  %v4022_v7 = vrot.slane %v3971_v40, 4  ;;  %v4024_v56 = vrot.slane %v3972_v2, 4  ;;  %v13208_v40 = vld [vmem:[#allocation16_spill] sm:$0xff] }
 0x386   : > { %v4009_v16 = vsel %vm3996_vm11, %v10925_v20, %v4008_v46  ;;  %v11041_v18 = vsel %vm13197_vm7, %v4161_v21, %v4165_v62  ;;  %v4026_v11 = vrot.slane %v3973_v41, 4  ;;  %v4011_v4 = vsel %vm3996_vm11, %v4008_v46, %v4010_v35 }
 0x387   : > { %4051 = vst.msk [vmem:[#allocation3 + $0x38] sm:$0xff] %vm1586_vm0, %v4009_v16  ;;  %v4013_v32 = vsel %vm3996_vm11, %v4010_v35, %v4012_v58  ;;  %4260 = vrot.lane.b32.xlu0 %v11041_v18, %s8489_s28  ;;  %v4015_v61 = vsel %vm3996_vm11, %v4012_v58, %v4014_v24  ;;  %v4017_v10 = vsel %vm3996_vm11, %v4014_v24, %v4016_v51  ;;  %4052 = vst.msk [vmem:[#allocation3 + $0x40] sm:$0xff] %vm1586_vm0, %v4011_v4 }
 0x388   : > { %v4019_v30 = vsel %vm3996_vm11, %v4016_v51, %v4018_v43  ;;  %v4021_v20 = vsel %vm3996_vm11, %v4018_v43, %v4020_v45  ;;  %4053 = vst.msk [vmem:[#allocation3 + $0x48] sm:$0xff] %vm1586_vm0, %v4013_v32  ;;  %v4023_v44 = vsel %vm3996_vm11, %v4020_v45, %v4022_v7  ;;  %v4025_v12 = vsel %vm3996_vm11, %v4022_v7, %v4024_v56 }
 0x389   : > { %v4027_v50 = vsel %vm3996_vm11, %v4024_v56, %v4026_v11  ;;  %4061 = vst.msk [vmem:[#allocation3 + $0x88] sm:$0xf] %vm12978_vm6, %v4026_v11  ;;  %v4883_v42 = vsel %vm3996_vm11, %v10938_v1, 0  ;;  %vm13200_vm2 = vcmp.ne.s16.totalorder %v13199_v57, 0  ;;  %vm13203_vm7 = vcmp.ne.s16.totalorder %v13202_v39, 0  ;;  %v13214_v56 = vld [vmem:[#allocation18_spill] sm:$0xff] }
 0x38a   : > { %4054 = vst.msk [vmem:[#allocation3 + $0x50] sm:$0xff] %vm1586_vm0, %v4015_v61  ;;  %4055 = vst.msk [vmem:[#allocation3 + $0x58] sm:$0xff] %vm1586_vm0, %v4017_v10  ;;  %7821 = vmatpush3.bf16.msra.mxu1 %v4883_v42  ;;  %v4167_v23 = vshrl.u32 %v11000_v8, 16  ;;  %vm13207_vm6 = vcmp.ne.s16.totalorder %v13206_v0, 0  ;;  %vm13209_vm13 = vcmp.ne.s16.totalorder %v13208_v40, 0  ;;  %v13216_v11 = vld [vmem:[#allocation19_spill] sm:$0xff] }
 0x38b   : > { %4056 = vst.msk [vmem:[#allocation3 + $0x60] sm:$0xff] %vm1586_vm0, %v4019_v30  ;;  %4057 = vst.msk [vmem:[#allocation3 + $0x68] sm:$0xff] %vm1586_vm0, %v4021_v20  ;;  %7854 = vmatprep.subr.bf16.mxu1 %v11068_v47 }
 0x38c   : > { %4058 = vst.msk [vmem:[#allocation3 + $0x70] sm:$0xff] %vm1586_vm0, %v4023_v44  ;;  %4059 = vst.msk [vmem:[#allocation3 + $0x78] sm:$0xff] %vm1586_vm0, %v4025_v12  ;;  %v4169_v54 = vor.u32 %v4167_v23, %v4165_v62 }
 0x38d   : > { %4060 = vst.msk [vmem:[#allocation3 + $0x80] sm:$0xff] %vm1586_vm0, %v4027_v50 }
 0x38e   : > { %v11070_v63 = vld [vmem:[#allocation3 + $0x38] sm:$0xff]  ;;  %v11077_v3 = vld [vmem:[#allocation3 + $0x40] sm:$0xff] }
 0x38f   : > { %13198 = vst [vmem:[#allocation8_spill] sm:$0xff] %v11070_v63  ;;  %v4485_v14 = vsel %vm13200_vm2, %v11070_v63, 0  ;;  %13201 = vst [vmem:[#allocation9_spill] sm:$0xff] %v11077_v3  ;;  %v4171_v6 = vshll.u32 %v11070_v63, 16  ;;  %v4486_v55 = vsel %vm13203_vm7, %v11077_v3, 0  ;;  %v11084_v34 = vld [vmem:[#allocation3 + $0x48] sm:$0xff] }
 0x390   : > { %v4556_v13 = vrot.slane %v4485_v14, 1  ;;  %v4558_v1 = vrot.slane %v4486_v55, 1  ;;  %v4175_v53 = vshrl.u32 %v11070_v63, 16  ;;  %v4179_v15 = vshll.u32 %v11077_v3, 16 }
 0x391   : > { %v11086_v27 = vld [vmem:[#allocation3 + $0x50] sm:$0xff]  ;;  %v4173_v52 = vrot.slane %v4171_v6, 1  ;;  %vm13204_vm2 = vcmask 1046528   ;;  %v4487_v37 = vsel %vm13207_vm6, %v11084_v34, 0  ;;  %v4187_v31 = vshll.u32 %v11084_v34, 16  ;;  %v11115_v58 = vld [vmem:[#allocation3 + $0x58] sm:$0xff] }
 0x392   : > { %v4557_v36 = vsel %vm13204_vm2, %v4554_v33, %v4556_v13  ;;  %vm13205_vm7 = vmmov %vm13204_vm2  ;;  %v4488_v19 = vsel %vm13209_vm13, %v11086_v27, 0  ;;  %v4181_v49 = vrot.slane %v4179_v15, 1  ;;  %vm13210_vm2 = vsmask.f32 7424  ;;  %v11117_v24 = vld [vmem:[#allocation3 + $0x60] sm:$0xff]  ;;  %v11143_v42 = vld [vmem:[#allocation3 + $0x68] sm:$0xff] }
 0x393   : > { %4588 = vrot.lane.b32.xlu1 %v4557_v36, %s8490_s18  ;;  %v4559_v38 = vsel %vm13205_vm7, %v4556_v13, %v4558_v1  ;;  %v4177_v9 = vor.u32 %v4175_v53, %v4173_v52  ;;  %v11105_v33 = vsel %vm13210_vm2, %v4169_v54, %v4173_v52  ;;  %v4560_v2 = vrot.slane %v4487_v37, 1  ;;  %vm13211_vm7 = vmmov %vm13210_vm2  ;;  %v11152_v55 = vld [vmem:[#allocation3 + $0x70] sm:$0xff]  ;;  %v13224_v15 = vld [vmem:[#allocation21_spill] sm:$0xff] }
 0x394   : > { %4590 = vrot.lane.b32.xlu0 %v4559_v38, %s8490_s18  ;;  %v4562_v17 = vrot.slane %v4488_v19, 1  ;;  %v4189_v21 = vrot.slane %v4187_v31, 1  ;;  %v4183_v35 = vshrl.u32 %v11077_v3, 16  ;;  %v4191_v41 = vshrl.u32 %v11084_v34, 16 }
 0x395   : > { %v11110_v46 = vsel %vm13211_vm7, %v4177_v9, %v4181_v49  ;;  %v4195_v62 = vshll.u32 %v11086_v27, 16  ;;  %vm13212_vm13 = vcmask 1046528   ;;  %vm13215_vm2 = vcmp.ne.s16.totalorder %v13214_v56, 0  ;;  %v13226_v9 = vld [vmem:[#allocation22_spill] sm:$0xff] }
 0x396   : > { %v4561_v51 = vsel %vm13212_vm13, %v4558_v1, %v4560_v2  ;;  %vm13213_vm6 = vmmov %vm13212_vm13  ;;  %v4185_v45 = vor.u32 %v4183_v35, %v4181_v49  ;;  %v4193_v7 = vor.u32 %v4191_v41, %v4189_v21  ;;  %v4489_v16 = vsel %vm13215_vm2, %v11115_v58, 0 }
 0x397   : > { %4262 = vrot.lane.b32.xlu1 %v11105_v33, %s8489_s28  ;;  %v4563_v43 = vsel %vm13213_vm6, %v4560_v2, %v4562_v17  ;;  %vm13217_vm7 = vcmp.ne.s16.totalorder %v13216_v11, 0  ;;  %v4203_v32 = vshll.u32 %v11115_v58, 16  ;;  %v4197_v61 = vrot.slane %v4195_v62, 1  ;;  %v11180_v62 = vld [vmem:[#allocation3 + $0x78] sm:$0xff] }
 0x398   : > { %4264 = vrot.lane.b32.xlu0 %v11110_v46, %s8489_s28  ;;  %v4490_v4 = vsel %vm13217_vm7, %v11117_v24, 0  ;;  %vm13218_vm13 = vsmask.f32 7424  ;;  %v4564_v30 = vrot.slane %v4489_v16, 1  ;;  %v4199_v50 = vshrl.u32 %v11086_v27, 16  ;;  %v11194_v16 = vld [vmem:[#allocation3 + $0x80] sm:$0xff] }
 0x399   : > { %v11133_v10 = vsel %vm13218_vm13, %v4185_v45, %v4189_v21  ;;  %v4566_v20 = vrot.slane %v4490_v4, 1  ;;  %vm13219_vm6 = vmmov %vm13218_vm13  ;;  %v4205_v12 = vrot.slane %v4203_v32, 1  ;;  %vm13221_vm2 = vcmp.ne.s16.totalorder %v13202_v39, 0  ;;  %13234 = vst [vmem:[#allocation15_spill] sm:$0xff] %v11194_v16 }
 0x39a   : > { %v11138_v44 = vsel %vm13219_vm6, %v4193_v7, %v4197_v61  ;;  %v11148_v14 = vsel %vm13221_vm2, %v11070_v63, 0  ;;  %v4207_v6 = vshrl.u32 %v11115_v58, 16  ;;  %v4211_v13 = vshll.u32 %v11117_v24, 16 }
 0x39b   : > { %4592 = vrot.lane.b32.xlu1 %v4561_v51, %s8490_s18  ;;  %13220 = vst [vmem:[#allocation10_spill] sm:$0xff] %v11138_v44  ;;  %vm13222_vm7 = vcmask 1046528   ;;  %v4201_v52 = vor.u32 %v4199_v50, %v4197_v61  ;;  %vm13225_vm6 = vcmp.ne.s16.totalorder %v13224_v15, 0  ;;  %v4219_v54 = vshll.u32 %v11143_v42, 16  ;;  %v13236_v61 = vld [vmem:[#allocation24_spill] sm:$0xff] }
 0x39c   : > { %4594 = vrot.lane.b32.xlu0 %v4563_v43, %s8490_s18  ;;  %v4565_v23 = vsel %vm13222_vm7, %v4562_v17, %v4564_v30  ;;  %vm13223_vm13 = vmmov %vm13222_vm7  ;;  %v4209_v53 = vor.u32 %v4207_v6, %v4205_v12  ;;  %v4491_v36 = vsel %vm13225_vm6, %v11143_v42, 0  ;;  %v12981_v38 = vrot.slane %v11148_v14, 1 }
 0x39d   : > { %v4567_v1 = vsel %vm13223_vm13, %v4564_v30, %v4566_v20  ;;  %vm13227_vm2 = vcmp.ne.s16.totalorder %v13226_v9, 0  ;;  %vm13228_vm7 = vcmp.ne.s16.totalorder %v13206_v0, 0  ;;  %v4213_v31 = vrot.slane %v4211_v13, 1  ;;  %v13239_v13 = vld [vmem:[#allocation25_spill] sm:$0xff] }
 0x39e   : > { %v4492_v37 = vsel %vm13227_vm2, %v11152_v55, 0  ;;  %v11169_v19 = vsel %vm13228_vm7, %v11077_v3, 0  ;;  %vm13229_vm13 = vsmask.f32 7424  ;;  %v4568_v17 = vrot.slane %v4491_v36, 1 }
 0x39f   : > { %4266 = vrot.lane.b32.xlu1 %v11133_v10, %s8489_s28  ;;  %v12980_v49 = vrot.slane %v11169_v19, 1  ;;  %v11173_v2 = vsel %vm13229_vm13, %v4201_v52, %v4205_v12  ;;  %vm13231_vm6 = vmmov %vm13229_vm13  ;;  %v4570_v35 = vrot.slane %v4492_v37, 1  ;;  %v4221_v41 = vrot.slane %v4219_v54, 1  ;;  %v4478_v52 = vld [vmem:[#allocation3 + $0x88] sm:$0x1f] }
 0x3a0   : > { %4268 = vrot.lane.b32.xlu0 %v11138_v44, %s8489_s28  ;;  %13230 = vst [vmem:[#allocation11_spill] sm:$0xff] %v11173_v2  ;;  %v11178_v21 = vsel %vm13231_vm6, %v4209_v53, %v4213_v31  ;;  %vm13233_vm2 = vcmask 1046528   ;;  %v4215_v43 = vshrl.u32 %v11117_v24, 16  ;;  %v4223_v45 = vshrl.u32 %v11143_v42, 16  ;;  %v11211_v37 = vld [vmem:[#allocation3] sm:$0xf0] }
 0x3a1   : > { %13232 = vst [vmem:[#allocation12_spill] sm:$0xff] %v11178_v21  ;;  %v11187_v51 = vsel %vm13233_vm2, %v12981_v38, %v12980_v49  ;;  %v4227_v7 = vshll.u32 %v11152_v55, 16  ;;  %vm13235_vm7 = vmmov %vm13233_vm2  ;;  %vm13237_vm13 = vcmp.ne.s16.totalorder %v13236_v61, 0  ;;  %v4235_v12 = vshll.u32 %v11180_v62, 16 }
 0x3a2   : > { %v4569_v4 = vsel %vm13235_vm7, %v4566_v20, %v4568_v17  ;;  %v4217_v32 = vor.u32 %v4215_v43, %v4213_v31  ;;  %v4493_v30 = vsel %vm13237_vm13, %v11180_v62, 0  ;;  %vm13238_vm6 = vmmov %vm13233_vm2  ;;  %v4225_v6 = vor.u32 %v4223_v45, %v4221_v41  ;;  %v11219_v45 = vld [vmem:[#allocation3 + $0x88] sm:$0xf] }
 0x3a3   : > { %4596 = vrot.lane.b32.xlu1 %v4565_v23, %s8490_s18  ;;  %v4571_v50 = vsel %vm13238_vm6, %v4568_v17, %v4570_v35  ;;  %vm13240_vm2 = vcmp.ne.s16.totalorder %v13239_v13, 0  ;;  %v4572_v20 = vrot.slane %v4493_v30, 1  ;;  %vm13241_vm7 = vsmask.f32 7424  ;;  %13245 = vst [vmem:[#allocation19_spill] sm:$0xff] %v11219_v45 }
 0x3a4   : > { %4598 = vrot.lane.b32.xlu0 %v4567_v1, %s8490_s18  ;;  %v4494_v23 = vsel %vm13240_vm2, %v11194_v16, 0  ;;  %v4229_v1 = vrot.slane %v4227_v7, 1  ;;  %v11208_v53 = vsel %vm13241_vm7, %v4217_v32, %v4221_v41  ;;  %v4231_v36 = vshrl.u32 %v11152_v55, 16  ;;  %vm13243_vm13 = vmmov %vm13241_vm7 }
 0x3a5   : > { %13242 = vst [vmem:[#allocation16_spill] sm:$0xff] %v11208_v53  ;;  %v4237_v54 = vrot.slane %v4235_v12, 1  ;;  %v4574_v17 = vrot.slane %v4494_v23, 1  ;;  %v4505_v43 = vshll.u32 %v11194_v16, 16  ;;  %vm13246_vm6 = vcmp.ne.s16.totalorder %v13194_v48, 0 }
 0x3a6   : > { %v11216_v31 = vsel %vm13243_vm13, %v4225_v6, %v4229_v1  ;;  %v11224_v41 = vsel %vm13246_vm6, %v11070_v63, 0  ;;  %v4239_v7 = vshrl.u32 %v11180_v62, 16  ;;  %v4116_v30 = vshrl.u32 %v11211_v37, 16 }
 0x3a7   : > { %4270 = vrot.lane.b32.xlu1 %v11173_v2, %s8489_s28  ;;  %13244 = vst [vmem:[#allocation18_spill] sm:$0xff] %v11216_v31  ;;  %vm13249_vm7 = vcmask 1046528   ;;  %v4233_v6 = vor.u32 %v4231_v36, %v4229_v1  ;;  %vm13250_vm13 = vcmp.ne.s16.totalorder %v13199_v57, 0  ;;  %vm13251_vm6 = vcmp.ne.s16.totalorder %v13202_v39, 0 }
 0x3a8   : > { %4272 = vrot.lane.b32.xlu0 %v11178_v21, %s8489_s28  ;;  %v5444_v23 = vsel %vm13250_vm13, %v11077_v3, 0  ;;  %v5445_v49 = vsel %vm13251_vm6, %v11084_v34, 0  ;;  %v11242_v38 = vor.u32 %v4239_v7, %v4237_v54  ;;  %v4507_v1 = vrot.slane %v4505_v43, 1 }
 0x3a9   : > { %v5654_v21 = vrot.slane %v5445_v49, 1  ;;  %v4118_v12 = vshll.u32 %v11211_v37, 16  ;;  %v13253_v39 = vrot.slane %v11224_v41, 1  ;;  %vm13256_vm6 = vcmp.ne.s16.totalorder %v13206_v0, 0 }
 0x3aa   : > { %v5446_v49 = vsel %vm13256_vm6, %v11086_v27, 0  ;;  %v11267_v43 = vsel %vm13258_vm8, %v4233_v6, %v4237_v54  ;;  %vm13263_vm6 = vcmp.ne.s16.totalorder %v13216_v11, 0  ;;  %v4517_v2 = vshrl.u32 %v11219_v45, 16 }
 0x3ab   : > { %4600 = vrot.lane.b32.xlu1 %v4569_v4, %s8490_s18  ;;  %v13247_v4 = vld [vmem:[#allocation23_spill] sm:$0xff]  ;;  %13259 = vst [vmem:[#allocation21_spill] sm:$0xff] %v11267_v43  ;;  %v4509_v63 = vshrl.u32 %v11194_v16, 16  ;;  %v4120_v44 = vrot.slane %v4118_v12, 1 }
 0x3ac   : > { %4602 = vrot.lane.b32.xlu0 %v4571_v50, %s8490_s18  ;;  %vm13248_vm2 = vcmp.ne.s16.totalorder %v13247_v4, 0  ;;  %v4573_v50 = vsel %vm13249_vm7, %v4570_v35, %v4572_v20 }
 0x3ad   : > { %v11231_v32 = vsel %vm13248_vm2, %v4478_v52, 0  ;;  %v4513_v52 = vshll.u32 %v11219_v45, 16  ;;  %vm13252_vm2 = vmmov %vm13249_vm7 }
 0x3ae   : > { %v4575_v35 = vsel %vm13252_vm2, %v4572_v20, %v4574_v17  ;;  %v4576_v36 = vrot.slane %v11231_v32, 1  ;;  %vm13254_vm7 = vmmov %vm13252_vm2 }
 0x3af   : > { %4274 = vrot.lane.b32.xlu1 %v11208_v53, %s8489_s28  ;;  %v5652_v53 = vrot.slane %v5444_v23, 1  ;;  %vm13255_vm13 = vmmov %vm13252_vm2  ;;  %vm13257_vm2 = vcmp.ne.s16.totalorder %v13208_v40, 0 }
 0x3b0   : > { %4276 = vrot.lane.b32.xlu0 %v11216_v31, %s8489_s28  ;;  %v11245_v31 = vld [vmem:[#allocation3 + $0x8] sm:$0xff]  ;;  %v5447_v20 = vsel %vm13257_vm2, %v11115_v58, 0 }
 0x3b1   : > { %v11255_v7 = vsel %vm13254_vm7, %v13253_v39, %v5652_v53  ;;  %v11258_v3 = vsel %vm13255_vm13, %v5652_v53, %v5654_v21  ;;  %v4123_v32 = vshll.u32 %v11245_v31, 16  ;;  %v5658_v23 = vrot.slane %v5447_v20, 1  ;;  %vm13260_vm7 = vmmov %vm13258_vm8 }
 0x3b2   : > { %v4515_v53 = vrot.slane %v4513_v52, 1  ;;  %vm13262_vm13 = vcmp.ne.s16.totalorder %v13214_v56, 0  ;;  %v5449_v39 = vsel %vm13263_vm6, %v11143_v42, 0  ;;  %vm13264_vm8 = vcmask 1046528  }
 0x3b3   : > { %4604 = vrot.lane.b32.xlu1 %v4573_v50, %s8490_s18  ;;  %v5656_v50 = vrot.slane %v5446_v49, 1  ;;  %v5448_v0 = vsel %vm13262_vm13, %v11117_v24, 0  ;;  %vm13265_vm2 = vmmov %vm13264_vm8  ;;  %v5662_v20 = vrot.slane %v5449_v39, 1  ;;  %v11305_v39 = vor.u32 %v4509_v63, %v4507_v1 }
 0x3b4   : > { %4606 = vrot.lane.b32.xlu0 %v4575_v35, %s8490_s18  ;;  %v11272_v35 = vsel %vm13260_vm7, %v11242_v38, %v4507_v1  ;;  %v5660_v49 = vrot.slane %v5448_v0, 1  ;;  %vm13266_vm7 = vmmov %vm13265_vm2  ;;  %v4125_v12 = vrot.slane %v4123_v32, 1  ;;  %v4121_v32 = vor.u32 %v4120_v44, %v4116_v30  ;;  %v13281_v44 = vld [vmem:[#allocation7_spill] sm:$0xff] }
 0x3b5   : > { %13261 = vst [vmem:[#allocation22_spill] sm:$0xff] %v11272_v35  ;;  %v11283_v54 = vsel %vm13264_vm8, %v5654_v21, %v5656_v50  ;;  %v11286_v6 = vsel %vm13265_vm2, %v5656_v50, %v5658_v23  ;;  %v4577_v52 = vsel %vm13266_vm7, %v4574_v17, %v4576_v36  ;;  %vm13267_vm13 = vmmov %vm13265_vm2  ;;  %vm13270_vm8 = vcmp.ne.s16.totalorder %v13224_v15, 0 }
 0x3b6   : > { %vm13268_vm6 = vmmov %vm13265_vm2  ;;  %v5450_v50 = vsel %vm13270_vm8, %v11152_v55, 0  ;;  %vm13271_vm2 = vcmp.ne.s16.totalorder %v13226_v9, 0  ;;  %v4519_v17 = vor.u32 %v4517_v2, %v4515_v53  ;;  %vm13272_vm7 = vcmp.ne.s16.totalorder %v13236_v61, 0 }
 0x3b7   : > { %4278 = vrot.lane.b32.xlu1 %v11267_v43, %s8489_s28  ;;  %v11294_v43 = vsel %vm13267_vm13, %v5658_v23, %v5660_v49  ;;  %v11297_v21 = vsel %vm13268_vm6, %v5660_v49, %v5662_v20  ;;  %v5451_v0 = vsel %vm13271_vm2, %v11180_v62, 0  ;;  %v5664_v45 = vrot.slane %v5450_v50, 1  ;;  %vm13273_vm13 = vmmov %vm13268_vm6  ;;  %v13276_v50 = vld [vmem:[#allocation5_spill] sm:$0xff] }
 0x3b8   : > { %4522 = vrot.lane.b32.xlu0 %v11272_v35, %s8489_s28  ;;  %13269 = vst [vmem:[#allocation24_spill] sm:$0xff] %v11297_v21  ;;  %v5666_v35 = vrot.slane %v5451_v0, 1  ;;  %v11311_v23 = vsel %vm13272_vm7, %v11194_v16, 0  ;;  %v4127_v2 = vshrl.u32 %v11245_v31, 16  ;;  %vm13274_vm8 = vsmask.f32 7424  ;;  %vm13275_vm2 = vmmov %vm13268_vm6 }
 0x3b9   : > { %v11315_v49 = vsel %vm13273_vm13, %v5662_v20, %v5664_v45  ;;  %v12995_v63 = vrot.slane %v11311_v23, 1  ;;  %v4516_v1 = vsel %vm13274_vm8, %v11305_v39, %v4515_v53  ;;  %vm13277_vm7 = vcmp.ne.s16.totalorder %v13276_v50, 0  ;;  %v13278_v0 = vld [vmem:[#allocation6_spill] sm:$0xff]  ;;  %v13280_v53 = vld [vmem:[#allocation39_spill] sm:$0xff] }
 0x3ba   : > { %v11318_v21 = vsel %vm13268_vm6, %v5664_v45, %v5666_v35  ;;  %v4129_v20 = vor.u32 %v4127_v2, %v4125_v12  ;;  %v4098_v45 = vsel %vm13277_vm7, %v11211_v37, 0  ;;  %vm13279_vm13 = vcmp.ne.s16.totalorder %v13278_v0, 0 }
 0x3bb   : > { %4608 = vrot.lane.b32.xlu1 %v4577_v52, %s8490_s18  ;;  %v11327_v52 = vsel %vm13275_vm2, %v5666_v35, %v12995_v63  ;;  %vm13282_vm6 = vcmp.ne.s16.totalorder %v13281_v44, 0  ;;  %v4126_v35 = vsel %vm13274_vm8, %v4121_v32, %v4125_v12  ;;  %v4301_v63 = vrot.slane %v4098_v45, 1  ;;  %vm13283_vm2 = vmmov %vm13274_vm8 }
 0x3bc   : > { %4526 = vrot.lane.b32.xlu0 %v4519_v17, %s8489_s28  ;;  %v4099_v17 = vsel %vm13279_vm13, %v11245_v31, 0  ;;  %v4100_v30 = vsel %vm13282_vm6, %v13280_v53, 0  ;;  %v4134_v2 = vsel %vm13283_vm2, %v4129_v20, %v10868_v5  ;;  %vm13284_vm7 = vcmp.ne.s16.totalorder %v13188_v60, 0 }
 0x3bd   : > { %v4302_v16 = vrot.slane %v4099_v17, 1  ;;  %v4304_v37 = vrot.slane %v4100_v30, 1  ;;  %vm13285_vm13 = vcmp.ne.s16.totalorder %v13192_v26, 0  ;;  %vm13286_vm6 = vcmask 1046528  }
 0x3be   : > { %vm13287_vm8 = vmmov %vm13286_vm6  ;;  %vm13288_vm2 = vcmp.ne.s16.totalorder %v13194_v48, 0 }
 0x3bf   : > { %4524 = vrot.lane.b32.xlu1 %v4516_v1, %s8489_s28  ;;  %v4101_v1 = vsel %vm13284_vm7, %v10860_v25, 0  ;;  %v4303_v12 = vsel %vm13286_vm6, %v4301_v63, %v4302_v16  ;;  %v4305_v45 = vsel %vm13287_vm8, %v4302_v16, %v4304_v37  ;;  %v4103_v5 = vsel %vm13288_vm2, %v10987_v59, 0  ;;  %vm13290_vm3 = vmmov %vm13286_vm6 }
 0x3c0   : > { %4610 = vrot.lane.b32.xlu0 %v4576_v36, %s8490_s18  ;;  %v4102_v36 = vsel %vm13285_vm13, %v10946_v29, 0  ;;  %v4306_v32 = vrot.slane %v4101_v1, 1  ;;  %vm13289_vm7 = vcmp.ne.s16.totalorder %v13199_v57, 0  ;;  %v4310_v30 = vrot.slane %v4103_v5, 1  ;;  %vm13291_vm13 = vmmov %vm13290_vm3 }
 0x3c1   : > { %v4308_v17 = vrot.slane %v4102_v36, 1  ;;  %v4104_v25 = vsel %vm13289_vm7, %v11000_v8, 0  ;;  %vm13292_vm6 = vmmov %vm13290_vm3  ;;  %vm13293_vm8 = vcmp.ne.s16.totalorder %v13208_v40, 0 }
 0x3c2   : > { %v4307_v20 = vsel %vm13290_vm3, %v4304_v37, %v4306_v32  ;;  %v4107_v48 = vsel %vm13293_vm8, %v11084_v34, 0  ;;  %vm13294_vm2 = vmmov %vm13290_vm3  ;;  %vm13295_vm3 = vcmp.ne.s16.totalorder %v13214_v56, 0  ;;  %v4461_v56 = vsel %vm891_vm15, %v13280_v53, 0 }
 0x3c3   : > { %4250 = vrot.lane.b32.xlu1 %v4126_v35, %s8489_s28  ;;  %v4309_v63 = vsel %vm13291_vm13, %v4306_v32, %v4308_v17  ;;  %v4312_v35 = vrot.slane %v4104_v25, 1  ;;  %v4311_v16 = vsel %vm13292_vm6, %v4308_v17, %v4310_v30  ;;  %v4108_v37 = vsel %vm13295_vm3, %v11086_v27, 0  ;;  %vm13297_vm7 = vmmov %vm13294_vm2 }
 0x3c4   : > { %4252 = vrot.lane.b32.xlu0 %v4134_v2, %s8489_s28  ;;  %v4318_v1 = vrot.slane %v4107_v48, 1  ;;  %vm13298_vm13 = vcmp.ne.s16.totalorder %v13216_v11, 0  ;;  %vm4419_vm6 = vcmask 130048   ;;  %v4320_v17 = vrot.slane %v4108_v37, 1  ;;  %vm13304_vm3 = vmmov %vm13297_vm7 }
 0x3c5   : > { %v4313_v57 = vsel %vm13294_vm2, %v4310_v30, %v4312_v35  ;;  %v4109_v40 = vsel %vm13298_vm13, %v11115_v58, 0  ;;  %vm13302_vm2 = vcmp.ne.s16.totalorder %v13224_v15, 0  ;;  %vm13307_vm13 = vcmp.ne.s16.totalorder %v13226_v9, 0 }
 0x3c6   : > { %v4110_v11 = vsel %vm13302_vm2, %v11117_v24, 0  ;;  %v4322_v48 = vrot.slane %v4109_v40, 1  ;;  %v4111_v15 = vsel %vm13307_vm13, %v11143_v42, 0  ;;  %vm13309_vm2 = vcmp.ne.s16.totalorder %v13236_v61, 0 }
 0x3c7   : > { %4334 = vrot.lane.b32.xlu1 %v4303_v12, %s8490_s18  ;;  %v13296_v12 = vrot.slane %v11148_v14, 1  ;;  %v4112_v40 = vsel %vm13309_vm2, %v11152_v55, 0  ;;  %vm13311_vm13 = vcmp.ne.s16.totalorder %v13239_v13, 0  ;;  %vm4832_vm2 = vcmask 195584  }
 0x3c8   : > { %4336 = vrot.lane.b32.xlu0 %v4305_v45, %s8490_s18  ;;  %v4457_v45 = vld [vmem:[#allocation3 + $0x8] sm:$0xf8] }
 0x3c9   : > { %v4315_v32 = vsel %vm13297_vm7, %v4312_v35, %v13296_v12  ;;  %v13303_v35 = vrot.slane %v11169_v19, 1 }
 0x3cb   : > { %4338 = vrot.lane.b32.xlu1 %v4307_v20, %s8490_s18  ;;  %v13300_v20 = vld [vmem:[#allocation27_spill] sm:$0xff] }
 0x3cc   : > { %4340 = vrot.lane.b32.xlu0 %v4309_v63, %s8490_s18  ;;  %vm13301_vm8 = vcmp.ne.s16.totalorder %v13300_v20, 0 }
 0x3cd   : > { %v4081_v14 = vsel %vm13301_vm8, %v13280_v53, 0  ;;  %vm13308_vm8 = vmmov %vm13304_vm3 }
 0x3ce   : > { %v4579_v2 = vpop.permute.xlu0 %4578  ;;  %v4321_v19 = vsel %vm13308_vm8, %v4318_v1, %v4320_v17  ;;  %vm13312_vm8 = vcmp.ne.s16.totalorder %v13247_v4, 0 }
 0x3cf   : > { %4342 = vrot.lane.b32.xlu1 %v4311_v16, %s8490_s18  ;;  %v4319_v16 = vsel %vm13304_vm3, %v13303_v35, %v4318_v1  ;;  %v4323_v35 = vsel %vm13304_vm3, %v4320_v17, %v4322_v48 }
 0x3d0   : > { %4344 = vrot.lane.b32.xlu0 %v4313_v57, %s8490_s18  ;;  %v4581_v36 = vpop.permute.xlu1 %4580  ;;  %v13305_v57 = vld [vmem:[#allocation26_spill] sm:$0xff] }
 0x3d1   : > { %vm13306_vm7 = vcmp.ne.s16.totalorder %v13305_v57, 0 }
 0x3d2   : > { %v4255_v25 = vpop.permute.xlu0 %4254  ;;  %v4460_v53 = vsel %vm13306_vm7, %v4457_v45, 0  ;;  %vm13310_vm7 = vmmov %vm13304_vm3 }
 0x3d3   : > { %4346 = vrot.lane.b32.xlu1 %v4315_v32, %s8490_s18  ;;  %v11394_v30 = vsel %vm1586_vm0, %v4081_v14, %v4255_v25  ;;  %v4616_v63 = vsel %vm1586_vm0, %v4461_v56, %v4255_v25  ;;  %v4324_v56 = vrot.slane %v4110_v11, 1 }
 0x3d4   : > { %4348 = vrot.lane.b32.xlu0 %v11187_v51, %s8490_s18  ;;  %v4521_v37 = vpop.permute.xlu1 %4520  ;;  %v4653_v51 = vsel %vm4419_vm6, %v4616_v63, %v4581_v36 }
 0x3d5   : > { %v4614_v12 = vsel %vm1586_vm0, %v4460_v53, %v4521_v37  ;;  %v4695_v32 = vshrl.u32 %v4653_v51, 16  ;;  %v4698_v14 = vshll.u32 %v4653_v51, 16  ;;  %v4097_v53 = vld [vmem:[#allocation3 + $0x80] sm:$0x1f]  ;;  %v4326_v37 = vrot.slane %v4111_v15, 1 }
 0x3d6   : > { %v4651_v45 = vsel %vm4419_vm6, %v4614_v12, %v4579_v2  ;;  %v4325_v61 = vsel %vm13310_vm7, %v4322_v48, %v4324_v56  ;;  %v4328_v2 = vrot.slane %v4112_v40, 1  ;;  %v4113_v12 = vsel %vm13311_vm13, %v11180_v62, 0  ;;  %vm13313_vm7 = vmmov %vm13304_vm3 }
 0x3d7   : > { %4350 = vrot.lane.b32.xlu1 %v4319_v16, %s8490_s18  ;;  %v4688_v36 = vshrl.u32 %v4651_v45, 16  ;;  %v4691_v9 = vshll.u32 %v4651_v45, 16  ;;  %v4697_v25 = vrot.slane %v4695_v32, 3  ;;  %v4700_v63 = vrot.slane %v4698_v14, 4  ;;  %v11415_v16 = vld [vmem:[#allocation3 + $0x80] sm:$0xf]  ;;  %vm13314_vm13 = vmmov %vm13304_vm3 }
 0x3d8   : > { %4352 = vrot.lane.b32.xlu0 %v4321_v19, %s8490_s18  ;;  %v4114_v17 = vsel %vm13312_vm8, %v4097_v53, 0  ;;  %v4243_v32 = vshll.u32 %v11415_v16, 16  ;;  %v4327_v14 = vsel %vm13304_vm3, %v4324_v56, %v4326_v37  ;;  %v4330_v19 = vrot.slane %v4113_v12, 1  ;;  %vm13315_vm8 = vmmov %vm13304_vm3 }
 0x3d9   : > { %v4690_v1 = vrot.slane %v4688_v36, 3  ;;  %v4693_v11 = vrot.slane %v4691_v9, 4  ;;  %v11417_v51 = vor.u32 %v4700_v63, %v4697_v25  ;;  %v4329_v40 = vsel %vm13313_vm7, %v4326_v37, %v4328_v2  ;;  %v11435_v36 = vld [vmem:[#allocation3 + $0x18] sm:$0xff]  ;;  %v5436_v9 = vld [vmem:[#allocation3 + $0x10] sm:$0xf0] }
 0x3da   : > { %v4332_v45 = vrot.slane %v4114_v17, 1  ;;  %v4245_v25 = vrot.slane %v4243_v32, 1  ;;  %v4331_v63 = vsel %vm13314_vm13, %v4328_v2, %v4330_v19  ;;  %vm13316_vm3 = vcmp.ne.s16.totalorder %v13278_v0, 0 }
 0x3db   : > { %4354 = vrot.lane.b32.xlu1 %v4323_v35, %s8490_s18  ;;  %v4694_v15 = vor.u32 %v4693_v11, %v4690_v1  ;;  %v4247_v35 = vshrl.u32 %v11415_v16, 16  ;;  %v5439_v53 = vsel %vm13316_vm3, %v11435_v36, 0  ;;  %v5458_v37 = vshll.u32 %v5436_v9, 16 }
 0x3dc   : > { %4356 = vrot.lane.b32.xlu0 %v4325_v61, %s8490_s18  ;;  %v4333_v56 = vsel %vm13315_vm8, %v4330_v19, %v4332_v45  ;;  %vm13317_vm7 = vcmp.ne.s16.totalorder %v13281_v44, 0  ;;  %v5642_v61 = vrot.slane %v5439_v53, 1  ;;  %v5463_v2 = vshll.u32 %v11435_v36, 16 }
 0x3dd   : > { %v4702_v48 = vsel %vm1102_vm1, %v4694_v15, %v11417_v51  ;;  %v5440_v1 = vsel %vm13317_vm7, %v10946_v29, 0  ;;  %v4249_v11 = vor.u32 %v4247_v35, %v4245_v25  ;;  %vm13318_vm13 = vsmask.f32 7424 }
 0x3de   : > { %7822 = vmatprep.mubr.msk.bf16.mxu1 %vm4832_vm2, %v4702_v48  ;;  %v4246_v12 = vsel %vm13318_vm13, %v11242_v38, %v4245_v25  ;;  %v5644_v17 = vrot.slane %v5440_v1, 1  ;;  %vm13319_vm8 = vcmp.ne.s16.totalorder %v13276_v50, 0  ;;  %v5460_v15 = vrot.slane %v5458_v37, 1 }
 0x3df   : > { %4358 = vrot.lane.b32.xlu1 %v4327_v14, %s8490_s18  ;;  %v5438_v0 = vsel %vm13319_vm8, %v5436_v9, 0  ;;  %v5456_v32 = vshrl.u32 %v5436_v9, 16  ;;  %v5465_v44 = vrot.slane %v5463_v2, 1  ;;  %vm13320_vm3 = vcmask 1046528  }
 0x3e0   : > { %4360 = vrot.lane.b32.xlu0 %v4329_v40, %s8490_s18  ;;  %v5641_v14 = vrot.slane %v5438_v0, 1  ;;  %v5645_v19 = vsel %vm13320_vm3, %v5642_v61, %v5644_v17  ;;  %v5467_v40 = vshrl.u32 %v11435_v36, 16  ;;  %vm13321_vm7 = vmmov %vm13320_vm3  ;;  %vm13322_vm13 = vcmp.ne.s16.totalorder %v13300_v20, 0 }
 0x3e1   : > { %v5461_v48 = vor.u32 %v5460_v15, %v5456_v32  ;;  %vm13323_vm8 = vsmask.f32 7424  ;;  %vm13324_vm3 = vcmp.ne.s16.totalorder %v13188_v60, 0 }
 0x3e2   : > { %v5643_v25 = vsel %vm13321_vm7, %v5641_v14, %v5642_v61  ;;  %v5469_v50 = vor.u32 %v5467_v40, %v5465_v44  ;;  %v5441_v35 = vsel %vm13324_vm3, %v10987_v59, 0  ;;  %vm13325_vm7 = vmmov %vm13323_vm8  ;;  %v8142_v40 = vld [vmem:[%s12862_s3 + $0x8] ss:$0 sps:$4 sm:$0xff]  }
 0x3e3   : > { %4362 = vrot.lane.b32.xlu1 %v4331_v63, %s8490_s18  ;;  %v11460_v63 = vld [vmem:[#allocation3 + $0x18] sm:$0xff]  ;;  %v5646_v2 = vrot.slane %v5441_v35, 1 }
 0x3e4   : > { %4364 = vrot.lane.b32.xlu0 %v4333_v56, %s8490_s18  ;;  %v4462_v9 = vsel %vm13322_vm13, %v11460_v63, 0  ;;  %v5474_v61 = vsel %vm13325_vm7, %v5469_v50, %v10970_v22  ;;  %vm13326_vm13 = vcmp.ne.s16.totalorder %v13192_v26, 0  ;;  %v13330_v50 = vld [vmem:[#allocation30_spill] sm:$0xff] }
 0x3e5   : > { %v5442_v60 = vsel %vm13326_vm13, %v11000_v8, 0  ;;  %vm13331_vm7 = vcmp.ne.s16.totalorder %v13330_v50, 0 }
 0x3e7   : > { %4282 = vrot.lane.b32.xlu1 %v4249_v11, %s8489_s28 }
 0x3e8   : > { %4280 = vrot.lane.b32.xlu0 %v4246_v12, %s8489_s28 }
 0x3eb   : > { %4366 = vrot.lane.b32.xlu1 %v4332_v45, %s8490_s18  ;;  %v4583_v38 = vpop.permute.xlu0 %4582  ;;  %v5466_v45 = vsel %vm13323_vm8, %v5461_v48, %v5465_v44  ;;  %vm13327_vm8 = vcmask 1046528  }
 0x3ec   : > { %5676 = vrot.lane.b32.xlu0 %v5645_v19, %s8490_s18  ;;  %v5647_v44 = vsel %vm13327_vm8, %v5644_v17, %v5646_v2  ;;  %v13328_v19 = vld [vmem:[#allocation28_spill] sm:$0xff]  ;;  %vm13332_vm13 = vmmov %vm13327_vm8 }
 0x3ed   : > { %v11465_v56 = vpop.permute.xlu1 %4256  ;;  %vm13329_vm3 = vcmp.ne.s16.totalorder %v13328_v19, 0 }
 0x3ee   : > { %v4618_v53 = vsel %vm1586_vm0, %v4462_v9, %v11465_v56  ;;  %v4463_v22 = vsel %vm13329_vm3, %v10946_v29, 0  ;;  %v4464_v9 = vsel %vm13331_vm7, %v10987_v59, 0 }
 0x3ef   : > { %5674 = vrot.lane.b32.xlu1 %v5643_v25, %s8490_s18  ;;  %v4655_v37 = vsel %vm4419_vm6, %v4618_v53, %v4583_v38 }
 0x3f0   : > { %5590 = vrot.lane.b32.xlu0 %v5466_v45, %s8489_s28  ;;  %v4703_v1 = vshrl.u32 %v4655_v37, 16  ;;  %v4706_v11 = vshll.u32 %v4655_v37, 16 }
 0x3f1   : > { %v4585_v12 = vpop.permute.xlu1 %4584 }
 0x3f2   : > { %v4705_v0 = vrot.slane %v4703_v1, 3  ;;  %v4708_v15 = vrot.slane %v4706_v11, 4 }
 0x3f3   : > { %5592 = vrot.lane.b32.xlu1 %v5474_v61, %s8489_s28  ;;  %v4587_v32 = vpop.permute.xlu0 %4586 }
 0x3f4   : > { %5594 = vrot.lane.b32.xlu0 %v11020_v28, %s8489_s28  ;;  %v4709_v14 = vor.u32 %v4708_v15, %v4705_v0  ;;  %v5648_v28 = vrot.slane %v5442_v60, 1 }
 0x3f5   : > { %v11488_v48 = vpop.permute.xlu1 %4258 }
 0x3f6   : > { %v4620_v26 = vsel %vm1586_vm0, %v4463_v22, %v11488_v48  ;;  %v4710_v38 = vsel %vm1102_vm1, %v11417_v51, %v4709_v14  ;;  %v5239_v51 = vsel %vm3996_vm11, %v8142_v40, 0 }
 0x3f7   : > { %5678 = vrot.lane.b32.xlu1 %v5647_v44, %s8490_s18  ;;  %v4657_v29 = vsel %vm4419_vm6, %v4620_v26, %v4585_v12  ;;  %7823 = vmatmul.mubr.msk.bf16.vlgmr.msra.gmra.mrb[16].mxu1 %vm4832_vm2, %v4710_v38  ;;  %v13333_v12 = vrot.slane %v11224_v41, 1  ;;  %v13339_v38 = vld [vmem:[#allocation32_spill] sm:$0xff] }
 0x3f8   : > { %5596 = vrot.lane.b32.xlu0 %v11041_v18, %s8489_s28  ;;  %v4711_v17 = vshrl.u32 %v4657_v29, 16  ;;  %v4714_v25 = vshll.u32 %v4657_v29, 16  ;;  %7855 = vmatpush3.bf16.msra.mxu1 %v11068_v47  ;;  %v11513_v18 = vld [vmem:[%s12862_s3 + $0x18] sm:$0xff]   ;;  %v5649_v47 = vsel %vm13332_vm13, %v5646_v2, %v5648_v28  ;;  %vm13340_vm7 = vcmp.ne.s16.totalorder %v13339_v38, 0 }
 0x3f9   : > { %v11506_v45 = vpop.permute.xlu0 %4260  ;;  %8095 = vmatprep.subr.msk.bf16.mxu1 %vm3996_vm11, %v8142_v40  ;;  %v5651_v0 = vsel %vm13327_vm8, %v5648_v28, %v13333_v12  ;;  %vm13352_vm13 = vcmp.ne.s16.totalorder %v13239_v13, 0  ;;  %vm13354_vm8 = vcmp.ne.s16.totalorder %v13247_v4, 0  ;;  %v4471_v13 = vsel %vm901_vm4, %v11117_v24, 0 }
 0x3fa   : > { %v4713_v35 = vrot.slane %v4711_v17, 3  ;;  %v4716_v53 = vrot.slane %v4714_v25, 4  ;;  %v4622_v59 = vsel %vm1586_vm0, %v4464_v9, %v11506_v45  ;;  %v13341_v9 = vld [vmem:[#allocation11_spill] sm:$0xff]  ;;  %v4472_v4 = vsel %vm902_vm14, %v11143_v42, 0 }
 0x3fb   : > { %5598 = vrot.lane.b32.xlu1 %v11105_v33, %s8489_s28  ;;  %v4659_v37 = vsel %vm4419_vm6, %v4622_v59, %v4587_v32 }
 0x3fc   : > { %5680 = vrot.lane.b32.xlu0 %v5649_v47, %s8490_s18  ;;  %v4717_v1 = vor.u32 %v4716_v53, %v4713_v35  ;;  %v4719_v11 = vshrl.u32 %v4659_v37, 16  ;;  %v4722_v61 = vshll.u32 %v4659_v37, 16  ;;  %7857 = vmatpush3.bf16.msra.mxu1 %v5239_v51 }
 0x3fd   : > { %7890 = vmatprep.subr.bf16.mxu1 %v11513_v18 }
 0x3fe   : > { %v4721_v33 = vrot.slane %v4719_v11, 3  ;;  %v4724_v2 = vrot.slane %v4722_v61, 4  ;;  %v4718_v15 = vsel %vm1102_vm1, %v4709_v14, %v4717_v1  ;;  %v13335_v14 = vld [vmem:[#allocation31_spill] sm:$0xff] }
 0x3ff   : > { %5682 = vrot.lane.b32.xlu1 %v5651_v0, %s8490_s18  ;;  %7826 = vmatprep.mubr.msk.bf16.mxu1 %vm4832_vm2, %v4718_v15  ;;  %vm13336_vm3 = vcmp.ne.s16.totalorder %v13335_v14, 0 }
 0x400   : > { %5600 = vrot.lane.b32.xlu0 %v11110_v46, %s8489_s28  ;;  %v4725_v60 = vor.u32 %v4724_v2, %v4721_v33  ;;  %v13334_v46 = vld [vmem:[#allocation10_spill] sm:$0xff]  ;;  %v4465_v22 = vsel %vm13336_vm3, %v11000_v8, 0  ;;  %v13342_v2 = vld [vmem:[#allocation12_spill] sm:$0xff] }
 0x402   : > { %v4726_v41 = vsel %vm1102_vm1, %v4717_v1, %v4725_v60 }
 0x403   : > { %5602 = vrot.lane.b32.xlu1 %v11133_v10, %s8489_s28  ;;  %7827 = vmatmul.mubr.msk.bf16.gmra.mrb[20].mxu1 %vm4832_vm2, %v4726_v41  ;;  %v13343_v41 = vld [vmem:[#allocation9_spill] sm:$0xff] }
 0x404   : > { %5684 = vrot.lane.b32.xlu0 %v11255_v7, %s8490_s18  ;;  %v13337_v7 = vld [vmem:[#allocation8_spill] sm:$0xff] }
 0x405   : > { %v4589_v32 = vpop.permute.xlu1 %4588  ;;  %v4086_v26 = vsel %vm897_vm12, %v13337_v7, 0 }
 0x406   : > { %v4591_v44 = vpop.permute.xlu0 %4590 }
 0x407   : > { %5686 = vrot.lane.b32.xlu1 %v11258_v3, %s8490_s18  ;;  %v4466_v3 = vsel %vm13340_vm7, %v13337_v7, 0  ;;  %vm13358_vm7 = vsmask.f32 7424 }
 0x408   : > { %5604 = vrot.lane.b32.xlu0 %v13334_v46, %s8489_s28 }
 0x409   : > { %v11544_v10 = vpop.permute.xlu1 %4262 }
 0x40a   : > { %v4624_v40 = vsel %vm1586_vm0, %v4465_v22, %v11544_v10  ;;  %v4265_v29 = vpop.permute.xlu0 %4264 }
 0x40b   : > { %v4661_v17 = vsel %vm4419_vm6, %v4624_v40, %v4589_v32  ;;  %v11556_v25 = vsel %vm1586_vm0, %v4086_v26, %v4265_v29  ;;  %v4626_v8 = vsel %vm1586_vm0, %v4466_v3, %v4265_v29  ;;  %5606 = vrot.lane.b32.xlu1 %v13341_v9, %s8489_s28  ;;  %v4088_v40 = vsel %vm899_vm5, %v11084_v34, 0 }
 0x40c   : > { %v4727_v51 = vshrl.u32 %v4661_v17, 16  ;;  %v4730_v47 = vshll.u32 %v4661_v17, 16  ;;  %v4663_v35 = vsel %vm4419_vm6, %v4626_v8, %v4591_v44  ;;  %5688 = vrot.lane.b32.xlu0 %v11283_v54, %s8490_s18  ;;  %v4087_v54 = vsel %vm898_vm10, %v13343_v41, 0 }
 0x40d   : > { %v4735_v53 = vshrl.u32 %v4663_v35, 16  ;;  %v4738_v59 = vshll.u32 %v4663_v35, 16  ;;  %v4593_v37 = vpop.permute.xlu1 %4592  ;;  %v4467_v44 = vsel %vm897_vm12, %v13343_v41, 0  ;;  %v4468_v26 = vsel %vm898_vm10, %v11084_v34, 0 }
 0x40e   : > { %v4729_v1 = vrot.slane %v4727_v51, 3  ;;  %v4732_v11 = vrot.slane %v4730_v47, 4  ;;  %v4595_v61 = vpop.permute.xlu0 %4594  ;;  %v13346_v51 = vld [vmem:[#allocation16_spill] sm:$0xff] }
 0x40f   : > { %v4737_v12 = vrot.slane %v4735_v53, 3  ;;  %v4740_v0 = vrot.slane %v4738_v59, 4  ;;  %5690 = vrot.lane.b32.xlu1 %v11286_v6, %s8490_s18 }
 0x410   : > { %v4733_v33 = vor.u32 %v4732_v11, %v4729_v1  ;;  %5608 = vrot.lane.b32.xlu0 %v13342_v2, %s8489_s28  ;;  %v11598_v1 = vld [vmem:[#allocation3 + $0x90] sm:$0xf] }
 0x411   : > { %v4741_v15 = vor.u32 %v4740_v0, %v4737_v12  ;;  %v4267_v46 = vpop.permute.xlu1 %4266 }
 0x412   : > { %v11578_v6 = vsel %vm1586_vm0, %v4087_v54, %v4267_v46  ;;  %v4628_v7 = vsel %vm1586_vm0, %v4467_v44, %v4267_v46  ;;  %v4269_v3 = vpop.permute.xlu0 %4268  ;;  %v4734_v29 = vsel %vm1102_vm1, %v4725_v60, %v4733_v33  ;;  %v13347_v54 = vld [vmem:[#allocation24_spill] sm:$0xff]  ;;  %v4089_v46 = vsel %vm900_vm9, %v11086_v27, 0 }
 0x413   : > { %v4665_v17 = vsel %vm4419_vm6, %v4628_v7, %v4593_v37  ;;  %v11587_v8 = vsel %vm1586_vm0, %v4088_v40, %v4269_v3  ;;  %v4630_v9 = vsel %vm1586_vm0, %v4468_v26, %v4269_v3  ;;  %7830 = vmatprep.mubr.msk.bf16.mxu1 %vm4832_vm2, %v4734_v29  ;;  %5610 = vrot.lane.b32.xlu1 %v13346_v51, %s8489_s28  ;;  %v5583_v40 = vshll.u32 %v11598_v1, 16  ;;  %v8442_v29 = vld [vmem:[#allocation3 + $0x70] sm:$0xff] }
 0x414   : > { %v4743_v47 = vshrl.u32 %v4665_v17, 16  ;;  %v4746_v35 = vshll.u32 %v4665_v17, 16  ;;  %v4667_v53 = vsel %vm4419_vm6, %v4630_v9, %v4595_v61  ;;  %5692 = vrot.lane.b32.xlu0 %v11294_v43, %s8490_s18  ;;  %v4742_v34 = vsel %vm1102_vm1, %v4733_v33, %v4741_v15  ;;  %v11602_v61 = vld [vmem:[#allocation3 + $0x88] sm:$0xff] }
 0x415   : > { %v4751_v60 = vshrl.u32 %v4667_v53, 16  ;;  %v4754_v59 = vshll.u32 %v4667_v53, 16  ;;  %7831 = vmatmul.mubr.msk.bf16.gmra.mrb[24].mxu1 %vm4832_vm2, %v4742_v34  ;;  %v4597_v37 = vpop.permute.xlu1 %4596  ;;  %v13348_v33 = vld [vmem:[#allocation18_spill] sm:$0xff]  ;;  %v4469_v26 = vsel %vm899_vm5, %v11086_v27, 0  ;;  %v4090_v17 = vsel %vm901_vm4, %v11115_v58, 0 }
 0x416   : > { %v4745_v11 = vrot.slane %v4743_v47, 3  ;;  %v4748_v12 = vrot.slane %v4746_v35, 4  ;;  %v4599_v0 = vpop.permute.xlu0 %4598  ;;  %v4470_v9 = vsel %vm900_vm9, %v11115_v58, 0  ;;  %v5575_v34 = vshll.u32 %v11602_v61, 16  ;;  %v13351_v58 = vld [vmem:[#allocation21_spill] sm:$0xff] }
 0x417   : > { %v4753_v2 = vrot.slane %v4751_v60, 3  ;;  %v4756_v41 = vrot.slane %v4754_v59, 4  ;;  %5694 = vrot.lane.b32.xlu1 %v13347_v54, %s8490_s18 }
 0x418   : > { %v4749_v43 = vor.u32 %v4748_v12, %v4745_v11  ;;  %5612 = vrot.lane.b32.xlu0 %v13348_v33, %s8489_s28 }
 0x419   : > { %v4757_v7 = vor.u32 %v4756_v41, %v4753_v2  ;;  %v4271_v3 = vpop.permute.xlu1 %4270 }
 0x41a   : > { %v11620_v51 = vsel %vm1586_vm0, %v4089_v46, %v4271_v3  ;;  %v4632_v47 = vsel %vm1586_vm0, %v4469_v26, %v4271_v3  ;;  %v4273_v35 = vpop.permute.xlu0 %4272  ;;  %v4750_v53 = vsel %vm1102_vm1, %v4741_v15, %v4749_v43  ;;  %v5585_v46 = vrot.slane %v5583_v40, 1 }
 0x41b   : > { %v4669_v27 = vsel %vm4419_vm6, %v4632_v47, %v4597_v37  ;;  %v11627_v60 = vsel %vm1586_vm0, %v4090_v17, %v4273_v35  ;;  %v4634_v59 = vsel %vm1586_vm0, %v4470_v9, %v4273_v35  ;;  %7834 = vmatprep.mubr.msk.bf16.mxu1 %vm4832_vm2, %v4750_v53  ;;  %5614 = vrot.lane.b32.xlu1 %v13351_v58, %s8489_s28  ;;  %v5437_v37 = vld [vmem:[#allocation3 + $0x90] sm:$0x1f]  ;;  %v5577_v9 = vrot.slane %v5575_v34, 1  ;;  %v13355_v34 = vld [vmem:[#allocation22_spill] sm:$0xff] }
 0x41c   : > { %v4759_v11 = vshrl.u32 %v4669_v27, 16  ;;  %v4762_v12 = vshll.u32 %v4669_v27, 16  ;;  %v4671_v2 = vsel %vm4419_vm6, %v4634_v59, %v4599_v0  ;;  %5696 = vrot.lane.b32.xlu0 %v11315_v49, %s8490_s18  ;;  %v4758_v15 = vsel %vm1102_vm1, %v4749_v43, %v4757_v7  ;;  %v13356_v27 = vld [vmem:[#allocation35_spill] sm:$0xff] }
 0x41d   : > { %v4767_v41 = vshrl.u32 %v4671_v2, 16  ;;  %v4770_v54 = vshll.u32 %v4671_v2, 16  ;;  %7835 = vmatmul.mubr.msk.bf16.gmra.mrb[28].mxu1 %vm4832_vm2, %v4758_v15  ;;  %v4601_v33 = vpop.permute.xlu1 %4600  ;;  %v5453_v0 = vsel %vm13352_vm13, %v11602_v61, 0  ;;  %v4091_v43 = vsel %vm902_vm14, %v11117_v24, 0 }
 0x41e   : > { %v4761_v26 = vrot.slane %v4759_v11, 3  ;;  %v4764_v3 = vrot.slane %v4762_v12, 4  ;;  %v4603_v17 = vpop.permute.xlu0 %4602  ;;  %v11648_v40 = vsel %vm13354_vm8, %v5437_v37, 0  ;;  %vm13357_vm3 = vcmp.ne.s16.totalorder %v13356_v27, 0  ;;  %vm13361_vm8 = vmmov %vm13358_vm7 }
 0x41f   : > { %v4769_v47 = vrot.slane %v4767_v41, 3  ;;  %v4772_v35 = vrot.slane %v4770_v54, 4  ;;  %5698 = vrot.lane.b32.xlu1 %v11318_v21, %s8490_s18  ;;  %v4092_v21 = vsel %vm13357_vm3, %v11143_v42, 0  ;;  %v5579_v59 = vshrl.u32 %v11602_v61, 16 }
 0x420   : > { %v4765_v53 = vor.u32 %v4764_v3, %v4761_v26  ;;  %5616 = vrot.lane.b32.xlu0 %v13355_v34, %s8489_s28  ;;  %v5578_v12 = vsel %vm13358_vm7, %v11305_v39, %v5577_v9  ;;  %v5670_v2 = vrot.slane %v5453_v0, 1  ;;  %v5587_v39 = vshrl.u32 %v11598_v1, 16 }
 0x421   : > { %v4773_v58 = vor.u32 %v4772_v35, %v4769_v47  ;;  %v4275_v11 = vpop.permute.xlu1 %4274  ;;  %v5581_v54 = vor.u32 %v5579_v59, %v5577_v9  ;;  %v13359_v59 = vrot.slane %v11311_v23, 1  ;;  %vm13360_vm13 = vcmask 1046528  }
 0x422   : > { %v11665_v15 = vsel %vm1586_vm0, %v4091_v43, %v4275_v11  ;;  %v4636_v24 = vsel %vm1586_vm0, %v4471_v13, %v4275_v11  ;;  %v4277_v37 = vpop.permute.xlu0 %4276  ;;  %v4766_v41 = vsel %vm1102_vm1, %v4757_v7, %v4765_v53  ;;  %v5672_v11 = vrot.slane %v11648_v40, 1 }
 0x423   : > { %v4673_v26 = vsel %vm4419_vm6, %v4636_v24, %v4601_v33  ;;  %v11671_v3 = vsel %vm1586_vm0, %v4092_v21, %v4277_v37  ;;  %v4638_v42 = vsel %vm1586_vm0, %v4472_v4, %v4277_v37  ;;  %7838 = vmatprep.mubr.msk.bf16.mxu1 %vm4832_vm2, %v4766_v41  ;;  %5618 = vrot.lane.b32.xlu1 %v5578_v12, %s8489_s28  ;;  %v13362_v37 = vld [vmem:[#allocation36_spill] sm:$0xff]  ;;  %vm13364_vm7 = vcmp.ne.s16.totalorder %v13356_v27, 0 }
 0x424   : > { %v4775_v0 = vshrl.u32 %v4673_v26, 16  ;;  %v4778_v47 = vshll.u32 %v4673_v26, 16  ;;  %v4675_v35 = vsel %vm4419_vm6, %v4638_v42, %v4603_v17  ;;  %5700 = vrot.lane.b32.xlu0 %v11327_v52, %s8490_s18  ;;  %v4774_v7 = vsel %vm1102_vm1, %v4765_v53, %v4773_v58 }
 0x425   : > { %v4783_v33 = vshrl.u32 %v4675_v35, 16  ;;  %v4786_v9 = vshll.u32 %v4675_v35, 16  ;;  %7839 = vmatmul.mubr.msk.bf16.gmra.mrb[32].mxu1 %vm4832_vm2, %v4774_v7  ;;  %v4605_v43 = vpop.permute.xlu1 %4604  ;;  %v5671_v1 = vsel %vm13360_vm13, %v13359_v59, %v5670_v2  ;;  %v5586_v52 = vsel %vm13361_vm8, %v5581_v54, %v5585_v46 }
 0x426   : > { %v4777_v34 = vrot.slane %v4775_v0, 3  ;;  %v4780_v13 = vrot.slane %v4778_v47, 4  ;;  %v4607_v21 = vpop.permute.xlu0 %4606  ;;  %v5589_v53 = vor.u32 %v5587_v39, %v5585_v46  ;;  %vm13363_vm3 = vcmp.ne.s16.totalorder %v13362_v37, 0 }
 0x427   : > { %v4785_v17 = vrot.slane %v4783_v33, 3  ;;  %v4788_v4 = vrot.slane %v4786_v9, 4  ;;  %5702 = vrot.lane.b32.xlu1 %v5671_v1, %s8490_s18  ;;  %v4093_v41 = vsel %vm13363_vm3, %v11152_v55, 0  ;;  %v4473_v23 = vsel %vm13364_vm7, %v11152_v55, 0  ;;  %vm13365_vm13 = vmmov %vm13363_vm3 }
 0x428   : > { %v4781_v12 = vor.u32 %v4780_v13, %v4777_v34  ;;  %5620 = vrot.lane.b32.xlu0 %v5586_v52, %s8489_s28  ;;  %v4474_v26 = vsel %vm13365_vm13, %v11180_v62, 0  ;;  %vm13366_vm8 = vcmask 1046528   ;;  %v13367_v52 = vld [vmem:[#allocation19_spill] sm:$0xff]  ;;  %vm13373_vm13 = vcmp.ne.s16.totalorder %v13305_v57, 0 }
 0x429   : > { %v4789_v24 = vor.u32 %v4788_v4, %v4785_v17  ;;  %v4279_v40 = vpop.permute.xlu1 %4278  ;;  %v5673_v0 = vsel %vm13366_vm8, %v5670_v2, %v5672_v11  ;;  %vm13374_vm8 = vcmp.ne.s16.totalorder %v13328_v19, 0 }
 0x42a   : > { %v11699_v54 = vsel %vm1586_vm0, %v4093_v41, %v4279_v40  ;;  %v4640_v46 = vsel %vm1586_vm0, %v4473_v23, %v4279_v40  ;;  %v4523_v42 = vpop.permute.xlu0 %4522  ;;  %v4782_v39 = vsel %vm1102_vm1, %v4773_v58, %v4781_v12  ;;  %v13371_v41 = vld [vmem:[#allocation38_spill] sm:$0xff] }
 0x42b   : > { %v4677_v47 = vsel %vm4419_vm6, %v4640_v46, %v4605_v43  ;;  %v4643_v35 = vsel %vm1586_vm0, %v4474_v26, %v4523_v42  ;;  %7842 = vmatprep.mubr.msk.bf16.mxu1 %vm4832_vm2, %v4782_v39  ;;  %5622 = vrot.lane.b32.xlu1 %v5589_v53, %s8489_s28  ;;  %v4790_v55 = vsel %vm1102_vm1, %v4781_v12, %v4789_v24  ;;  %v13368_v53 = vld [vmem:[#allocation37_spill] sm:$0xff]  ;;  %v13370_v12 = vld [vmem:[#allocation15_spill] sm:$0xff]  ;;  %vm13372_vm7 = vcmp.ne.s16.totalorder %v13371_v41, 0 }
 0x42c   : > { %v4791_v62 = vshrl.u32 %v4677_v47, 16  ;;  %v4794_v7 = vshll.u32 %v4677_v47, 16  ;;  %v4679_v33 = vsel %vm4419_vm6, %v4643_v35, %v4607_v21  ;;  %5704 = vrot.lane.b32.xlu0 %v5673_v0, %s8490_s18  ;;  %vm13369_vm3 = vcmp.ne.s16.totalorder %v13368_v53, 0  ;;  %v4062_v0 = vld [vmem:[#allocation3] sm:$0xf8] }
 0x42d   : > { %v4799_v9 = vshrl.u32 %v4679_v33, 16  ;;  %v4802_v58 = vshll.u32 %v4679_v33, 16  ;;  %7843 = vmatmul.mubr.msk.bf16.gmra.mrb[36].mxu1 %vm4832_vm2, %v4790_v55  ;;  %v4609_v2 = vpop.permute.xlu1 %4608  ;;  %v4476_v21 = vsel %vm13369_vm3, %v13367_v52, 0  ;;  %v4475_v23 = vsel %vm13372_vm7, %v13370_v12, 0 }
 0x42e   : > { %v4793_v43 = vrot.slane %v4791_v62, 3  ;;  %v4796_v34 = vrot.slane %v4794_v7, 4  ;;  %v4527_v13 = vpop.permute.xlu0 %4526  ;;  %vm13375_vm3 = vcmp.ne.s16.totalorder %v13330_v50, 0  ;;  %vm13376_vm7 = vcmp.ne.s16.totalorder %v13335_v14, 0 }
 0x42f   : > { %v4801_v59 = vrot.slane %v4799_v9, 3  ;;  %v4804_v1 = vrot.slane %v4802_v58, 4  ;;  %5706 = vrot.lane.b32.xlu1 %v5672_v11, %s8490_s18  ;;  %v4649_v26 = vsel %vm1586_vm0, %v4476_v21, %v4527_v13  ;;  %v4079_v9 = vsel %vm13373_vm13, %v4062_v0, 0  ;;  %s12645_s18 = scalar_lea.vmem %s12865_s6, %s7560_s23 }
 0x430   : > { %v4797_v17 = vor.u32 %v4796_v34, %v4793_v43  ;;  %vm6835_vm13 = vcmask 1041408  }
 0x431   : > { %v4805_v4 = vor.u32 %v4804_v1, %v4801_v59  ;;  %v4525_v40 = vpop.permute.xlu1 %4524 }
 0x432   : > { %v4646_v46 = vsel %vm1586_vm0, %v4475_v23, %v4525_v40  ;;  %v4611_v42 = vpop.permute.xlu0 %4610  ;;  %v4798_v39 = vsel %vm1102_vm1, %v4789_v24, %v4797_v17 }
 0x433   : > { %v4681_v11 = vsel %vm4419_vm6, %v4646_v46, %v4609_v2  ;;  %v4683_v47 = vsel %vm4419_vm6, %v4649_v26, %v4611_v42  ;;  %7846 = vmatprep.mubr.msk.bf16.mxu1 %vm4832_vm2, %v4798_v39  ;;  %v4806_v35 = vsel %vm1102_vm1, %v4797_v17, %v4805_v4  ;;  %v4080_v17 = vsel %vm891_vm15, %v11245_v31, 0 }
 0x434   : > { %v4807_v55 = vshrl.u32 %v4681_v11, 16  ;;  %v4810_v62 = vshll.u32 %v4681_v11, 16  ;;  %v4815_v7 = vshrl.u32 %v4683_v47, 16  ;;  %v4818_v33 = vshll.u32 %v4683_v47, 16  ;;  %v11742_v11 = vld [vmem:[#allocation3 + $0x20] sm:$0xff] }
 0x435   : > { %7847 = vmatmul.mubr.msk.bf16.gmra.mrb[40].mxu1 %vm4832_vm2, %v4806_v35  ;;  %v4251_v58 = vpop.permute.xlu1 %4250  ;;  %v4082_v31 = vsel %vm13374_vm8, %v11460_v63, 0  ;;  %v4083_v47 = vsel %vm13375_vm3, %v11742_v11, 0  ;;  %vm13377_vm8 = vcmp.ne.s16.totalorder %v13339_v38, 0  ;;  %vm13379_vm3 = vcmp.ne.s16.totalorder %v13368_v53, 0 }
 0x436   : > { %v4809_v24 = vrot.slane %v4807_v55, 3  ;;  %v4812_v43 = vrot.slane %v4810_v62, 4  ;;  %v4817_v34 = vrot.slane %v4815_v7, 3  ;;  %v4820_v2 = vrot.slane %v4818_v33, 4  ;;  %v4253_v13 = vpop.permute.xlu0 %4252  ;;  %v11749_v62 = vld [vmem:[#allocation3 + $0x28] sm:$0xff] }
 0x437   : > { %v4370_v52 = vsel %vm1586_vm0, %v4079_v9, %v4251_v58  ;;  %v4373_v12 = vsel %vm1586_vm0, %v4080_v17, %v4253_v13  ;;  %v4379_v55 = vsel %vm1586_vm0, %v4082_v31, %v11465_v56  ;;  %v4084_v7 = vsel %vm13376_vm7, %v11749_v62, 0  ;;  %v6766_v56 = vld [vmem:[%s12864_s5] sm:$0x3] }
 0x438   : > { %v4813_v59 = vor.u32 %v4812_v43, %v4809_v24  ;;  %v4821_v1 = vor.u32 %v4820_v2, %v4817_v34  ;;  %8097 = vmatprep.subr.msk.bf16.mxu0 %vm6835_vm13, %v6766_v56  ;;  %vm13380_vm7 = vcmp.ne.s16.totalorder %v13305_v57, 0 }
 0x439   : > { %v4335_v21 = vpop.permute.xlu1 %4334 }
 0x43a   : > { %v4421_v23 = vsel %vm4419_vm6, %v4370_v52, %v4335_v21  ;;  %v4337_v40 = vpop.permute.xlu0 %4336  ;;  %v4814_v26 = vsel %vm1102_vm1, %v4805_v4, %v4813_v59  ;;  %v4822_v46 = vsel %vm1102_vm1, %v4813_v59, %v4821_v1 }
 0x43b   : > { %v5046_v42 = vshrl.u32 %v4421_v23, 16  ;;  %v5049_v39 = vshll.u32 %v4421_v23, 16  ;;  %v4423_v0 = vsel %vm4419_vm6, %v4373_v12, %v4337_v40  ;;  %7850 = vmatprep.mubr.msk.bf16.mxu1 %vm4832_vm2, %v4814_v26  ;;  %v6837_v12 = vsel %vm6835_vm13, %v6766_v56, 0 }
 0x43c   : > { %v5053_v35 = vshrl.u32 %v4423_v0, 16  ;;  %v5056_v4 = vshll.u32 %v4423_v0, 16  ;;  %v4382_v23 = vsel %vm1586_vm0, %v4083_v47, %v11488_v48  ;;  %7927 = vmatpush3.bf16.msra.mxu0 %v6837_v12  ;;  %v11769_v48 = vld [vmem:[#allocation3 + $0x30] sm:$0xff]  ;;  %vm13382_vm13 = vcmp.ne.s16.totalorder %v13328_v19, 0 }
 0x43d   : > { %v5048_v33 = vrot.slane %v5046_v42, 3  ;;  %v5051_v9 = vrot.slane %v5049_v39, 4  ;;  %7851 = vmatmul.mubr.msk.bf16.gmra.mrb[44].mxu1 %vm4832_vm2, %v4822_v46  ;;  %v4339_v63 = vpop.permute.xlu1 %4338 }
 0x43e   : > { %v5055_v58 = vrot.slane %v5053_v35, 3  ;;  %v5058_v24 = vrot.slane %v5056_v4, 4  ;;  %v4425_v43 = vsel %vm4419_vm6, %v11394_v30, %v4339_v63  ;;  %v4341_v34 = vpop.permute.xlu0 %4340  ;;  %v4385_v30 = vsel %vm1586_vm0, %v4084_v7, %v11506_v45 }
 0x43f   : > { %v5052_v2 = vor.u32 %v5051_v9, %v5048_v33  ;;  %v5061_v13 = vshrl.u32 %v4425_v43, 16  ;;  %v5064_v59 = vshll.u32 %v4425_v43, 16  ;;  %v4427_v1 = vsel %vm4419_vm6, %v4379_v55, %v4341_v34 }
 0x440   : > { %v5059_v52 = vor.u32 %v5058_v24, %v5055_v58  ;;  %v5069_v17 = vshrl.u32 %v4427_v1, 16  ;;  %v5072_v21 = vshll.u32 %v4427_v1, 16  ;;  %v4085_v45 = vsel %vm13377_vm8, %v11769_v48, 0  ;;  %v8144_v58 = vld [vmem:[%s12862_s3 + $0x20] ss:$0 sps:$4 sm:$0xff]  }
 0x441   : > { %v5063_v40 = vrot.slane %v5061_v13, 3  ;;  %v5066_v26 = vrot.slane %v5064_v59, 4  ;;  %v4343_v46 = vpop.permute.xlu1 %4342  ;;  %v4388_v24 = vsel %vm1586_vm0, %v4085_v45, %v11544_v10  ;;  %vm13383_vm8 = vcmp.ne.s16.totalorder %v13335_v14, 0 }
 0x442   : > { %v5071_v42 = vrot.slane %v5069_v17, 3  ;;  %v5074_v39 = vrot.slane %v5072_v21, 4  ;;  %v4429_v0 = vsel %vm4419_vm6, %v4382_v23, %v4343_v46  ;;  %v4345_v31 = vpop.permute.xlu0 %4344  ;;  %v5060_v35 = vsel %vm1102_vm1, %v5052_v2, %v5059_v52 }
 0x443   : > { %v5067_v4 = vor.u32 %v5066_v26, %v5063_v40  ;;  %v5077_v55 = vshrl.u32 %v4429_v0, 16  ;;  %v5080_v33 = vshll.u32 %v4429_v0, 16  ;;  %v4431_v9 = vsel %vm4419_vm6, %v4385_v30, %v4345_v31  ;;  %7858 = vmatprep.mubr.msk.bf16.mxu1 %vm4832_vm2, %v5060_v35 }
 0x444   : > { %v5075_v47 = vor.u32 %v5074_v39, %v5071_v42  ;;  %v5085_v7 = vshrl.u32 %v4431_v9, 16  ;;  %v5088_v63 = vshll.u32 %v4431_v9, 16  ;;  %v5990_v46 = vsel %vm3996_vm11, %v8144_v58, 0 }
 0x445   : > { %v5079_v43 = vrot.slane %v5077_v55, 3  ;;  %v5082_v34 = vrot.slane %v5080_v33, 4  ;;  %v4347_v56 = vpop.permute.xlu1 %4346  ;;  %v5068_v2 = vsel %vm1102_vm1, %v5059_v52, %v5067_v4 }
 0x446   : > { %v5087_v13 = vrot.slane %v5085_v7, 3  ;;  %v5090_v59 = vrot.slane %v5088_v63, 4  ;;  %v4433_v1 = vsel %vm4419_vm6, %v4388_v24, %v4347_v56  ;;  %v4349_v17 = vpop.permute.xlu0 %4348  ;;  %7859 = vmatmul.mubr.msk.bf16.vlgmr.msra.gmra.mrb[16].mxu1 %vm4832_vm2, %v5068_v2  ;;  %v5076_v21 = vsel %vm1102_vm1, %v5067_v4, %v5075_v47 }
 0x447   : > { %v5083_v12 = vor.u32 %v5082_v34, %v5079_v43  ;;  %v5093_v23 = vshrl.u32 %v4433_v1, 16  ;;  %v5096_v30 = vshll.u32 %v4433_v1, 16  ;;  %v4435_v10 = vsel %vm4419_vm6, %v11556_v25, %v4349_v17  ;;  %7891 = vmatpush3.bf16.msra.mxu1 %v11513_v18  ;;  %7862 = vmatprep.mubr.msk.bf16.mxu1 %vm4832_vm2, %v5076_v21 }
 0x448   : > { %v5091_v52 = vor.u32 %v5090_v59, %v5087_v13  ;;  %v5101_v40 = vshrl.u32 %v4435_v10, 16  ;;  %v5104_v26 = vshll.u32 %v4435_v10, 16  ;;  %8096 = vmatprep.subr.msk.bf16.mxu1 %vm3996_vm11, %v8144_v58  ;;  %vm13378_vm11 = vcmp.ne.s16.totalorder %v13371_v41, 0 }
 0x449   : > { %v5095_v42 = vrot.slane %v5093_v23, 3  ;;  %v5098_v39 = vrot.slane %v5096_v30, 4  ;;  %v4351_v0 = vpop.permute.xlu1 %4350  ;;  %v5084_v31 = vsel %vm1102_vm1, %v5075_v47, %v5083_v12 }
 0x44a   : > { %v5103_v35 = vrot.slane %v5101_v40, 3  ;;  %v5106_v4 = vrot.slane %v5104_v26, 4  ;;  %v4437_v25 = vsel %vm4419_vm6, %v11578_v6, %v4351_v0  ;;  %v4353_v18 = vpop.permute.xlu0 %4352  ;;  %v5092_v55 = vsel %vm1102_vm1, %v5083_v12, %v5091_v52 }
 0x44b   : > { %v5099_v33 = vor.u32 %v5098_v39, %v5095_v42  ;;  %v5109_v9 = vshrl.u32 %v4437_v25, 16  ;;  %v5112_v45 = vshll.u32 %v4437_v25, 16  ;;  %v4439_v7 = vsel %vm4419_vm6, %v11587_v8, %v4353_v18  ;;  %7893 = vmatpush3.bf16.msra.mxu1 %v5990_v46 }
 0x44c   : > { %v5107_v63 = vor.u32 %v5106_v4, %v5103_v35  ;;  %v5117_v58 = vshrl.u32 %v4439_v7, 16  ;;  %v5120_v24 = vshll.u32 %v4439_v7, 16 }
 0x44d   : > { %v5111_v43 = vrot.slane %v5109_v9, 3  ;;  %v5114_v47 = vrot.slane %v5112_v45, 4  ;;  %v4355_v34 = vpop.permute.xlu1 %4354  ;;  %v5100_v56 = vsel %vm1102_vm1, %v5091_v52, %v5099_v33 }
 0x44e   : > { %v5119_v2 = vrot.slane %v5117_v58, 3  ;;  %v5122_v6 = vrot.slane %v5120_v24, 4  ;;  %v4441_v13 = vsel %vm4419_vm6, %v11620_v51, %v4355_v34  ;;  %v4357_v59 = vpop.permute.xlu0 %4356  ;;  %7863 = vmatmul.mubr.msk.bf16.gmra.mrb[20].mxu1 %vm4832_vm2, %v5084_v31  ;;  %v5108_v1 = vsel %vm1102_vm1, %v5099_v33, %v5107_v63 }
 0x44f   : > { %v5115_v8 = vor.u32 %v5114_v47, %v5111_v43  ;;  %v5125_v17 = vshrl.u32 %v4441_v13, 16  ;;  %v5128_v21 = vshll.u32 %v4441_v13, 16  ;;  %v4443_v12 = vsel %vm4419_vm6, %v11627_v60, %v4357_v59  ;;  %7866 = vmatprep.mubr.msk.bf16.mxu1 %vm4832_vm2, %v5092_v55 }
 0x450   : > { %v5123_v23 = vor.u32 %v5122_v6, %v5119_v2  ;;  %v5133_v30 = vshrl.u32 %v4443_v12, 16  ;;  %v5136_v10 = vshll.u32 %v4443_v12, 16 }
 0x451   : > { %v5127_v52 = vrot.slane %v5125_v17, 3  ;;  %v5130_v40 = vrot.slane %v5128_v21, 4  ;;  %v4359_v26 = vpop.permute.xlu1 %4358  ;;  %v5116_v51 = vsel %vm1102_vm1, %v5107_v63, %v5115_v8  ;;  %v11816_v21 = vld [vmem:[#allocation3 + $0x78] sm:$0xff] }
 0x452   : > { %v5135_v46 = vrot.slane %v5133_v30, 3  ;;  %v5138_v42 = vrot.slane %v5136_v10, 4  ;;  %v4445_v39 = vsel %vm4419_vm6, %v11665_v15, %v4359_v26  ;;  %v4361_v0 = vpop.permute.xlu0 %4360  ;;  %v5124_v31 = vsel %vm1102_vm1, %v5115_v8, %v5123_v23 }
 0x453   : > { %v5131_v35 = vor.u32 %v5130_v40, %v5127_v52  ;;  %v5141_v60 = vshrl.u32 %v4445_v39, 16  ;;  %v5144_v4 = vshll.u32 %v4445_v39, 16  ;;  %v4447_v25 = vsel %vm4419_vm6, %v11671_v3, %v4361_v0 }
 0x454   : > { %v5139_v18 = vor.u32 %v5138_v42, %v5135_v46  ;;  %v5149_v55 = vshrl.u32 %v4447_v25, 16  ;;  %v5152_v33 = vshll.u32 %v4447_v25, 16 }
 0x455   : > { %v5143_v9 = vrot.slane %v5141_v60, 3  ;;  %v5146_v45 = vrot.slane %v5144_v4, 4  ;;  %v4363_v7 = vpop.permute.xlu1 %4362  ;;  %v5132_v63 = vsel %vm1102_vm1, %v5123_v23, %v5131_v35 }
 0x456   : > { %v5151_v58 = vrot.slane %v5149_v55, 3  ;;  %v5154_v24 = vrot.slane %v5152_v33, 4  ;;  %v4449_v15 = vsel %vm4419_vm6, %v11699_v54, %v4363_v7  ;;  %v4365_v43 = vpop.permute.xlu0 %4364  ;;  %7867 = vmatmul.mubr.msk.bf16.gmra.mrb[24].mxu1 %vm4832_vm2, %v5100_v56  ;;  %v5140_v47 = vsel %vm1102_vm1, %v5131_v35, %v5139_v18 }
 0x457   : > { %v5147_v34 = vor.u32 %v5146_v45, %v5143_v9  ;;  %v5157_v3 = vshrl.u32 %v4449_v15, 16  ;;  %v5160_v2 = vshll.u32 %v4449_v15, 16  ;;  %7870 = vmatprep.mubr.msk.bf16.mxu1 %vm4832_vm2, %v5108_v1  ;;  %v4094_v54 = vsel %vm13378_vm11, %v11816_v21, 0 }
 0x458   : > { %v5155_v6 = vor.u32 %v5154_v24, %v5151_v58  ;;  %v4095_v1 = vsel %vm13379_vm3, %v11415_v16, 0  ;;  %vm13384_vm11 = vcmp.ne.s16.totalorder %v13339_v38, 0  ;;  %vm13385_vm3 = vcmp.ne.s16.totalorder %v13330_v50, 0 }
 0x459   : > { %v5159_v13 = vrot.slane %v5157_v3, 3  ;;  %v5162_v59 = vrot.slane %v5160_v2, 4  ;;  %v4283_v8 = vpop.permute.xlu1 %4282  ;;  %v5148_v17 = vsel %vm1102_vm1, %v5139_v18, %v5147_v34 }
 0x45a   : > { %v4281_v56 = vpop.permute.xlu0 %4280  ;;  %v5156_v12 = vsel %vm1102_vm1, %v5147_v34, %v5155_v6  ;;  %v4418_v52 = vsel %vm1586_vm0, %v4095_v1, %v4283_v8 }
 0x45b   : > { %v5163_v23 = vor.u32 %v5162_v59, %v5159_v13  ;;  %v4415_v30 = vsel %vm1586_vm0, %v4094_v54, %v4281_v56 }
 0x45c   : > { %v4451_v10 = vsel %vm4419_vm6, %v4415_v30, %v4365_v43 }
 0x45d   : > { %v5165_v40 = vshrl.u32 %v4451_v10, 16  ;;  %v5168_v26 = vshll.u32 %v4451_v10, 16  ;;  %v4367_v46 = vpop.permute.xlu1 %4366  ;;  %v5164_v42 = vsel %vm1102_vm1, %v5155_v6, %v5163_v23 }
 0x45e   : > { %v4453_v39 = vsel %vm4419_vm6, %v4418_v52, %v4367_v46  ;;  %v5677_v0 = vpop.permute.xlu0 %5676  ;;  %7871 = vmatmul.mubr.msk.bf16.gmra.mrb[28].mxu1 %vm4832_vm2, %v5116_v51  ;;  %v5402_v51 = vld [vmem:[#allocation3 + $0x10] sm:$0xf8]  ;;  %v8435_v52 = vld [vmem:[#allocation3 + $0x38] sm:$0xff] }
 0x45f   : > { %v5167_v35 = vrot.slane %v5165_v40, 3  ;;  %v5170_v60 = vrot.slane %v5168_v26, 4  ;;  %v5173_v4 = vshrl.u32 %v4453_v39, 16  ;;  %v5176_v25 = vshll.u32 %v4453_v39, 16  ;;  %7874 = vmatprep.mubr.msk.bf16.mxu1 %vm4832_vm2, %v5124_v31 }
 0x460   : > { %v5420_v31 = vsel %vm891_vm15, %v11435_v36, 0  ;;  %v5419_v3 = vsel %vm13380_vm7, %v5402_v51, 0  ;;  %vm13381_vm15 = vcmp.ne.s16.totalorder %v13300_v20, 0  ;;  %v5424_v40 = vsel %vm13383_vm8, %v8435_v52, 0 }
 0x461   : > { %v5171_v16 = vor.u32 %v5170_v60, %v5167_v35  ;;  %v5175_v18 = vrot.slane %v5173_v4, 3  ;;  %v5178_v55 = vrot.slane %v5176_v25, 4  ;;  %v5675_v33 = vpop.permute.xlu1 %5674 }
 0x462   : > { %v5591_v9 = vpop.permute.xlu0 %5590 }
 0x463   : > { %v5179_v45 = vor.u32 %v5178_v55, %v5175_v18  ;;  %v5172_v7 = vsel %vm1102_vm1, %v5163_v23, %v5171_v16  ;;  %v5710_v6 = vsel %vm1586_vm0, %v5419_v3, %v5591_v9  ;;  %v5421_v23 = vsel %vm13381_vm15, %v11742_v11, 0 }
 0x464   : > { %v5423_v3 = vsel %vm13385_vm3, %v11769_v48, 0 }
 0x465   : > { %v5593_v58 = vpop.permute.xlu1 %5592  ;;  %v11834_v24 = vsel %vm1102_vm1, %v5171_v16, %v5179_v45 }
 0x466   : > { %v5595_v15 = vpop.permute.xlu0 %5594  ;;  %7875 = vmatmul.mubr.msk.bf16.gmra.mrb[32].mxu1 %vm4832_vm2, %v5132_v63  ;;  %v5713_v2 = vsel %vm1586_vm0, %v5420_v31, %v5593_v58 }
 0x467   : > { %7878 = vmatprep.mubr.msk.bf16.mxu1 %vm4832_vm2, %v5140_v47  ;;  %v5762_v59 = vsel %vm4419_vm6, %v5713_v2, %v5677_v0  ;;  %v5760_v47 = vsel %vm4419_vm6, %v5710_v6, %v5675_v33  ;;  %v5716_v30 = vsel %vm1586_vm0, %v5421_v23, %v5595_v15  ;;  %v8437_v2 = vld [vmem:[#allocation3 + $0x48] sm:$0xff] }
 0x468   : > { %v5804_v5 = vshrl.u32 %v5762_v59, 16  ;;  %v5807_v36 = vshll.u32 %v5762_v59, 16  ;;  %v5797_v54 = vshrl.u32 %v5760_v47, 16  ;;  %v5800_v57 = vshll.u32 %v5760_v47, 16 }
 0x469   : > { %v5679_v43 = vpop.permute.xlu1 %5678  ;;  %v5426_v6 = vsel %vm897_vm12, %v8437_v2, 0  ;;  %vm13386_vm12 = vcmp.ne.s16.totalorder %v13356_v27, 0 }
 0x46a   : > { %v5597_v34 = vpop.permute.xlu0 %5596  ;;  %v5806_v1 = vrot.slane %v5804_v5, 3  ;;  %v5809_v10 = vrot.slane %v5807_v36, 4  ;;  %v5799_v46 = vrot.slane %v5797_v54, 3  ;;  %v5802_v39 = vrot.slane %v5800_v57, 4 }
 0x46b   : > { %v5432_v49 = vsel %vm13386_vm12, %v11816_v21, 0 }
 0x46c   : > { %v5810_v18 = vor.u32 %v5809_v10, %v5806_v1  ;;  %v5803_v9 = vor.u32 %v5802_v39, %v5799_v46 }
 0x46d   : > { %v5599_v13 = vpop.permute.xlu1 %5598 }
 0x46e   : > { %v5681_v63 = vpop.permute.xlu0 %5680  ;;  %7879 = vmatmul.mubr.msk.bf16.gmra.mrb[36].mxu1 %vm4832_vm2, %v5148_v17  ;;  %v5422_v17 = vsel %vm13382_vm13, %v11749_v62, 0  ;;  %v8436_v62 = vld [vmem:[#allocation3 + $0x40] sm:$0xff]  ;;  %v5722_v59 = vsel %vm1586_vm0, %v5423_v3, %v5599_v13  ;;  %v5811_v36 = vsel %vm1102_vm1, %v5803_v9, %v5810_v18 }
 0x46f   : > { %7882 = vmatprep.mubr.msk.bf16.mxu1 %vm4832_vm2, %v5156_v12  ;;  %v5764_v12 = vsel %vm4419_vm6, %v5716_v30, %v5679_v43  ;;  %v5719_v20 = vsel %vm1586_vm0, %v5422_v17, %v5597_v34  ;;  %v5425_v35 = vsel %vm13384_vm11, %v8436_v62, 0  ;;  %v8438_v17 = vld [vmem:[#allocation3 + $0x50] sm:$0xff] }
 0x470   : > { %v5766_v19 = vsel %vm4419_vm6, %v5719_v20, %v5681_v63  ;;  %v5812_v14 = vshrl.u32 %v5764_v12, 16  ;;  %v5815_v4 = vshll.u32 %v5764_v12, 16  ;;  %v5427_v1 = vsel %vm898_vm10, %v8438_v17, 0 }
 0x471   : > { %v5683_v8 = vpop.permute.xlu1 %5682  ;;  %v5823_v45 = vshll.u32 %v5766_v19, 16  ;;  %vm13387_vm10 = vcmp.ne.s16.totalorder %v13362_v37, 0 }
 0x472   : > { %v5601_v56 = vpop.permute.xlu0 %5600  ;;  %v5814_v34 = vrot.slane %v5812_v14, 3 }
 0x473   : > { %v5725_v11 = vsel %vm1586_vm0, %v5424_v40, %v5601_v56  ;;  %v5825_v57 = vrot.slane %v5823_v45, 4  ;;  %v5768_v56 = vsel %vm4419_vm6, %v5722_v59, %v5683_v8 }
 0x474   : > { %v5828_v12 = vshrl.u32 %v5768_v56, 16  ;;  %v5831_v52 = vshll.u32 %v5768_v56, 16 }
 0x475   : > { %v5603_v26 = vpop.permute.xlu1 %5602 }
 0x476   : > { %v5685_v0 = vpop.permute.xlu0 %5684  ;;  %7883 = vmatmul.mubr.msk.bf16.gmra.mrb[40].mxu1 %vm4832_vm2, %v5164_v42  ;;  %v5728_v55 = vsel %vm1586_vm0, %v5425_v35, %v5603_v26  ;;  %v5820_v42 = vshrl.u32 %v5766_v19, 16  ;;  %v8439_v35 = vld [vmem:[#allocation3 + $0x58] sm:$0xff] }
 0x477   : > { %v5770_v60 = vsel %vm4419_vm6, %v5725_v11, %v5685_v0  ;;  %7886 = vmatprep.mubr.msk.bf16.mxu1 %vm4832_vm2, %v5172_v7  ;;  %v5817_v7 = vrot.slane %v5815_v4, 4  ;;  %v5830_v4 = vrot.slane %v5828_v12, 3 }
 0x478   : > { %v5836_v25 = vshrl.u32 %v5770_v60, 16  ;;  %v5839_v16 = vshll.u32 %v5770_v60, 16  ;;  %v5822_v54 = vrot.slane %v5820_v42, 3  ;;  %v5428_v60 = vsel %vm899_vm5, %v8439_v35, 0 }
 0x479   : > { %v5687_v33 = vpop.permute.xlu1 %5686  ;;  %v5818_v13 = vor.u32 %v5817_v7, %v5814_v34  ;;  %vm13388_vm5 = vcmp.ne.s16.totalorder %v13371_v41, 0 }
 0x47a   : > { %v5772_v58 = vsel %vm4419_vm6, %v5728_v55, %v5687_v33  ;;  %v5605_v15 = vpop.permute.xlu0 %5604  ;;  %v5838_v38 = vrot.slane %v5836_v25, 3  ;;  %v5841_v51 = vrot.slane %v5839_v16, 4  ;;  %v5826_v46 = vor.u32 %v5825_v57, %v5822_v54  ;;  %v8441_v57 = vld [vmem:[#allocation3 + $0x68] sm:$0xff] }
 0x47b   : > { %v5844_v43 = vshrl.u32 %v5772_v58, 16  ;;  %v5847_v31 = vshll.u32 %v5772_v58, 16  ;;  %v5731_v23 = vsel %vm1586_vm0, %v5426_v6, %v5605_v15  ;;  %v5819_v14 = vsel %vm1102_vm1, %v5810_v18, %v5818_v13  ;;  %v8440_v18 = vld [vmem:[#allocation3 + $0x60] sm:$0xff] }
 0x47c   : > { %v11880_v50 = vor.u32 %v5841_v51, %v5838_v38  ;;  %v5833_v25 = vrot.slane %v5831_v52, 4  ;;  %v5827_v45 = vsel %vm1102_vm1, %v5818_v13, %v5826_v46  ;;  %v5429_v38 = vsel %vm900_vm9, %v8440_v18, 0 }
 0x47d   : > { %v5846_v63 = vrot.slane %v5844_v43, 3  ;;  %v5849_v47 = vrot.slane %v5847_v31, 4  ;;  %v5607_v5 = vpop.permute.xlu1 %5606  ;;  %v5430_v56 = vsel %vm901_vm4, %v8441_v57, 0  ;;  %v5434_v37 = vsel %vm13388_vm5, %v11602_v61, 0 }
 0x47e   : > { %v5689_v30 = vpop.permute.xlu0 %5688  ;;  %7887 = vmatmul.mubr.msk.bf16.gmra.mrb[44].mxu1 %vm4832_vm2, %v11834_v24  ;;  %v5734_v40 = vsel %vm1586_vm0, %v5427_v1, %v5607_v5  ;;  %v5834_v31 = vor.u32 %v5833_v25, %v5830_v4  ;;  %vm13389_vm9 = vcmp.ne.s16.totalorder %v13368_v53, 0  ;;  %vm13390_vm4 = vcmask 31744  }
 0x47f   : > { %v5850_v28 = vor.u32 %v5849_v47, %v5846_v63  ;;  %v5774_v48 = vsel %vm4419_vm6, %v5731_v23, %v5689_v30  ;;  %7894 = vmatprep.mubr.msk.bf16.mxu1 %vm4832_vm2, %v5811_v36 }
 0x480   : > { %v5852_v10 = vshrl.u32 %v5774_v48, 16  ;;  %v5855_v8 = vshll.u32 %v5774_v48, 16  ;;  %v5835_v30 = vsel %vm1102_vm1, %v5826_v46, %v5834_v31  ;;  %v5843_v13 = vsel %vm1102_vm1, %v5834_v31, %v11880_v50 }
 0x481   : > { %v5691_v26 = vpop.permute.xlu1 %5690  ;;  %v11889_v24 = vsel %vm1102_vm1, %v11880_v50, %v5850_v28 }
 0x482   : > { %v5854_v39 = vrot.slane %v5852_v10, 3  ;;  %v5857_v20 = vrot.slane %v5855_v8, 4  ;;  %v5776_v11 = vsel %vm4419_vm6, %v5734_v40, %v5691_v26  ;;  %v5609_v0 = vpop.permute.xlu0 %5608  ;;  %v5431_v8 = vsel %vm902_vm14, %v8442_v29, 0  ;;  %v8445_v29 = vld [vmem:[%s8556_s26 + $0x4] sm:$0xf]  ;;  %vm13391_vm14 = vmmov %vm13390_vm4 }
 0x483   : > { %v5860_v19 = vshrl.u32 %v5776_v11, 16  ;;  %v5863_v32 = vshll.u32 %v5776_v11, 16  ;;  %v5737_v9 = vsel %vm1586_vm0, %v5428_v60, %v5609_v0 }
 0x484   : > { %v5858_v62 = vor.u32 %v5857_v20, %v5854_v39 }
 0x485   : > { %v5862_v16 = vrot.slane %v5860_v19, 3  ;;  %v5865_v55 = vrot.slane %v5863_v32, 4  ;;  %v5611_v33 = vpop.permute.xlu1 %5610 }
 0x486   : > { %v5693_v42 = vpop.permute.xlu0 %5692  ;;  %7895 = vmatmul.mubr.msk.bf16.vlgmr.msra.gmra.mrb[16].mxu1 %vm4832_vm2, %v5819_v14  ;;  %v5859_v58 = vsel %vm1102_vm1, %v5850_v28, %v5858_v62  ;;  %v5740_v34 = vsel %vm1586_vm0, %v5429_v38, %v5611_v33  ;;  %v8443_v33 = vld [vmem:[#allocation3 + $0x80] sm:$0xff] }
 0x487   : > { %v5866_v15 = vor.u32 %v5865_v55, %v5862_v16  ;;  %v5778_v22 = vsel %vm4419_vm6, %v5737_v9, %v5693_v42  ;;  %7898 = vmatprep.mubr.msk.bf16.mxu1 %vm4832_vm2, %v5827_v45  ;;  %v5433_v9 = vsel %vm13387_vm10, %v8443_v33, 0 }
 0x488   : > { %v5868_v51 = vshrl.u32 %v5778_v22, 16  ;;  %v5871_v43 = vshll.u32 %v5778_v22, 16 }
 0x489   : > { %v5695_v7 = vpop.permute.xlu1 %5694  ;;  %v11905_v3 = vsel %vm1102_vm1, %v5858_v62, %v5866_v15 }
 0x48a   : > { %v5870_v2 = vrot.slane %v5868_v51, 3  ;;  %v5873_v6 = vrot.slane %v5871_v43, 4  ;;  %v5780_v59 = vsel %vm4419_vm6, %v5740_v34, %v5695_v7  ;;  %v5613_v63 = vpop.permute.xlu0 %5612 }
 0x48b   : > { %v5876_v47 = vshrl.u32 %v5780_v59, 16  ;;  %v5879_v5 = vshll.u32 %v5780_v59, 16  ;;  %v5743_v28 = vsel %vm1586_vm0, %v5430_v56, %v5613_v63 }
 0x48c   : > { %v5874_v36 = vor.u32 %v5873_v6, %v5870_v2 }
 0x48d   : > { %v5878_v54 = vrot.slane %v5876_v47, 3  ;;  %v5881_v44 = vrot.slane %v5879_v5, 4  ;;  %v5615_v23 = vpop.permute.xlu1 %5614 }
 0x48e   : > { %v5697_v48 = vpop.permute.xlu0 %5696  ;;  %7899 = vmatmul.mubr.msk.bf16.gmra.mrb[20].mxu1 %vm4832_vm2, %v5835_v30  ;;  %v5875_v17 = vsel %vm1102_vm1, %v5866_v15, %v5874_v36  ;;  %v5746_v40 = vsel %vm1586_vm0, %v5431_v8, %v5615_v23  ;;  %v8446_v8 = vld [vmem:[%s8556_s26] sm:$0xf] }
 0x48f   : > { %v5882_v1 = vor.u32 %v5881_v44, %v5878_v54  ;;  %v5782_v10 = vsel %vm4419_vm6, %v5743_v28, %v5697_v48  ;;  %7902 = vmatprep.mubr.msk.bf16.mxu1 %vm4832_vm2, %v5843_v13 }
 0x490   : > { %v5884_v12 = vshrl.u32 %v5782_v10, 16  ;;  %v5887_v52 = vshll.u32 %v5782_v10, 16 }
 0x491   : > { %v5699_v26 = vpop.permute.xlu1 %5698  ;;  %v5883_v46 = vsel %vm1102_vm1, %v5874_v36, %v5882_v1 }
 0x492   : > { %v5886_v39 = vrot.slane %v5884_v12, 3  ;;  %v5889_v50 = vrot.slane %v5887_v52, 4  ;;  %v5784_v20 = vsel %vm4419_vm6, %v5746_v40, %v5699_v26  ;;  %v5617_v11 = vpop.permute.xlu0 %5616  ;;  %v7494_v12 = vcombine.low %v8446_v8, %v8445_v29  ;;  %v8447_v52 = vld [vmem:[%s8556_s26 + $0xc] sm:$0xf]  ;;  %v8448_v40 = vld [vmem:[%s8556_s26 + $0x8] sm:$0xf] }
 0x493   : > { %v5892_v0 = vshrl.u32 %v5784_v20, 16  ;;  %v5895_v19 = vshll.u32 %v5784_v20, 16  ;;  %v5749_v14 = vsel %vm1586_vm0, %v5432_v49, %v5617_v11  ;;  %v7495_v26 = vcombine.low %v8448_v40, %v8447_v52  ;;  %v8451_v20 = vld [vmem:[%s8556_s26 + $0x18] sm:$0xf]  ;;  %v8452_v11 = vld [vmem:[%s8556_s26 + $0x1c] sm:$0xf] }
 0x494   : > { %v5890_v32 = vor.u32 %v5889_v50, %v5886_v39  ;;  %7928 = vmatprep.mubr.msk.bf16.mxu0 %vm13390_vm4, %v7494_v12  ;;  %v8450_v39 = vld [vmem:[%s8556_s26 + $0x14] sm:$0xf]  ;;  %v8456_v49 = vld [vmem:[%s8556_s26 + $0x2c] sm:$0xf] }
 0x495   : > { %v5894_v62 = vrot.slane %v5892_v0, 3  ;;  %v5897_v35 = vrot.slane %v5895_v19, 4  ;;  %v5619_v60 = vpop.permute.xlu1 %5618  ;;  %7929 = vmatmul.mubr.msk.bf16.vlgmr.msra.gmra.mrb[32].mxu0 %vm13391_vm14, %v7495_v26  ;;  %v7497_v0 = vcombine.low %v8451_v20, %v8452_v11  ;;  %v8453_v19 = vld [vmem:[%s8556_s26 + $0x20] sm:$0xf] }
 0x496   : > { %v5701_v4 = vpop.permute.xlu0 %5700  ;;  %7903 = vmatmul.mubr.msk.bf16.gmra.mrb[24].mxu1 %vm4832_vm2, %v11889_v24  ;;  %v5891_v25 = vsel %vm1102_vm1, %v5882_v1, %v5890_v32  ;;  %v5752_v42 = vsel %vm1586_vm0, %v5433_v9, %v5619_v60  ;;  %v8461_v9 = vld [vmem:[%s8556_s26 + $0x40] sm:$0xf] }
 0x497   : > { %v5898_v16 = vor.u32 %v5897_v35, %v5894_v62  ;;  %v5786_v55 = vsel %vm4419_vm6, %v5749_v14, %v5701_v4  ;;  %7906 = vmatprep.mubr.msk.bf16.mxu1 %vm4832_vm2, %v5859_v58  ;;  %v8455_v35 = vld [vmem:[%s8556_s26 + $0x28] sm:$0xf]  ;;  %v8457_v14 = vld [vmem:[%s8556_s26 + $0x30] sm:$0xf]  ;;  %v8458_v4 = vld [vmem:[%s8556_s26 + $0x34] sm:$0xf] }
 0x498   : > { %v5900_v27 = vshrl.u32 %v5786_v55, 16  ;;  %v5903_v21 = vshll.u32 %v5786_v55, 16  ;;  %v7499_v60 = vcombine.low %v8455_v35, %v8456_v49  ;;  %v8460_v55 = vld [vmem:[%s8556_s26 + $0x3c] sm:$0xf] }
 0x499   : > { %v5703_v45 = vpop.permute.xlu1 %5702  ;;  %v5899_v15 = vsel %vm1102_vm1, %v5890_v32, %v5898_v16  ;;  %v8454_v32 = vld [vmem:[%s8556_s26 + $0x24] sm:$0xf] }
 0x49a   : > { %v5902_v22 = vrot.slane %v5900_v27, 3  ;;  %v5905_v24 = vrot.slane %v5903_v21, 4  ;;  %v5788_v18 = vsel %vm4419_vm6, %v5752_v42, %v5703_v45  ;;  %v5621_v38 = vpop.permute.xlu0 %5620  ;;  %v7498_v62 = vcombine.low %v8453_v19, %v8454_v32  ;;  %v8462_v27 = vld [vmem:[%s8556_s26 + $0x44] sm:$0xf]  ;;  %v8463_v42 = vld [vmem:[%s8556_s26 + $0x48] sm:$0xf] }
 0x49b   : > { %v5908_v51 = vshrl.u32 %v5788_v18, 16  ;;  %v5911_v43 = vshll.u32 %v5788_v18, 16  ;;  %v5755_v7 = vsel %vm1586_vm0, %v5434_v37, %v5621_v38  ;;  %v7502_v21 = vcombine.low %v8461_v9, %v8462_v27  ;;  %v8464_v45 = vld [vmem:[%s8556_s26 + $0x4c] sm:$0xf]  ;;  %v8467_v38 = vld [vmem:[%s8556_s26 + $0x58] sm:$0xf] }
 0x49c   : > { %v5906_v31 = vor.u32 %v5905_v24, %v5902_v22  ;;  %v8465_v22 = vld [vmem:[%s8556_s26 + $0x50] sm:$0xf]  ;;  %v8466_v24 = vld [vmem:[%s8556_s26 + $0x54] sm:$0xf]  ;;  %v8471_v37 = vld [vmem:[%s8556_s26 + $0x68] sm:$0xf] }
 0x49d   : > { %v5910_v58 = vrot.slane %v5908_v51, 3  ;;  %v5913_v34 = vrot.slane %v5911_v43, 4  ;;  %v5623_v44 = vpop.permute.xlu1 %5622  ;;  %v7504_v18 = vcombine.low %v8465_v22, %v8466_v24  ;;  %v8468_v51 = vld [vmem:[%s8556_s26 + $0x5c] sm:$0xf] }
 0x49e   : > { %v5705_v2 = vpop.permute.xlu0 %5704  ;;  %7907 = vmatmul.mubr.msk.bf16.gmra.mrb[28].mxu1 %vm4832_vm2, %v11905_v3  ;;  %v5907_v6 = vsel %vm1102_vm1, %v5898_v16, %v5906_v31  ;;  %v8444_v3 = vld [vmem:[#allocation3 + $0x90] sm:$0xf]  ;;  %v8459_v16 = vld [vmem:[%s8556_s26 + $0x38] sm:$0xf]  ;;  %v7505_v43 = vcombine.low %v8467_v38, %v8468_v51 }
 0x49f   : > { %v5914_v59 = vor.u32 %v5913_v34, %v5910_v58  ;;  %v5790_v63 = vsel %vm4419_vm6, %v5755_v7, %v5705_v2  ;;  %7910 = vmatprep.mubr.msk.bf16.mxu1 %vm4832_vm2, %v5875_v17  ;;  %v5435_v56 = vsel %vm13389_vm9, %v8444_v3, 0  ;;  %v7501_v33 = vcombine.low %v8459_v16, %v8460_v55  ;;  %v8470_v58 = vld [vmem:[%s8556_s26 + $0x64] sm:$0xf]  ;;  %v8472_v7 = vld [vmem:[%s8556_s26 + $0x6c] sm:$0xf] }
 0x4a0   : > { %v5916_v47 = vshrl.u32 %v5790_v63, 16  ;;  %v5919_v5 = vshll.u32 %v5790_v63, 16  ;;  %v5758_v23 = vsel %vm1586_vm0, %v5435_v56, %v5623_v44  ;;  %v7507_v2 = vcombine.low %v8471_v37, %v8472_v7 }
 0x4a1   : > { %v5915_v36 = vsel %vm1102_vm1, %v5906_v31, %v5914_v59  ;;  %v5707_v30 = vpop.permute.xlu1 %5706  ;;  %v8469_v31 = vld [vmem:[%s8556_s26 + $0x60] sm:$0xf] }
 0x4a2   : > { %v5918_v54 = vrot.slane %v5916_v47, 3  ;;  %v5921_v41 = vrot.slane %v5919_v5, 4  ;;  %v5792_v28 = vsel %vm4419_vm6, %v5758_v23, %v5707_v30  ;;  %v7506_v34 = vcombine.low %v8469_v31, %v8470_v58  ;;  %v8475_v47 = vld [vmem:[%s8556_s26 + $0x78] sm:$0xf]  ;;  %v8476_v5 = vld [vmem:[%s8556_s26 + $0x7c] sm:$0xf] }
 0x4a3   : > { %v5924_v48 = vshrl.u32 %v5792_v28, 16  ;;  %v5927_v13 = vshll.u32 %v5792_v28, 16 }
 0x4a4   : > { %v5922_v61 = vor.u32 %v5921_v41, %v5918_v54  ;;  %v13406_v54 = vld [vmem:[#allocation4_spill] sm:$0xff] }
 0x4a5   : > { %v5926_v17 = vrot.slane %v5924_v48, 3  ;;  %v5929_v53 = vrot.slane %v5927_v13, 4  ;;  %v6187_v41 = vsub.s32 3, %v13406_v54 }
 0x4a6   : > { %7911 = vmatmul.mubr.msk.bf16.gmra.mrb[32].mxu1 %vm4832_vm2, %v5883_v46  ;;  %v5923_v57 = vsel %vm1102_vm1, %v5914_v59, %v5922_v61  ;;  %v8449_v46 = vld [vmem:[%s8556_s26 + $0x10] sm:$0xf]  ;;  %v8474_v59 = vld [vmem:[%s8556_s26 + $0x74] sm:$0xf] }
 0x4a7   : > { %7914 = vmatprep.mubr.msk.bf16.mxu1 %vm4832_vm2, %v5891_v25  ;;  %v5930_v1 = vor.u32 %v5929_v53, %v5926_v17  ;;  %v7496_v50 = vcombine.low %v8449_v46, %v8450_v39  ;;  %v7500_v25 = vcombine.low %v8457_v14, %v8458_v4 }
 0x4a9   : > { %v5931_v10 = vsel %vm1102_vm1, %v5922_v61, %v5930_v1  ;;  %vm13392_vm1 = vmmov %vm13390_vm4  ;;  %v12012_v61 = vld [vmem:[%s12863_s4] sm:$0xff] }
 0x4aa   : > { %7932 = vmatprep.mubr.msk.bf16.mxu0 %vm13392_vm1, %v7496_v50  ;;  %vm13393_vm6 = vmmov %vm13392_vm1  ;;  %v12015_v44 = vrot.slane %v12012_v61, %v6187_v41 }
 0x4ab   : > { %7933 = vmatmul.mubr.msk.bf16.gmra.mrb[36].mxu0 %vm13393_vm6, %v7497_v0  ;;  %vm13395_vm7 = vmmov %vm13392_vm1 }
 0x4ac   : > { %vm13396_vm15 = vmmov %vm13392_vm1 }
 0x4ad   : > { %vm13397_vm13 = vmmov %vm13392_vm1 }
 0x4ae   : > { %7915 = vmatmul.mubr.msk.bf16.gmra.mrb[36].mxu1 %vm4832_vm2, %v5899_v15  ;;  %vm13398_vm8 = vmmov %vm13392_vm1  ;;  %v7503_v15 = vcombine.low %v8463_v42, %v8464_v45 }
 0x4af   : > { %7918 = vmatprep.mubr.msk.bf16.mxu1 %vm4832_vm2, %v5907_v6  ;;  %vm13399_vm11 = vmmov %vm13392_vm1  ;;  %v8473_v6 = vld [vmem:[%s8556_s26 + $0x70] sm:$0xf] }
 0x4b0   : > { %vm13400_vm3 = vmmov %vm13392_vm1  ;;  %v7508_v63 = vcombine.low %v8473_v6, %v8474_v59 }
 0x4b1   : > { %vm13401_vm12 = vmmov %vm13392_vm1 }
 0x4b2   : > { %vm13402_vm10 = vmmov %vm13392_vm1 }
 0x4b3   : > { %vm13403_vm5 = vmmov %vm13392_vm1 }
 0x4b4   : > { %vm13404_vm9 = vmmov %vm13392_vm1 }
 0x4b5   : > { %vm13405_vm4 = vmmov %vm13392_vm1 }
 0x4b6   : > { %7919 = vmatmul.mubr.msk.bf16.gmra.mrb[40].mxu1 %vm4832_vm2, %v5915_v36  ;;  %v7509_v36 = vcombine.low %v8475_v47, %v8476_v5 }
 0x4b7   : > { %7922 = vmatprep.mubr.msk.bf16.mxu1 %vm4832_vm2, %v5923_v57 }
 0x4be   : > { %7923 = vmatmul.mubr.msk.bf16.gmra.mrb[44].mxu1 %vm4832_vm2, %v5931_v10  ;;  %vm13394_vm2 = vmmov %vm13392_vm1 }
 0x4bf   : > { %7936 = vmatprep.mubr.msk.bf16.mxu0 %vm13394_vm2, %v7498_v62 }
 0x4c0   : > { %7937 = vmatmul.mubr.msk.bf16.gmra.mrb[40].mxu0 %vm13395_vm7, %v7499_v60 }
 0x4c1   : > { %7940 = vmatprep.mubr.msk.bf16.mxu0 %vm13396_vm15, %v7500_v25 }
 0x4c8   : > { %7941 = vmatmul.mubr.msk.bf16.gmra.mrb[44].mxu0 %vm13397_vm13, %v7501_v33 }
 0x4c9   : > { %7944 = vmatprep.mubr.msk.bf16.mxu0 %vm13398_vm8, %v7502_v21 }
 0x4d0   : > { %7945 = vmatmul.mubr.msk.bf16.gmra.mrb[48].mxu0 %vm13399_vm11, %v7503_v15 }
 0x4d1   : > { %7948 = vmatprep.mubr.msk.bf16.mxu0 %vm13400_vm3, %v7504_v18 }
 0x4d8   : > { %7949 = vmatmul.mubr.msk.bf16.gmra.mrb[52].mxu0 %vm13401_vm12, %v7505_v43 }
 0x4d9   : > { %7952 = vmatprep.mubr.msk.bf16.mxu0 %vm13402_vm10, %v7506_v34 }
 0x4e0   : > { %7953 = vmatmul.mubr.msk.bf16.gmra.mrb[56].mxu0 %vm13403_vm5, %v7507_v2 }
 0x4e1   : > { %7956 = vmatprep.mubr.msk.bf16.mxu0 %vm13404_vm9, %v7508_v63 }
 0x4e8   : > { %7957 = vmatmul.mubr.msk.bf16.gmra.mrb[60].mxu0 %vm13405_vm4, %v7509_v36 }
 0x559   : > { %v7896_v57 = vpop.f32.mrb[16].mxu1 }
 0x55a   : > { %v6026_v3 = vpop.f32.mrb[17].mxu1  ;;  %v12018_v56 = vadd.f32 %v7896_v57, %v12015_v44 }
 0x55b   : > { %v12021_v23 = vadd.f32 %v12015_v44, %v6026_v3  ;;  %v7897_v30 = vpop.f32.mrb[18].mxu1 }
 0x55c   : > { %v6029_v28 = vpop.f32.mrb[19].mxu1  ;;  %v12026_v13 = vadd.f32 %v7897_v30, %v12015_v44  ;;  %v6297_v53 = vmul.f32 %v12018_v56, %v12018_v56  ;;  %v6224_v12 = vsel %vm1586_vm0, %v12018_v56, 0.0 }
 0x55d   : > { %v6295_v48 = vmul.f32 %v12021_v23, %v12021_v23  ;;  %v12029_v17 = vadd.f32 %v12015_v44, %v6029_v28  ;;  %v6221_v1 = vsel %vm1586_vm0, %v12021_v23, 0.0 }
 0x55e   : > { %v6298_v40 = vmul.f32 %v12026_v13, %v12026_v13  ;;  %v6330_v11 = vsel %vm1586_vm0, %v6297_v53, 0.0  ;;  %v6226_v0 = vsel %vm1586_vm0, %v12026_v13, 0.0 }
 0x55f   : > { %v6222_v10 = vsel %vm1586_vm0, %v12029_v17, 0.0  ;;  %v6296_v29 = vmul.f32 %v12029_v17, %v12029_v17  ;;  %v6327_v52 = vsel %vm1586_vm0, %v6295_v48, 0.0 }
 0x560   : > { %v6223_v8 = vadd.f32 %v6222_v10, %v6221_v1  ;;  %v6332_v14 = vsel %vm1586_vm0, %v6298_v40, 0.0 }
 0x561   : > { %v6328_v26 = vsel %vm1586_vm0, %v6296_v29, 0.0  ;;  %v7900_v46 = vpop.f32.mrb[20].mxu1 }
 0x562   : > { %v6225_v39 = vadd.f32 %v6224_v12, %v6223_v8  ;;  %v6329_v50 = vadd.f32 %v6328_v26, %v6327_v52  ;;  %v6042_v20 = vpop.f32.mrb[21].mxu1  ;;  %v12052_v35 = vadd.f32 %v7900_v46, %v12015_v44 }
 0x563   : > { %v12049_v19 = vadd.f32 %v12015_v44, %v6042_v20  ;;  %v7901_v32 = vpop.f32.mrb[22].mxu1 }
 0x564   : > { %v6331_v62 = vadd.f32 %v6330_v11, %v6329_v50  ;;  %v6227_v49 = vadd.f32 %v6226_v0, %v6225_v39  ;;  %v6045_v60 = vpop.f32.mrb[23].mxu1  ;;  %v12063_v9 = vadd.f32 %v7901_v32, %v12015_v44  ;;  %v6301_v42 = vmul.f32 %v12052_v35, %v12052_v35 }
 0x565   : > { %v6228_v4 = vsel %vm1586_vm0, %v12049_v19, 0.0  ;;  %v6299_v25 = vmul.f32 %v12049_v19, %v12049_v19  ;;  %v12060_v16 = vadd.f32 %v12015_v44, %v6045_v60  ;;  %v6232_v24 = vsel %vm1586_vm0, %v12052_v35, 0.0 }
 0x566   : > { %v6229_v55 = vadd.f32 %v6228_v4, %v6227_v49  ;;  %v6333_v33 = vadd.f32 %v6332_v14, %v6331_v62  ;;  %v6302_v38 = vmul.f32 %v12063_v9, %v12063_v9  ;;  %v6234_v58 = vsel %vm1586_vm0, %v12063_v9, 0.0 }
 0x567   : > { %v6334_v27 = vsel %vm1586_vm0, %v6299_v25, 0.0  ;;  %v6230_v21 = vsel %vm1586_vm0, %v12060_v16, 0.0  ;;  %v6300_v22 = vmul.f32 %v12060_v16, %v12060_v16  ;;  %v6338_v2 = vsel %vm1586_vm0, %v6301_v42, 0.0 }
 0x568   : > { %v6335_v45 = vadd.f32 %v6334_v27, %v6333_v33  ;;  %v6231_v15 = vadd.f32 %v6230_v21, %v6229_v55  ;;  %v6340_v57 = vsel %vm1586_vm0, %v6302_v38, 0.0 }
 0x569   : > { %v7904_v18 = vpop.f32.mrb[24].mxu1  ;;  %v6336_v43 = vsel %vm1586_vm0, %v6300_v22, 0.0 }
 0x56a   : > { %v6233_v51 = vadd.f32 %v6232_v24, %v6231_v15  ;;  %v6058_v31 = vpop.f32.mrb[25].mxu1  ;;  %v6337_v34 = vadd.f32 %v6336_v43, %v6335_v45  ;;  %v12084_v6 = vadd.f32 %v7904_v18, %v12015_v44 }
 0x56b   : > { %v12080_v37 = vadd.f32 %v12015_v44, %v6058_v31  ;;  %v7905_v7 = vpop.f32.mrb[26].mxu1 }
 0x56c   : > { %v6235_v59 = vadd.f32 %v6234_v58, %v6233_v51  ;;  %v6061_v63 = vpop.f32.mrb[27].mxu1  ;;  %v6339_v47 = vadd.f32 %v6338_v2, %v6337_v34  ;;  %v12095_v30 = vadd.f32 %v7905_v7, %v12015_v44  ;;  %v6305_v10 = vmul.f32 %v12084_v6, %v12084_v6 }
 0x56d   : > { %v6236_v5 = vsel %vm1586_vm0, %v12080_v37, 0.0  ;;  %v6303_v36 = vmul.f32 %v12080_v37, %v12080_v37  ;;  %v12091_v41 = vadd.f32 %v12015_v44, %v6061_v63  ;;  %v6240_v8 = vsel %vm1586_vm0, %v12084_v6, 0.0 }
 0x56e   : > { %v6237_v3 = vadd.f32 %v6236_v5, %v6235_v59  ;;  %v6341_v28 = vadd.f32 %v6340_v57, %v6339_v47  ;;  %v6306_v26 = vmul.f32 %v12095_v30, %v12095_v30  ;;  %v6242_v50 = vsel %vm1586_vm0, %v12095_v30, 0.0 }
 0x56f   : > { %v6342_v48 = vsel %vm1586_vm0, %v6303_v36, 0.0  ;;  %v6238_v53 = vsel %vm1586_vm0, %v12091_v41, 0.0  ;;  %v6304_v1 = vmul.f32 %v12091_v41, %v12091_v41  ;;  %v6346_v32 = vsel %vm1586_vm0, %v6305_v10, 0.0 }
 0x570   : > { %v6239_v29 = vadd.f32 %v6238_v53, %v6237_v3  ;;  %v6343_v12 = vadd.f32 %v6342_v48, %v6341_v28  ;;  %v6348_v33 = vsel %vm1586_vm0, %v6306_v26, 0.0 }
 0x571   : > { %v6344_v52 = vsel %vm1586_vm0, %v6304_v1, 0.0  ;;  %v7908_v40 = vpop.f32.mrb[28].mxu1 }
 0x572   : > { %v6241_v46 = vadd.f32 %v6240_v8, %v6239_v29  ;;  %v6074_v39 = vpop.f32.mrb[29].mxu1  ;;  %v6345_v20 = vadd.f32 %v6344_v52, %v6343_v12  ;;  %v12116_v62 = vadd.f32 %v7908_v40, %v12015_v44 }
 0x573   : > { %v12112_v11 = vadd.f32 %v12015_v44, %v6074_v39  ;;  %v7909_v0 = vpop.f32.mrb[30].mxu1 }
 0x574   : > { %v6243_v49 = vadd.f32 %v6242_v50, %v6241_v46  ;;  %v6077_v60 = vpop.f32.mrb[31].mxu1  ;;  %v6347_v14 = vadd.f32 %v6346_v32, %v6345_v20  ;;  %v12127_v21 = vadd.f32 %v7909_v0, %v12015_v44  ;;  %v6309_v24 = vmul.f32 %v12116_v62, %v12116_v62 }
 0x575   : > { %v6244_v4 = vsel %vm1586_vm0, %v12112_v11, 0.0  ;;  %v6307_v25 = vmul.f32 %v12112_v11, %v12112_v11  ;;  %v12123_v55 = vadd.f32 %v12015_v44, %v6077_v60  ;;  %v6248_v38 = vsel %vm1586_vm0, %v12116_v62, 0.0 }
 0x576   : > { %v6245_v27 = vadd.f32 %v6244_v4, %v6243_v49  ;;  %v6349_v42 = vadd.f32 %v6348_v33, %v6347_v14  ;;  %v6310_v58 = vmul.f32 %v12127_v21, %v12127_v21  ;;  %v6250_v2 = vsel %vm1586_vm0, %v12127_v21, 0.0 }
 0x577   : > { %v6350_v45 = vsel %vm1586_vm0, %v6307_v25, 0.0  ;;  %v6246_v15 = vsel %vm1586_vm0, %v12123_v55, 0.0  ;;  %v6308_v22 = vmul.f32 %v12123_v55, %v12123_v55  ;;  %v6354_v5 = vsel %vm1586_vm0, %v6309_v24, 0.0 }
 0x578   : > { %v6247_v18 = vadd.f32 %v6246_v15, %v6245_v27  ;;  %v6351_v51 = vadd.f32 %v6350_v45, %v6349_v42  ;;  %v6356_v10 = vsel %vm1586_vm0, %v6310_v58, 0.0 }
 0x579   : > { %v6352_v43 = vsel %vm1586_vm0, %v6308_v22, 0.0  ;;  %v7912_v31 = vpop.f32.mrb[32].mxu1 }
 0x57a   : > { %v6249_v34 = vadd.f32 %v6248_v38, %v6247_v18  ;;  %v6090_v7 = vpop.f32.mrb[33].mxu1  ;;  %v6353_v59 = vadd.f32 %v6352_v43, %v6351_v51  ;;  %v12148_v36 = vadd.f32 %v7912_v31, %v12015_v44 }
 0x57b   : > { %v12144_v63 = vadd.f32 %v12015_v44, %v6090_v7  ;;  %v7913_v47 = vpop.f32.mrb[34].mxu1 }
 0x57c   : > { %v6251_v57 = vadd.f32 %v6250_v2, %v6249_v34  ;;  %v6093_v3 = vpop.f32.mrb[35].mxu1  ;;  %v6355_v28 = vadd.f32 %v6354_v5, %v6353_v59  ;;  %v12159_v8 = vadd.f32 %v7913_v47, %v12015_v44  ;;  %v6313_v46 = vmul.f32 %v12148_v36, %v12148_v36 }
 0x57d   : > { %v6252_v48 = vsel %vm1586_vm0, %v12144_v63, 0.0  ;;  %v6311_v53 = vmul.f32 %v12144_v63, %v12144_v63  ;;  %v12155_v1 = vadd.f32 %v12015_v44, %v6093_v3  ;;  %v6256_v50 = vsel %vm1586_vm0, %v12148_v36, 0.0 }
 0x57e   : > { %v6253_v29 = vadd.f32 %v6252_v48, %v6251_v57  ;;  %v6357_v12 = vadd.f32 %v6356_v10, %v6355_v28  ;;  %v6314_v49 = vmul.f32 %v12159_v8, %v12159_v8  ;;  %v6258_v4 = vsel %vm1586_vm0, %v12159_v8, 0.0 }
 0x57f   : > { %v6358_v52 = vsel %vm1586_vm0, %v6311_v53, 0.0  ;;  %v6254_v40 = vsel %vm1586_vm0, %v12155_v1, 0.0  ;;  %v6312_v26 = vmul.f32 %v12155_v1, %v12155_v1  ;;  %v6362_v42 = vsel %vm1586_vm0, %v6313_v46, 0.0 }
 0x580   : > { %v6255_v39 = vadd.f32 %v6254_v40, %v6253_v29  ;;  %v6359_v20 = vadd.f32 %v6358_v52, %v6357_v12  ;;  %v6364_v43 = vsel %vm1586_vm0, %v6314_v49, 0.0 }
 0x581   : > { %v6360_v0 = vsel %vm1586_vm0, %v6312_v26, 0.0  ;;  %v7916_v32 = vpop.f32.mrb[36].mxu1 }
 0x582   : > { %v6257_v60 = vadd.f32 %v6256_v50, %v6255_v39  ;;  %v6106_v14 = vpop.f32.mrb[37].mxu1  ;;  %v6361_v25 = vadd.f32 %v6360_v0, %v6359_v20  ;;  %v12180_v45 = vadd.f32 %v7916_v32, %v12015_v44 }
 0x583   : > { %v12176_v33 = vadd.f32 %v12015_v44, %v6106_v14  ;;  %v7917_v27 = vpop.f32.mrb[38].mxu1 }
 0x584   : > { %v6259_v15 = vadd.f32 %v6258_v4, %v6257_v60  ;;  %v6109_v22 = vpop.f32.mrb[39].mxu1  ;;  %v6363_v24 = vadd.f32 %v6362_v42, %v6361_v25  ;;  %v12191_v58 = vadd.f32 %v7917_v27, %v12015_v44  ;;  %v6317_v47 = vmul.f32 %v12180_v45, %v12180_v45 }
 0x585   : > { %v6260_v18 = vsel %vm1586_vm0, %v12176_v33, 0.0  ;;  %v6315_v38 = vmul.f32 %v12176_v33, %v12176_v33  ;;  %v12187_v51 = vadd.f32 %v12015_v44, %v6109_v22  ;;  %v6264_v57 = vsel %vm1586_vm0, %v12180_v45, 0.0 }
 0x586   : > { %v6261_v31 = vadd.f32 %v6260_v18, %v6259_v15  ;;  %v6365_v34 = vadd.f32 %v6364_v43, %v6363_v24  ;;  %v6318_v53 = vmul.f32 %v12191_v58, %v12191_v58  ;;  %v6266_v12 = vsel %vm1586_vm0, %v12191_v58, 0.0 }
 0x587   : > { %v6366_v7 = vsel %vm1586_vm0, %v6315_v38, 0.0  ;;  %v6262_v2 = vsel %vm1586_vm0, %v12187_v51, 0.0  ;;  %v6316_v59 = vmul.f32 %v12187_v51, %v12187_v51  ;;  %v6370_v46 = vsel %vm1586_vm0, %v6317_v47, 0.0 }
 0x588   : > { %v6263_v5 = vadd.f32 %v6262_v2, %v6261_v31  ;;  %v6367_v3 = vadd.f32 %v6366_v7, %v6365_v34  ;;  %v6372_v14 = vsel %vm1586_vm0, %v6318_v53, 0.0 }
 0x589   : > { %v6368_v28 = vsel %vm1586_vm0, %v6316_v59, 0.0  ;;  %v7920_v48 = vpop.f32.mrb[40].mxu1 }
 0x58a   : > { %v6265_v10 = vadd.f32 %v6264_v57, %v6263_v5  ;;  %v6122_v29 = vpop.f32.mrb[41].mxu1  ;;  %v6369_v52 = vadd.f32 %v6368_v28, %v6367_v3  ;;  %v12212_v39 = vadd.f32 %v7920_v48, %v12015_v44 }
 0x58b   : > { %v12208_v40 = vadd.f32 %v12015_v44, %v6122_v29  ;;  %v7921_v26 = vpop.f32.mrb[42].mxu1 }
 0x58c   : > { %v6267_v50 = vadd.f32 %v6266_v12, %v6265_v10  ;;  %v6125_v20 = vpop.f32.mrb[43].mxu1  ;;  %v6371_v0 = vadd.f32 %v6370_v46, %v6369_v52  ;;  %v12223_v25 = vadd.f32 %v7921_v26, %v12015_v44  ;;  %v6321_v24 = vmul.f32 %v12212_v39, %v12212_v39 }
 0x58d   : > { %v6268_v32 = vsel %vm1586_vm0, %v12208_v40, 0.0  ;;  %v6319_v49 = vmul.f32 %v12208_v40, %v12208_v40  ;;  %v12219_v60 = vadd.f32 %v12015_v44, %v6125_v20  ;;  %v6272_v38 = vsel %vm1586_vm0, %v12212_v39, 0.0 }
 0x58e   : > { %v6269_v4 = vadd.f32 %v6268_v32, %v6267_v50  ;;  %13408 = vst [vmem:[#allocation23_spill] sm:$0xff] %v12223_v25  ;;  %v6373_v27 = vadd.f32 %v6372_v14, %v6371_v0  ;;  %v6322_v7 = vmul.f32 %v12223_v25, %v12223_v25  ;;  %v6274_v47 = vsel %vm1586_vm0, %v12223_v25, 0.0 }
 0x58f   : > { %13407 = vst [vmem:[#allocation25_spill] sm:$0xff] %v12219_v60  ;;  %v6374_v42 = vsel %vm1586_vm0, %v6319_v49, 0.0  ;;  %v6270_v15 = vsel %vm1586_vm0, %v12219_v60, 0.0  ;;  %v6320_v22 = vmul.f32 %v12219_v60, %v12219_v60  ;;  %v6378_v28 = vsel %vm1586_vm0, %v6321_v24, 0.0 }
 0x590   : > { %v6271_v18 = vadd.f32 %v6270_v15, %v6269_v4  ;;  %v6375_v43 = vadd.f32 %v6374_v42, %v6373_v27  ;;  %v6380_v46 = vsel %vm1586_vm0, %v6322_v7, 0.0 }
 0x591   : > { %v6376_v31 = vsel %vm1586_vm0, %v6320_v22, 0.0  ;;  %v7924_v34 = vpop.f32.mrb[44].mxu1 }
 0x592   : > { %v6273_v2 = vadd.f32 %v6272_v38, %v6271_v18  ;;  %v6138_v59 = vpop.f32.mrb[45].mxu1  ;;  %v6377_v5 = vadd.f32 %v6376_v31, %v6375_v43  ;;  %v12244_v48 = vadd.f32 %v7924_v34, %v12015_v44 }
 0x593   : > { %v12240_v57 = vadd.f32 %v12015_v44, %v6138_v59  ;;  %v7925_v3 = vpop.f32.mrb[46].mxu1  ;;  %v7930_v59 = vpop.f32.mrb[32].mxu0 }
 0x594   : > { %13410 = vst [vmem:[#allocation6_spill] sm:$0xff] %v12244_v48  ;;  %v6275_v53 = vadd.f32 %v6274_v47, %v6273_v2  ;;  %v6141_v10 = vpop.f32.mrb[47].mxu1  ;;  %v6379_v29 = vadd.f32 %v6378_v28, %v6377_v5  ;;  %v12255_v20 = vadd.f32 %v7925_v3, %v12015_v44  ;;  %v6325_v4 = vmul.f32 %v12244_v48, %v12244_v48  ;;  %v6873_v47 = vpop.f32.mrb[33].mxu0 }
 0x595   : > { %13409 = vst [vmem:[#allocation5_spill] sm:$0xff] %v12240_v57  ;;  %v6276_v12 = vsel %vm1586_vm0, %v12240_v57, 0.0  ;;  %v6323_v52 = vmul.f32 %v12240_v57, %v12240_v57  ;;  %v12251_v26 = vadd.f32 %v12015_v44, %v6141_v10  ;;  %v6280_v42 = vsel %vm1586_vm0, %v12244_v48, 0.0  ;;  %v7931_v5 = vpop.f32.mrb[34].mxu0 }
 0x596   : > { %v6277_v50 = vadd.f32 %v6276_v12, %v6275_v53  ;;  %13412 = vst [vmem:[#allocation7_spill] sm:$0xff] %v12255_v20  ;;  %v6381_v0 = vadd.f32 %v6380_v46, %v6379_v29  ;;  %v6326_v22 = vmul.f32 %v12255_v20, %v12255_v20  ;;  %v6282_v18 = vsel %vm1586_vm0, %v12255_v20, 0.0  ;;  %v6876_v3 = vpop.f32.mrb[35].mxu0 }
 0x597   : > { %13411 = vst [vmem:[#allocation39_spill] sm:$0xff] %v12251_v26  ;;  %v6382_v32 = vsel %vm1586_vm0, %v6323_v52, 0.0  ;;  %v6278_v49 = vsel %vm1586_vm0, %v12251_v26, 0.0  ;;  %v6324_v14 = vmul.f32 %v12251_v26, %v12251_v26  ;;  %v6386_v31 = vsel %vm1586_vm0, %v6325_v4, 0.0  ;;  %v7934_v28 = vpop.f32.mrb[36].mxu0 }
 0x598   : > { %v6279_v27 = vadd.f32 %v6278_v49, %v6277_v50  ;;  %v6383_v15 = vadd.f32 %v6382_v32, %v6381_v0  ;;  %v6388_v7 = vsel %vm1586_vm0, %v6326_v22, 0.0  ;;  %v6889_v53 = vpop.f32.mrb[37].mxu0 }
 0x599   : > { %v6384_v44 = vsel %vm1586_vm0, %v6324_v14, 0.0  ;;  %v12273_v10 = vpop.f32.mrb[38].mxu0  ;;  %vm13454_vm0 = vcmask 60416  }
 0x59a   : > { %v6281_v24 = vadd.f32 %v6280_v42, %v6279_v27  ;;  %v6385_v38 = vadd.f32 %v6384_v44, %v6383_v15  ;;  %v6892_v52 = vpop.f32.mrb[39].mxu0  ;;  %vm13455_vm14 = vmmov %vm13454_vm0 }
 0x59b   : > { %v7938_v0 = vpop.f32.mrb[40].mxu0  ;;  %vm13456_vm1 = vmmov %vm13454_vm0 }
 0x59c   : > { %v6283_v43 = vadd.f32 %v6282_v18, %v6281_v24  ;;  %v6387_v34 = vadd.f32 %v6386_v31, %v6385_v38  ;;  %v6905_v49 = vpop.f32.mrb[41].mxu0  ;;  %vm13457_vm6 = vmmov %vm13454_vm0 }
 0x59d   : > { %v7939_v4 = vpop.f32.mrb[42].mxu0  ;;  %vm13458_vm2 = vmmov %vm13454_vm0 }
 0x59e   : > { %6284 = vadd.xlane.f32.xlu0 %v6283_v43  ;;  %v6389_v2 = vadd.f32 %v6388_v7, %v6387_v34  ;;  %v6908_v42 = vpop.f32.mrb[43].mxu0  ;;  %vm13459_vm7 = vmmov %vm13454_vm0 }
 0x59f   : > { %v7942_v44 = vpop.f32.mrb[44].mxu0  ;;  %vm13460_vm15 = vmmov %vm13454_vm0 }
 0x5a0   : > { %6390 = vadd.xlane.f32.xlu1 %v6389_v2  ;;  %v6921_v34 = vpop.f32.mrb[45].mxu0  ;;  %vm13461_vm13 = vmmov %vm13454_vm0 }
 0x5a1   : > { %v7943_v7 = vpop.f32.mrb[46].mxu0  ;;  %vm13462_vm8 = vmmov %vm13454_vm0 }
 0x5a2   : > { %v6924_v2 = vpop.f32.mrb[47].mxu0  ;;  %vm13464_vm11 = vmmov %vm13454_vm0 }
 0x5a3   : > { %vm13465_vm3 = vmmov %vm13454_vm0 }
 0x5a4   : > { %vm13466_vm12 = vmmov %vm13454_vm0 }
 0x5a5   : > { %vm13469_vm10 = vmmov %vm13454_vm0 }
 0x5a6   : > { %vm13484_vm5 = vmmov %vm13454_vm0 }
 0x5a7   : > { %vm13487_vm9 = vmmov %vm13454_vm0 }
 0x5a8   : > { %vm13489_vm4 = vmmov %vm13454_vm0 }
 0x62b   : > { %v6285_v29 = vpop.xlane.xlu0 %6284 }
 0x62c   : > { %v6286_v12 = vrot.slane %v6285_v29, 4 }
 0x62d   : > { %v6391_v50 = vpop.xlane.xlu1 %6390 }
 0x62e   : > { %v6287_v46 = vadd.f32 %v6286_v12, %v6285_v29  ;;  %v6392_v32 = vrot.slane %v6391_v50, 4  ;;  %v7946_v29 = vpop.f32.mrb[48].mxu0 }
 0x62f   : > { %v6937_v12 = vpop.f32.mrb[49].mxu0 }
 0x630   : > { %v6288_v14 = vrot.slane %v6287_v46, 2  ;;  %v6393_v27 = vadd.f32 %v6392_v32, %v6391_v50  ;;  %v7947_v26 = vpop.f32.mrb[50].mxu0 }
 0x631   : > { %v6940_v20 = vpop.f32.mrb[51].mxu0 }
 0x632   : > { %v6289_v15 = vadd.f32 %v6288_v14, %v6287_v46  ;;  %v6394_v22 = vrot.slane %v6393_v27, 2  ;;  %v7950_v57 = vpop.f32.mrb[52].mxu0 }
 0x633   : > { %v6953_v50 = vpop.f32.mrb[53].mxu0 }
 0x634   : > { %v6290_v24 = vrot.slane %v6289_v15, 1  ;;  %v6395_v18 = vadd.f32 %v6394_v22, %v6393_v27  ;;  %v12275_v32 = vpop.f32.mrb[54].mxu0 }
 0x635   : > { %13413 = vst [vmem:[#allocation29_spill] sm:$0xff] %v12275_v32  ;;  %v12277_v46 = vpop.f32.mrb[55].mxu0 }
 0x636   : > { %v6291_v38 = vadd.f32 %v6290_v24, %v6289_v15  ;;  %v6396_v43 = vrot.slane %v6395_v18, 1  ;;  %13414 = vst [vmem:[#allocation27_spill] sm:$0xff] %v12277_v46  ;;  %v12279_v14 = vpop.f32.mrb[56].mxu0 }
 0x637   : > { %13415 = vst [vmem:[#allocation26_spill] sm:$0xff] %v12279_v14  ;;  %v12281_v27 = vpop.f32.mrb[57].mxu0 }
 0x638   : > { %8102 = vpush %v6291_v38  ;;  %v6397_v31 = vadd.f32 %v6396_v43, %v6395_v18  ;;  %13416 = vst [vmem:[#allocation28_spill] sm:$0xff] %v12281_v27  ;;  %v12283_v15 = vpop.f32.mrb[58].mxu0 }
 0x639   : > { %13417 = vst [vmem:[#allocation30_spill] sm:$0xff] %v12283_v15  ;;  %v12285_v22 = vpop.f32.mrb[59].mxu0 }
 0x63a   : > { %8104 = vpush %v6397_v31  ;;  %13418 = vst [vmem:[#allocation10_spill] sm:$0xff] %v12285_v22  ;;  %v12287_v24 = vpop.f32.mrb[60].mxu0  ;;  %v6769_v31 = vsub.s32 6, %v13406_v54 }
 0x63b   : > { %13419 = vst [vmem:[#allocation31_spill] sm:$0xff] %v12287_v24  ;;  %v12289_v18 = vpop.f32.mrb[61].mxu0 }
 0x63c   : > { %13420 = vst [vmem:[#allocation8_spill] sm:$0xff] %v12289_v18  ;;  %v12291_v38 = vpop.f32.mrb[62].mxu0  ;;  %v12301_v22 = vrot.slane %v12012_v61, %v6769_v31 }
 0x63d   : > { %13421 = vst [vmem:[#allocation17_spill] sm:$0xff] %v12291_v38  ;;  %v12293_v43 = vpop.f32.mrb[63].mxu0  ;;  %v6472_v38 = vsub.s32 4, %v13406_v54 }
 0x63e   : > { %13422 = vst [vmem:[#allocation32_spill] sm:$0xff] %v12293_v43  ;;  %13423 = vst [vmem:[#allocation11_spill] sm:$0xff] %v12301_v22  ;;  %v6508_v43 = vsub.s32 5, %v13406_v54  ;;  %v12306_v14 = vadd.f32 %v7930_v59, %v12301_v22  ;;  %v12312_v60 = vadd.f32 %v7931_v5, %v12301_v22  ;;  %v12315_v25 = vadd.f32 %v6876_v3, %v12301_v22 }
 0x63f   : > { %v12324_v59 = vrot.slane %v12012_v61, %v6472_v38  ;;  %v12334_v5 = vadd.f32 %v6892_v52, %v12301_v22  ;;  %v12337_v3 = vadd.f32 %v7938_v0, %v12301_v22  ;;  %v12355_v52 = vadd.f32 %v7943_v7, %v12301_v22 }
 0x640   : > { %v12358_v0 = vadd.f32 %v6924_v2, %v12301_v22 }
 0x641   : > { %13425 = vst [vmem:[#allocation9_spill] sm:$0xff] %v12355_v52 }
 0x642   : > { %13426 = vst [vmem:[#allocation13_spill] sm:$0xff] %v12358_v0 }
 0x669   : > { %s8103_s26 = spop %8102 }
 0x66a   : > { %v6293_v46 = vstv %s8103_s26 }
 0x66b   : > { %v12296_v32 = vmul.f32 0.00048828125, %v6293_v46  ;;  %s8105_s15 = spop %8104  ;;  %v12309_v46 = vadd.f32 %v6873_v47, %v12301_v22  ;;  %v12331_v47 = vadd.f32 %v12273_v10, %v12301_v22  ;;  %v12352_v10 = vadd.f32 %v6921_v34, %v12301_v22 }
 0x66c   : > { %v6399_v27 = vstv %s8105_s15  ;;  %v12373_v34 = vadd.f32 %v7950_v57, %v12301_v22 }
 0x66d   : > { %v6401_v15 = vmul.f32 %v12296_v32, %v12296_v32  ;;  %v6400_v24 = vmul.f32 0.00048828125, %v6399_v27  ;;  %v12318_v27 = vadd.f32 %v7934_v28, %v12301_v22  ;;  %v12340_v28 = vadd.f32 %v6905_v49, %v12301_v22  ;;  %13424 = vst [vmem:[#allocation12_spill] sm:$0xff] %v12352_v10 }
 0x66e   : > { %v12361_v49 = vadd.f32 %v7946_v29, %v12301_v22  ;;  %13431 = vst [vmem:[#allocation20_spill] sm:$0xff] %v12373_v34  ;;  %v6404_v7 = vsub.f32 %v12021_v23, %v12296_v32  ;;  %v6405_v2 = vsub.f32 %v12029_v17, %v12296_v32  ;;  %v6406_v29 = vsub.f32 %v12018_v56, %v12296_v32 }
 0x66f   : > { %v6402_v18 = vsub.f32 %v6400_v24, %v6401_v15  ;;  %v12321_v15 = vadd.f32 %v6889_v53, %v12301_v22  ;;  %v12327_v24 = vrot.slane %v12012_v61, %v6508_v43  ;;  %v12346_v61 = vadd.f32 %v6908_v42, %v12301_v22 }
 0x670   : > { %v12349_v53 = vadd.f32 %v7942_v44, %v12301_v22  ;;  %13427 = vst [vmem:[#allocation14_spill] sm:$0xff] %v12361_v49  ;;  %v12367_v42 = vadd.f32 %v7947_v26, %v12301_v22  ;;  %v12370_v44 = vadd.f32 %v6940_v20, %v12301_v22  ;;  %v6407_v26 = vsub.f32 %v12026_v13, %v12296_v32 }
 0x671   : > { %v6403_v48 = vmax.f32 %v6402_v18, 0.0  ;;  %v6408_v20 = vsub.f32 %v12049_v19, %v12296_v32  ;;  %v6410_v57 = vsub.f32 %v12052_v35, %v12296_v32  ;;  %v6411_v23 = vsub.f32 %v12063_v9, %v12296_v32 }
 0x672   : > { %13429 = vst [vmem:[#allocation24_spill] sm:$0xff] %v12367_v42  ;;  %13430 = vst [vmem:[#allocation18_spill] sm:$0xff] %v12370_v44  ;;  %v6409_v17 = vsub.f32 %v12060_v16, %v12296_v32  ;;  %v6414_v56 = vsub.f32 %v12084_v6, %v12296_v32  ;;  %v6415_v13 = vsub.f32 %v12095_v30, %v12296_v32  ;;  %v13436_v6 = vld [vmem:[#allocation5_spill] sm:$0xff]  ;;  %v13437_v16 = vld [vmem:[#allocation7_spill] sm:$0xff] }
 0x673   : > { %v6436_v54 = vadd.f32 1e-05, %v6403_v48  ;;  %v12343_v48 = vadd.f32 %v7939_v4, %v12301_v22  ;;  %v12364_v4 = vadd.f32 %v6937_v12, %v12301_v22  ;;  %v12382_v12 = vadd.f32 %v6953_v50, %v12301_v22 }
 0x674   : > { %v6412_v50 = vsub.f32 %v12080_v37, %v12296_v32  ;;  %v6413_v19 = vsub.f32 %v12091_v41, %v12296_v32  ;;  %v6418_v35 = vsub.f32 %v12116_v62, %v12296_v32  ;;  %v6416_v9 = vsub.f32 %v12112_v11, %v12296_v32  ;;  %v13433_v62 = vld [vmem:[#allocation23_spill] sm:$0xff]  ;;  %v13434_v11 = vld [vmem:[#allocation25_spill] sm:$0xff]  ;;  %v13435_v37 = vld [vmem:[#allocation6_spill] sm:$0xff] }
 0x675   : > { %8275 = vrsqrt.f32 %v6436_v54  ;;  %13428 = vst [vmem:[#allocation16_spill] sm:$0xff] %v12364_v4  ;;  %13432 = vst [vmem:[#allocation33_spill] sm:$0xff] %v12382_v12 }
 0x67f   : > { %v12432_v30 = vpop.eup %8275 }
 0x680   : > { %v6438_v12 = vmul.f32 %v12432_v30, %v6404_v7  ;;  %v6439_v54 = vmul.f32 %v12432_v30, %v6405_v2  ;;  %v6440_v41 = vmul.f32 %v12432_v30, %v6406_v29  ;;  %v6441_v34 = vmul.f32 %v12432_v30, %v6407_v26 }
 0x681   : > { %v6442_v44 = vmul.f32 %v12432_v30, %v6408_v20  ;;  %v6444_v18 = vmul.f32 %v12432_v30, %v6410_v57  ;;  %v6445_v38 = vmul.f32 %v12432_v30, %v6411_v23  ;;  %v6443_v42 = vmul.f32 %v12432_v30, %v6409_v17 }
 0x682   : > { %v6474_v43 = vmul.f32 %v12324_v59, %v6438_v12  ;;  %v6475_v31 = vmul.f32 %v12324_v59, %v6439_v54  ;;  %v6476_v7 = vmul.f32 %v12324_v59, %v6440_v41  ;;  %v6477_v2 = vmul.f32 %v12324_v59, %v6441_v34 }
 0x683   : > { %v6478_v29 = vmul.f32 %v12324_v59, %v6442_v44  ;;  %v6480_v26 = vmul.f32 %v12324_v59, %v6444_v18  ;;  %v6481_v20 = vmul.f32 %v12324_v59, %v6445_v38  ;;  %v6479_v57 = vmul.f32 %v12324_v59, %v6443_v42 }
 0x684   : > { %v12459_v23 = vadd.f32 %v12327_v24, %v6474_v43  ;;  %v12462_v17 = vadd.f32 %v12327_v24, %v6475_v31  ;;  %v12465_v12 = vadd.f32 %v12327_v24, %v6476_v7  ;;  %v12468_v41 = vadd.f32 %v12327_v24, %v6477_v2 }
 0x685   : > { %v12471_v44 = vadd.f32 %v12327_v24, %v6478_v29  ;;  %v12474_v34 = vadd.f32 %v12327_v24, %v6480_v26  ;;  %v12477_v42 = vadd.f32 %v12327_v24, %v6481_v20  ;;  %v12480_v18 = vadd.f32 %v12327_v24, %v6479_v57 }
 0x686   : > { %v7462_v38 = vmul.f32 -1.442695, %v12459_v23  ;;  %v7463_v43 = vmul.f32 -1.442695, %v12462_v17  ;;  %v7464_v31 = vmul.f32 -1.442695, %v12465_v12  ;;  %v6448_v54 = vmul.f32 %v12432_v30, %v6414_v56 }
 0x687   : > { %v7465_v7 = vmul.f32 -1.442695, %v12468_v41  ;;  %v7466_v2 = vmul.f32 -1.442695, %v12471_v44  ;;  %v7468_v29 = vmul.f32 -1.442695, %v12474_v34  ;;  %v6446_v26 = vmul.f32 %v12432_v30, %v6412_v50 }
 0x688   : > { %8277 = vpow2.f32 %v7462_v38  ;;  %v7469_v20 = vmul.f32 -1.442695, %v12477_v42  ;;  %v7467_v57 = vmul.f32 -1.442695, %v12480_v18  ;;  %v6484_v4 = vmul.f32 %v12324_v59, %v6448_v54 }
 0x689   : > { %8279 = vpow2.f32 %v7463_v43  ;;  %v6482_v49 = vmul.f32 %v12324_v59, %v6446_v26  ;;  %v6449_v56 = vmul.f32 %v12432_v30, %v6415_v13  ;;  %v6447_v0 = vmul.f32 %v12432_v30, %v6413_v19 }
 0x68a   : > { %8281 = vpow2.f32 %v7464_v31  ;;  %v12497_v52 = vadd.f32 %v12327_v24, %v6484_v4  ;;  %v6452_v50 = vmul.f32 %v12432_v30, %v6418_v35  ;;  %v6450_v38 = vmul.f32 %v12432_v30, %v6416_v9 }
 0x68b   : > { %8283 = vpow2.f32 %v7465_v7  ;;  %v12502_v10 = vadd.f32 %v12327_v24, %v6482_v49  ;;  %v6485_v43 = vmul.f32 %v12324_v59, %v6449_v56  ;;  %v6483_v54 = vmul.f32 %v12324_v59, %v6447_v0 }
 0x68c   : > { %8285 = vpow2.f32 %v7466_v2  ;;  %v7472_v13 = vmul.f32 -1.442695, %v12497_v52  ;;  %v6488_v19 = vmul.f32 %v12324_v59, %v6452_v50  ;;  %v6486_v4 = vmul.f32 %v12324_v59, %v6450_v38 }
 0x68d   : > { %8287 = vpow2.f32 %v7468_v29  ;;  %v7470_v35 = vmul.f32 -1.442695, %v12502_v10  ;;  %v12511_v9 = vadd.f32 %v12327_v24, %v6485_v43  ;;  %v12514_v49 = vadd.f32 %v12327_v24, %v6483_v54 }
 0x68e   : > { %8289 = vpow2.f32 %v7469_v20  ;;  %v12517_v31 = vadd.f32 %v12327_v24, %v6488_v19  ;;  %v12520_v0 = vadd.f32 %v12327_v24, %v6486_v4  ;;  %v13438_v7 = vsub.f32 %v12127_v21, %v12296_v32 }
 0x68f   : > { %8291 = vpow2.f32 %v7467_v57  ;;  %v7473_v29 = vmul.f32 -1.442695, %v12511_v9  ;;  %v7471_v26 = vmul.f32 -1.442695, %v12514_v49  ;;  %v13439_v56 = vsub.f32 %v12123_v55, %v12296_v32 }
 0x690   : > { %v6453_v2 = vmul.f32 %v12432_v30, %v13438_v7  ;;  %8293 = vpow2.f32 %v7472_v13  ;;  %v7476_v50 = vmul.f32 -1.442695, %v12517_v31  ;;  %v12534_v38 = vmul.f32 -1.442695, %v12520_v0 }
 0x691   : > { %v6451_v20 = vmul.f32 %v12432_v30, %v13439_v56  ;;  %8295 = vpow2.f32 %v7470_v35  ;;  %v13440_v43 = vsub.f32 %v12148_v36, %v12296_v32  ;;  %v13441_v55 = vsub.f32 %v12144_v63, %v12296_v32 }
 0x692   : > { %v6489_v21 = vmul.f32 %v12324_v59, %v6453_v2  ;;  %v8278_v19 = vpop.eup %8277  ;;  %8297 = vpow2.f32 %v7473_v29  ;;  %v13442_v35 = vsub.f32 %v12159_v8, %v12296_v32  ;;  %v13443_v36 = vsub.f32 %v12155_v1, %v12296_v32 }
 0x693   : > { %v6487_v57 = vmul.f32 %v12324_v59, %v6451_v20  ;;  %v6456_v54 = vmul.f32 %v12432_v30, %v13440_v43  ;;  %v6454_v13 = vmul.f32 %v12432_v30, %v13441_v55  ;;  %v8280_v56 = vpop.eup %8279  ;;  %v6638_v20 = vadd.f32 1.0, %v8278_v19 }
 0x694   : > { %v12547_v4 = vadd.f32 %v12327_v24, %v6489_v21  ;;  %v6457_v7 = vmul.f32 %v12432_v30, %v13442_v35  ;;  %v6455_v2 = vmul.f32 %v12432_v30, %v13443_v36  ;;  %8299 = vpow2.f32 %v7471_v26  ;;  %v8282_v21 = vpop.eup %8281 }
 0x695   : > { %v12558_v63 = vadd.f32 %v12327_v24, %v6487_v57  ;;  %v6492_v29 = vmul.f32 %v12324_v59, %v6456_v54  ;;  %v6639_v43 = vadd.f32 1.0, %v8280_v56  ;;  %8301 = vpow2.f32 %v7476_v50  ;;  %v8284_v35 = vpop.eup %8283 }
 0x696   : > { %v12562_v8 = vmul.f32 -1.442695, %v12547_v4  ;;  %v6490_v55 = vmul.f32 %v12324_v59, %v6454_v13  ;;  %v6640_v1 = vadd.f32 1.0, %v8282_v21  ;;  %8303 = vrcp.f32 %v6638_v20  ;;  %v8286_v57 = vpop.eup %8285 }
 0x697   : > { %13444 = vst [vmem:[#allocation21_spill] sm:$0xff] %v12558_v63  ;;  %v12566_v36 = vmul.f32 -1.442695, %v12558_v63  ;;  %v12569_v26 = vadd.f32 %v12327_v24, %v6492_v29  ;;  %v6641_v19 = vadd.f32 1.0, %v8284_v35  ;;  %8305 = vrcp.f32 %v6639_v43  ;;  %v8288_v56 = vpop.eup %8287 }
 0x698   : > { %v12572_v54 = vadd.f32 %v12327_v24, %v6490_v55  ;;  %v6493_v50 = vmul.f32 %v12324_v59, %v6457_v7  ;;  %v6642_v22 = vadd.f32 1.0, %v8286_v57  ;;  %8307 = vrcp.f32 %v6640_v1  ;;  %v8290_v21 = vpop.eup %8289 }
 0x699   : > { %13445 = vst [vmem:[#allocation34_spill] sm:$0xff] %v12569_v26  ;;  %v12576_v13 = vmul.f32 -1.442695, %v12569_v26  ;;  %v6491_v20 = vmul.f32 %v12324_v59, %v6455_v2  ;;  %v6644_v63 = vadd.f32 1.0, %v8288_v56  ;;  %8309 = vrcp.f32 %v6641_v19  ;;  %v8292_v55 = vpop.eup %8291 }
 0x69a   : > { %13446 = vst [vmem:[#allocation22_spill] sm:$0xff] %v12572_v54  ;;  %v12580_v29 = vmul.f32 -1.442695, %v12572_v54  ;;  %v12583_v43 = vadd.f32 %v12327_v24, %v6493_v50  ;;  %v6645_v35 = vadd.f32 1.0, %v8290_v21  ;;  %8311 = vrcp.f32 %v6642_v22  ;;  %v8294_v57 = vpop.eup %8293 }
 0x69b   : > { %v12586_v7 = vadd.f32 %v12327_v24, %v6491_v20  ;;  %v13449_v1 = vsub.f32 %v12180_v45, %v12296_v32  ;;  %8313 = vrcp.f32 %v6644_v63  ;;  %v6643_v19 = vadd.f32 1.0, %v8292_v55  ;;  %v8296_v22 = vpop.eup %8295 }
 0x69c   : > { %13447 = vst [vmem:[#allocation35_spill] sm:$0xff] %v12583_v43  ;;  %v12593_v56 = vmul.f32 -1.442695, %v12583_v43  ;;  %v13450_v50 = vsub.f32 %v12176_v33, %v12296_v32  ;;  %8315 = vrcp.f32 %v6645_v35  ;;  %v6648_v20 = vadd.f32 1.0, %v8294_v57 }
 0x69d   : > { %13448 = vst [vmem:[#allocation36_spill] sm:$0xff] %v12586_v7  ;;  %v6460_v2 = vmul.f32 %v12432_v30, %v13449_v1  ;;  %v12600_v54 = vmul.f32 -1.442695, %v12586_v7  ;;  %v8298_v1 = vpop.eup %8297  ;;  %8317 = vrcp.f32 %v6643_v19  ;;  %v6646_v63 = vadd.f32 1.0, %v8296_v22 }
 0x69e   : > { %v6458_v21 = vmul.f32 %v12432_v30, %v13450_v50  ;;  %v13451_v43 = vsub.f32 %v12191_v58, %v12296_v32  ;;  %v8300_v26 = vpop.eup %8299  ;;  %8319 = vrcp.f32 %v6648_v20  ;;  %v6649_v50 = vadd.f32 1.0, %v8298_v1 }
 0x69f   : > { %v6496_v45 = vmul.f32 %v12324_v59, %v6460_v2  ;;  %v13452_v57 = vsub.f32 %v12187_v51, %v12296_v32  ;;  %v8302_v19 = vpop.eup %8301  ;;  %8321 = vrcp.f32 %v6646_v63  ;;  %v6647_v22 = vadd.f32 1.0, %v8300_v26 }
 0x6a0   : > { %v6494_v55 = vmul.f32 %v12324_v59, %v6458_v21  ;;  %v6461_v33 = vmul.f32 %v12432_v30, %v13451_v43  ;;  %v8304_v43 = vpop.eup %8303  ;;  %8323 = vrcp.f32 %v6649_v50  ;;  %v6652_v20 = vadd.f32 1.0, %v8302_v19 }
 0x6a1   : > { %v12609_v35 = vadd.f32 %v12327_v24, %v6496_v45  ;;  %v6459_v2 = vmul.f32 %v12432_v30, %v13452_v57  ;;  %v8306_v7 = vpop.eup %8305  ;;  %v6734_v51 = vmul.f32 %v8304_v43, %v12459_v23  ;;  %8325 = vrcp.f32 %v6647_v22 }
 0x6a2   : > { %v12616_v21 = vadd.f32 %v12327_v24, %v6494_v55  ;;  %v6497_v58 = vmul.f32 %v12324_v59, %v6461_v33  ;;  %v8308_v55 = vpop.eup %8307  ;;  %v6735_v33 = vmul.f32 %v8306_v7, %v12462_v17  ;;  %8327 = vrcp.f32 %v6652_v20 }
 0x6a3   : > { %v7484_v1 = vmul.f32 -1.442695, %v12609_v35  ;;  %v6495_v45 = vmul.f32 %v12324_v59, %v6459_v2  ;;  %v13453_v57 = vsub.f32 %v12212_v39, %v12296_v32  ;;  %v8310_v23 = vpop.eup %8309  ;;  %v6736_v19 = vmul.f32 %v8308_v55, %v12465_v12 }
 0x6a4   : > { %v7482_v63 = vmul.f32 -1.442695, %v12616_v21  ;;  %v12624_v26 = vadd.f32 %v12327_v24, %v6497_v58  ;;  %v7000_v22 = vadd.f32 %v12309_v46, %v6734_v51  ;;  %8329 = vpow2.f32 %v12534_v38  ;;  %v8312_v17 = vpop.eup %8311 }
 0x6a5   : > { %v12628_v50 = vadd.f32 %v12327_v24, %v6495_v45  ;;  %v12634_v2 = vmul.f32 %v12432_v30, %v13453_v57  ;;  %v6737_v39 = vmul.f32 %v8310_v23, %v12468_v41  ;;  %v7001_v7 = vadd.f32 %v12315_v25, %v6735_v33  ;;  %v8314_v12 = vpop.eup %8313 }
 0x6a6   : > { %v7485_v58 = vmul.f32 -1.442695, %v12624_v26  ;;  %8331 = vpow2.f32 %v12562_v8  ;;  %v6738_v38 = vmul.f32 %v8312_v17, %v12471_v44  ;;  %v7002_v43 = vadd.f32 %v12306_v14, %v6736_v19  ;;  %v8316_v45 = vpop.eup %8315 }
 0x6a7   : > { %v7483_v46 = vmul.f32 -1.442695, %v12628_v50  ;;  %v7562_v20 = vpack.c.bf16 %v7000_v22, %v7000_v22  ;;  %8333 = vpow2.f32 %v12566_v36  ;;  %v6740_v51 = vmul.f32 %v8314_v12, %v12474_v34  ;;  %v8318_v8 = vpop.eup %8317 }
 0x6a8   : > { %v7003_v41 = vadd.f32 %v12312_v60, %v6737_v39  ;;  %v7563_v25 = vpack.c.bf16 %v7001_v7, %v7001_v7  ;;  %8335 = vpow2.f32 %v12576_v13  ;;  %v6741_v55 = vmul.f32 %v8316_v45, %v12477_v42  ;;  %v8320_v14 = vpop.eup %8319 }
 0x6a9   : > { %v7004_v44 = vadd.f32 %v12321_v15, %v6738_v38  ;;  %v7564_v33 = vpack.c.bf16 %v7002_v43, %v7002_v43  ;;  %7160 = vst.msk [vmem:[%s12645_s18] sm:$0xf] %vm13454_vm0, %v7562_v20  ;;  %8337 = vpow2.f32 %v12580_v29  ;;  %v7006_v34 = vadd.f32 %v12318_v27, %v6740_v51  ;;  %v8322_v42 = vpop.eup %8321 }
 0x6aa   : > { %v7565_v36 = vpack.c.bf16 %v7003_v41, %v7003_v41  ;;  %7161 = vst.msk [vmem:[%s12645_s18 + $0x4] sm:$0xf] %vm13455_vm14, %v7563_v25  ;;  %v6739_v60 = vmul.f32 %v8318_v8, %v12480_v18  ;;  %8339 = vpow2.f32 %v12593_v56  ;;  %v7007_v15 = vadd.f32 %v12331_v47, %v6741_v55  ;;  %v8324_v27 = vpop.eup %8323  ;;  %vm13492_vm14 = vmmov %vm13454_vm0 }
 0x6ab   : > { %v7566_v13 = vpack.c.bf16 %v7004_v44, %v7004_v44  ;;  %7162 = vst.msk [vmem:[%s12645_s18 + $0x8] sm:$0xf] %vm13456_vm1, %v7564_v33  ;;  %v6744_v29 = vmul.f32 %v8320_v14, %v12497_v52  ;;  %8341 = vpow2.f32 %v12600_v54  ;;  %v7568_v57 = vpack.c.bf16 %v7006_v34, %v7006_v34  ;;  %v8326_v23 = vpop.eup %8325  ;;  %v13468_v44 = vld [vmem:[#allocation39_spill] sm:$0xff]  ;;  %vm13495_vm1 = vmmov %vm13454_vm0 }
 0x6ac   : > { %7163 = vst.msk [vmem:[%s12645_s18 + $0xc] sm:$0xf] %vm13457_vm6, %v7565_v36  ;;  %v7005_v18 = vadd.f32 %v12334_v5, %v6739_v60  ;;  %v6742_v56 = vmul.f32 %v8322_v42, %v12502_v10  ;;  %8343 = vpow2.f32 %v7484_v1  ;;  %v7569_v47 = vpack.c.bf16 %v7007_v15, %v7007_v15  ;;  %v8328_v54 = vpop.eup %8327  ;;  %vm13496_vm6 = vmmov %vm13454_vm0 }
 0x6ad   : > { %7164 = vst.msk [vmem:[%s12645_s18 + $0x10] sm:$0xf] %vm13458_vm2, %v7566_v13  ;;  %v7010_v19 = vadd.f32 %v12337_v3, %v6744_v29  ;;  %v6745_v52 = vmul.f32 %v8324_v27, %v12511_v9  ;;  %8345 = vpow2.f32 %v7482_v63  ;;  %v6743_v10 = vmul.f32 %v8326_v23, %v12514_v49  ;;  %vm13497_vm2 = vmmov %vm13454_vm0 }
 0x6ae   : > { %7166 = vst.msk [vmem:[%s12645_s18 + $0x18] sm:$0xf] %vm13459_vm7, %v7568_v57  ;;  %v7567_v22 = vpack.c.bf16 %v7005_v18, %v7005_v18  ;;  %v7008_v5 = vadd.f32 %v12340_v28, %v6742_v56  ;;  %8347 = vpow2.f32 %v7485_v58  ;;  %v8330_v1 = vpop.eup %8329  ;;  %v6748_v9 = vmul.f32 %v8328_v54, %v12517_v31  ;;  %vm13498_vm7 = vmmov %vm13454_vm0 }
 0x6af   : > { %7167 = vst.msk [vmem:[%s12645_s18 + $0x1c] sm:$0xf] %vm13460_vm15, %v7569_v47  ;;  %v7572_v17 = vpack.c.bf16 %v7010_v19, %v7010_v19  ;;  %v7011_v3 = vadd.f32 %v12343_v48, %v6745_v52  ;;  %8349 = vpow2.f32 %v7483_v46  ;;  %v7009_v28 = vadd.f32 %v12346_v61, %v6743_v10  ;;  %vm13499_vm15 = vmmov %vm13454_vm0 }
 0x6b0   : > { %v8332_v63 = vpop.eup %8331  ;;  %7165 = vst.msk [vmem:[%s12645_s18 + $0x14] sm:$0xf] %vm13461_vm13, %v7567_v22  ;;  %v7570_v39 = vpack.c.bf16 %v7008_v5, %v7008_v5  ;;  %v6650_v7 = vadd.f32 1.0, %v8330_v1  ;;  %v6500_v49 = vmul.f32 %v12324_v59, %v12634_v2  ;;  %v7014_v48 = vadd.f32 %v12349_v53, %v6748_v9  ;;  %vm13500_vm13 = vmmov %vm13454_vm0 }
 0x6b1   : > { %v8334_v58 = vpop.eup %8333  ;;  %7170 = vst.msk [vmem:[%s12645_s18 + $0x28] sm:$0xf] %vm13462_vm8, %v7572_v17  ;;  %v7573_v12 = vpack.c.bf16 %v7011_v3, %v7011_v3  ;;  %v6653_v31 = vadd.f32 1.0, %v8332_v63  ;;  %v13463_v46 = vsub.f32 %v12208_v40, %v12296_v32  ;;  %v7571_v61 = vpack.c.bf16 %v7009_v28, %v7009_v28  ;;  %vm13507_vm8 = vmmov %vm13454_vm0 }
 0x6b2   : > { %v8336_v43 = vpop.eup %8335  ;;  %7168 = vst.msk [vmem:[%s12645_s18 + $0x20] sm:$0xf] %vm13464_vm11, %v7570_v39  ;;  %8351 = vrcp.f32 %v6650_v7  ;;  %v6651_v2 = vadd.f32 1.0, %v8334_v58  ;;  %v12703_v20 = vadd.f32 %v12327_v24, %v6500_v49  ;;  %v7576_v53 = vpack.c.bf16 %v7014_v48, %v7014_v48  ;;  %vm13508_vm11 = vmmov %vm13454_vm0 }
 0x6b3   : > { %v6462_v38 = vmul.f32 %v12432_v30, %v13463_v46  ;;  %v8338_v45 = vpop.eup %8337  ;;  %7171 = vst.msk [vmem:[%s12645_s18 + $0x2c] sm:$0xf] %vm13465_vm3, %v7573_v12  ;;  %8353 = vrcp.f32 %v6653_v31  ;;  %v6656_v51 = vadd.f32 1.0, %v8336_v43  ;;  %v13467_v8 = vsub.f32 %v13433_v62, %v12296_v32  ;;  %v13475_v43 = vld [vmem:[#allocation29_spill] sm:$0xff]  ;;  %vm13509_vm3 = vmmov %vm13454_vm0 }
 0x6b4   : > { %v8340_v41 = vpop.eup %8339  ;;  %7169 = vst.msk [vmem:[%s12645_s18 + $0x24] sm:$0xf] %vm13466_vm12, %v7571_v61  ;;  %8355 = vrcp.f32 %v6651_v2  ;;  %v6654_v25 = vadd.f32 1.0, %v8338_v45  ;;  %v6433_v33 = vsub.f32 %v13468_v44, %v12296_v32  ;;  %v13470_v60 = vsub.f32 %v13434_v11, %v12296_v32  ;;  %vm13511_vm12 = vmmov %vm13454_vm0 }
 0x6b5   : > { %v6498_v40 = vmul.f32 %v12324_v59, %v6462_v38  ;;  %v6465_v55 = vmul.f32 %v12432_v30, %v13467_v8  ;;  %v8342_v14 = vpop.eup %8341  ;;  %7174 = vst.msk [vmem:[%s12645_s18 + $0x38] sm:$0xf] %vm13469_vm10, %v7576_v53  ;;  %8357 = vrcp.f32 %v6656_v51  ;;  %v6657_v34 = vadd.f32 1.0, %v8340_v41  ;;  %v13474_v38 = vld [vmem:[#allocation11_spill] sm:$0xff]  ;;  %v13477_v51 = vld [vmem:[#allocation21_spill] sm:$0xff]  ;;  %vm13512_vm10 = vmmov %vm13454_vm0 }
 0x6b6   : > { %v6463_v42 = vmul.f32 %v12432_v30, %v13470_v60  ;;  %v8344_v15 = vpop.eup %8343  ;;  %8359 = vrcp.f32 %v6654_v25  ;;  %v6655_v62 = vadd.f32 1.0, %v8342_v14  ;;  %v13471_v29 = vsub.f32 %v13435_v37, %v12296_v32  ;;  %v13478_v25 = vld [vmem:[#allocation9_spill] sm:$0xff]  ;;  %v13481_v60 = vld [vmem:[#allocation22_spill] sm:$0xff] }
 0x6b7   : > { %v12719_v36 = vadd.f32 %v12327_v24, %v6498_v40  ;;  %v6501_v13 = vmul.f32 %v12324_v59, %v6465_v55  ;;  %v8346_v57 = vpop.eup %8345  ;;  %8361 = vrcp.f32 %v6657_v34  ;;  %v6660_v18 = vadd.f32 1.0, %v8344_v15  ;;  %v13479_v55 = vld [vmem:[#allocation34_spill] sm:$0xff]  ;;  %v13480_v14 = vld [vmem:[#allocation13_spill] sm:$0xff] }
 0x6b8   : > { %v6468_v27 = vmul.f32 %v12432_v30, %v13471_v29  ;;  %v7488_v56 = vmul.f32 -1.442695, %v12703_v20  ;;  %v6499_v23 = vmul.f32 %v12324_v59, %v6463_v42  ;;  %v8348_v11 = vpop.eup %8347  ;;  %8363 = vrcp.f32 %v6655_v62 }
 0x6b9   : > { %v6658_v47 = vadd.f32 1.0, %v8346_v57  ;;  %v12733_v19 = vadd.f32 %v12327_v24, %v6501_v13  ;;  %v8350_v54 = vpop.eup %8349  ;;  %8365 = vrcp.f32 %v6660_v18  ;;  %v6661_v37 = vadd.f32 1.0, %v8348_v11  ;;  %v13482_v13 = vld [vmem:[#allocation14_spill] sm:$0xff] }
 0x6ba   : > { %v6504_v52 = vmul.f32 %v12324_v59, %v6468_v27  ;;  %v12737_v22 = vadd.f32 %v12327_v24, %v6499_v23  ;;  %v13472_v5 = vsub.f32 %v13436_v6, %v12296_v32  ;;  %v6659_v1 = vadd.f32 1.0, %v8350_v54  ;;  %v13483_v27 = vld [vmem:[#allocation35_spill] sm:$0xff]  ;;  %v13485_v23 = vld [vmem:[#allocation16_spill] sm:$0xff] }
 0x6bb   : > { %8367 = vrcp.f32 %v6658_v47  ;;  %v7486_v17 = vmul.f32 -1.442695, %v12719_v36  ;;  %v7489_v9 = vmul.f32 -1.442695, %v12733_v19  ;;  %v13473_v39 = vsub.f32 %v13437_v16, %v12296_v32  ;;  %v13486_v47 = vld [vmem:[#allocation36_spill] sm:$0xff] }
 0x6bc   : > { %v6466_v10 = vmul.f32 %v12432_v30, %v13472_v5  ;;  %v12745_v3 = vadd.f32 %v12327_v24, %v6504_v52  ;;  %8369 = vrcp.f32 %v6661_v37  ;;  %v8352_v6 = vpop.eup %8351  ;;  %v7487_v7 = vmul.f32 -1.442695, %v12737_v22 }
 0x6bd   : > { %v6469_v28 = vmul.f32 %v12432_v30, %v13473_v39  ;;  %8371 = vrcp.f32 %v6659_v1  ;;  %v6467_v58 = vmul.f32 %v12432_v30, %v6433_v33  ;;  %v8354_v12 = vpop.eup %8353  ;;  %v6746_v48 = vmul.f32 %v8352_v6, %v12520_v0  ;;  %v13476_v30 = vld [vmem:[#allocation12_spill] sm:$0xff] }
 0x6be   : > { %v6502_v63 = vmul.f32 %v12324_v59, %v6466_v10  ;;  %v7492_v49 = vmul.f32 -1.442695, %v12745_v3  ;;  %8373 = vpow2.f32 %v7488_v56  ;;  %v8356_v32 = vpop.eup %8355  ;;  %v6749_v16 = vmul.f32 %v8354_v12, %v12547_v4  ;;  %v13488_v10 = vld [vmem:[#allocation24_spill] sm:$0xff] }
 0x6bf   : > { %v6505_v46 = vmul.f32 %v12324_v59, %v6469_v28  ;;  %v6965_v61 = vadd.f32 %v13475_v43, %v13474_v38  ;;  %8375 = vpow2.f32 %v7486_v17  ;;  %v6503_v2 = vmul.f32 %v12324_v59, %v6467_v58  ;;  %v8358_v45 = vpop.eup %8357  ;;  %v13490_v28 = vld [vmem:[#allocation18_spill] sm:$0xff]  ;;  %v13491_v12 = vld [vmem:[#allocation20_spill] sm:$0xff] }
 0x6c0   : > { %v12758_v31 = vadd.f32 %v12327_v24, %v6502_v63  ;;  %v7012_v53 = vadd.f32 %v13476_v30, %v6746_v48  ;;  %v6747_v0 = vmul.f32 %v8356_v32, %v13477_v51  ;;  %8377 = vpow2.f32 %v7489_v9  ;;  %v8360_v41 = vpop.eup %8359 }
 0x6c1   : > { %v7015_v8 = vadd.f32 %v13478_v25, %v6749_v16  ;;  %v6752_v4 = vmul.f32 %v8358_v45, %v13479_v55  ;;  %8379 = vpow2.f32 %v7487_v7  ;;  %v12771_v44 = vadd.f32 %v12327_v24, %v6505_v46  ;;  %v8362_v33 = vpop.eup %8361  ;;  %v13493_v16 = vld [vmem:[#allocation33_spill] sm:$0xff] }
 0x6c2   : > { %v7490_v40 = vmul.f32 -1.442695, %v12758_v31  ;;  %v7574_v59 = vpack.c.bf16 %v7012_v53, %v7012_v53  ;;  %v7013_v34 = vadd.f32 %v13480_v14, %v6747_v0  ;;  %v6750_v42 = vmul.f32 %v8360_v41, %v13481_v60  ;;  %v8364_v15 = vpop.eup %8363 }
 0x6c3   : > { %8381 = vpow2.f32 %v7492_v49  ;;  %v7577_v62 = vpack.c.bf16 %v7015_v8, %v7015_v8  ;;  %v7018_v29 = vadd.f32 %v13482_v13, %v6752_v4  ;;  %v6753_v57 = vmul.f32 %v8362_v33, %v13483_v27  ;;  %v8366_v18 = vpop.eup %8365 }
 0x6c4   : > { %8383 = vpow2.f32 %v7490_v40  ;;  %7172 = vst.msk [vmem:[%s12645_s18 + $0x30] sm:$0xf] %vm13484_vm5, %v7574_v59  ;;  %v7575_v56 = vpack.c.bf16 %v7013_v34, %v7013_v34  ;;  %v7016_v11 = vadd.f32 %v13485_v23, %v6750_v42  ;;  %v6751_v52 = vmul.f32 %v8364_v15, %v13486_v47  ;;  %vm13513_vm5 = vmmov %vm13454_vm0 }
 0x6c5   : > { %v7493_v54 = vmul.f32 -1.442695, %v12771_v44  ;;  %v8368_v37 = vpop.eup %8367  ;;  %7175 = vst.msk [vmem:[%s12645_s18 + $0x3c] sm:$0xf] %vm13487_vm9, %v7577_v62  ;;  %v7580_v5 = vpack.c.bf16 %v7018_v29, %v7018_v29  ;;  %v7019_v1 = vadd.f32 %v13488_v10, %v6753_v57  ;;  %v6756_v17 = vmul.f32 %v8366_v18, %v12609_v35  ;;  %v13501_v57 = vld [vmem:[#allocation26_spill] sm:$0xff]  ;;  %vm13515_vm9 = vmmov %vm13454_vm0 }
 0x6c6   : > { %v12787_v9 = vadd.f32 %v12327_v24, %v6503_v2  ;;  %v8370_v63 = vpop.eup %8369  ;;  %7173 = vst.msk [vmem:[%s12645_s18 + $0x34] sm:$0xf] %vm13489_vm4, %v7575_v56  ;;  %v7578_v39 = vpack.c.bf16 %v7016_v11, %v7016_v11  ;;  %v7017_v6 = vadd.f32 %v13490_v28, %v6751_v52  ;;  %v6754_v7 = vmul.f32 %v8368_v37, %v12616_v21  ;;  %v13494_v2 = vld [vmem:[#allocation27_spill] sm:$0xff]  ;;  %v13502_v11 = vld [vmem:[#allocation28_spill] sm:$0xff]  ;;  %vm13516_vm4 = vmmov %vm13454_vm0 }
 0x6c7   : > { %8385 = vpow2.f32 %v7493_v54  ;;  %v8372_v49 = vpop.eup %8371  ;;  %7178 = vst.msk [vmem:[%s12645_s18 + $0x48] sm:$0xf] %vm13454_vm0, %v7580_v5  ;;  %v7581_v58 = vpack.c.bf16 %v7019_v1, %v7019_v1  ;;  %v7022_v48 = vadd.f32 %v13491_v12, %v6756_v17  ;;  %v6757_v24 = vmul.f32 %v8370_v63, %v12624_v26  ;;  %v13503_v5 = vld [vmem:[#allocation30_spill] sm:$0xff] }
 0x6c8   : > { %v7491_v35 = vmul.f32 -1.442695, %v12787_v9  ;;  %v8374_v46 = vpop.eup %8373  ;;  %7176 = vst.msk [vmem:[%s12645_s18 + $0x40] sm:$0xf] %vm13492_vm14, %v7578_v39  ;;  %v7579_v32 = vpack.c.bf16 %v7017_v6, %v7017_v6  ;;  %v7020_v43 = vadd.f32 %v13493_v16, %v6754_v7  ;;  %v6755_v21 = vmul.f32 %v8372_v49, %v12628_v50  ;;  %v13504_v63 = vld [vmem:[#allocation10_spill] sm:$0xff]  ;;  %v13505_v49 = vld [vmem:[#allocation31_spill] sm:$0xff] }
 0x6c9   : > { %v6957_v45 = vadd.f32 %v13494_v2, %v13474_v38  ;;  %v8376_v30 = vpop.eup %8375  ;;  %7179 = vst.msk [vmem:[%s12645_s18 + $0x4c] sm:$0xf] %vm13495_vm1, %v7581_v58  ;;  %v7584_v53 = vpack.c.bf16 %v7022_v48, %v7022_v48  ;;  %v7023_v26 = vadd.f32 %v6965_v61, %v6757_v24  ;;  %v6664_v51 = vadd.f32 1.0, %v8374_v46  ;;  %v13506_v24 = vld [vmem:[#allocation8_spill] sm:$0xff] }
 0x6ca   : > { %8387 = vpow2.f32 %v7491_v35  ;;  %v8378_v0 = vpop.eup %8377  ;;  %7177 = vst.msk [vmem:[%s12645_s18 + $0x44] sm:$0xf] %vm13496_vm6, %v7579_v32  ;;  %v7582_v40 = vpack.c.bf16 %v7020_v43, %v7020_v43  ;;  %v6662_v25 = vadd.f32 1.0, %v8376_v30  ;;  %v6978_v18 = vadd.f32 %v13501_v57, %v13474_v38 }
 0x6cb   : > { %v7021_v41 = vadd.f32 %v6957_v45, %v6755_v21  ;;  %v8380_v50 = vpop.eup %8379  ;;  %7182 = vst.msk [vmem:[%s12645_s18 + $0x58] sm:$0xf] %vm13497_vm2, %v7584_v53  ;;  %v7585_v8 = vpack.c.bf16 %v7023_v26, %v7023_v26  ;;  %8389 = vrcp.f32 %v6664_v51  ;;  %v6665_v55 = vadd.f32 1.0, %v8378_v0  ;;  %v13510_v21 = vld [vmem:[#allocation17_spill] sm:$0xff]  ;;  %v13514_v51 = vld [vmem:[#allocation32_spill] sm:$0xff] }
 0x6cc   : > { %7180 = vst.msk [vmem:[%s12645_s18 + $0x50] sm:$0xf] %vm13498_vm7, %v7582_v40  ;;  %8391 = vrcp.f32 %v6662_v25  ;;  %v6663_v33 = vadd.f32 1.0, %v8380_v50  ;;  %v6970_v47 = vadd.f32 %v13502_v11, %v13474_v38  ;;  %v6981_v10 = vadd.f32 %v13503_v5, %v13474_v38 }
 0x6cd   : > { %v8382_v4 = vpop.eup %8381  ;;  %v7583_v61 = vpack.c.bf16 %v7021_v41, %v7021_v41  ;;  %7183 = vst.msk [vmem:[%s12645_s18 + $0x5c] sm:$0xf] %vm13499_vm15, %v7585_v8  ;;  %8393 = vrcp.f32 %v6665_v55  ;;  %v6973_v39 = vadd.f32 %v13504_v63, %v13474_v38  ;;  %v6997_v2 = vadd.f32 %v13510_v21, %v13474_v38 }
 0x6ce   : > { %v8384_v59 = vpop.eup %8383  ;;  %v6668_v14 = vadd.f32 1.0, %v8382_v4  ;;  %8395 = vrcp.f32 %v6663_v33  ;;  %v6989_v0 = vadd.f32 %v13514_v51, %v13474_v38 }
 0x6cf   : > { %7181 = vst.msk [vmem:[%s12645_s18 + $0x54] sm:$0xf] %vm13500_vm13, %v7583_v61  ;;  %v6666_v34 = vadd.f32 1.0, %v8384_v59 }
 0x6d0   : > { %8397 = vrcp.f32 %v6668_v14 }
 0x6d1   : > { %v8386_v60 = vpop.eup %8385  ;;  %8399 = vrcp.f32 %v6666_v34 }
 0x6d2   : > { %v6669_v42 = vadd.f32 1.0, %v8386_v60 }
 0x6d4   : > { %v8388_v15 = vpop.eup %8387  ;;  %8401 = vrcp.f32 %v6669_v42 }
 0x6d5   : > { %v6667_v62 = vadd.f32 1.0, %v8388_v15  ;;  %v8390_v13 = vpop.eup %8389 }
 0x6d6   : > { %v8392_v29 = vpop.eup %8391  ;;  %v6760_v27 = vmul.f32 %v8390_v13, %v12703_v20 }
 0x6d7   : > { %8403 = vrcp.f32 %v6667_v62  ;;  %v8394_v56 = vpop.eup %8393  ;;  %v6758_v23 = vmul.f32 %v8392_v29, %v12719_v36 }
 0x6d8   : > { %v8396_v52 = vpop.eup %8395  ;;  %v7026_v54 = vadd.f32 %v6978_v18, %v6760_v27  ;;  %v6761_v37 = vmul.f32 %v8394_v56, %v12733_v19  ;;  %v6994_v19 = vadd.f32 %v13505_v49, %v13474_v38 }
 0x6d9   : > { %v7024_v20 = vadd.f32 %v6970_v47, %v6758_v23  ;;  %v6759_v17 = vmul.f32 %v8396_v52, %v12737_v22  ;;  %v6986_v22 = vadd.f32 %v13506_v24, %v13474_v38 }
 0x6da   : > { %v8398_v1 = vpop.eup %8397  ;;  %v7588_v28 = vpack.c.bf16 %v7026_v54, %v7026_v54  ;;  %v7027_v6 = vadd.f32 %v6981_v10, %v6761_v37 }
 0x6db   : > { %v8400_v36 = vpop.eup %8399  ;;  %v6764_v7 = vmul.f32 %v8398_v1, %v12745_v3  ;;  %v7586_v58 = vpack.c.bf16 %v7024_v20, %v7024_v20  ;;  %v7025_v12 = vadd.f32 %v6973_v39, %v6759_v17 }
 0x6dc   : > { %v6762_v48 = vmul.f32 %v8400_v36, %v12758_v31  ;;  %7186 = vst.msk [vmem:[%s12645_s18 + $0x68] sm:$0xf] %vm13507_vm8, %v7588_v28  ;;  %v7589_v35 = vpack.c.bf16 %v7027_v6, %v7027_v6 }
 0x6dd   : > { %v7030_v46 = vadd.f32 %v6994_v19, %v6764_v7  ;;  %7184 = vst.msk [vmem:[%s12645_s18 + $0x60] sm:$0xf] %vm13508_vm11, %v7586_v58  ;;  %v7587_v3 = vpack.c.bf16 %v7025_v12, %v7025_v12 }
 0x6de   : > { %v8402_v32 = vpop.eup %8401  ;;  %v7028_v16 = vadd.f32 %v6986_v22, %v6762_v48  ;;  %7187 = vst.msk [vmem:[%s12645_s18 + $0x6c] sm:$0xf] %vm13509_vm3, %v7589_v35 }
 0x6df   : > { %v7592_v43 = vpack.c.bf16 %v7030_v46, %v7030_v46  ;;  %v6765_v31 = vmul.f32 %v8402_v32, %v12771_v44  ;;  %7185 = vst.msk [vmem:[%s12645_s18 + $0x64] sm:$0xf] %vm13511_vm12, %v7587_v3 }
 0x6e0   : > { %v7590_v45 = vpack.c.bf16 %v7028_v16, %v7028_v16 }
 0x6e1   : > { %v8404_v30 = vpop.eup %8403  ;;  %7190 = vst.msk [vmem:[%s12645_s18 + $0x78] sm:$0xf] %vm13512_vm10, %v7592_v43  ;;  %v7031_v53 = vadd.f32 %v6997_v2, %v6765_v31 }
 0x6e2   : > { %7188 = vst.msk [vmem:[%s12645_s18 + $0x70] sm:$0xf] %vm13513_vm5, %v7590_v45  ;;  %v6763_v26 = vmul.f32 %v8404_v30, %v12787_v9 }
 0x6e3   : > { %v7593_v40 = vpack.c.bf16 %v7031_v53, %v7031_v53 }
 0x6e4   : > { %v7029_v41 = vadd.f32 %v6989_v0, %v6763_v26 }
 0x6e5   : > { %7191 = vst.msk [vmem:[%s12645_s18 + $0x7c] sm:$0xf] %vm13515_vm9, %v7593_v40 }
 0x6e6   : > { %v7591_v44 = vpack.c.bf16 %v7029_v41, %v7029_v41 }
 0x6e8   : > { %7189 = vst.msk [vmem:[%s12645_s18 + $0x74] sm:$0xf] %vm13516_vm4, %v7591_v44 }
 0x6e9 PF: > { %s16_s21 = sadd.s32 1, %s8484_s21  }
 0x6ea   : > { %p13_p4 = scmp.ge.s32.totalorder %s16_s21, 4  }
 0x6ec   :  { %15 = sbr.rel (!%p13_p4) target bundleno = 1 (0x1), region = 81 }

</bundles_post_ra>
